<compile_context>
chip_gen: v7x
topology: tpu7x:2x2x1
jax: 0.10.0
libtpu: 0.0.40
codegen_flags: <defaults>
</compile_context>

<pallas_src>
import functools

import numpy as np

import jax
import jax.numpy as jnp
from jax.experimental import pallas as pl
from jax.experimental.pallas import tpu as pltpu


# ----------------------------------------------------------------------------
# The single fused Pallas kernel
# ----------------------------------------------------------------------------
def _lenet5_kernel(patches1_ref, w1_ref, b1_ref, p1_ref,
                   g2_ref, w2_ref, b2_ref,
                   t_ref, wfc1_ref, bfc1_ref,
                   wfc2_ref, bfc2_ref, wfc3_ref, bfc3_ref, wfc4_ref, bfc4_ref,
                   out_ref):
    f32 = jnp.float32
    dot = functools.partial(jnp.dot, preferred_element_type=f32)

    # conv1 (1->8, k=5, pad=2) as im2col matmul + bias + ReLU.      (M1, 8)
    a1 = jnp.maximum(dot(patches1_ref[...], w1_ref[...]) + b1_ref[...], 0.0)

    # AvgPool2d(2,2) #1 as a constant 0.25-matrix matmul.           (M1p, 8)
    y1p = dot(p1_ref[...], a1)

    # conv2 (8->64, k=5, pad=2): 25 shift-gather matmuls, accumulated while
    # the activation stays resident (padding is baked into the gather mats).
    z2 = None
    for s in range(25):
        term = dot(dot(g2_ref[s], y1p), w2_ref[s])                  # (M2, 64)
        z2 = term if z2 is None else z2 + term
    a2 = jnp.maximum(z2 + b2_ref[...], 0.0)                         # (M2, 64)

    # AvgPool2d(2,2) #2 + PyTorch CHW flatten + fc1, folded into 9 terms:
    #   h1 = sum_p (T[p] @ a2) @ Wfc1[p]    (T carries pool + row selection,
    #   Wfc1[p] carries the CHW permutation of fc1's input rows).
    h1 = None
    for q in range(9):
        term = dot(dot(t_ref[q], a2), wfc1_ref[q])                  # (N, 128)
        h1 = term if h1 is None else h1 + term
    h1 = jnp.maximum(h1 + bfc1_ref[...], 0.0)                       # (N, 128)

    h2 = jnp.maximum(dot(h1, wfc2_ref[...]) + bfc2_ref[...], 0.0)   # (N, 128)
    h3 = jnp.maximum(dot(h2, wfc3_ref[...]) + bfc3_ref[...], 0.0)   # (N, 64)
    out_ref[...] = (dot(h3, wfc4_ref[...]) + bfc4_ref[...]).astype(out_ref.dtype)


# ----------------------------------------------------------------------------
# One-time operand preparation (outside the jitted forward)
# ----------------------------------------------------------------------------
def prepare_operands(params, n):
    """Pre-transpose / re-lay-out all weights and build the constant pool /
    shift / flatten-permutation matrices.  Called once, outside jit."""
    f32 = jnp.float32
    m1, m1p, m2 = n * 144, n * 36, n * 36

    # conv1 weight (Cout=8, Cin=1, 5, 5) -> (25, 8); rows ordered (kh, kw).
    w1 = jnp.transpose(params["conv1_w"], (2, 3, 1, 0)).reshape(25, 8).astype(f32)
    b1 = params["conv1_b"].reshape(1, 8).astype(f32)

    # Pool1: (m1p, m1) matrix with 0.25 at each 2x2-window member.
    p1 = np.zeros((m1p, m1), np.float32)
    for nn in range(n):
        for io in range(6):
            for jo in range(6):
                r = nn * 36 + io * 6 + jo
                for di in range(2):
                    for dj in range(2):
                        p1[r, nn * 144 + (2 * io + di) * 12 + (2 * jo + dj)] = 0.25

    # conv2: 25 shift/gather matrices over the pooled 6x6 map ("same" padding
    # becomes all-zero rows) and weight slices (kh,kw) -> (Cin=8, Cout=64).
    g2 = np.zeros((25, m2, m1p), np.float32)
    for kh in range(5):
        for kw in range(5):
            s = kh * 5 + kw
            for nn in range(n):
                for i in range(6):
                    for j in range(6):
                        ii, jj = i + kh - 2, j + kw - 2
                        if 0 <= ii < 6 and 0 <= jj < 6:
                            g2[s, nn * 36 + i * 6 + j, nn * 36 + ii * 6 + jj] = 1.0
    w2 = jnp.transpose(params["conv2_w"], (2, 3, 1, 0)).reshape(25, 8, 64).astype(f32)
    b2 = params["conv2_b"].reshape(1, 64).astype(f32)

    # Pool2 + per-sample row selection for each of the 9 pooled positions.
    t = np.zeros((9, n, m2), np.float32)
    for i in range(3):
        for j in range(3):
            q = i * 3 + j
            for nn in range(n):
                for di in range(2):
                    for dj in range(2):
                        t[q, nn, nn * 36 + (2 * i + di) * 6 + (2 * j + dj)] = 0.25

    # fc1 weight (128, 576) viewed as (128, C=64, 3, 3); per spatial position
    # (i,j) a (64, 128) slice -> the CHW flatten permutation is absorbed here.
    wfc1 = jnp.transpose(params["fc1_w"].reshape(128, 64, 3, 3),
                         (2, 3, 1, 0)).reshape(9, 64, 128).astype(f32)
    bfc1 = params["fc1_b"].reshape(1, 128).astype(f32)

    # Remaining FC weights pre-transposed to (in, out) once.
    wfc2 = params["fc2_w"].T.astype(f32)
    bfc2 = params["fc2_b"].reshape(1, 128).astype(f32)
    wfc3 = params["fc3_w"].T.astype(f32)
    bfc3 = params["fc3_b"].reshape(1, 64).astype(f32)
    wfc4 = params["fc4_w"].T.astype(f32)
    bfc4 = params["fc4_b"].reshape(1, 10).astype(f32)

    return dict(w1=w1, b1=b1, p1=jnp.asarray(p1), g2=jnp.asarray(g2), w2=w2,
                b2=b2, t=jnp.asarray(t), wfc1=wfc1, bfc1=bfc1, wfc2=wfc2,
                bfc2=bfc2, wfc3=wfc3, bfc3=bfc3, wfc4=wfc4, bfc4=bfc4)


def _im2col_conv1(x_nchw):
    """Input-layer 5x5 'same' patches (Cin=1): (N,1,12,12) -> (N*144, 25)."""
    n = x_nchw.shape[0]
    x = x_nchw[:, 0, :, :]                                   # (N, 12, 12)
    xp = jnp.pad(x, ((0, 0), (2, 2), (2, 2)))
    cols = [xp[:, kh:kh + 12, kw:kw + 12] for kh in range(5) for kw in range(5)]
    return jnp.stack(cols, axis=-1).reshape(n * 144, 25)     # col index = kh*5+kw


# ----------------------------------------------------------------------------
# Forward pass: one pallas_call for the whole network
# ----------------------------------------------------------------------------
def lenet5_forward(x_nchw, ops):
    n = x_nchw.shape[0]
    patches1 = _im2col_conv1(x_nchw)
    vmem = pl.BlockSpec(memory_space=pltpu.MemorySpace.VMEM)
    args = (patches1, ops["w1"], ops["b1"], ops["p1"], ops["g2"], ops["w2"],
            ops["b2"], ops["t"], ops["wfc1"], ops["bfc1"], ops["wfc2"],
            ops["bfc2"], ops["wfc3"], ops["bfc3"], ops["wfc4"], ops["bfc4"])
    return pl.pallas_call(
        _lenet5_kernel,
        out_shape=jax.ShapeDtypeStruct((n, 10), jnp.float32),
        in_specs=[vmem] * len(args),
        out_specs=vmem,
    )(*args)


# ----------------------------------------------------------------------------
# Reference (plain JAX, mirrors the PyTorch module) + params
# ----------------------------------------------------------------------------
def lenet5_reference(x_nchw, params):
    hp = jax.lax.Precision.HIGHEST
    y = jax.lax.conv_general_dilated(
        x_nchw, params["conv1_w"], (1, 1), ((2, 2), (2, 2)),
        dimension_numbers=("NCHW", "OIHW", "NCHW"), precision=hp)
    y = jax.nn.relu(y + params["conv1_b"][None, :, None, None])
    n, c, h, w = y.shape
    y = y.reshape(n, c, h // 2, 2, w // 2, 2).mean(axis=(3, 5))
    y = jax.lax.conv_general_dilated(
        y, params["conv2_w"], (1, 1), ((2, 2), (2, 2)),
        dimension_numbers=("NCHW", "OIHW", "NCHW"), precision=hp)
    y = jax.nn.relu(y + params["conv2_b"][None, :, None, None])
    n, c, h, w = y.shape
    y = y.reshape(n, c, h // 2, 2, w // 2, 2).mean(axis=(3, 5))
    flat = y.reshape(n, -1)
    h1 = jax.nn.relu(jnp.dot(flat, params["fc1_w"].T, precision=hp) + params["fc1_b"])
    h2 = jax.nn.relu(jnp.dot(h1, params["fc2_w"].T, precision=hp) + params["fc2_b"])
    h3 = jax.nn.relu(jnp.dot(h2, params["fc3_w"].T, precision=hp) + params["fc3_b"])
    return jnp.dot(h3, params["fc4_w"].T, precision=hp) + params["fc4_b"]


def init_params(key):
    """Deterministic synthetic params with PyTorch-layout shapes."""
    ks = jax.random.split(key, 12)
    s = 0.1
    return {
        "conv1_w": s * jax.random.normal(ks[0], (8, 1, 5, 5), jnp.float32),
        "conv1_b": s * jax.random.normal(ks[1], (8,), jnp.float32),
        "conv2_w": s * jax.random.normal(ks[2], (64, 8, 5, 5), jnp.float32),
        "conv2_b": s * jax.random.normal(ks[3], (64,), jnp.float32),
        "fc1_w": s * jax.random.normal(ks[4], (128, 576), jnp.float32),
        "fc1_b": s * jax.random.normal(ks[5], (128,), jnp.float32),
        "fc2_w": s * jax.random.normal(ks[6], (128, 128), jnp.float32),
        "fc2_b": s * jax.random.normal(ks[7], (128,), jnp.float32),
        "fc3_w": s * jax.random.normal(ks[8], (64, 128), jnp.float32),
        "fc3_b": s * jax.random.normal(ks[9], (64,), jnp.float32),
        "fc4_w": s * jax.random.normal(ks[10], (10, 64), jnp.float32),
        "fc4_b": s * jax.random.normal(ks[11], (10,), jnp.float32),
    }


if __name__ == "__main__":
    key = jax.random.PRNGKey(0)
    k_in, k_par = jax.random.split(key)
    # Flatten->Linear(576) implies 12x12 single-channel input after two /2 pools.
    x = jax.random.normal(k_in, (2, 1, 12, 12), jnp.float32)   # NCHW, like PyTorch
    params = init_params(k_par)

    ops = prepare_operands(params, n=x.shape[0])   # once, outside the jitted forward

    fwd = jax.jit(lenet5_forward)
    logits = fwd(x, ops)
    jax.block_until_ready(logits)
    assert logits.shape == (2, 10) and logits.dtype == jnp.float32

    ref = lenet5_reference(x, params)
    err = float(jnp.max(jnp.abs(logits - ref)))
    assert jnp.allclose(logits, ref, atol=1e-3, rtol=1e-3), err
    print("KERNEL_OK")
</pallas_src>

<mosaic_0001>
module attributes {stable_mosaic.version = 11 : i64} {
  func.func @_lenet5_kernel(%arg0: memref<288x25xf32, #tpu.memory_space<vmem>>, %arg1: memref<25x8xf32, #tpu.memory_space<vmem>>, %arg2: memref<1x8xf32, #tpu.memory_space<vmem>>, %arg3: memref<72x288xf32, #tpu.memory_space<vmem>>, %arg4: memref<25x72x72xf32, #tpu.memory_space<vmem>>, %arg5: memref<25x8x64xf32, #tpu.memory_space<vmem>>, %arg6: memref<1x64xf32, #tpu.memory_space<vmem>>, %arg7: memref<9x2x72xf32, #tpu.memory_space<vmem>>, %arg8: memref<9x64x128xf32, #tpu.memory_space<vmem>>, %arg9: memref<1x128xf32, #tpu.memory_space<vmem>>, %arg10: memref<128x128xf32, #tpu.memory_space<vmem>>, %arg11: memref<1x128xf32, #tpu.memory_space<vmem>>, %arg12: memref<128x64xf32, #tpu.memory_space<vmem>>, %arg13: memref<1x64xf32, #tpu.memory_space<vmem>>, %arg14: memref<64x10xf32, #tpu.memory_space<vmem>>, %arg15: memref<1x10xf32, #tpu.memory_space<vmem>>, %arg16: memref<2x10xf32, #tpu.memory_space<vmem>>) attributes {dimension_semantics = [], scalar_prefetch = 0 : i64, scratch_operands = 0 : i64, tpu.core_type = #tpu.core_type<tc>} {
    %c0 = arith.constant 0 : index
    %c0_0 = arith.constant 0 : index
    %0 = vector.load %arg0[%c0, %c0_0] : memref<288x25xf32, #tpu.memory_space<vmem>>, vector<288x25xf32>
    %c0_1 = arith.constant 0 : index
    %c0_2 = arith.constant 0 : index
    %1 = vector.load %arg1[%c0_1, %c0_2] : memref<25x8xf32, #tpu.memory_space<vmem>>, vector<25x8xf32>
    %cst = arith.constant dense<0.000000e+00> : vector<288x8xf32>
    %2 = tpu.matmul %0, %1, %cst {dimension_numbers = #tpu.dot_dimension_numbers<[1], [0], [0], [1], [0, 0, 1, 1], [], []>} : vector<288x25xf32>, vector<25x8xf32>, vector<288x8xf32> -> vector<288x8xf32>
    %c0_3 = arith.constant 0 : index
    %c0_4 = arith.constant 0 : index
    %3 = vector.load %arg2[%c0_3, %c0_4] : memref<1x8xf32, #tpu.memory_space<vmem>>, vector<1x8xf32>
    %4 = vector.broadcast %3 : vector<1x8xf32> to vector<288x8xf32>
    %5 = arith.addf %2, %4 : vector<288x8xf32>
    %cst_5 = arith.constant 0.000000e+00 : f32
    %6 = vector.broadcast %cst_5 : f32 to vector<288x8xf32>
    %7 = arith.maximumf %5, %6 : vector<288x8xf32>
    %c0_6 = arith.constant 0 : index
    %c0_7 = arith.constant 0 : index
    %8 = vector.load %arg3[%c0_6, %c0_7] : memref<72x288xf32, #tpu.memory_space<vmem>>, vector<72x288xf32>
    %cst_8 = arith.constant dense<0.000000e+00> : vector<72x8xf32>
    %9 = tpu.matmul %8, %7, %cst_8 {dimension_numbers = #tpu.dot_dimension_numbers<[1], [0], [0], [1], [0, 0, 1, 1], [], []>} : vector<72x288xf32>, vector<288x8xf32>, vector<72x8xf32> -> vector<72x8xf32>
    %c0_9 = arith.constant 0 : index
    %c0_10 = arith.constant 0 : index
    %c0_11 = arith.constant 0 : index
    %10 = vector.load %arg4[%c0_9, %c0_10, %c0_11] : memref<25x72x72xf32, #tpu.memory_space<vmem>>, vector<1x72x72xf32>
    %11 = vector.shape_cast %10 : vector<1x72x72xf32> to vector<72x72xf32>
    %cst_12 = arith.constant dense<0.000000e+00> : vector<72x8xf32>
    %12 = tpu.matmul %11, %9, %cst_12 {dimension_numbers = #tpu.dot_dimension_numbers<[1], [0], [0], [1], [0, 0, 1, 1], [], []>} : vector<72x72xf32>, vector<72x8xf32>, vector<72x8xf32> -> vector<72x8xf32>
    %c0_13 = arith.constant 0 : index
    %c0_14 = arith.constant 0 : index
    %c0_15 = arith.constant 0 : index
    %13 = vector.load %arg5[%c0_13, %c0_14, %c0_15] : memref<25x8x64xf32, #tpu.memory_space<vmem>>, vector<1x8x64xf32>
    %14 = vector.shape_cast %13 : vector<1x8x64xf32> to vector<8x64xf32>
    %cst_16 = arith.constant dense<0.000000e+00> : vector<72x64xf32>
    %15 = tpu.matmul %12, %14, %cst_16 {dimension_numbers = #tpu.dot_dimension_numbers<[1], [0], [0], [1], [0, 0, 1, 1], [], []>} : vector<72x8xf32>, vector<8x64xf32>, vector<72x64xf32> -> vector<72x64xf32>
    %c1 = arith.constant 1 : index
    %c0_17 = arith.constant 0 : index
    %c0_18 = arith.constant 0 : index
    %16 = vector.load %arg4[%c1, %c0_17, %c0_18] : memref<25x72x72xf32, #tpu.memory_space<vmem>>, vector<1x72x72xf32>
    %17 = vector.shape_cast %16 : vector<1x72x72xf32> to vector<72x72xf32>
    %cst_19 = arith.constant dense<0.000000e+00> : vector<72x8xf32>
    %18 = tpu.matmul %17, %9, %cst_19 {dimension_numbers = #tpu.dot_dimension_numbers<[1], [0], [0], [1], [0, 0, 1, 1], [], []>} : vector<72x72xf32>, vector<72x8xf32>, vector<72x8xf32> -> vector<72x8xf32>
    %c1_20 = arith.constant 1 : index
    %c0_21 = arith.constant 0 : index
    %c0_22 = arith.constant 0 : index
    %19 = vector.load %arg5[%c1_20, %c0_21, %c0_22] : memref<25x8x64xf32, #tpu.memory_space<vmem>>, vector<1x8x64xf32>
    %20 = vector.shape_cast %19 : vector<1x8x64xf32> to vector<8x64xf32>
    %cst_23 = arith.constant dense<0.000000e+00> : vector<72x64xf32>
    %21 = tpu.matmul %18, %20, %cst_23 {dimension_numbers = #tpu.dot_dimension_numbers<[1], [0], [0], [1], [0, 0, 1, 1], [], []>} : vector<72x8xf32>, vector<8x64xf32>, vector<72x64xf32> -> vector<72x64xf32>
    %22 = arith.addf %15, %21 : vector<72x64xf32>
    %c2 = arith.constant 2 : index
    %c0_24 = arith.constant 0 : index
    %c0_25 = arith.constant 0 : index
    %23 = vector.load %arg4[%c2, %c0_24, %c0_25] : memref<25x72x72xf32, #tpu.memory_space<vmem>>, vector<1x72x72xf32>
    %24 = vector.shape_cast %23 : vector<1x72x72xf32> to vector<72x72xf32>
    %cst_26 = arith.constant dense<0.000000e+00> : vector<72x8xf32>
    %25 = tpu.matmul %24, %9, %cst_26 {dimension_numbers = #tpu.dot_dimension_numbers<[1], [0], [0], [1], [0, 0, 1, 1], [], []>} : vector<72x72xf32>, vector<72x8xf32>, vector<72x8xf32> -> vector<72x8xf32>
    %c2_27 = arith.constant 2 : index
    %c0_28 = arith.constant 0 : index
    %c0_29 = arith.constant 0 : index
    %26 = vector.load %arg5[%c2_27, %c0_28, %c0_29] : memref<25x8x64xf32, #tpu.memory_space<vmem>>, vector<1x8x64xf32>
    %27 = vector.shape_cast %26 : vector<1x8x64xf32> to vector<8x64xf32>
    %cst_30 = arith.constant dense<0.000000e+00> : vector<72x64xf32>
    %28 = tpu.matmul %25, %27, %cst_30 {dimension_numbers = #tpu.dot_dimension_numbers<[1], [0], [0], [1], [0, 0, 1, 1], [], []>} : vector<72x8xf32>, vector<8x64xf32>, vector<72x64xf32> -> vector<72x64xf32>
    %29 = arith.addf %22, %28 : vector<72x64xf32>
    %c3 = arith.constant 3 : index
    %c0_31 = arith.constant 0 : index
    %c0_32 = arith.constant 0 : index
    %30 = vector.load %arg4[%c3, %c0_31, %c0_32] : memref<25x72x72xf32, #tpu.memory_space<vmem>>, vector<1x72x72xf32>
    %31 = vector.shape_cast %30 : vector<1x72x72xf32> to vector<72x72xf32>
    %cst_33 = arith.constant dense<0.000000e+00> : vector<72x8xf32>
    %32 = tpu.matmul %31, %9, %cst_33 {dimension_numbers = #tpu.dot_dimension_numbers<[1], [0], [0], [1], [0, 0, 1, 1], [], []>} : vector<72x72xf32>, vector<72x8xf32>, vector<72x8xf32> -> vector<72x8xf32>
    %c3_34 = arith.constant 3 : index
    %c0_35 = arith.constant 0 : index
    %c0_36 = arith.constant 0 : index
    %33 = vector.load %arg5[%c3_34, %c0_35, %c0_36] : memref<25x8x64xf32, #tpu.memory_space<vmem>>, vector<1x8x64xf32>
    %34 = vector.shape_cast %33 : vector<1x8x64xf32> to vector<8x64xf32>
    %cst_37 = arith.constant dense<0.000000e+00> : vector<72x64xf32>
    %35 = tpu.matmul %32, %34, %cst_37 {dimension_numbers = #tpu.dot_dimension_numbers<[1], [0], [0], [1], [0, 0, 1, 1], [], []>} : vector<72x8xf32>, vector<8x64xf32>, vector<72x64xf32> -> vector<72x64xf32>
    %36 = arith.addf %29, %35 : vector<72x64xf32>
    %c4 = arith.constant 4 : index
    %c0_38 = arith.constant 0 : index
    %c0_39 = arith.constant 0 : index
    %37 = vector.load %arg4[%c4, %c0_38, %c0_39] : memref<25x72x72xf32, #tpu.memory_space<vmem>>, vector<1x72x72xf32>
    %38 = vector.shape_cast %37 : vector<1x72x72xf32> to vector<72x72xf32>
    %cst_40 = arith.constant dense<0.000000e+00> : vector<72x8xf32>
    %39 = tpu.matmul %38, %9, %cst_40 {dimension_numbers = #tpu.dot_dimension_numbers<[1], [0], [0], [1], [0, 0, 1, 1], [], []>} : vector<72x72xf32>, vector<72x8xf32>, vector<72x8xf32> -> vector<72x8xf32>
    %c4_41 = arith.constant 4 : index
    %c0_42 = arith.constant 0 : index
    %c0_43 = arith.constant 0 : index
    %40 = vector.load %arg5[%c4_41, %c0_42, %c0_43] : memref<25x8x64xf32, #tpu.memory_space<vmem>>, vector<1x8x64xf32>
    %41 = vector.shape_cast %40 : vector<1x8x64xf32> to vector<8x64xf32>
    %cst_44 = arith.constant dense<0.000000e+00> : vector<72x64xf32>
    %42 = tpu.matmul %39, %41, %cst_44 {dimension_numbers = #tpu.dot_dimension_numbers<[1], [0], [0], [1], [0, 0, 1, 1], [], []>} : vector<72x8xf32>, vector<8x64xf32>, vector<72x64xf32> -> vector<72x64xf32>
    %43 = arith.addf %36, %42 : vector<72x64xf32>
    %c5 = arith.constant 5 : index
    %c0_45 = arith.constant 0 : index
    %c0_46 = arith.constant 0 : index
    %44 = vector.load %arg4[%c5, %c0_45, %c0_46] : memref<25x72x72xf32, #tpu.memory_space<vmem>>, vector<1x72x72xf32>
    %45 = vector.shape_cast %44 : vector<1x72x72xf32> to vector<72x72xf32>
    %cst_47 = arith.constant dense<0.000000e+00> : vector<72x8xf32>
    %46 = tpu.matmul %45, %9, %cst_47 {dimension_numbers = #tpu.dot_dimension_numbers<[1], [0], [0], [1], [0, 0, 1, 1], [], []>} : vector<72x72xf32>, vector<72x8xf32>, vector<72x8xf32> -> vector<72x8xf32>
    %c5_48 = arith.constant 5 : index
    %c0_49 = arith.constant 0 : index
    %c0_50 = arith.constant 0 : index
    %47 = vector.load %arg5[%c5_48, %c0_49, %c0_50] : memref<25x8x64xf32, #tpu.memory_space<vmem>>, vector<1x8x64xf32>
    %48 = vector.shape_cast %47 : vector<1x8x64xf32> to vector<8x64xf32>
    %cst_51 = arith.constant dense<0.000000e+00> : vector<72x64xf32>
    %49 = tpu.matmul %46, %48, %cst_51 {dimension_numbers = #tpu.dot_dimension_numbers<[1], [0], [0], [1], [0, 0, 1, 1], [], []>} : vector<72x8xf32>, vector<8x64xf32>, vector<72x64xf32> -> vector<72x64xf32>
    %50 = arith.addf %43, %49 : vector<72x64xf32>
    %c6 = arith.constant 6 : index
    %c0_52 = arith.constant 0 : index
    %c0_53 = arith.constant 0 : index
    %51 = vector.load %arg4[%c6, %c0_52, %c0_53] : memref<25x72x72xf32, #tpu.memory_space<vmem>>, vector<1x72x72xf32>
    %52 = vector.shape_cast %51 : vector<1x72x72xf32> to vector<72x72xf32>
    %cst_54 = arith.constant dense<0.000000e+00> : vector<72x8xf32>
    %53 = tpu.matmul %52, %9, %cst_54 {dimension_numbers = #tpu.dot_dimension_numbers<[1], [0], [0], [1], [0, 0, 1, 1], [], []>} : vector<72x72xf32>, vector<72x8xf32>, vector<72x8xf32> -> vector<72x8xf32>
    %c6_55 = arith.constant 6 : index
    %c0_56 = arith.constant 0 : index
    %c0_57 = arith.constant 0 : index
    %54 = vector.load %arg5[%c6_55, %c0_56, %c0_57] : memref<25x8x64xf32, #tpu.memory_space<vmem>>, vector<1x8x64xf32>
    %55 = vector.shape_cast %54 : vector<1x8x64xf32> to vector<8x64xf32>
    %cst_58 = arith.constant dense<0.000000e+00> : vector<72x64xf32>
    %56 = tpu.matmul %53, %55, %cst_58 {dimension_numbers = #tpu.dot_dimension_numbers<[1], [0], [0], [1], [0, 0, 1, 1], [], []>} : vector<72x8xf32>, vector<8x64xf32>, vector<72x64xf32> -> vector<72x64xf32>
    %57 = arith.addf %50, %56 : vector<72x64xf32>
    %c7 = arith.constant 7 : index
    %c0_59 = arith.constant 0 : index
    %c0_60 = arith.constant 0 : index
    %58 = vector.load %arg4[%c7, %c0_59, %c0_60] : memref<25x72x72xf32, #tpu.memory_space<vmem>>, vector<1x72x72xf32>
    %59 = vector.shape_cast %58 : vector<1x72x72xf32> to vector<72x72xf32>
    %cst_61 = arith.constant dense<0.000000e+00> : vector<72x8xf32>
    %60 = tpu.matmul %59, %9, %cst_61 {dimension_numbers = #tpu.dot_dimension_numbers<[1], [0], [0], [1], [0, 0, 1, 1], [], []>} : vector<72x72xf32>, vector<72x8xf32>, vector<72x8xf32> -> vector<72x8xf32>
    %c7_62 = arith.constant 7 : index
    %c0_63 = arith.constant 0 : index
    %c0_64 = arith.constant 0 : index
    %61 = vector.load %arg5[%c7_62, %c0_63, %c0_64] : memref<25x8x64xf32, #tpu.memory_space<vmem>>, vector<1x8x64xf32>
    %62 = vector.shape_cast %61 : vector<1x8x64xf32> to vector<8x64xf32>
    %cst_65 = arith.constant dense<0.000000e+00> : vector<72x64xf32>
    %63 = tpu.matmul %60, %62, %cst_65 {dimension_numbers = #tpu.dot_dimension_numbers<[1], [0], [0], [1], [0, 0, 1, 1], [], []>} : vector<72x8xf32>, vector<8x64xf32>, vector<72x64xf32> -> vector<72x64xf32>
    %64 = arith.addf %57, %63 : vector<72x64xf32>
    %c8 = arith.constant 8 : index
    %c0_66 = arith.constant 0 : index
    %c0_67 = arith.constant 0 : index
    %65 = vector.load %arg4[%c8, %c0_66, %c0_67] : memref<25x72x72xf32, #tpu.memory_space<vmem>>, vector<1x72x72xf32>
    %66 = vector.shape_cast %65 : vector<1x72x72xf32> to vector<72x72xf32>
    %cst_68 = arith.constant dense<0.000000e+00> : vector<72x8xf32>
    %67 = tpu.matmul %66, %9, %cst_68 {dimension_numbers = #tpu.dot_dimension_numbers<[1], [0], [0], [1], [0, 0, 1, 1], [], []>} : vector<72x72xf32>, vector<72x8xf32>, vector<72x8xf32> -> vector<72x8xf32>
    %c8_69 = arith.constant 8 : index
    %c0_70 = arith.constant 0 : index
    %c0_71 = arith.constant 0 : index
    %68 = vector.load %arg5[%c8_69, %c0_70, %c0_71] : memref<25x8x64xf32, #tpu.memory_space<vmem>>, vector<1x8x64xf32>
    %69 = vector.shape_cast %68 : vector<1x8x64xf32> to vector<8x64xf32>
    %cst_72 = arith.constant dense<0.000000e+00> : vector<72x64xf32>
    %70 = tpu.matmul %67, %69, %cst_72 {dimension_numbers = #tpu.dot_dimension_numbers<[1], [0], [0], [1], [0, 0, 1, 1], [], []>} : vector<72x8xf32>, vector<8x64xf32>, vector<72x64xf32> -> vector<72x64xf32>
    %71 = arith.addf %64, %70 : vector<72x64xf32>
    %c9 = arith.constant 9 : index
    %c0_73 = arith.constant 0 : index
    %c0_74 = arith.constant 0 : index
    %72 = vector.load %arg4[%c9, %c0_73, %c0_74] : memref<25x72x72xf32, #tpu.memory_space<vmem>>, vector<1x72x72xf32>
    %73 = vector.shape_cast %72 : vector<1x72x72xf32> to vector<72x72xf32>
    %cst_75 = arith.constant dense<0.000000e+00> : vector<72x8xf32>
    %74 = tpu.matmul %73, %9, %cst_75 {dimension_numbers = #tpu.dot_dimension_numbers<[1], [0], [0], [1], [0, 0, 1, 1], [], []>} : vector<72x72xf32>, vector<72x8xf32>, vector<72x8xf32> -> vector<72x8xf32>
    %c9_76 = arith.constant 9 : index
    %c0_77 = arith.constant 0 : index
    %c0_78 = arith.constant 0 : index
    %75 = vector.load %arg5[%c9_76, %c0_77, %c0_78] : memref<25x8x64xf32, #tpu.memory_space<vmem>>, vector<1x8x64xf32>
    %76 = vector.shape_cast %75 : vector<1x8x64xf32> to vector<8x64xf32>
    %cst_79 = arith.constant dense<0.000000e+00> : vector<72x64xf32>
    %77 = tpu.matmul %74, %76, %cst_79 {dimension_numbers = #tpu.dot_dimension_numbers<[1], [0], [0], [1], [0, 0, 1, 1], [], []>} : vector<72x8xf32>, vector<8x64xf32>, vector<72x64xf32> -> vector<72x64xf32>
    %78 = arith.addf %71, %77 : vector<72x64xf32>
    %c10 = arith.constant 10 : index
    %c0_80 = arith.constant 0 : index
    %c0_81 = arith.constant 0 : index
    %79 = vector.load %arg4[%c10, %c0_80, %c0_81] : memref<25x72x72xf32, #tpu.memory_space<vmem>>, vector<1x72x72xf32>
    %80 = vector.shape_cast %79 : vector<1x72x72xf32> to vector<72x72xf32>
    %cst_82 = arith.constant dense<0.000000e+00> : vector<72x8xf32>
    %81 = tpu.matmul %80, %9, %cst_82 {dimension_numbers = #tpu.dot_dimension_numbers<[1], [0], [0], [1], [0, 0, 1, 1], [], []>} : vector<72x72xf32>, vector<72x8xf32>, vector<72x8xf32> -> vector<72x8xf32>
    %c10_83 = arith.constant 10 : index
    %c0_84 = arith.constant 0 : index
    %c0_85 = arith.constant 0 : index
    %82 = vector.load %arg5[%c10_83, %c0_84, %c0_85] : memref<25x8x64xf32, #tpu.memory_space<vmem>>, vector<1x8x64xf32>
    %83 = vector.shape_cast %82 : vector<1x8x64xf32> to vector<8x64xf32>
    %cst_86 = arith.constant dense<0.000000e+00> : vector<72x64xf32>
    %84 = tpu.matmul %81, %83, %cst_86 {dimension_numbers = #tpu.dot_dimension_numbers<[1], [0], [0], [1], [0, 0, 1, 1], [], []>} : vector<72x8xf32>, vector<8x64xf32>, vector<72x64xf32> -> vector<72x64xf32>
    %85 = arith.addf %78, %84 : vector<72x64xf32>
    %c11 = arith.constant 11 : index
    %c0_87 = arith.constant 0 : index
    %c0_88 = arith.constant 0 : index
    %86 = vector.load %arg4[%c11, %c0_87, %c0_88] : memref<25x72x72xf32, #tpu.memory_space<vmem>>, vector<1x72x72xf32>
    %87 = vector.shape_cast %86 : vector<1x72x72xf32> to vector<72x72xf32>
    %cst_89 = arith.constant dense<0.000000e+00> : vector<72x8xf32>
    %88 = tpu.matmul %87, %9, %cst_89 {dimension_numbers = #tpu.dot_dimension_numbers<[1], [0], [0], [1], [0, 0, 1, 1], [], []>} : vector<72x72xf32>, vector<72x8xf32>, vector<72x8xf32> -> vector<72x8xf32>
    %c11_90 = arith.constant 11 : index
    %c0_91 = arith.constant 0 : index
    %c0_92 = arith.constant 0 : index
    %89 = vector.load %arg5[%c11_90, %c0_91, %c0_92] : memref<25x8x64xf32, #tpu.memory_space<vmem>>, vector<1x8x64xf32>
    %90 = vector.shape_cast %89 : vector<1x8x64xf32> to vector<8x64xf32>
    %cst_93 = arith.constant dense<0.000000e+00> : vector<72x64xf32>
    %91 = tpu.matmul %88, %90, %cst_93 {dimension_numbers = #tpu.dot_dimension_numbers<[1], [0], [0], [1], [0, 0, 1, 1], [], []>} : vector<72x8xf32>, vector<8x64xf32>, vector<72x64xf32> -> vector<72x64xf32>
    %92 = arith.addf %85, %91 : vector<72x64xf32>
    %c12 = arith.constant 12 : index
    %c0_94 = arith.constant 0 : index
    %c0_95 = arith.constant 0 : index
    %93 = vector.load %arg4[%c12, %c0_94, %c0_95] : memref<25x72x72xf32, #tpu.memory_space<vmem>>, vector<1x72x72xf32>
    %94 = vector.shape_cast %93 : vector<1x72x72xf32> to vector<72x72xf32>
    %cst_96 = arith.constant dense<0.000000e+00> : vector<72x8xf32>
    %95 = tpu.matmul %94, %9, %cst_96 {dimension_numbers = #tpu.dot_dimension_numbers<[1], [0], [0], [1], [0, 0, 1, 1], [], []>} : vector<72x72xf32>, vector<72x8xf32>, vector<72x8xf32> -> vector<72x8xf32>
    %c12_97 = arith.constant 12 : index
    %c0_98 = arith.constant 0 : index
    %c0_99 = arith.constant 0 : index
    %96 = vector.load %arg5[%c12_97, %c0_98, %c0_99] : memref<25x8x64xf32, #tpu.memory_space<vmem>>, vector<1x8x64xf32>
    %97 = vector.shape_cast %96 : vector<1x8x64xf32> to vector<8x64xf32>
    %cst_100 = arith.constant dense<0.000000e+00> : vector<72x64xf32>
    %98 = tpu.matmul %95, %97, %cst_100 {dimension_numbers = #tpu.dot_dimension_numbers<[1], [0], [0], [1], [0, 0, 1, 1], [], []>} : vector<72x8xf32>, vector<8x64xf32>, vector<72x64xf32> -> vector<72x64xf32>
    %99 = arith.addf %92, %98 : vector<72x64xf32>
    %c13 = arith.constant 13 : index
    %c0_101 = arith.constant 0 : index
    %c0_102 = arith.constant 0 : index
    %100 = vector.load %arg4[%c13, %c0_101, %c0_102] : memref<25x72x72xf32, #tpu.memory_space<vmem>>, vector<1x72x72xf32>
    %101 = vector.shape_cast %100 : vector<1x72x72xf32> to vector<72x72xf32>
    %cst_103 = arith.constant dense<0.000000e+00> : vector<72x8xf32>
    %102 = tpu.matmul %101, %9, %cst_103 {dimension_numbers = #tpu.dot_dimension_numbers<[1], [0], [0], [1], [0, 0, 1, 1], [], []>} : vector<72x72xf32>, vector<72x8xf32>, vector<72x8xf32> -> vector<72x8xf32>
    %c13_104 = arith.constant 13 : index
    %c0_105 = arith.constant 0 : index
    %c0_106 = arith.constant 0 : index
    %103 = vector.load %arg5[%c13_104, %c0_105, %c0_106] : memref<25x8x64xf32, #tpu.memory_space<vmem>>, vector<1x8x64xf32>
    %104 = vector.shape_cast %103 : vector<1x8x64xf32> to vector<8x64xf32>
    %cst_107 = arith.constant dense<0.000000e+00> : vector<72x64xf32>
    %105 = tpu.matmul %102, %104, %cst_107 {dimension_numbers = #tpu.dot_dimension_numbers<[1], [0], [0], [1], [0, 0, 1, 1], [], []>} : vector<72x8xf32>, vector<8x64xf32>, vector<72x64xf32> -> vector<72x64xf32>
    %106 = arith.addf %99, %105 : vector<72x64xf32>
    %c14 = arith.constant 14 : index
    %c0_108 = arith.constant 0 : index
    %c0_109 = arith.constant 0 : index
    %107 = vector.load %arg4[%c14, %c0_108, %c0_109] : memref<25x72x72xf32, #tpu.memory_space<vmem>>, vector<1x72x72xf32>
    %108 = vector.shape_cast %107 : vector<1x72x72xf32> to vector<72x72xf32>
    %cst_110 = arith.constant dense<0.000000e+00> : vector<72x8xf32>
    %109 = tpu.matmul %108, %9, %cst_110 {dimension_numbers = #tpu.dot_dimension_numbers<[1], [0], [0], [1], [0, 0, 1, 1], [], []>} : vector<72x72xf32>, vector<72x8xf32>, vector<72x8xf32> -> vector<72x8xf32>
    %c14_111 = arith.constant 14 : index
    %c0_112 = arith.constant 0 : index
    %c0_113 = arith.constant 0 : index
    %110 = vector.load %arg5[%c14_111, %c0_112, %c0_113] : memref<25x8x64xf32, #tpu.memory_space<vmem>>, vector<1x8x64xf32>
    %111 = vector.shape_cast %110 : vector<1x8x64xf32> to vector<8x64xf32>
    %cst_114 = arith.constant dense<0.000000e+00> : vector<72x64xf32>
    %112 = tpu.matmul %109, %111, %cst_114 {dimension_numbers = #tpu.dot_dimension_numbers<[1], [0], [0], [1], [0, 0, 1, 1], [], []>} : vector<72x8xf32>, vector<8x64xf32>, vector<72x64xf32> -> vector<72x64xf32>
    %113 = arith.addf %106, %112 : vector<72x64xf32>
    %c15 = arith.constant 15 : index
    %c0_115 = arith.constant 0 : index
    %c0_116 = arith.constant 0 : index
    %114 = vector.load %arg4[%c15, %c0_115, %c0_116] : memref<25x72x72xf32, #tpu.memory_space<vmem>>, vector<1x72x72xf32>
    %115 = vector.shape_cast %114 : vector<1x72x72xf32> to vector<72x72xf32>
    %cst_117 = arith.constant dense<0.000000e+00> : vector<72x8xf32>
    %116 = tpu.matmul %115, %9, %cst_117 {dimension_numbers = #tpu.dot_dimension_numbers<[1], [0], [0], [1], [0, 0, 1, 1], [], []>} : vector<72x72xf32>, vector<72x8xf32>, vector<72x8xf32> -> vector<72x8xf32>
    %c15_118 = arith.constant 15 : index
    %c0_119 = arith.constant 0 : index
    %c0_120 = arith.constant 0 : index
    %117 = vector.load %arg5[%c15_118, %c0_119, %c0_120] : memref<25x8x64xf32, #tpu.memory_space<vmem>>, vector<1x8x64xf32>
    %118 = vector.shape_cast %117 : vector<1x8x64xf32> to vector<8x64xf32>
    %cst_121 = arith.constant dense<0.000000e+00> : vector<72x64xf32>
    %119 = tpu.matmul %116, %118, %cst_121 {dimension_numbers = #tpu.dot_dimension_numbers<[1], [0], [0], [1], [0, 0, 1, 1], [], []>} : vector<72x8xf32>, vector<8x64xf32>, vector<72x64xf32> -> vector<72x64xf32>
    %120 = arith.addf %113, %119 : vector<72x64xf32>
    %c16 = arith.constant 16 : index
    %c0_122 = arith.constant 0 : index
    %c0_123 = arith.constant 0 : index
    %121 = vector.load %arg4[%c16, %c0_122, %c0_123] : memref<25x72x72xf32, #tpu.memory_space<vmem>>, vector<1x72x72xf32>
    %122 = vector.shape_cast %121 : vector<1x72x72xf32> to vector<72x72xf32>
    %cst_124 = arith.constant dense<0.000000e+00> : vector<72x8xf32>
    %123 = tpu.matmul %122, %9, %cst_124 {dimension_numbers = #tpu.dot_dimension_numbers<[1], [0], [0], [1], [0, 0, 1, 1], [], []>} : vector<72x72xf32>, vector<72x8xf32>, vector<72x8xf32> -> vector<72x8xf32>
    %c16_125 = arith.constant 16 : index
    %c0_126 = arith.constant 0 : index
    %c0_127 = arith.constant 0 : index
    %124 = vector.load %arg5[%c16_125, %c0_126, %c0_127] : memref<25x8x64xf32, #tpu.memory_space<vmem>>, vector<1x8x64xf32>
    %125 = vector.shape_cast %124 : vector<1x8x64xf32> to vector<8x64xf32>
    %cst_128 = arith.constant dense<0.000000e+00> : vector<72x64xf32>
    %126 = tpu.matmul %123, %125, %cst_128 {dimension_numbers = #tpu.dot_dimension_numbers<[1], [0], [0], [1], [0, 0, 1, 1], [], []>} : vector<72x8xf32>, vector<8x64xf32>, vector<72x64xf32> -> vector<72x64xf32>
    %127 = arith.addf %120, %126 : vector<72x64xf32>
    %c17 = arith.constant 17 : index
    %c0_129 = arith.constant 0 : index
    %c0_130 = arith.constant 0 : index
    %128 = vector.load %arg4[%c17, %c0_129, %c0_130] : memref<25x72x72xf32, #tpu.memory_space<vmem>>, vector<1x72x72xf32>
    %129 = vector.shape_cast %128 : vector<1x72x72xf32> to vector<72x72xf32>
    %cst_131 = arith.constant dense<0.000000e+00> : vector<72x8xf32>
    %130 = tpu.matmul %129, %9, %cst_131 {dimension_numbers = #tpu.dot_dimension_numbers<[1], [0], [0], [1], [0, 0, 1, 1], [], []>} : vector<72x72xf32>, vector<72x8xf32>, vector<72x8xf32> -> vector<72x8xf32>
    %c17_132 = arith.constant 17 : index
    %c0_133 = arith.constant 0 : index
    %c0_134 = arith.constant 0 : index
    %131 = vector.load %arg5[%c17_132, %c0_133, %c0_134] : memref<25x8x64xf32, #tpu.memory_space<vmem>>, vector<1x8x64xf32>
    %132 = vector.shape_cast %131 : vector<1x8x64xf32> to vector<8x64xf32>
    %cst_135 = arith.constant dense<0.000000e+00> : vector<72x64xf32>
    %133 = tpu.matmul %130, %132, %cst_135 {dimension_numbers = #tpu.dot_dimension_numbers<[1], [0], [0], [1], [0, 0, 1, 1], [], []>} : vector<72x8xf32>, vector<8x64xf32>, vector<72x64xf32> -> vector<72x64xf32>
    %134 = arith.addf %127, %133 : vector<72x64xf32>
    %c18 = arith.constant 18 : index
    %c0_136 = arith.constant 0 : index
    %c0_137 = arith.constant 0 : index
    %135 = vector.load %arg4[%c18, %c0_136, %c0_137] : memref<25x72x72xf32, #tpu.memory_space<vmem>>, vector<1x72x72xf32>
    %136 = vector.shape_cast %135 : vector<1x72x72xf32> to vector<72x72xf32>
    %cst_138 = arith.constant dense<0.000000e+00> : vector<72x8xf32>
    %137 = tpu.matmul %136, %9, %cst_138 {dimension_numbers = #tpu.dot_dimension_numbers<[1], [0], [0], [1], [0, 0, 1, 1], [], []>} : vector<72x72xf32>, vector<72x8xf32>, vector<72x8xf32> -> vector<72x8xf32>
    %c18_139 = arith.constant 18 : index
    %c0_140 = arith.constant 0 : index
    %c0_141 = arith.constant 0 : index
    %138 = vector.load %arg5[%c18_139, %c0_140, %c0_141] : memref<25x8x64xf32, #tpu.memory_space<vmem>>, vector<1x8x64xf32>
    %139 = vector.shape_cast %138 : vector<1x8x64xf32> to vector<8x64xf32>
    %cst_142 = arith.constant dense<0.000000e+00> : vector<72x64xf32>
    %140 = tpu.matmul %137, %139, %cst_142 {dimension_numbers = #tpu.dot_dimension_numbers<[1], [0], [0], [1], [0, 0, 1, 1], [], []>} : vector<72x8xf32>, vector<8x64xf32>, vector<72x64xf32> -> vector<72x64xf32>
    %141 = arith.addf %134, %140 : vector<72x64xf32>
    %c19 = arith.constant 19 : index
    %c0_143 = arith.constant 0 : index
    %c0_144 = arith.constant 0 : index
    %142 = vector.load %arg4[%c19, %c0_143, %c0_144] : memref<25x72x72xf32, #tpu.memory_space<vmem>>, vector<1x72x72xf32>
    %143 = vector.shape_cast %142 : vector<1x72x72xf32> to vector<72x72xf32>
    %cst_145 = arith.constant dense<0.000000e+00> : vector<72x8xf32>
    %144 = tpu.matmul %143, %9, %cst_145 {dimension_numbers = #tpu.dot_dimension_numbers<[1], [0], [0], [1], [0, 0, 1, 1], [], []>} : vector<72x72xf32>, vector<72x8xf32>, vector<72x8xf32> -> vector<72x8xf32>
    %c19_146 = arith.constant 19 : index
    %c0_147 = arith.constant 0 : index
    %c0_148 = arith.constant 0 : index
    %145 = vector.load %arg5[%c19_146, %c0_147, %c0_148] : memref<25x8x64xf32, #tpu.memory_space<vmem>>, vector<1x8x64xf32>
    %146 = vector.shape_cast %145 : vector<1x8x64xf32> to vector<8x64xf32>
    %cst_149 = arith.constant dense<0.000000e+00> : vector<72x64xf32>
    %147 = tpu.matmul %144, %146, %cst_149 {dimension_numbers = #tpu.dot_dimension_numbers<[1], [0], [0], [1], [0, 0, 1, 1], [], []>} : vector<72x8xf32>, vector<8x64xf32>, vector<72x64xf32> -> vector<72x64xf32>
    %148 = arith.addf %141, %147 : vector<72x64xf32>
    %c20 = arith.constant 20 : index
    %c0_150 = arith.constant 0 : index
    %c0_151 = arith.constant 0 : index
    %149 = vector.load %arg4[%c20, %c0_150, %c0_151] : memref<25x72x72xf32, #tpu.memory_space<vmem>>, vector<1x72x72xf32>
    %150 = vector.shape_cast %149 : vector<1x72x72xf32> to vector<72x72xf32>
    %cst_152 = arith.constant dense<0.000000e+00> : vector<72x8xf32>
    %151 = tpu.matmul %150, %9, %cst_152 {dimension_numbers = #tpu.dot_dimension_numbers<[1], [0], [0], [1], [0, 0, 1, 1], [], []>} : vector<72x72xf32>, vector<72x8xf32>, vector<72x8xf32> -> vector<72x8xf32>
    %c20_153 = arith.constant 20 : index
    %c0_154 = arith.constant 0 : index
    %c0_155 = arith.constant 0 : index
    %152 = vector.load %arg5[%c20_153, %c0_154, %c0_155] : memref<25x8x64xf32, #tpu.memory_space<vmem>>, vector<1x8x64xf32>
    %153 = vector.shape_cast %152 : vector<1x8x64xf32> to vector<8x64xf32>
    %cst_156 = arith.constant dense<0.000000e+00> : vector<72x64xf32>
    %154 = tpu.matmul %151, %153, %cst_156 {dimension_numbers = #tpu.dot_dimension_numbers<[1], [0], [0], [1], [0, 0, 1, 1], [], []>} : vector<72x8xf32>, vector<8x64xf32>, vector<72x64xf32> -> vector<72x64xf32>
    %155 = arith.addf %148, %154 : vector<72x64xf32>
    %c21 = arith.constant 21 : index
    %c0_157 = arith.constant 0 : index
    %c0_158 = arith.constant 0 : index
    %156 = vector.load %arg4[%c21, %c0_157, %c0_158] : memref<25x72x72xf32, #tpu.memory_space<vmem>>, vector<1x72x72xf32>
    %157 = vector.shape_cast %156 : vector<1x72x72xf32> to vector<72x72xf32>
    %cst_159 = arith.constant dense<0.000000e+00> : vector<72x8xf32>
    %158 = tpu.matmul %157, %9, %cst_159 {dimension_numbers = #tpu.dot_dimension_numbers<[1], [0], [0], [1], [0, 0, 1, 1], [], []>} : vector<72x72xf32>, vector<72x8xf32>, vector<72x8xf32> -> vector<72x8xf32>
    %c21_160 = arith.constant 21 : index
    %c0_161 = arith.constant 0 : index
    %c0_162 = arith.constant 0 : index
    %159 = vector.load %arg5[%c21_160, %c0_161, %c0_162] : memref<25x8x64xf32, #tpu.memory_space<vmem>>, vector<1x8x64xf32>
    %160 = vector.shape_cast %159 : vector<1x8x64xf32> to vector<8x64xf32>
    %cst_163 = arith.constant dense<0.000000e+00> : vector<72x64xf32>
    %161 = tpu.matmul %158, %160, %cst_163 {dimension_numbers = #tpu.dot_dimension_numbers<[1], [0], [0], [1], [0, 0, 1, 1], [], []>} : vector<72x8xf32>, vector<8x64xf32>, vector<72x64xf32> -> vector<72x64xf32>
    %162 = arith.addf %155, %161 : vector<72x64xf32>
    %c22 = arith.constant 22 : index
    %c0_164 = arith.constant 0 : index
    %c0_165 = arith.constant 0 : index
    %163 = vector.load %arg4[%c22, %c0_164, %c0_165] : memref<25x72x72xf32, #tpu.memory_space<vmem>>, vector<1x72x72xf32>
    %164 = vector.shape_cast %163 : vector<1x72x72xf32> to vector<72x72xf32>
    %cst_166 = arith.constant dense<0.000000e+00> : vector<72x8xf32>
    %165 = tpu.matmul %164, %9, %cst_166 {dimension_numbers = #tpu.dot_dimension_numbers<[1], [0], [0], [1], [0, 0, 1, 1], [], []>} : vector<72x72xf32>, vector<72x8xf32>, vector<72x8xf32> -> vector<72x8xf32>
    %c22_167 = arith.constant 22 : index
    %c0_168 = arith.constant 0 : index
    %c0_169 = arith.constant 0 : index
    %166 = vector.load %arg5[%c22_167, %c0_168, %c0_169] : memref<25x8x64xf32, #tpu.memory_space<vmem>>, vector<1x8x64xf32>
    %167 = vector.shape_cast %166 : vector<1x8x64xf32> to vector<8x64xf32>
    %cst_170 = arith.constant dense<0.000000e+00> : vector<72x64xf32>
    %168 = tpu.matmul %165, %167, %cst_170 {dimension_numbers = #tpu.dot_dimension_numbers<[1], [0], [0], [1], [0, 0, 1, 1], [], []>} : vector<72x8xf32>, vector<8x64xf32>, vector<72x64xf32> -> vector<72x64xf32>
    %169 = arith.addf %162, %168 : vector<72x64xf32>
    %c23 = arith.constant 23 : index
    %c0_171 = arith.constant 0 : index
    %c0_172 = arith.constant 0 : index
    %170 = vector.load %arg4[%c23, %c0_171, %c0_172] : memref<25x72x72xf32, #tpu.memory_space<vmem>>, vector<1x72x72xf32>
    %171 = vector.shape_cast %170 : vector<1x72x72xf32> to vector<72x72xf32>
    %cst_173 = arith.constant dense<0.000000e+00> : vector<72x8xf32>
    %172 = tpu.matmul %171, %9, %cst_173 {dimension_numbers = #tpu.dot_dimension_numbers<[1], [0], [0], [1], [0, 0, 1, 1], [], []>} : vector<72x72xf32>, vector<72x8xf32>, vector<72x8xf32> -> vector<72x8xf32>
    %c23_174 = arith.constant 23 : index
    %c0_175 = arith.constant 0 : index
    %c0_176 = arith.constant 0 : index
    %173 = vector.load %arg5[%c23_174, %c0_175, %c0_176] : memref<25x8x64xf32, #tpu.memory_space<vmem>>, vector<1x8x64xf32>
    %174 = vector.shape_cast %173 : vector<1x8x64xf32> to vector<8x64xf32>
    %cst_177 = arith.constant dense<0.000000e+00> : vector<72x64xf32>
    %175 = tpu.matmul %172, %174, %cst_177 {dimension_numbers = #tpu.dot_dimension_numbers<[1], [0], [0], [1], [0, 0, 1, 1], [], []>} : vector<72x8xf32>, vector<8x64xf32>, vector<72x64xf32> -> vector<72x64xf32>
    %176 = arith.addf %169, %175 : vector<72x64xf32>
    %c24 = arith.constant 24 : index
    %c0_178 = arith.constant 0 : index
    %c0_179 = arith.constant 0 : index
    %177 = vector.load %arg4[%c24, %c0_178, %c0_179] : memref<25x72x72xf32, #tpu.memory_space<vmem>>, vector<1x72x72xf32>
    %178 = vector.shape_cast %177 : vector<1x72x72xf32> to vector<72x72xf32>
    %cst_180 = arith.constant dense<0.000000e+00> : vector<72x8xf32>
    %179 = tpu.matmul %178, %9, %cst_180 {dimension_numbers = #tpu.dot_dimension_numbers<[1], [0], [0], [1], [0, 0, 1, 1], [], []>} : vector<72x72xf32>, vector<72x8xf32>, vector<72x8xf32> -> vector<72x8xf32>
    %c24_181 = arith.constant 24 : index
    %c0_182 = arith.constant 0 : index
    %c0_183 = arith.constant 0 : index
    %180 = vector.load %arg5[%c24_181, %c0_182, %c0_183] : memref<25x8x64xf32, #tpu.memory_space<vmem>>, vector<1x8x64xf32>
    %181 = vector.shape_cast %180 : vector<1x8x64xf32> to vector<8x64xf32>
    %cst_184 = arith.constant dense<0.000000e+00> : vector<72x64xf32>
    %182 = tpu.matmul %179, %181, %cst_184 {dimension_numbers = #tpu.dot_dimension_numbers<[1], [0], [0], [1], [0, 0, 1, 1], [], []>} : vector<72x8xf32>, vector<8x64xf32>, vector<72x64xf32> -> vector<72x64xf32>
    %183 = arith.addf %176, %182 : vector<72x64xf32>
    %c0_185 = arith.constant 0 : index
    %c0_186 = arith.constant 0 : index
    %184 = vector.load %arg6[%c0_185, %c0_186] : memref<1x64xf32, #tpu.memory_space<vmem>>, vector<1x64xf32>
    %185 = vector.broadcast %184 : vector<1x64xf32> to vector<72x64xf32>
    %186 = arith.addf %183, %185 : vector<72x64xf32>
    %cst_187 = arith.constant 0.000000e+00 : f32
    %187 = vector.broadcast %cst_187 : f32 to vector<72x64xf32>
    %188 = arith.maximumf %186, %187 : vector<72x64xf32>
    %c0_188 = arith.constant 0 : index
    %c0_189 = arith.constant 0 : index
    %c0_190 = arith.constant 0 : index
    %189 = vector.load %arg7[%c0_188, %c0_189, %c0_190] : memref<9x2x72xf32, #tpu.memory_space<vmem>>, vector<1x2x72xf32>
    %190 = vector.shape_cast %189 : vector<1x2x72xf32> to vector<2x72xf32>
    %cst_191 = arith.constant dense<0.000000e+00> : vector<2x64xf32>
    %191 = tpu.matmul %190, %188, %cst_191 {dimension_numbers = #tpu.dot_dimension_numbers<[1], [0], [0], [1], [0, 0, 1, 1], [], []>} : vector<2x72xf32>, vector<72x64xf32>, vector<2x64xf32> -> vector<2x64xf32>
    %c0_192 = arith.constant 0 : index
    %c0_193 = arith.constant 0 : index
    %c0_194 = arith.constant 0 : index
    %192 = vector.load %arg8[%c0_192, %c0_193, %c0_194] : memref<9x64x128xf32, #tpu.memory_space<vmem>>, vector<1x64x128xf32>
    %193 = vector.shape_cast %192 : vector<1x64x128xf32> to vector<64x128xf32>
    %cst_195 = arith.constant dense<0.000000e+00> : vector<2x128xf32>
    %194 = tpu.matmul %191, %193, %cst_195 {dimension_numbers = #tpu.dot_dimension_numbers<[1], [0], [0], [1], [0, 0, 1, 1], [], []>} : vector<2x64xf32>, vector<64x128xf32>, vector<2x128xf32> -> vector<2x128xf32>
    %c1_196 = arith.constant 1 : index
    %c0_197 = arith.constant 0 : index
    %c0_198 = arith.constant 0 : index
    %195 = vector.load %arg7[%c1_196, %c0_197, %c0_198] : memref<9x2x72xf32, #tpu.memory_space<vmem>>, vector<1x2x72xf32>
    %196 = vector.shape_cast %195 : vector<1x2x72xf32> to vector<2x72xf32>
    %cst_199 = arith.constant dense<0.000000e+00> : vector<2x64xf32>
    %197 = tpu.matmul %196, %188, %cst_199 {dimension_numbers = #tpu.dot_dimension_numbers<[1], [0], [0], [1], [0, 0, 1, 1], [], []>} : vector<2x72xf32>, vector<72x64xf32>, vector<2x64xf32> -> vector<2x64xf32>
    %c1_200 = arith.constant 1 : index
    %c0_201 = arith.constant 0 : index
    %c0_202 = arith.constant 0 : index
    %198 = vector.load %arg8[%c1_200, %c0_201, %c0_202] : memref<9x64x128xf32, #tpu.memory_space<vmem>>, vector<1x64x128xf32>
    %199 = vector.shape_cast %198 : vector<1x64x128xf32> to vector<64x128xf32>
    %cst_203 = arith.constant dense<0.000000e+00> : vector<2x128xf32>
    %200 = tpu.matmul %197, %199, %cst_203 {dimension_numbers = #tpu.dot_dimension_numbers<[1], [0], [0], [1], [0, 0, 1, 1], [], []>} : vector<2x64xf32>, vector<64x128xf32>, vector<2x128xf32> -> vector<2x128xf32>
    %201 = arith.addf %194, %200 : vector<2x128xf32>
    %c2_204 = arith.constant 2 : index
    %c0_205 = arith.constant 0 : index
    %c0_206 = arith.constant 0 : index
    %202 = vector.load %arg7[%c2_204, %c0_205, %c0_206] : memref<9x2x72xf32, #tpu.memory_space<vmem>>, vector<1x2x72xf32>
    %203 = vector.shape_cast %202 : vector<1x2x72xf32> to vector<2x72xf32>
    %cst_207 = arith.constant dense<0.000000e+00> : vector<2x64xf32>
    %204 = tpu.matmul %203, %188, %cst_207 {dimension_numbers = #tpu.dot_dimension_numbers<[1], [0], [0], [1], [0, 0, 1, 1], [], []>} : vector<2x72xf32>, vector<72x64xf32>, vector<2x64xf32> -> vector<2x64xf32>
    %c2_208 = arith.constant 2 : index
    %c0_209 = arith.constant 0 : index
    %c0_210 = arith.constant 0 : index
    %205 = vector.load %arg8[%c2_208, %c0_209, %c0_210] : memref<9x64x128xf32, #tpu.memory_space<vmem>>, vector<1x64x128xf32>
    %206 = vector.shape_cast %205 : vector<1x64x128xf32> to vector<64x128xf32>
    %cst_211 = arith.constant dense<0.000000e+00> : vector<2x128xf32>
    %207 = tpu.matmul %204, %206, %cst_211 {dimension_numbers = #tpu.dot_dimension_numbers<[1], [0], [0], [1], [0, 0, 1, 1], [], []>} : vector<2x64xf32>, vector<64x128xf32>, vector<2x128xf32> -> vector<2x128xf32>
    %208 = arith.addf %201, %207 : vector<2x128xf32>
    %c3_212 = arith.constant 3 : index
    %c0_213 = arith.constant 0 : index
    %c0_214 = arith.constant 0 : index
    %209 = vector.load %arg7[%c3_212, %c0_213, %c0_214] : memref<9x2x72xf32, #tpu.memory_space<vmem>>, vector<1x2x72xf32>
    %210 = vector.shape_cast %209 : vector<1x2x72xf32> to vector<2x72xf32>
    %cst_215 = arith.constant dense<0.000000e+00> : vector<2x64xf32>
    %211 = tpu.matmul %210, %188, %cst_215 {dimension_numbers = #tpu.dot_dimension_numbers<[1], [0], [0], [1], [0, 0, 1, 1], [], []>} : vector<2x72xf32>, vector<72x64xf32>, vector<2x64xf32> -> vector<2x64xf32>
    %c3_216 = arith.constant 3 : index
    %c0_217 = arith.constant 0 : index
    %c0_218 = arith.constant 0 : index
    %212 = vector.load %arg8[%c3_216, %c0_217, %c0_218] : memref<9x64x128xf32, #tpu.memory_space<vmem>>, vector<1x64x128xf32>
    %213 = vector.shape_cast %212 : vector<1x64x128xf32> to vector<64x128xf32>
    %cst_219 = arith.constant dense<0.000000e+00> : vector<2x128xf32>
    %214 = tpu.matmul %211, %213, %cst_219 {dimension_numbers = #tpu.dot_dimension_numbers<[1], [0], [0], [1], [0, 0, 1, 1], [], []>} : vector<2x64xf32>, vector<64x128xf32>, vector<2x128xf32> -> vector<2x128xf32>
    %215 = arith.addf %208, %214 : vector<2x128xf32>
    %c4_220 = arith.constant 4 : index
    %c0_221 = arith.constant 0 : index
    %c0_222 = arith.constant 0 : index
    %216 = vector.load %arg7[%c4_220, %c0_221, %c0_222] : memref<9x2x72xf32, #tpu.memory_space<vmem>>, vector<1x2x72xf32>
    %217 = vector.shape_cast %216 : vector<1x2x72xf32> to vector<2x72xf32>
    %cst_223 = arith.constant dense<0.000000e+00> : vector<2x64xf32>
    %218 = tpu.matmul %217, %188, %cst_223 {dimension_numbers = #tpu.dot_dimension_numbers<[1], [0], [0], [1], [0, 0, 1, 1], [], []>} : vector<2x72xf32>, vector<72x64xf32>, vector<2x64xf32> -> vector<2x64xf32>
    %c4_224 = arith.constant 4 : index
    %c0_225 = arith.constant 0 : index
    %c0_226 = arith.constant 0 : index
    %219 = vector.load %arg8[%c4_224, %c0_225, %c0_226] : memref<9x64x128xf32, #tpu.memory_space<vmem>>, vector<1x64x128xf32>
    %220 = vector.shape_cast %219 : vector<1x64x128xf32> to vector<64x128xf32>
    %cst_227 = arith.constant dense<0.000000e+00> : vector<2x128xf32>
    %221 = tpu.matmul %218, %220, %cst_227 {dimension_numbers = #tpu.dot_dimension_numbers<[1], [0], [0], [1], [0, 0, 1, 1], [], []>} : vector<2x64xf32>, vector<64x128xf32>, vector<2x128xf32> -> vector<2x128xf32>
    %222 = arith.addf %215, %221 : vector<2x128xf32>
    %c5_228 = arith.constant 5 : index
    %c0_229 = arith.constant 0 : index
    %c0_230 = arith.constant 0 : index
    %223 = vector.load %arg7[%c5_228, %c0_229, %c0_230] : memref<9x2x72xf32, #tpu.memory_space<vmem>>, vector<1x2x72xf32>
    %224 = vector.shape_cast %223 : vector<1x2x72xf32> to vector<2x72xf32>
    %cst_231 = arith.constant dense<0.000000e+00> : vector<2x64xf32>
    %225 = tpu.matmul %224, %188, %cst_231 {dimension_numbers = #tpu.dot_dimension_numbers<[1], [0], [0], [1], [0, 0, 1, 1], [], []>} : vector<2x72xf32>, vector<72x64xf32>, vector<2x64xf32> -> vector<2x64xf32>
    %c5_232 = arith.constant 5 : index
    %c0_233 = arith.constant 0 : index
    %c0_234 = arith.constant 0 : index
    %226 = vector.load %arg8[%c5_232, %c0_233, %c0_234] : memref<9x64x128xf32, #tpu.memory_space<vmem>>, vector<1x64x128xf32>
    %227 = vector.shape_cast %226 : vector<1x64x128xf32> to vector<64x128xf32>
    %cst_235 = arith.constant dense<0.000000e+00> : vector<2x128xf32>
    %228 = tpu.matmul %225, %227, %cst_235 {dimension_numbers = #tpu.dot_dimension_numbers<[1], [0], [0], [1], [0, 0, 1, 1], [], []>} : vector<2x64xf32>, vector<64x128xf32>, vector<2x128xf32> -> vector<2x128xf32>
    %229 = arith.addf %222, %228 : vector<2x128xf32>
    %c6_236 = arith.constant 6 : index
    %c0_237 = arith.constant 0 : index
    %c0_238 = arith.constant 0 : index
    %230 = vector.load %arg7[%c6_236, %c0_237, %c0_238] : memref<9x2x72xf32, #tpu.memory_space<vmem>>, vector<1x2x72xf32>
    %231 = vector.shape_cast %230 : vector<1x2x72xf32> to vector<2x72xf32>
    %cst_239 = arith.constant dense<0.000000e+00> : vector<2x64xf32>
    %232 = tpu.matmul %231, %188, %cst_239 {dimension_numbers = #tpu.dot_dimension_numbers<[1], [0], [0], [1], [0, 0, 1, 1], [], []>} : vector<2x72xf32>, vector<72x64xf32>, vector<2x64xf32> -> vector<2x64xf32>
    %c6_240 = arith.constant 6 : index
    %c0_241 = arith.constant 0 : index
    %c0_242 = arith.constant 0 : index
    %233 = vector.load %arg8[%c6_240, %c0_241, %c0_242] : memref<9x64x128xf32, #tpu.memory_space<vmem>>, vector<1x64x128xf32>
    %234 = vector.shape_cast %233 : vector<1x64x128xf32> to vector<64x128xf32>
    %cst_243 = arith.constant dense<0.000000e+00> : vector<2x128xf32>
    %235 = tpu.matmul %232, %234, %cst_243 {dimension_numbers = #tpu.dot_dimension_numbers<[1], [0], [0], [1], [0, 0, 1, 1], [], []>} : vector<2x64xf32>, vector<64x128xf32>, vector<2x128xf32> -> vector<2x128xf32>
    %236 = arith.addf %229, %235 : vector<2x128xf32>
    %c7_244 = arith.constant 7 : index
    %c0_245 = arith.constant 0 : index
    %c0_246 = arith.constant 0 : index
    %237 = vector.load %arg7[%c7_244, %c0_245, %c0_246] : memref<9x2x72xf32, #tpu.memory_space<vmem>>, vector<1x2x72xf32>
    %238 = vector.shape_cast %237 : vector<1x2x72xf32> to vector<2x72xf32>
    %cst_247 = arith.constant dense<0.000000e+00> : vector<2x64xf32>
    %239 = tpu.matmul %238, %188, %cst_247 {dimension_numbers = #tpu.dot_dimension_numbers<[1], [0], [0], [1], [0, 0, 1, 1], [], []>} : vector<2x72xf32>, vector<72x64xf32>, vector<2x64xf32> -> vector<2x64xf32>
    %c7_248 = arith.constant 7 : index
    %c0_249 = arith.constant 0 : index
    %c0_250 = arith.constant 0 : index
    %240 = vector.load %arg8[%c7_248, %c0_249, %c0_250] : memref<9x64x128xf32, #tpu.memory_space<vmem>>, vector<1x64x128xf32>
    %241 = vector.shape_cast %240 : vector<1x64x128xf32> to vector<64x128xf32>
    %cst_251 = arith.constant dense<0.000000e+00> : vector<2x128xf32>
    %242 = tpu.matmul %239, %241, %cst_251 {dimension_numbers = #tpu.dot_dimension_numbers<[1], [0], [0], [1], [0, 0, 1, 1], [], []>} : vector<2x64xf32>, vector<64x128xf32>, vector<2x128xf32> -> vector<2x128xf32>
    %243 = arith.addf %236, %242 : vector<2x128xf32>
    %c8_252 = arith.constant 8 : index
    %c0_253 = arith.constant 0 : index
    %c0_254 = arith.constant 0 : index
    %244 = vector.load %arg7[%c8_252, %c0_253, %c0_254] : memref<9x2x72xf32, #tpu.memory_space<vmem>>, vector<1x2x72xf32>
    %245 = vector.shape_cast %244 : vector<1x2x72xf32> to vector<2x72xf32>
    %cst_255 = arith.constant dense<0.000000e+00> : vector<2x64xf32>
    %246 = tpu.matmul %245, %188, %cst_255 {dimension_numbers = #tpu.dot_dimension_numbers<[1], [0], [0], [1], [0, 0, 1, 1], [], []>} : vector<2x72xf32>, vector<72x64xf32>, vector<2x64xf32> -> vector<2x64xf32>
    %c8_256 = arith.constant 8 : index
    %c0_257 = arith.constant 0 : index
    %c0_258 = arith.constant 0 : index
    %247 = vector.load %arg8[%c8_256, %c0_257, %c0_258] : memref<9x64x128xf32, #tpu.memory_space<vmem>>, vector<1x64x128xf32>
    %248 = vector.shape_cast %247 : vector<1x64x128xf32> to vector<64x128xf32>
    %cst_259 = arith.constant dense<0.000000e+00> : vector<2x128xf32>
    %249 = tpu.matmul %246, %248, %cst_259 {dimension_numbers = #tpu.dot_dimension_numbers<[1], [0], [0], [1], [0, 0, 1, 1], [], []>} : vector<2x64xf32>, vector<64x128xf32>, vector<2x128xf32> -> vector<2x128xf32>
    %250 = arith.addf %243, %249 : vector<2x128xf32>
    %c0_260 = arith.constant 0 : index
    %c0_261 = arith.constant 0 : index
    %251 = vector.load %arg9[%c0_260, %c0_261] : memref<1x128xf32, #tpu.memory_space<vmem>>, vector<1x128xf32>
    %252 = vector.broadcast %251 : vector<1x128xf32> to vector<2x128xf32>
    %253 = arith.addf %250, %252 : vector<2x128xf32>
    %cst_262 = arith.constant 0.000000e+00 : f32
    %254 = vector.broadcast %cst_262 : f32 to vector<2x128xf32>
    %255 = arith.maximumf %253, %254 : vector<2x128xf32>
    %c0_263 = arith.constant 0 : index
    %c0_264 = arith.constant 0 : index
    %256 = vector.load %arg10[%c0_263, %c0_264] : memref<128x128xf32, #tpu.memory_space<vmem>>, vector<128x128xf32>
    %cst_265 = arith.constant dense<0.000000e+00> : vector<2x128xf32>
    %257 = tpu.matmul %255, %256, %cst_265 {dimension_numbers = #tpu.dot_dimension_numbers<[1], [0], [0], [1], [0, 0, 1, 1], [], []>} : vector<2x128xf32>, vector<128x128xf32>, vector<2x128xf32> -> vector<2x128xf32>
    %c0_266 = arith.constant 0 : index
    %c0_267 = arith.constant 0 : index
    %258 = vector.load %arg11[%c0_266, %c0_267] : memref<1x128xf32, #tpu.memory_space<vmem>>, vector<1x128xf32>
    %259 = vector.broadcast %258 : vector<1x128xf32> to vector<2x128xf32>
    %260 = arith.addf %257, %259 : vector<2x128xf32>
    %cst_268 = arith.constant 0.000000e+00 : f32
    %261 = vector.broadcast %cst_268 : f32 to vector<2x128xf32>
    %262 = arith.maximumf %260, %261 : vector<2x128xf32>
    %c0_269 = arith.constant 0 : index
    %c0_270 = arith.constant 0 : index
    %263 = vector.load %arg12[%c0_269, %c0_270] : memref<128x64xf32, #tpu.memory_space<vmem>>, vector<128x64xf32>
    %cst_271 = arith.constant dense<0.000000e+00> : vector<2x64xf32>
    %264 = tpu.matmul %262, %263, %cst_271 {dimension_numbers = #tpu.dot_dimension_numbers<[1], [0], [0], [1], [0, 0, 1, 1], [], []>} : vector<2x128xf32>, vector<128x64xf32>, vector<2x64xf32> -> vector<2x64xf32>
    %c0_272 = arith.constant 0 : index
    %c0_273 = arith.constant 0 : index
    %265 = vector.load %arg13[%c0_272, %c0_273] : memref<1x64xf32, #tpu.memory_space<vmem>>, vector<1x64xf32>
    %266 = vector.broadcast %265 : vector<1x64xf32> to vector<2x64xf32>
    %267 = arith.addf %264, %266 : vector<2x64xf32>
    %cst_274 = arith.constant 0.000000e+00 : f32
    %268 = vector.broadcast %cst_274 : f32 to vector<2x64xf32>
    %269 = arith.maximumf %267, %268 : vector<2x64xf32>
    %c0_275 = arith.constant 0 : index
    %c0_276 = arith.constant 0 : index
    %270 = vector.load %arg14[%c0_275, %c0_276] : memref<64x10xf32, #tpu.memory_space<vmem>>, vector<64x10xf32>
    %cst_277 = arith.constant dense<0.000000e+00> : vector<2x10xf32>
    %271 = tpu.matmul %269, %270, %cst_277 {dimension_numbers = #tpu.dot_dimension_numbers<[1], [0], [0], [1], [0, 0, 1, 1], [], []>} : vector<2x64xf32>, vector<64x10xf32>, vector<2x10xf32> -> vector<2x10xf32>
    %c0_278 = arith.constant 0 : index
    %c0_279 = arith.constant 0 : index
    %272 = vector.load %arg15[%c0_278, %c0_279] : memref<1x10xf32, #tpu.memory_space<vmem>>, vector<1x10xf32>
    %273 = vector.broadcast %272 : vector<1x10xf32> to vector<2x10xf32>
    %274 = arith.addf %271, %273 : vector<2x10xf32>
    %c0_280 = arith.constant 0 : index
    %c0_281 = arith.constant 0 : index
    %275 = vector.load %arg16[%c0_280, %c0_281] : memref<2x10xf32, #tpu.memory_space<vmem>>, vector<2x10xf32>
    tpu.vector_store %arg16[%c0_280, %c0_281], %274 {strides = array<i32>} : memref<2x10xf32, #tpu.memory_space<vmem>>, vector<2x10xf32>,
    return
  }
}

</mosaic_0001>

<bundles_post_ra>
// kernel: lenet5_forward.1
= control target key start
LH: loop header
LB: loop body
LE: loop exit
PB: predicated region body
PF: predicated region fallthrough
CT: control target
= control target key end

     0   :  { %s18709_s0 = inlined_call_operand.vmem [shape: f32[288,25], index: 0, kind: input, shape index: {}]   ;;  %s18710_s1 = inlined_call_operand.vmem [shape: f32[25,8], index: 1, kind: input, shape index: {}]   ;;  %s18711_s2 = inlined_call_operand.vmem [shape: f32[1,8], index: 2, kind: input, shape index: {}]   ;;  %s18712_s3 = inlined_call_operand.vmem [shape: f32[72,288], index: 3, kind: input, shape index: {}]   ;;  %s18713_s4 = inlined_call_operand.vmem [shape: f32[25,72,72], index: 4, kind: input, shape index: {}]   ;;  %s18714_s5 = inlined_call_operand.vmem [shape: f32[25,8,64], index: 5, kind: input, shape index: {}]   ;;  %s18715_s6 = inlined_call_operand.vmem [shape: f32[1,64], index: 6, kind: input, shape index: {}]   ;;  %s18716_s7 = inlined_call_operand.vmem [shape: f32[9,2,72], index: 7, kind: input, shape index: {}]   ;;  %s18717_s8 = inlined_call_operand.vmem [shape: f32[9,64,128], index: 8, kind: input, shape index: {}]   ;;  %s18718_s9 = inlined_call_operand.vmem [shape: f32[1,128], index: 9, kind: input, shape index: {}]   ;;  %s18719_s10 = inlined_call_operand.vmem [shape: f32[128,128], index: 10, kind: input, shape index: {}]   ;;  %s18720_s11 = inlined_call_operand.vmem [shape: f32[1,128], index: 11, kind: input, shape index: {}]   ;;  %s18721_s12 = inlined_call_operand.vmem [shape: f32[128,64], index: 12, kind: input, shape index: {}]   ;;  %s18722_s13 = inlined_call_operand.vmem [shape: f32[1,64], index: 13, kind: input, shape index: {}]   ;;  %s18723_s14 = inlined_call_operand.vmem [shape: f32[64,10], index: 14, kind: input, shape index: {}]   ;;  %s18724_s15 = inlined_call_operand.vmem [shape: f32[1,10], index: 15, kind: input, shape index: {}]   ;;  %s18725_s16 = inlined_call_operand.hbm [shape: f32[2,10], index: 16, kind: output, shape index: {}]  }
   0x1   :  { %18727 = sst [smem:[#allocation5_spill]] %s18709_s0 }
   0x2   :  { %v90_v0 = vld [vmem:[%s18710_s1] sm:$0xff]  ;;  %v91_v1 = vld [vmem:[%s18710_s1 + $0x8] sm:$0xff]  ;;  %v92_v2 = vld [vmem:[%s18710_s1 + $0x10] sm:$0xff]  ;;  %vm210_vm0 = vcmask 1040384   ;;  %vm101_vm1 = vcmask 203776   ;;  %s18728_s0 = sld [smem:[#allocation5_spill]] }
   0x3   :  { %v14127_v3 = vpack.c.bf16 %v91_v1, %v90_v0  ;;  %v93_v4 = vld [vmem:[%s18710_s1 + $0x18] sm:$0x1]  ;;  %vm14782_vm2 = vmmov 1  }
   0x4   :  { %v14131_v6 = vpack.c.bf16 %v93_v4, %v92_v2  ;;  %vm14132_vm3 = vmpackc.low %vm210_vm0, %vm14782_vm2 }
   0x5   :  { %14128 = vmatprep.subr.bf16.mxu0 %v14127_v3 }
   0x6   :  { %14130 = vmatpush3.bf16.msra.mxu0 %v14127_v3 }
   0x7   :  { %14133 = vmatprep.subr.msk.bf16.mxu0 %vm14132_vm3, %v14131_v6 }
   0x8   :  { %v54_v5 = vld [vmem:[%s18728_s0] sm:$0xff]  ;;  %v55_v7 = vld [vmem:[%s18728_s0 + $0x8] sm:$0xff]  ;;  %v56_v8 = vld [vmem:[%s18728_s0 + $0x10] sm:$0xff] }
   0x9   :  { %11739 = vmatprep.mubr.msk.f32.mxu0 %vm101_vm1, %v54_v5  ;;  %v57_v9 = vld [vmem:[%s18728_s0 + $0x18] sm:$0xff]  ;;  %v58_v10 = vld [vmem:[%s18728_s0 + $0x20] sm:$0xff] }
   0xa   :  { %14136 = vmatpush3.bf16.msk.msra.mxu0 %vm14132_vm3, %v14131_v6 }
   0xd   :  { %11740 = vmatmul.mubr.msk.f32.vlgmr.msra.gmra.mrb[0].mxu0 %vm101_vm1, %v55_v7 }
   0xe   :  { %11742 = vmatprep.mubr.msk.f32.mxu0 %vm101_vm1, %v56_v8 }
   0xf   :  { %21 = vsyncpa [#allocation3], 0  ;;  %v59_v11 = vld [vmem:[%s18728_s0 + $0x28] sm:$0xff]  ;;  %v60_v12 = vld [vmem:[%s18728_s0 + $0x30] sm:$0xff]  ;;  %v14783_v43 = vmov 0.0|0.0   ;;  %vm14784_vm4 = vmmov 0  }
  0x10   :  { %v61_v13 = vld [vmem:[%s18728_s0 + $0x38] sm:$0xff]  ;;  %v62_v14 = vld [vmem:[%s18728_s0 + $0x40] sm:$0xff]  ;;  %v63_v15 = vld [vmem:[%s18728_s0 + $0x48] sm:$0xff]  ;;  %14175 = vmatprep.subr.bf16.mxu0 %v14783_v43  ;;  %v14785_v44 = vmov 0.0   ;;  %vm522_vm5 = vcmask 261120   ;;  %vm779_vm6 = vcmask 588800  }
  0x11   :  { %11743 = vmatmul.mubr.msk.f32.gmra.mrb[2].mxu0 %vm101_vm1, %v57_v9  ;;  %v64_v16 = vld [vmem:[%s18728_s0 + $0x50] sm:$0xff]  ;;  %v65_v17 = vld [vmem:[%s18728_s0 + $0x58] sm:$0xff]  ;;  %v66_v18 = vld [vmem:[%s18728_s0 + $0x60] sm:$0xff]  ;;  %vm1067_vm7 = vcmask 64512   ;;  %vm8318_vm8 = vcmask 523264   ;;  %vm9856_vm9 = vcmask 74752  }
  0x12   :  { %11745 = vmatprep.mubr.msk.f32.mxu0 %vm101_vm1, %v58_v10  ;;  %v67_v19 = vld [vmem:[%s18728_s0 + $0x68] sm:$0xff]  ;;  %v68_v20 = vld [vmem:[%s18728_s0 + $0x70] sm:$0xff]  ;;  %v69_v21 = vld [vmem:[%s18728_s0 + $0x78] sm:$0xff] }
  0x13   :  { %v70_v22 = vld [vmem:[%s18728_s0 + $0x80] sm:$0xff]  ;;  %v71_v23 = vld [vmem:[%s18728_s0 + $0x88] sm:$0xff]  ;;  %v72_v24 = vld [vmem:[%s18728_s0 + $0x90] sm:$0xff] }
  0x14   :  { %v73_v25 = vld [vmem:[%s18728_s0 + $0x98] sm:$0xff]  ;;  %v74_v26 = vld [vmem:[%s18728_s0 + $0xa0] sm:$0xff]  ;;  %v75_v27 = vld [vmem:[%s18728_s0 + $0xa8] sm:$0xff] }
  0x15   :  { %11746 = vmatmul.mubr.msk.f32.gmra.mrb[4].mxu0 %vm101_vm1, %v59_v11  ;;  %v76_v28 = vld [vmem:[%s18728_s0 + $0xb0] sm:$0xff]  ;;  %v77_v29 = vld [vmem:[%s18728_s0 + $0xb8] sm:$0xff]  ;;  %v78_v30 = vld [vmem:[%s18728_s0 + $0xc0] sm:$0xff] }
  0x16   :  { %11748 = vmatprep.mubr.msk.f32.mxu0 %vm101_vm1, %v60_v12  ;;  %v79_v31 = vld [vmem:[%s18728_s0 + $0xc8] sm:$0xff]  ;;  %v80_v32 = vld [vmem:[%s18728_s0 + $0xd0] sm:$0xff]  ;;  %v81_v33 = vld [vmem:[%s18728_s0 + $0xd8] sm:$0xff] }
  0x17   :  { %v82_v34 = vld [vmem:[%s18728_s0 + $0xe0] sm:$0xff]  ;;  %v83_v35 = vld [vmem:[%s18728_s0 + $0xe8] sm:$0xff]  ;;  %v84_v36 = vld [vmem:[%s18728_s0 + $0xf0] sm:$0xff] }
  0x18   :  { %v85_v37 = vld [vmem:[%s18728_s0 + $0xf8] sm:$0xff]  ;;  %v86_v38 = vld [vmem:[%s18728_s0 + $0x100] sm:$0xff]  ;;  %v87_v39 = vld [vmem:[%s18728_s0 + $0x108] sm:$0xff] }
  0x19   :  { %11749 = vmatmul.mubr.msk.f32.gmra.mrb[6].mxu0 %vm101_vm1, %v61_v13  ;;  %v88_v40 = vld [vmem:[%s18728_s0 + $0x110] sm:$0xff]  ;;  %v89_v41 = vld [vmem:[%s18728_s0 + $0x118] sm:$0xff]  ;;  %v496_v42 = vld [vmem:[%s18712_s3 + $0x8] sm:$0xff]  ;;  %s14786_s0 = smov [#allocation2]  }
  0x1a   :  { %11751 = vmatprep.mubr.msk.f32.mxu0 %vm101_vm1, %v62_v14  ;;  %614 = vmatprep.mubr.f32.mxu1 %v496_v42  ;;  %v15037_v45 = vld [vmem:[%s18711_s2] ss:$0 sm:$0xff]  ;;  %s9864_s30 = sshll.u32 %s14786_s0, 4  ;;  %s9865_s30 = int_to_ptr.vmem [resolvable:$true] %s9864_s30 }
  0x1b   :  { %p14763_p1 = scmp.lt.s32.totalorder %s9865_s30, %s9865_s30 }
  0x1d   :  { %11752 = vmatmul.mubr.msk.f32.gmra.mrb[8].mxu0 %vm101_vm1, %v63_v15 }
  0x1e   :  { %11754 = vmatprep.mubr.msk.f32.mxu0 %vm101_vm1, %v64_v16 }
  0x21   :  { %11755 = vmatmul.mubr.msk.f32.gmra.mrb[10].mxu0 %vm101_vm1, %v65_v17 }
  0x22   :  { %11757 = vmatprep.mubr.msk.f32.mxu0 %vm101_vm1, %v66_v18 }
  0x25   :  { %11758 = vmatmul.mubr.msk.f32.gmra.mrb[12].mxu0 %vm101_vm1, %v67_v19 }
  0x26   :  { %11760 = vmatprep.mubr.msk.f32.mxu0 %vm101_vm1, %v68_v20 }
  0x29   :  { %11761 = vmatmul.mubr.msk.f32.gmra.mrb[14].mxu0 %vm101_vm1, %v69_v21 }
  0x2a   :  { %11763 = vmatprep.mubr.msk.f32.mxu0 %vm101_vm1, %v70_v22 }
  0x2d   :  { %11764 = vmatmul.mubr.msk.f32.gmra.mrb[16].mxu0 %vm101_vm1, %v71_v23 }
  0x2e   :  { %11766 = vmatprep.mubr.msk.f32.mxu0 %vm101_vm1, %v72_v24 }
  0x31   :  { %11767 = vmatmul.mubr.msk.f32.gmra.mrb[18].mxu0 %vm101_vm1, %v73_v25 }
  0x32   :  { %11769 = vmatprep.mubr.msk.f32.mxu0 %vm101_vm1, %v74_v26 }
  0x35   :  { %11770 = vmatmul.mubr.msk.f32.gmra.mrb[20].mxu0 %vm101_vm1, %v75_v27 }
  0x36   :  { %11772 = vmatprep.mubr.msk.f32.mxu0 %vm101_vm1, %v76_v28 }
  0x39   :  { %11773 = vmatmul.mubr.msk.f32.gmra.mrb[22].mxu0 %vm101_vm1, %v77_v29 }
  0x3a   :  { %11775 = vmatprep.mubr.msk.f32.mxu0 %vm101_vm1, %v78_v30 }
  0x3d   :  { %11776 = vmatmul.mubr.msk.f32.gmra.mrb[24].mxu0 %vm101_vm1, %v79_v31 }
  0x3e   :  { %11778 = vmatprep.mubr.msk.f32.mxu0 %vm101_vm1, %v80_v32 }
  0x41   :  { %11779 = vmatmul.mubr.msk.f32.gmra.mrb[26].mxu0 %vm101_vm1, %v81_v33 }
  0x42   :  { %11781 = vmatprep.mubr.msk.f32.mxu0 %vm101_vm1, %v82_v34 }
  0x45   :  { %11782 = vmatmul.mubr.msk.f32.gmra.mrb[28].mxu0 %vm101_vm1, %v83_v35 }
  0x46   :  { %11784 = vmatprep.mubr.msk.f32.mxu0 %vm101_vm1, %v84_v36 }
  0x49   :  { %11785 = vmatmul.mubr.msk.f32.gmra.mrb[30].mxu0 %vm101_vm1, %v85_v37 }
  0x4a   :  { %11787 = vmatprep.mubr.msk.f32.mxu0 %vm101_vm1, %v86_v38 }
  0x4d   :  { %11788 = vmatmul.mubr.msk.f32.gmra.mrb[32].mxu0 %vm101_vm1, %v87_v39 }
  0x4e   :  { %11790 = vmatprep.mubr.msk.f32.mxu0 %vm101_vm1, %v88_v40 }
  0x51   :  { %11791 = vmatmul.mubr.msk.f32.gmra.mrb[34].mxu0 %vm101_vm1, %v89_v41 }
  0x52   :  { %11846 = vmatprep.mubr.msk.f32.mxu0 %vm14784_vm4, %v14785_v44 }
  0xe0   :  { %v11741_v46 = vpop.f32.mrb[0].mxu0 }
  0xe1   :  { %v286_v47 = vadd.f32 %v11741_v46, %v15037_v45  ;;  %v280_v48 = vpop.f32.mrb[1].mxu0 }
  0xe2   :  { %v281_v49 = vadd.f32 %v15037_v45, %v280_v48 }
  0xe3   :  { %v460_v50 = vmax.f32 %v286_v47, 0.0 }
  0xe4   :  { %v11744_v51 = vpop.f32.mrb[2].mxu0  ;;  %v459_v52 = vmax.f32 %v281_v49, 0.0 }
  0xe5   :  { %v296_v53 = vadd.f32 %v11744_v51, %v15037_v45  ;;  %v290_v54 = vpop.f32.mrb[3].mxu0 }
  0xe6   :  { %v291_v55 = vadd.f32 %v15037_v45, %v290_v54  ;;  %v14139_v56 = vpack.c.bf16 %v460_v50, %v459_v52 }
  0xe7   :  { %v462_v57 = vmax.f32 %v296_v53, 0.0 }
  0xe8   :  { %v461_v58 = vmax.f32 %v291_v55, 0.0  ;;  %v11747_v59 = vpop.f32.mrb[4].mxu0 }
  0xe9   :  { %v306_v60 = vadd.f32 %v11747_v59, %v15037_v45  ;;  %v300_v61 = vpop.f32.mrb[5].mxu0 }
  0xea   :  { %v301_v62 = vadd.f32 %v15037_v45, %v300_v61  ;;  %v15045_v63 = vpack.c.bf16 %v462_v57, %v461_v58 }
  0xeb   :  { %v464_v0 = vmax.f32 %v306_v60, 0.0 }
  0xec   :  { %v463_v1 = vmax.f32 %v301_v62, 0.0  ;;  %v11750_v2 = vpop.f32.mrb[6].mxu0 }
  0xed   :  { %v316_v3 = vadd.f32 %v11750_v2, %v15037_v45  ;;  %v310_v4 = vpop.f32.mrb[7].mxu0 }
  0xee   :  { %v311_v5 = vadd.f32 %v15037_v45, %v310_v4  ;;  %v15049_v6 = vpack.c.bf16 %v464_v0, %v463_v1 }
  0xef   :  { %v466_v7 = vmax.f32 %v316_v3, 0.0 }
  0xf0   :  { %v465_v8 = vmax.f32 %v311_v5, 0.0  ;;  %v11753_v9 = vpop.f32.mrb[8].mxu0 }
  0xf1   :  { %v326_v10 = vadd.f32 %v11753_v9, %v15037_v45  ;;  %v320_v11 = vpop.f32.mrb[9].mxu0 }
  0xf2   :  { %v321_v12 = vadd.f32 %v15037_v45, %v320_v11  ;;  %v15053_v13 = vpack.c.bf16 %v466_v7, %v465_v8 }
  0xf3   :  { %v468_v14 = vmax.f32 %v326_v10, 0.0 }
  0xf4   :  { %v467_v15 = vmax.f32 %v321_v12, 0.0  ;;  %v11756_v16 = vpop.f32.mrb[10].mxu0 }
  0xf5   :  { %v336_v17 = vadd.f32 %v11756_v16, %v15037_v45  ;;  %v330_v18 = vpop.f32.mrb[11].mxu0 }
  0xf6   :  { %v331_v19 = vadd.f32 %v15037_v45, %v330_v18  ;;  %v15057_v20 = vpack.c.bf16 %v468_v14, %v467_v15 }
  0xf7   :  { %v470_v21 = vmax.f32 %v336_v17, 0.0 }
  0xf8   :  { %v469_v22 = vmax.f32 %v331_v19, 0.0  ;;  %v11759_v23 = vpop.f32.mrb[12].mxu0 }
  0xf9   :  { %v346_v24 = vadd.f32 %v11759_v23, %v15037_v45  ;;  %v340_v25 = vpop.f32.mrb[13].mxu0 }
  0xfa   :  { %v341_v26 = vadd.f32 %v15037_v45, %v340_v25  ;;  %v15061_v27 = vpack.c.bf16 %v470_v21, %v469_v22 }
  0xfb   :  { %v472_v28 = vmax.f32 %v346_v24, 0.0 }
  0xfc   :  { %v471_v29 = vmax.f32 %v341_v26, 0.0  ;;  %v11762_v30 = vpop.f32.mrb[14].mxu0 }
  0xfd   :  { %v356_v31 = vadd.f32 %v11762_v30, %v15037_v45  ;;  %v350_v32 = vpop.f32.mrb[15].mxu0 }
  0xfe   :  { %v351_v33 = vadd.f32 %v15037_v45, %v350_v32  ;;  %v15065_v34 = vpack.c.bf16 %v472_v28, %v471_v29 }
  0xff   :  { %v474_v35 = vmax.f32 %v356_v31, 0.0 }
 0x100   :  { %v473_v36 = vmax.f32 %v351_v33, 0.0  ;;  %v11765_v37 = vpop.f32.mrb[16].mxu0 }
 0x101   :  { %v360_v38 = vpop.f32.mrb[17].mxu0  ;;  %v366_v39 = vadd.f32 %v11765_v37, %v15037_v45 }
 0x102   :  { %v361_v40 = vadd.f32 %v15037_v45, %v360_v38  ;;  %v15069_v41 = vpack.c.bf16 %v474_v35, %v473_v36 }
 0x103   :  { %v476_v42 = vmax.f32 %v366_v39, 0.0 }
 0x104   :  { %v11768_v46 = vpop.f32.mrb[18].mxu0  ;;  %v475_v47 = vmax.f32 %v361_v40, 0.0 }
 0x105   :  { %v376_v48 = vadd.f32 %v11768_v46, %v15037_v45  ;;  %v370_v49 = vpop.f32.mrb[19].mxu0 }
 0x106   :  { %v371_v50 = vadd.f32 %v15037_v45, %v370_v49  ;;  %v14137_v51 = vpack.c.bf16 %v476_v42, %v475_v47 }
 0x107   :  { %v478_v52 = vmax.f32 %v376_v48, 0.0  ;;  %v499_v48 = vld [vmem:[%s18712_s3 + $0x20] sm:$0xff] }
 0x108   :  { %v477_v53 = vmax.f32 %v371_v50, 0.0  ;;  %v11771_v54 = vpop.f32.mrb[20].mxu0  ;;  %14138 = vmatprep.subr.bf16.mxu1 %v14137_v51 }
 0x109   :  { %v386_v55 = vadd.f32 %v11771_v54, %v15037_v45  ;;  %v380_v57 = vpop.f32.mrb[21].mxu0  ;;  %14140 = vmatpush3.bf16.msra.mxu1 %v14139_v56  ;;  %v505_v54 = vld [vmem:[%s18712_s3 + $0x50] sm:$0xff] }
 0x10a   :  { %v381_v58 = vadd.f32 %v15037_v45, %v380_v57  ;;  %v14141_v59 = vpack.c.bf16 %v478_v52, %v477_v53  ;;  %v502_v52 = vld [vmem:[%s18712_s3 + $0x38] sm:$0xff]  ;;  %v508_v57 = vld [vmem:[%s18712_s3 + $0x68] sm:$0xff] }
 0x10b   :  { %v480_v60 = vmax.f32 %v386_v55, 0.0  ;;  %v504_v55 = vld [vmem:[%s18712_s3 + $0x48] sm:$0xff] }
 0x10c   :  { %v479_v61 = vmax.f32 %v381_v58, 0.0  ;;  %v11774_v62 = vpop.f32.mrb[22].mxu0  ;;  %14142 = vmatprep.subr.bf16.mxu1 %v14141_v59  ;;  %v507_v58 = vld [vmem:[%s18712_s3 + $0x60] sm:$0xff] }
 0x10d   :  { %v396_v0 = vadd.f32 %v11774_v62, %v15037_v45  ;;  %v390_v1 = vpop.f32.mrb[23].mxu0  ;;  %14144 = vmatpush3.bf16.msra.mxu1 %v15045_v63  ;;  %v511_v59 = vld [vmem:[%s18712_s3 + $0x80] sm:$0xff]  ;;  %v513_v62 = vld [vmem:[%s18712_s3 + $0x90] sm:$0xff] }
 0x10e   :  { %v391_v2 = vadd.f32 %v15037_v45, %v390_v1  ;;  %v14145_v3 = vpack.c.bf16 %v480_v60, %v479_v61  ;;  %v510_v60 = vld [vmem:[%s18712_s3 + $0x78] sm:$0xff]  ;;  %v516_v1 = vld [vmem:[%s18712_s3 + $0xa8] sm:$0xff] }
 0x10f   :  { %v482_v4 = vmax.f32 %v396_v0, 0.0  ;;  %v514_v61 = vld [vmem:[%s18712_s3 + $0x98] sm:$0xff]  ;;  %v517_v0 = vld [vmem:[%s18712_s3 + $0xb0] sm:$0xff] }
 0x110   :  { %v481_v5 = vmax.f32 %v391_v2, 0.0  ;;  %v11777_v7 = vpop.f32.mrb[24].mxu0  ;;  %14146 = vmatprep.subr.bf16.mxu1 %v14145_v3  ;;  %v520_v2 = vld [vmem:[%s18712_s3 + $0xc8] sm:$0xff]  ;;  %v519_v3 = vld [vmem:[%s18712_s3 + $0xc0] sm:$0xff] }
 0x111   :  { %v406_v56 = vadd.f32 %v11777_v7, %v15037_v45  ;;  %v400_v8 = vpop.f32.mrb[25].mxu0  ;;  %14148 = vmatpush3.bf16.msra.mxu1 %v15049_v6  ;;  %v503_v7 = vld [vmem:[%s18712_s3 + $0x40] sm:$0xff] }
 0x112   :  { %v401_v9 = vadd.f32 %v15037_v45, %v400_v8  ;;  %v14149_v10 = vpack.c.bf16 %v482_v4, %v481_v5  ;;  %v497_v4 = vld [vmem:[%s18712_s3 + $0x10] sm:$0xff]  ;;  %v500_v5 = vld [vmem:[%s18712_s3 + $0x28] sm:$0xff] }
 0x113   :  { %v484_v11 = vmax.f32 %v406_v56, 0.0  ;;  %v506_v56 = vld [vmem:[%s18712_s3 + $0x58] sm:$0xff]  ;;  %v509_v8 = vld [vmem:[%s18712_s3 + $0x70] sm:$0xff] }
 0x114   :  { %v483_v12 = vmax.f32 %v401_v9, 0.0  ;;  %v11780_v14 = vpop.f32.mrb[26].mxu0  ;;  %14150 = vmatprep.subr.bf16.mxu1 %v14149_v10  ;;  %v512_v9 = vld [vmem:[%s18712_s3 + $0x88] sm:$0xff]  ;;  %v515_v10 = vld [vmem:[%s18712_s3 + $0xa0] sm:$0xff] }
 0x115   :  { %v416_v63 = vadd.f32 %v11780_v14, %v15037_v45  ;;  %v410_v15 = vpop.f32.mrb[27].mxu0  ;;  %14152 = vmatpush3.bf16.msra.mxu1 %v15053_v13 }
 0x116   :  { %v411_v16 = vadd.f32 %v15037_v45, %v410_v15  ;;  %v14153_v17 = vpack.c.bf16 %v484_v11, %v483_v12  ;;  %v518_v11 = vld [vmem:[%s18712_s3 + $0xb8] sm:$0xff]  ;;  %v521_v12 = vld [vmem:[%s18712_s3 + $0xd0] sm:$0xff] }
 0x117   :  { %v486_v18 = vmax.f32 %v416_v63, 0.0 }
 0x118   :  { %v485_v19 = vmax.f32 %v411_v16, 0.0  ;;  %v11783_v21 = vpop.f32.mrb[28].mxu0  ;;  %14154 = vmatprep.subr.bf16.mxu1 %v14153_v17 }
 0x119   :  { %v426_v6 = vadd.f32 %v11783_v21, %v15037_v45  ;;  %v420_v22 = vpop.f32.mrb[29].mxu0  ;;  %14156 = vmatpush3.bf16.msra.mxu1 %v15057_v20 }
 0x11a   :  { %v421_v23 = vadd.f32 %v15037_v45, %v420_v22  ;;  %v14157_v24 = vpack.c.bf16 %v486_v18, %v485_v19 }
 0x11b   :  { %v488_v25 = vmax.f32 %v426_v6, 0.0 }
 0x11c   :  { %v487_v26 = vmax.f32 %v421_v23, 0.0  ;;  %v11786_v28 = vpop.f32.mrb[30].mxu0  ;;  %14158 = vmatprep.subr.bf16.mxu1 %v14157_v24 }
 0x11d   :  { %v436_v13 = vadd.f32 %v11786_v28, %v15037_v45  ;;  %v430_v29 = vpop.f32.mrb[31].mxu0  ;;  %14160 = vmatpush3.bf16.msra.mxu1 %v15061_v27  ;;  %v495_v27 = vld [vmem:[%s18712_s3] sm:$0xff] }
 0x11e   :  { %v431_v30 = vadd.f32 %v15037_v45, %v430_v29  ;;  %v14161_v31 = vpack.c.bf16 %v488_v25, %v487_v26 }
 0x11f   :  { %v490_v32 = vmax.f32 %v436_v13, 0.0 }
 0x120   :  { %v489_v33 = vmax.f32 %v431_v30, 0.0  ;;  %14162 = vmatprep.subr.bf16.mxu1 %v14161_v31  ;;  %v11789_v35 = vpop.f32.mrb[32].mxu0 }
 0x121   :  { %14164 = vmatpush3.bf16.msra.mxu1 %v15065_v34  ;;  %v446_v20 = vadd.f32 %v11789_v35, %v15037_v45  ;;  %v440_v36 = vpop.f32.mrb[33].mxu0 }
 0x122   :  { %v14165_v37 = vpack.c.bf16 %v490_v32, %v489_v33  ;;  %v441_v38 = vadd.f32 %v15037_v45, %v440_v36 }
 0x123   :  { %v492_v39 = vmax.f32 %v446_v20, 0.0 }
 0x124   :  { %14166 = vmatprep.subr.bf16.mxu1 %v14165_v37  ;;  %v491_v40 = vmax.f32 %v441_v38, 0.0  ;;  %v11792_v42 = vpop.f32.mrb[34].mxu0 }
 0x125   :  { %14168 = vmatpush3.bf16.msra.mxu1 %v15069_v41  ;;  %v456_v46 = vadd.f32 %v11792_v42, %v15037_v45  ;;  %v450_v47 = vpop.f32.mrb[35].mxu0  ;;  %v498_v41 = vld [vmem:[%s18712_s3 + $0x18] sm:$0xff] }
 0x126   :  { %v14170_v34 = vpack.c.bf16 %v492_v39, %v491_v40  ;;  %14169 = vmatprep.subr.bf16.mxu1 %v14783_v43  ;;  %v451_v49 = vadd.f32 %v15037_v45, %v450_v47  ;;  %v501_v45 = vld [vmem:[%s18712_s3 + $0x30] sm:$0xff] }
 0x127   :  { %v494_v50 = vmax.f32 %v456_v46, 0.0 }
 0x128   :  { %615 = vmatmul.mubr.f32.vlgmr.msra.gmra.mrb[0].mxu1 %v495_v27  ;;  %v493_v51 = vmax.f32 %v451_v49, 0.0 }
 0x129   :  { %619 = vmatprep.mubr.f32.mxu1 %v499_v48  ;;  %14171 = vmatpush3.bf16.msra.mxu1 %v14170_v34 }
 0x12a   :  { %v14173_v53 = vpack.c.bf16 %v494_v50, %v493_v51  ;;  %14172 = vmatprep.subr.bf16.mxu1 %v14783_v43 }
 0x12c   :  { %620 = vmatmul.mubr.f32.gmra.mrb[2].mxu1 %v498_v41 }
 0x12d   :  { %624 = vmatprep.mubr.f32.mxu1 %v502_v52  ;;  %14174 = vmatpush3.bf16.msra.mxu1 %v14173_v53 }
 0x12e   :  { %14187 = vmatprep.subr.bf16.mxu1 %v14783_v43 }
 0x130   :  { %625 = vmatmul.mubr.f32.gmra.mrb[4].mxu1 %v501_v45 }
 0x131   :  { %629 = vmatprep.mubr.f32.mxu1 %v505_v54 }
 0x134   :  { %630 = vmatmul.mubr.f32.gmra.mrb[6].mxu1 %v504_v55 }
 0x135   :  { %634 = vmatprep.mubr.f32.mxu1 %v508_v57 }
 0x138   :  { %635 = vmatmul.mubr.f32.gmra.mrb[8].mxu1 %v507_v58 }
 0x139   :  { %639 = vmatprep.mubr.f32.mxu1 %v511_v59 }
 0x13c   :  { %640 = vmatmul.mubr.f32.gmra.mrb[10].mxu1 %v510_v60 }
 0x13d   :  { %644 = vmatprep.mubr.f32.mxu1 %v514_v61 }
 0x140   :  { %645 = vmatmul.mubr.f32.gmra.mrb[12].mxu1 %v513_v62 }
 0x141   :  { %649 = vmatprep.mubr.f32.mxu1 %v517_v0 }
 0x144   :  { %650 = vmatmul.mubr.f32.gmra.mrb[14].mxu1 %v516_v1 }
 0x145   :  { %654 = vmatprep.mubr.f32.mxu1 %v520_v2 }
 0x148   :  { %655 = vmatmul.mubr.f32.gmra.mrb[16].mxu1 %v519_v3 }
 0x149   :  { %11801 = vmatprep.mubr.msk.f32.mxu1 %vm14784_vm4, %v14785_v44 }
 0x14c   :  { %11802 = vmatmul.mubr.msk.f32.vlgmr.msra.gmra.mrb[18].mxu1 %vm522_vm5, %v497_v4 }
 0x14d   :  { %11804 = vmatprep.mubr.msk.f32.mxu1 %vm14784_vm4, %v14785_v44 }
 0x150   :  { %11805 = vmatmul.mubr.msk.f32.gmra.mrb[20].mxu1 %vm522_vm5, %v500_v5 }
 0x151   :  { %11807 = vmatprep.mubr.msk.f32.mxu1 %vm14784_vm4, %v14785_v44 }
 0x154   :  { %11808 = vmatmul.mubr.msk.f32.gmra.mrb[22].mxu1 %vm522_vm5, %v503_v7 }
 0x155   :  { %11810 = vmatprep.mubr.msk.f32.mxu1 %vm14784_vm4, %v14785_v44 }
 0x158   :  { %11811 = vmatmul.mubr.msk.f32.gmra.mrb[24].mxu1 %vm522_vm5, %v506_v56 }
 0x159   :  { %11813 = vmatprep.mubr.msk.f32.mxu1 %vm14784_vm4, %v14785_v44 }
 0x15c   :  { %11814 = vmatmul.mubr.msk.f32.gmra.mrb[26].mxu1 %vm522_vm5, %v509_v8 }
 0x15d   :  { %11816 = vmatprep.mubr.msk.f32.mxu1 %vm14784_vm4, %v14785_v44 }
 0x160   :  { %11817 = vmatmul.mubr.msk.f32.gmra.mrb[28].mxu1 %vm522_vm5, %v512_v9  ;;  %v9928_v9 = vld [vmem:[%s18713_s4 + $0x48] sm:$0xff] }
 0x161   :  { %11819 = vmatprep.mubr.msk.f32.mxu1 %vm14784_vm4, %v14785_v44 }
 0x164   :  { %11820 = vmatmul.mubr.msk.f32.gmra.mrb[30].mxu1 %vm522_vm5, %v515_v10  ;;  %v770_v10 = vld [vmem:[%s18713_s4] sm:$0xff] }
 0x165   :  { %11822 = vmatprep.mubr.msk.f32.mxu1 %vm14784_vm4, %v14785_v44 }
 0x168   :  { %11823 = vmatmul.mubr.msk.f32.gmra.mrb[32].mxu1 %vm522_vm5, %v518_v11  ;;  %v9946_v11 = vld [vmem:[%s18714_s5 + $0x8] sm:$0xff] }
 0x169   :  { %11825 = vmatprep.mubr.msk.f32.mxu1 %vm14784_vm4, %v14785_v44 }
 0x16c   :  { %11826 = vmatmul.mubr.msk.f32.gmra.mrb[34].mxu1 %vm522_vm5, %v521_v12  ;;  %v9929_v12 = vld [vmem:[%s18713_s4 + $0x50] sm:$0xff] }
 0x16d   :  { %11891 = vmatprep.mubr.msk.f32.mxu1 %vm14784_vm4, %v14785_v44 }
 0x1fb   :  { %v10777_v14 = vpop.f32.mrb[0].mxu1 }
 0x1fc   :  { %v10778_v63 = vpop.f32.mrb[1].mxu1 }
 0x1fd   :  { %v10779_v15 = vadd.f32 %v10778_v63, %v10777_v14  ;;  %v771_v14 = vld [vmem:[%s18713_s4 + $0x8] sm:$0xff]  ;;  %v9930_v63 = vld [vmem:[%s18713_s4 + $0x58] sm:$0xff] }
 0x1ff   :  { %v10780_v16 = vpop.f32.mrb[2].mxu1 }
 0x200   :  { %v10781_v17 = vpop.f32.mrb[3].mxu1 }
 0x201   :  { %v10782_v18 = vadd.f32 %v10781_v17, %v10780_v16  ;;  %v9931_v16 = vld [vmem:[%s18713_s4 + $0x60] sm:$0xff]  ;;  %v773_v17 = vld [vmem:[%s18713_s4 + $0x18] sm:$0xff] }
 0x203   :  { %v10783_v19 = vpop.f32.mrb[4].mxu1 }
 0x204   :  { %v10784_v21 = vpop.f32.mrb[5].mxu1 }
 0x205   :  { %v10785_v6 = vadd.f32 %v10784_v21, %v10783_v19  ;;  %v774_v19 = vld [vmem:[%s18713_s4 + $0x20] sm:$0xff]  ;;  %v9933_v21 = vld [vmem:[%s18713_s4 + $0x70] sm:$0xff] }
 0x207   :  { %v10786_v22 = vpop.f32.mrb[6].mxu1 }
 0x208   :  { %v10787_v23 = vpop.f32.mrb[7].mxu1 }
 0x209   :  { %v10788_v24 = vadd.f32 %v10787_v23, %v10786_v22  ;;  %v9934_v22 = vld [vmem:[%s18713_s4 + $0x78] sm:$0xff]  ;;  %v776_v23 = vld [vmem:[%s18713_s4 + $0x30] sm:$0xff] }
 0x20b   :  { %v10789_v25 = vpop.f32.mrb[8].mxu1 }
 0x20c   :  { %v10790_v26 = vpop.f32.mrb[9].mxu1 }
 0x20d   :  { %v10791_v28 = vadd.f32 %v10790_v26, %v10789_v25  ;;  %v777_v25 = vld [vmem:[%s18713_s4 + $0x38] sm:$0xff]  ;;  %v9936_v26 = vld [vmem:[%s18713_s4 + $0x88] sm:$0xff] }
 0x20f   :  { %v10792_v13 = vpop.f32.mrb[10].mxu1 }
 0x210   :  { %v10793_v29 = vpop.f32.mrb[11].mxu1 }
 0x211   :  { %v10794_v30 = vadd.f32 %v10793_v29, %v10792_v13 }
 0x213   :  { %v10795_v31 = vpop.f32.mrb[12].mxu1 }
 0x214   :  { %v10796_v32 = vpop.f32.mrb[13].mxu1 }
 0x215   :  { %v10797_v33 = vadd.f32 %v10796_v32, %v10795_v31 }
 0x217   :  { %v10798_v35 = vpop.f32.mrb[14].mxu1 }
 0x218   :  { %v10799_v20 = vpop.f32.mrb[15].mxu1 }
 0x219   :  { %v10800_v36 = vadd.f32 %v10799_v20, %v10798_v35 }
 0x21b   :  { %v10801_v37 = vpop.f32.mrb[16].mxu1 }
 0x21c   :  { %v10802_v38 = vpop.f32.mrb[17].mxu1 }
 0x21d   :  { %v10803_v39 = vadd.f32 %v10802_v38, %v10801_v37 }
 0x21f   :  { %v726_v40 = vpop.f32.mrb[18].mxu1 }
 0x220   :  { %v727_v42 = vadd.f32 %v10779_v15, %v726_v40  ;;  %v11803_v27 = vpop.f32.mrb[19].mxu1  ;;  %v772_v15 = vld [vmem:[%s18713_s4 + $0x10] sm:$0xff] }
 0x223   :  { %v731_v46 = vpop.f32.mrb[20].mxu1 }
 0x224   :  { %v732_v47 = vadd.f32 %v10782_v18, %v731_v46  ;;  %v11806_v34 = vpop.f32.mrb[21].mxu1  ;;  %v9932_v18 = vld [vmem:[%s18713_s4 + $0x68] sm:$0xff] }
 0x226   :  { %v15206_v48 = vpack.c.bf16 %v732_v47, %v727_v42 }
 0x227   :  { %v736_v49 = vpop.f32.mrb[22].mxu1 }
 0x228   :  { %v737_v50 = vadd.f32 %v10785_v6, %v736_v49  ;;  %v11809_v51 = vpop.f32.mrb[23].mxu1  ;;  %14177 = vmatpush3.bf16.msra.mxu0 %v15206_v48  ;;  %14189 = vmatpush3.bf16.msra.mxu1 %v15206_v48  ;;  %v775_v6 = vld [vmem:[%s18713_s4 + $0x28] sm:$0xff] }
 0x229   :  { %14178 = vmatprep.subr.bf16.mxu0 %v14783_v43  ;;  %14190 = vmatprep.subr.bf16.mxu1 %v14783_v43 }
 0x22b   :  { %v741_v41 = vpop.f32.mrb[24].mxu1 }
 0x22c   :  { %v742_v52 = vadd.f32 %v10788_v24, %v741_v41  ;;  %v11812_v53 = vpop.f32.mrb[25].mxu1  ;;  %v9935_v24 = vld [vmem:[%s18713_s4 + $0x80] sm:$0xff] }
 0x22e   :  { %v15212_v45 = vpack.c.bf16 %v742_v52, %v737_v50 }
 0x22f   :  { %v746_v54 = vpop.f32.mrb[26].mxu1 }
 0x230   :  { %v747_v55 = vadd.f32 %v10791_v28, %v746_v54  ;;  %v11815_v57 = vpop.f32.mrb[27].mxu1  ;;  %14180 = vmatpush3.bf16.msra.mxu0 %v15212_v45  ;;  %14192 = vmatpush3.bf16.msra.mxu1 %v15212_v45  ;;  %v778_v28 = vld [vmem:[%s18713_s4 + $0x40] sm:$0xff] }
 0x231   :  { %14181 = vmatprep.subr.bf16.mxu0 %v14783_v43  ;;  %14193 = vmatprep.subr.bf16.mxu1 %v14783_v43 }
 0x233   :  { %v751_v58 = vpop.f32.mrb[28].mxu1 }
 0x234   :  { %v752_v59 = vadd.f32 %v10794_v30, %v751_v58  ;;  %v11818_v60 = vpop.f32.mrb[29].mxu1 }
 0x236   :  { %v15218_v61 = vpack.c.bf16 %v752_v59, %v747_v55  ;;  %v9965_v59 = vld [vmem:[%s18713_s4 + $0x90] sm:$0xff] }
 0x237   :  { %v756_v62 = vpop.f32.mrb[30].mxu1 }
 0x238   :  { %v757_v0 = vadd.f32 %v10797_v33, %v756_v62  ;;  %v11821_v1 = vpop.f32.mrb[31].mxu1  ;;  %14183 = vmatpush3.bf16.msra.mxu0 %v15218_v61  ;;  %14195 = vmatpush3.bf16.msra.mxu1 %v15218_v61 }
 0x239   :  { %14184 = vmatprep.subr.bf16.mxu0 %v14783_v43  ;;  %14196 = vmatprep.subr.bf16.mxu1 %v14783_v43  ;;  %v9966_v1 = vld [vmem:[%s18713_s4 + $0x98] sm:$0xff] }
 0x23b   :  { %v761_v2 = vpop.f32.mrb[32].mxu1 }
 0x23c   :  { %v762_v3 = vadd.f32 %v10800_v36, %v761_v2  ;;  %v11824_v4 = vpop.f32.mrb[33].mxu1 }
 0x23d   :  { %v9967_v4 = vld [vmem:[%s18713_s4 + $0xa0] sm:$0xff] }
 0x23e   :  { %v15224_v5 = vpack.c.bf16 %v762_v3, %v757_v0  ;;  %v917_v0 = vld [vmem:[%s18714_s5] sm:$0xff] }
 0x23f   :  { %v766_v7 = vpop.f32.mrb[34].mxu1 }
 0x240   :  { %v15226_v56 = vadd.f32 %v10803_v39, %v766_v7  ;;  %14186 = vmatpush3.bf16.msra.mxu0 %v15224_v5  ;;  %14198 = vmatpush3.bf16.msra.mxu1 %v15224_v5  ;;  %v11827_v8 = vpop.f32.mrb[35].mxu1  ;;  %v9968_v7 = vld [vmem:[%s18713_s4 + $0xa8] sm:$0xff] }
 0x241   :  { %11844 = vmatprep.subr.mxu0 %v14785_v44  ;;  %11889 = vmatprep.subr.mxu1 %v14785_v44  ;;  %v9969_v8 = vld [vmem:[%s18713_s4 + $0xb0] sm:$0xff] }
 0x244   :  { %11845 = vmatpush3.msra.mxu0 %v15226_v56  ;;  %11890 = vmatpush3.msra.mxu1 %v15226_v56 }
 0x245   :  { %11892 = vmatmul.mubr.msk.f32.vlgmr.msra.gmra.mrb[36].mxu1 %vm779_vm6, %v9928_v9  ;;  %11847 = vmatmul.mubr.msk.f32.vlgmr.msra.gmra.mrb[36].mxu0 %vm779_vm6, %v770_v10  ;;  %v9970_v9 = vld [vmem:[%s18713_s4 + $0xb8] sm:$0xff]  ;;  %v9971_v10 = vld [vmem:[%s18713_s4 + $0xc0] sm:$0xff] }
 0x246   :  { %11894 = vmatprep.mubr.msk.f32.mxu1 %vm14784_vm4, %v14785_v44  ;;  %11849 = vmatprep.mubr.msk.f32.mxu0 %vm14784_vm4, %v14785_v44 }
 0x247   :  { %11918 = vmatprep.subr.mxu0 %v14785_v44  ;;  %14751 = vmatprep.subr.mxu1 %v14785_v44 }
 0x248   :  { %11919 = vmatpush3.msra.mxu0 %v9946_v11  ;;  %14752 = vmatpush3.msra.mxu1 %v9946_v11  ;;  %v9972_v11 = vld [vmem:[%s18713_s4 + $0xc8] sm:$0xff] }
 0x249   :  { %11895 = vmatmul.mubr.msk.f32.gmra.mrb[38].mxu1 %vm779_vm6, %v9929_v12  ;;  %11850 = vmatmul.mubr.msk.f32.gmra.mrb[38].mxu0 %vm779_vm6, %v771_v14  ;;  %v9973_v12 = vld [vmem:[%s18713_s4 + $0xd0] sm:$0xff]  ;;  %v9993_v14 = vld [vmem:[%s18713_s4 + $0xd8] sm:$0xff] }
 0x24a   :  { %11897 = vmatprep.mubr.msk.f32.mxu1 %vm14784_vm4, %v14785_v44  ;;  %11852 = vmatprep.mubr.msk.f32.mxu0 %vm14784_vm4, %v14785_v44 }
 0x24b   :  { %14199 = vmatprep.subr.bf16.mxu0 %v14783_v43  ;;  %11947 = vmatprep.subr.mxu1 %v14785_v44 }
 0x24d   :  { %11898 = vmatmul.mubr.msk.f32.gmra.mrb[40].mxu1 %vm779_vm6, %v9930_v63  ;;  %11853 = vmatmul.mubr.msk.f32.gmra.mrb[40].mxu0 %vm779_vm6, %v772_v15  ;;  %v9994_v63 = vld [vmem:[%s18713_s4 + $0xe0] sm:$0xff] }
 0x24e   :  { %11900 = vmatprep.mubr.msk.f32.mxu1 %vm14784_vm4, %v14785_v44  ;;  %11855 = vmatprep.mubr.msk.f32.mxu0 %vm14784_vm4, %v14785_v44 }
 0x251   :  { %11901 = vmatmul.mubr.msk.f32.gmra.mrb[42].mxu1 %vm779_vm6, %v9931_v16  ;;  %11856 = vmatmul.mubr.msk.f32.gmra.mrb[42].mxu0 %vm779_vm6, %v773_v17  ;;  %v9995_v17 = vld [vmem:[%s18713_s4 + $0xe8] sm:$0xff] }
 0x252   :  { %11903 = vmatprep.mubr.msk.f32.mxu1 %vm14784_vm4, %v14785_v44  ;;  %11858 = vmatprep.mubr.msk.f32.mxu0 %vm14784_vm4, %v14785_v44 }
 0x255   :  { %11904 = vmatmul.mubr.msk.f32.gmra.mrb[44].mxu1 %vm779_vm6, %v9932_v18  ;;  %11859 = vmatmul.mubr.msk.f32.gmra.mrb[44].mxu0 %vm779_vm6, %v774_v19 }
 0x256   :  { %11906 = vmatprep.mubr.msk.f32.mxu1 %vm14784_vm4, %v14785_v44  ;;  %11861 = vmatprep.mubr.msk.f32.mxu0 %vm14784_vm4, %v14785_v44 }
 0x259   :  { %11907 = vmatmul.mubr.msk.f32.gmra.mrb[46].mxu1 %vm779_vm6, %v9933_v21  ;;  %11862 = vmatmul.mubr.msk.f32.gmra.mrb[46].mxu0 %vm779_vm6, %v775_v6  ;;  %v9996_v21 = vld [vmem:[%s18713_s4 + $0xf0] sm:$0xff]  ;;  %v9997_v6 = vld [vmem:[%s18713_s4 + $0xf8] sm:$0xff] }
 0x25a   :  { %11909 = vmatprep.mubr.msk.f32.mxu1 %vm14784_vm4, %v14785_v44  ;;  %11864 = vmatprep.mubr.msk.f32.mxu0 %vm14784_vm4, %v14785_v44 }
 0x25d   :  { %11910 = vmatmul.mubr.msk.f32.gmra.mrb[48].mxu1 %vm779_vm6, %v9934_v22  ;;  %11865 = vmatmul.mubr.msk.f32.gmra.mrb[48].mxu0 %vm779_vm6, %v776_v23  ;;  %v9998_v22 = vld [vmem:[%s18713_s4 + $0x100] sm:$0xff]  ;;  %v9999_v23 = vld [vmem:[%s18713_s4 + $0x108] sm:$0xff] }
 0x25e   :  { %11912 = vmatprep.mubr.msk.f32.mxu1 %vm14784_vm4, %v14785_v44  ;;  %11867 = vmatprep.mubr.msk.f32.mxu0 %vm14784_vm4, %v14785_v44 }
 0x261   :  { %11913 = vmatmul.mubr.msk.f32.gmra.mrb[50].mxu1 %vm779_vm6, %v9935_v24  ;;  %11868 = vmatmul.mubr.msk.f32.gmra.mrb[50].mxu0 %vm779_vm6, %v777_v25  ;;  %v9983_v24 = vld [vmem:[%s18714_s5 + $0x10] sm:$0xff] }
 0x262   :  { %11915 = vmatprep.mubr.msk.f32.mxu1 %vm14784_vm4, %v14785_v44  ;;  %11870 = vmatprep.mubr.msk.f32.mxu0 %vm14784_vm4, %v14785_v44  ;;  %v10000_v25 = vld [vmem:[%s18713_s4 + $0x110] sm:$0xff] }
 0x265   :  { %11916 = vmatmul.mubr.msk.f32.gmra.mrb[52].mxu1 %vm779_vm6, %v9936_v26  ;;  %11871 = vmatmul.mubr.msk.f32.gmra.mrb[52].mxu0 %vm779_vm6, %v778_v28  ;;  %v10001_v26 = vld [vmem:[%s18713_s4 + $0x118] sm:$0xff]  ;;  %v10021_v28 = vld [vmem:[%s18713_s4 + $0x120] sm:$0xff] }
 0x266   :  { %11920 = vmatprep.mubr.msk.f32.mxu0 %vm14784_vm4, %v14785_v44  ;;  %11941 = vmatprep.mubr.msk.f32.mxu1 %vm14784_vm4, %v14785_v44 }
 0x318   :  { %v1021_v13 = vpop.f32.mrb[36].mxu1  ;;  %v15349_v29 = vpop.f32.mrb[36].mxu0 }
 0x319   :  { %v11893_v30 = vpop.f32.mrb[37].mxu1  ;;  %11921 = vmatmul.mubr.msk.f32.vlgmr.msra.gmra.mrb[54].mxu0 %vm1067_vm7, %v1021_v13  ;;  %v11848_v31 = vpop.f32.mrb[37].mxu0  ;;  %v10022_v13 = vld [vmem:[%s18713_s4 + $0x128] sm:$0xff] }
 0x31a   :  { %14201 = vmatpush3.bf16.msra.mxu0 %v15206_v48  ;;  %11923 = vmatprep.mubr.msk.f32.mxu0 %vm14784_vm4, %v14785_v44  ;;  %v10024_v30 = vld [vmem:[%s18713_s4 + $0x138] sm:$0xff]  ;;  %v10025_v31 = vld [vmem:[%s18713_s4 + $0x140] sm:$0xff] }
 0x31b   :  { %14202 = vmatprep.subr.bf16.mxu0 %v14783_v43 }
 0x31c   :  { %v1026_v32 = vpop.f32.mrb[38].mxu1  ;;  %v15356_v33 = vpop.f32.mrb[38].mxu0 }
 0x31d   :  { %v11896_v35 = vpop.f32.mrb[39].mxu1  ;;  %11924 = vmatmul.mubr.msk.f32.gmra.mrb[56].mxu0 %vm1067_vm7, %v1026_v32  ;;  %v11851_v20 = vpop.f32.mrb[39].mxu0  ;;  %v10026_v32 = vld [vmem:[%s18713_s4 + $0x148] sm:$0xff] }
 0x31e   :  { %14204 = vmatpush3.bf16.msra.mxu0 %v15212_v45  ;;  %11926 = vmatprep.mubr.msk.f32.mxu0 %vm14784_vm4, %v14785_v44  ;;  %v10028_v35 = vld [vmem:[%s18713_s4 + $0x158] sm:$0xff]  ;;  %v10029_v20 = vld [vmem:[%s18713_s4 + $0x160] sm:$0xff] }
 0x31f   :  { %14205 = vmatprep.subr.bf16.mxu0 %v14783_v43 }
 0x320   :  { %v1031_v36 = vpop.f32.mrb[40].mxu1  ;;  %v15363_v37 = vpop.f32.mrb[40].mxu0 }
 0x321   :  { %v11899_v38 = vpop.f32.mrb[41].mxu1  ;;  %11927 = vmatmul.mubr.msk.f32.gmra.mrb[58].mxu0 %vm1067_vm7, %v1031_v36  ;;  %v11854_v39 = vpop.f32.mrb[41].mxu0  ;;  %v10049_v36 = vld [vmem:[%s18713_s4 + $0x168] sm:$0xff] }
 0x322   :  { %14207 = vmatpush3.bf16.msra.mxu0 %v15218_v61  ;;  %11929 = vmatprep.mubr.msk.f32.mxu0 %vm14784_vm4, %v14785_v44  ;;  %v10051_v38 = vld [vmem:[%s18713_s4 + $0x178] sm:$0xff]  ;;  %v10052_v39 = vld [vmem:[%s18713_s4 + $0x180] sm:$0xff] }
 0x323   :  { %14208 = vmatprep.subr.bf16.mxu0 %v14783_v43 }
 0x324   :  { %v1036_v40 = vpop.f32.mrb[42].mxu1  ;;  %v15370_v42 = vpop.f32.mrb[42].mxu0 }
 0x325   :  { %v11902_v27 = vpop.f32.mrb[43].mxu1  ;;  %11930 = vmatmul.mubr.msk.f32.gmra.mrb[60].mxu0 %vm1067_vm7, %v1036_v40  ;;  %v11857_v46 = vpop.f32.mrb[43].mxu0  ;;  %v10053_v40 = vld [vmem:[%s18713_s4 + $0x188] sm:$0xff] }
 0x326   :  { %14210 = vmatpush3.bf16.msra.mxu0 %v15224_v5  ;;  %11932 = vmatprep.mubr.msk.f32.mxu0 %vm14784_vm4, %v14785_v44  ;;  %v10055_v27 = vld [vmem:[%s18713_s4 + $0x198] sm:$0xff]  ;;  %v10056_v46 = vld [vmem:[%s18713_s4 + $0x1a0] sm:$0xff] }
 0x327   :  { %11992 = vmatprep.subr.mxu0 %v14785_v44 }
 0x328   :  { %v1041_v47 = vpop.f32.mrb[44].mxu1  ;;  %v15377_v34 = vpop.f32.mrb[44].mxu0 }
 0x329   :  { %v11905_v49 = vpop.f32.mrb[45].mxu1  ;;  %11933 = vmatmul.mubr.msk.f32.gmra.mrb[62].mxu0 %vm1067_vm7, %v1041_v47  ;;  %v11860_v50 = vpop.f32.mrb[45].mxu0  ;;  %v10057_v47 = vld [vmem:[%s18713_s4 + $0x1a8] sm:$0xff] }
 0x32a   :  { %11993 = vmatpush3.msra.mxu0 %v15226_v56  ;;  %11935 = vmatprep.mubr.msk.f32.mxu0 %vm14784_vm4, %v14785_v44  ;;  %v10078_v49 = vld [vmem:[%s18713_s4 + $0x1b8] sm:$0xff]  ;;  %v10079_v50 = vld [vmem:[%s18713_s4 + $0x1c0] sm:$0xff] }
 0x32b   :  { %14211 = vmatprep.subr.bf16.mxu0 %v14783_v43 }
 0x32c   :  { %v1046_v51 = vpop.f32.mrb[46].mxu1  ;;  %v15384_v41 = vpop.f32.mrb[46].mxu0 }
 0x32d   :  { %v11908_v52 = vpop.f32.mrb[47].mxu1  ;;  %11936 = vmatmul.mubr.msk.f32.gmra.mrb[64].mxu0 %vm1067_vm7, %v1046_v51  ;;  %v11863_v53 = vpop.f32.mrb[47].mxu0  ;;  %v10080_v51 = vld [vmem:[%s18713_s4 + $0x1c8] sm:$0xff] }
 0x32e   :  { %11938 = vmatprep.mubr.msk.f32.mxu0 %vm14784_vm4, %v14785_v44  ;;  %v10082_v52 = vld [vmem:[%s18713_s4 + $0x1d8] sm:$0xff]  ;;  %v10083_v53 = vld [vmem:[%s18713_s4 + $0x1e0] sm:$0xff] }
 0x330   :  { %v1051_v54 = vpop.f32.mrb[48].mxu1  ;;  %v15389_v55 = vpop.f32.mrb[48].mxu0 }
 0x331   :  { %v11911_v57 = vpop.f32.mrb[49].mxu1  ;;  %11939 = vmatmul.mubr.msk.f32.gmra.mrb[66].mxu0 %vm1067_vm7, %v1051_v54  ;;  %v11866_v58 = vpop.f32.mrb[49].mxu0  ;;  %v10084_v54 = vld [vmem:[%s18713_s4 + $0x1e8] sm:$0xff] }
 0x332   :  { %11994 = vmatprep.mubr.msk.f32.mxu0 %vm14784_vm4, %v14785_v44  ;;  %v10105_v57 = vld [vmem:[%s18713_s4 + $0x1f8] sm:$0xff]  ;;  %v10106_v58 = vld [vmem:[%s18713_s4 + $0x200] sm:$0xff] }
 0x334   :  { %v1056_v60 = vpop.f32.mrb[50].mxu1  ;;  %v908_v15 = vpop.f32.mrb[50].mxu0 }
 0x335   :  { %11942 = vmatmul.mubr.msk.f32.vlgmr.msra.gmra.mrb[54].mxu1 %vm1067_vm7, %v1056_v60  ;;  %11995 = vmatmul.mubr.msk.f32.vlgmr.msra.gmra.mrb[68].mxu0 %vm779_vm6, %v9965_v59  ;;  %v11914_v62 = vpop.f32.mrb[51].mxu1  ;;  %v11869_v16 = vpop.f32.mrb[51].mxu0 }
 0x336   :  { %14213 = vmatpush3.bf16.msra.mxu0 %v15206_v48  ;;  %11944 = vmatprep.mubr.msk.f32.mxu1 %vm14784_vm4, %v14785_v44  ;;  %v10107_v62 = vld [vmem:[%s18713_s4 + $0x208] sm:$0xff]  ;;  %v10112_v16 = vld [vmem:[%s18713_s4 + $0x230] sm:$0xff] }
 0x337   :  { %11997 = vmatprep.mubr.msk.f32.mxu0 %vm14784_vm4, %v14785_v44  ;;  %14214 = vmatprep.subr.bf16.mxu0 %v14783_v43 }
 0x338   :  { %v1061_v2 = vpop.f32.mrb[52].mxu1  ;;  %11948 = vmatpush3.msra.mxu1 %v917_v0  ;;  %v913_v18 = vpop.f32.mrb[52].mxu0 }
 0x339   :  { %11945 = vmatmul.mubr.msk.f32.gmra.mrb[56].mxu1 %vm1067_vm7, %v1061_v2  ;;  %11998 = vmatmul.mubr.msk.f32.gmra.mrb[70].mxu0 %vm779_vm6, %v9966_v1  ;;  %v11917_v3 = vpop.f32.mrb[53].mxu1  ;;  %v11872_v19 = vpop.f32.mrb[53].mxu0  ;;  %v10108_v2 = vld [vmem:[%s18713_s4 + $0x210] sm:$0xff] }
 0x33a   :  { %14216 = vmatpush3.bf16.msra.mxu0 %v15212_v45  ;;  %11949 = vmatprep.mubr.msk.f32.mxu1 %vm14784_vm4, %v14785_v44  ;;  %v10113_v19 = vld [vmem:[%s18713_s4 + $0x238] sm:$0xff] }
 0x33b   :  { %12000 = vmatprep.mubr.msk.f32.mxu0 %vm14784_vm4, %v14785_v44  ;;  %14217 = vmatprep.subr.bf16.mxu0 %v14783_v43 }
 0x33c   :  { %12021 = vmatprep.subr.mxu1 %v14785_v44 }
 0x33d   :  { %11950 = vmatmul.mubr.msk.f32.vlgmr.msra.gmra.mrb[58].mxu1 %vm1067_vm7, %v15349_v29  ;;  %12001 = vmatmul.mubr.msk.f32.gmra.mrb[72].mxu0 %vm779_vm6, %v9967_v4  ;;  %v10023_v29 = vld [vmem:[%s18713_s4 + $0x130] sm:$0xff] }
 0x33e   :  { %14219 = vmatpush3.bf16.msra.mxu0 %v15218_v61  ;;  %11952 = vmatprep.mubr.msk.f32.mxu1 %vm14784_vm4, %v14785_v44 }
 0x33f   :  { %12003 = vmatprep.mubr.msk.f32.mxu0 %vm14784_vm4, %v14785_v44  ;;  %14220 = vmatprep.subr.bf16.mxu0 %v14783_v43 }
 0x340   :  { %12022 = vmatpush3.msra.mxu1 %v9983_v24 }
 0x341   :  { %11953 = vmatmul.mubr.msk.f32.gmra.mrb[60].mxu1 %vm1067_vm7, %v15356_v33  ;;  %12004 = vmatmul.mubr.msk.f32.gmra.mrb[74].mxu0 %vm779_vm6, %v9968_v7  ;;  %v10027_v33 = vld [vmem:[%s18713_s4 + $0x150] sm:$0xff]  ;;  %v10109_v7 = vld [vmem:[%s18713_s4 + $0x218] sm:$0xff] }
 0x342   :  { %14222 = vmatpush3.bf16.msra.mxu0 %v15224_v5  ;;  %11955 = vmatprep.mubr.msk.f32.mxu1 %vm14784_vm4, %v14785_v44 }
 0x343   :  { %12006 = vmatprep.mubr.msk.f32.mxu0 %vm14784_vm4, %v14785_v44  ;;  %12066 = vmatprep.subr.mxu0 %v14785_v44 }
 0x344   :  { %12095 = vmatprep.subr.mxu1 %v14785_v44 }
 0x345   :  { %11956 = vmatmul.mubr.msk.f32.gmra.mrb[62].mxu1 %vm1067_vm7, %v15363_v37  ;;  %12007 = vmatmul.mubr.msk.f32.gmra.mrb[76].mxu0 %vm779_vm6, %v9969_v8  ;;  %v10050_v37 = vld [vmem:[%s18713_s4 + $0x170] sm:$0xff] }
 0x346   :  { %12067 = vmatpush3.msra.mxu0 %v15226_v56  ;;  %11958 = vmatprep.mubr.msk.f32.mxu1 %vm14784_vm4, %v14785_v44 }
 0x347   :  { %12009 = vmatprep.mubr.msk.f32.mxu0 %vm14784_vm4, %v14785_v44  ;;  %14223 = vmatprep.subr.bf16.mxu0 %v14783_v43 }
 0x349   :  { %11959 = vmatmul.mubr.msk.f32.gmra.mrb[64].mxu1 %vm1067_vm7, %v15370_v42  ;;  %12010 = vmatmul.mubr.msk.f32.gmra.mrb[78].mxu0 %vm779_vm6, %v9970_v9  ;;  %v10054_v42 = vld [vmem:[%s18713_s4 + $0x190] sm:$0xff] }
 0x34a   :  { %11961 = vmatprep.mubr.msk.f32.mxu1 %vm14784_vm4, %v14785_v44  ;;  %12012 = vmatprep.mubr.msk.f32.mxu0 %vm14784_vm4, %v14785_v44 }
 0x34d   :  { %11962 = vmatmul.mubr.msk.f32.gmra.mrb[66].mxu1 %vm1067_vm7, %v15377_v34  ;;  %12013 = vmatmul.mubr.msk.f32.gmra.mrb[80].mxu0 %vm779_vm6, %v9971_v10  ;;  %v10077_v34 = vld [vmem:[%s18713_s4 + $0x1b0] sm:$0xff]  ;;  %v10110_v10 = vld [vmem:[%s18713_s4 + $0x220] sm:$0xff] }
 0x34e   :  { %11964 = vmatprep.mubr.msk.f32.mxu1 %vm14784_vm4, %v14785_v44  ;;  %12015 = vmatprep.mubr.msk.f32.mxu0 %vm14784_vm4, %v14785_v44 }
 0x351   :  { %11965 = vmatmul.mubr.msk.f32.gmra.mrb[68].mxu1 %vm1067_vm7, %v15384_v41  ;;  %12016 = vmatmul.mubr.msk.f32.gmra.mrb[82].mxu0 %vm779_vm6, %v9972_v11  ;;  %v10081_v41 = vld [vmem:[%s18713_s4 + $0x1d0] sm:$0xff] }
 0x352   :  { %11967 = vmatprep.mubr.msk.f32.mxu1 %vm14784_vm4, %v14785_v44  ;;  %12018 = vmatprep.mubr.msk.f32.mxu0 %vm14784_vm4, %v14785_v44 }
 0x355   :  { %11968 = vmatmul.mubr.msk.f32.gmra.mrb[70].mxu1 %vm1067_vm7, %v15389_v55  ;;  %12019 = vmatmul.mubr.msk.f32.gmra.mrb[84].mxu0 %vm779_vm6, %v9973_v12  ;;  %v10085_v55 = vld [vmem:[%s18713_s4 + $0x1f0] sm:$0xff] }
 0x356   :  { %12068 = vmatprep.mubr.msk.f32.mxu0 %vm14784_vm4, %v14785_v44  ;;  %11970 = vmatprep.mubr.msk.f32.mxu1 %vm14784_vm4, %v14785_v44 }
 0x359   :  { %12069 = vmatmul.mubr.msk.f32.vlgmr.msra.gmra.mrb[86].mxu0 %vm779_vm6, %v9993_v14  ;;  %11971 = vmatmul.mubr.msk.f32.gmra.mrb[72].mxu1 %vm1067_vm7, %v908_v15  ;;  %v10111_v14 = vld [vmem:[%s18713_s4 + $0x228] sm:$0xff] }
 0x35a   :  { %14225 = vmatpush3.bf16.msra.mxu0 %v15206_v48  ;;  %12071 = vmatprep.mubr.msk.f32.mxu0 %vm14784_vm4, %v14785_v44 }
 0x35b   :  { %14226 = vmatprep.subr.bf16.mxu0 %v14783_v43  ;;  %11973 = vmatprep.mubr.msk.f32.mxu1 %vm14784_vm4, %v14785_v44 }
 0x35d   :  { %12072 = vmatmul.mubr.msk.f32.gmra.mrb[88].mxu0 %vm779_vm6, %v9994_v63  ;;  %11974 = vmatmul.mubr.msk.f32.gmra.mrb[74].mxu1 %vm1067_vm7, %v913_v18 }
 0x35e   :  { %14228 = vmatpush3.bf16.msra.mxu0 %v15212_v45  ;;  %12074 = vmatprep.mubr.msk.f32.mxu0 %vm14784_vm4, %v14785_v44 }
 0x35f   :  { %14229 = vmatprep.subr.bf16.mxu0 %v14783_v43  ;;  %12023 = vmatprep.mubr.msk.f32.mxu1 %vm14784_vm4, %v14785_v44 }
 0x361   :  { %12075 = vmatmul.mubr.msk.f32.gmra.mrb[90].mxu0 %vm779_vm6, %v9995_v17 }
 0x362   :  { %14231 = vmatpush3.bf16.msra.mxu0 %v15218_v61  ;;  %12077 = vmatprep.mubr.msk.f32.mxu0 %vm14784_vm4, %v14785_v44 }
 0x363   :  { %14232 = vmatprep.subr.bf16.mxu0 %v14783_v43 }
 0x365   :  { %12078 = vmatmul.mubr.msk.f32.gmra.mrb[92].mxu0 %vm779_vm6, %v9996_v21 }
 0x366   :  { %14234 = vmatpush3.bf16.msra.mxu0 %v15224_v5  ;;  %12080 = vmatprep.mubr.msk.f32.mxu0 %vm14784_vm4, %v14785_v44 }
 0x367   :  { %12140 = vmatprep.subr.mxu0 %v14785_v44 }
 0x369   :  { %12081 = vmatmul.mubr.msk.f32.gmra.mrb[94].mxu0 %vm779_vm6, %v9997_v6 }
 0x36a   :  { %12141 = vmatpush3.msra.mxu0 %v15226_v56  ;;  %12083 = vmatprep.mubr.msk.f32.mxu0 %vm14784_vm4, %v14785_v44 }
 0x36b   :  { %14235 = vmatprep.subr.bf16.mxu0 %v14783_v43 }
 0x36d   :  { %12084 = vmatmul.mubr.msk.f32.gmra.mrb[96].mxu0 %vm779_vm6, %v9998_v22  ;;  %v10011_v22 = vld [vmem:[%s18714_s5 + $0x18] sm:$0xff] }
 0x36e   :  { %12086 = vmatprep.mubr.msk.f32.mxu0 %vm14784_vm4, %v14785_v44 }
 0x371   :  { %12087 = vmatmul.mubr.msk.f32.gmra.mrb[98].mxu0 %vm779_vm6, %v9999_v23 }
 0x372   :  { %12089 = vmatprep.mubr.msk.f32.mxu0 %vm14784_vm4, %v14785_v44 }
 0x375   :  { %12090 = vmatmul.mubr.msk.f32.gmra.mrb[100].mxu0 %vm779_vm6, %v10000_v25  ;;  %v10133_v25 = vld [vmem:[%s18713_s4 + $0x240] sm:$0xff] }
 0x376   :  { %12092 = vmatprep.mubr.msk.f32.mxu0 %vm14784_vm4, %v14785_v44 }
 0x379   :  { %12093 = vmatmul.mubr.msk.f32.gmra.mrb[102].mxu0 %vm779_vm6, %v10001_v26 }
 0x37a   :  { %12142 = vmatprep.mubr.msk.f32.mxu0 %vm14784_vm4, %v14785_v44 }
 0x37d   :  { %12143 = vmatmul.mubr.msk.f32.vlgmr.msra.gmra.mrb[104].mxu0 %vm779_vm6, %v10021_v28 }
 0x37e   :  { %14237 = vmatpush3.bf16.msra.mxu0 %v15206_v48  ;;  %12145 = vmatprep.mubr.msk.f32.mxu0 %vm14784_vm4, %v14785_v44 }
 0x37f   :  { %14238 = vmatprep.subr.bf16.mxu0 %v14783_v43 }
 0x381   :  { %12146 = vmatmul.mubr.msk.f32.gmra.mrb[106].mxu0 %vm779_vm6, %v10022_v13 }
 0x382   :  { %14240 = vmatpush3.bf16.msra.mxu0 %v15212_v45  ;;  %12148 = vmatprep.mubr.msk.f32.mxu0 %vm14784_vm4, %v14785_v44 }
 0x383   :  { %14241 = vmatprep.subr.bf16.mxu0 %v14783_v43 }
 0x385   :  { %12149 = vmatmul.mubr.msk.f32.gmra.mrb[108].mxu0 %vm779_vm6, %v10023_v29 }
 0x386   :  { %14243 = vmatpush3.bf16.msra.mxu0 %v15218_v61  ;;  %12151 = vmatprep.mubr.msk.f32.mxu0 %vm14784_vm4, %v14785_v44 }
 0x387   :  { %14244 = vmatprep.subr.bf16.mxu0 %v14783_v43 }
 0x389   :  { %12152 = vmatmul.mubr.msk.f32.gmra.mrb[110].mxu0 %vm779_vm6, %v10024_v30  ;;  %v10134_v30 = vld [vmem:[%s18713_s4 + $0x248] sm:$0xff] }
 0x38a   :  { %14246 = vmatpush3.bf16.msra.mxu0 %v15224_v5  ;;  %12154 = vmatprep.mubr.msk.f32.mxu0 %vm14784_vm4, %v14785_v44 }
 0x38b   :  { %12214 = vmatprep.subr.mxu0 %v14785_v44 }
 0x38d   :  { %12155 = vmatmul.mubr.msk.f32.gmra.mrb[112].mxu0 %vm779_vm6, %v10025_v31 }
 0x38e   :  { %12215 = vmatpush3.msra.mxu0 %v15226_v56  ;;  %12157 = vmatprep.mubr.msk.f32.mxu0 %vm14784_vm4, %v14785_v44 }
 0x38f   :  { %14247 = vmatprep.subr.bf16.mxu0 %v14783_v43 }
 0x391   :  { %12158 = vmatmul.mubr.msk.f32.gmra.mrb[114].mxu0 %vm779_vm6, %v10026_v32 }
 0x392   :  { %12160 = vmatprep.mubr.msk.f32.mxu0 %vm14784_vm4, %v14785_v44 }
 0x395   :  { %12161 = vmatmul.mubr.msk.f32.gmra.mrb[116].mxu0 %vm779_vm6, %v10027_v33 }
 0x396   :  { %12163 = vmatprep.mubr.msk.f32.mxu0 %vm14784_vm4, %v14785_v44 }
 0x399   :  { %12164 = vmatmul.mubr.msk.f32.gmra.mrb[118].mxu0 %vm779_vm6, %v10028_v35 }
 0x39a   :  { %12166 = vmatprep.mubr.msk.f32.mxu0 %vm14784_vm4, %v14785_v44 }
 0x39d   :  { %12167 = vmatmul.mubr.msk.f32.gmra.mrb[120].mxu0 %vm779_vm6, %v10029_v20 }
 0x39e   :  { %12216 = vmatprep.mubr.msk.f32.mxu0 %vm14784_vm4, %v14785_v44 }
 0x3a1   :  { %12217 = vmatmul.mubr.msk.f32.vlgmr.msra.gmra.mrb[122].mxu0 %vm779_vm6, %v10049_v36  ;;  %v10135_v36 = vld [vmem:[%s18713_s4 + $0x250] sm:$0xff] }
 0x3a2   :  { %14249 = vmatpush3.bf16.msra.mxu0 %v15206_v48  ;;  %12219 = vmatprep.mubr.msk.f32.mxu0 %vm14784_vm4, %v14785_v44 }
 0x3a3   :  { %14250 = vmatprep.subr.bf16.mxu0 %v14783_v43 }
 0x3a5   :  { %12220 = vmatmul.mubr.msk.f32.gmra.mrb[124].mxu0 %vm779_vm6, %v10050_v37 }
 0x3a6   :  { %14252 = vmatpush3.bf16.msra.mxu0 %v15212_v45  ;;  %12222 = vmatprep.mubr.msk.f32.mxu0 %vm14784_vm4, %v14785_v44 }
 0x3a7   :  { %14253 = vmatprep.subr.bf16.mxu0 %v14783_v43 }
 0x3a9   :  { %12223 = vmatmul.mubr.msk.f32.gmra.mrb[126].mxu0 %vm779_vm6, %v10051_v38 }
 0x3aa   :  { %14255 = vmatpush3.bf16.msra.mxu0 %v15218_v61  ;;  %12225 = vmatprep.mubr.msk.f32.mxu0 %vm14784_vm4, %v14785_v44 }
 0x3ab   :  { %14256 = vmatprep.subr.bf16.mxu0 %v14783_v43 }
 0x3ad   :  { %12226 = vmatmul.mubr.msk.f32.gmra.mrb[128].mxu0 %vm779_vm6, %v10052_v39 }
 0x3ae   :  { %14258 = vmatpush3.bf16.msra.mxu0 %v15224_v5  ;;  %12228 = vmatprep.mubr.msk.f32.mxu0 %vm14784_vm4, %v14785_v44 }
 0x3af   :  { %12288 = vmatprep.subr.mxu0 %v14785_v44 }
 0x3b1   :  { %12229 = vmatmul.mubr.msk.f32.gmra.mrb[130].mxu0 %vm779_vm6, %v10053_v40 }
 0x3b2   :  { %12289 = vmatpush3.msra.mxu0 %v15226_v56  ;;  %12231 = vmatprep.mubr.msk.f32.mxu0 %vm14784_vm4, %v14785_v44 }
 0x3b3   :  { %14259 = vmatprep.subr.bf16.mxu0 %v14783_v43 }
 0x3b5   :  { %12232 = vmatmul.mubr.msk.f32.gmra.mrb[132].mxu0 %vm779_vm6, %v10054_v42 }
 0x3b6   :  { %12234 = vmatprep.mubr.msk.f32.mxu0 %vm14784_vm4, %v14785_v44 }
 0x3b9   :  { %12235 = vmatmul.mubr.msk.f32.gmra.mrb[134].mxu0 %vm779_vm6, %v10055_v27  ;;  %v10136_v27 = vld [vmem:[%s18713_s4 + $0x258] sm:$0xff] }
 0x3ba   :  { %12237 = vmatprep.mubr.msk.f32.mxu0 %vm14784_vm4, %v14785_v44 }
 0x3bd   :  { %12238 = vmatmul.mubr.msk.f32.gmra.mrb[136].mxu0 %vm779_vm6, %v10056_v46 }
 0x3be   :  { %12240 = vmatprep.mubr.msk.f32.mxu0 %vm14784_vm4, %v14785_v44 }
 0x3c1   :  { %12241 = vmatmul.mubr.msk.f32.gmra.mrb[138].mxu0 %vm779_vm6, %v10057_v47 }
 0x3c2   :  { %12290 = vmatprep.mubr.msk.f32.mxu0 %vm14784_vm4, %v14785_v44 }
 0x3c5   :  { %12291 = vmatmul.mubr.msk.f32.vlgmr.msra.gmra.mrb[140].mxu0 %vm779_vm6, %v10077_v34 }
 0x3c6   :  { %14261 = vmatpush3.bf16.msra.mxu0 %v15206_v48  ;;  %12293 = vmatprep.mubr.msk.f32.mxu0 %vm14784_vm4, %v14785_v44 }
 0x3c7   :  { %14262 = vmatprep.subr.bf16.mxu0 %v14783_v43 }
 0x3c9   :  { %12294 = vmatmul.mubr.msk.f32.gmra.mrb[142].mxu0 %vm779_vm6, %v10078_v49 }
 0x3ca   :  { %14264 = vmatpush3.bf16.msra.mxu0 %v15212_v45  ;;  %12296 = vmatprep.mubr.msk.f32.mxu0 %vm14784_vm4, %v14785_v44 }
 0x3cb   :  { %14265 = vmatprep.subr.bf16.mxu0 %v14783_v43 }
 0x3cd   :  { %12297 = vmatmul.mubr.msk.f32.gmra.mrb[144].mxu0 %vm779_vm6, %v10079_v50 }
 0x3ce   :  { %14267 = vmatpush3.bf16.msra.mxu0 %v15218_v61  ;;  %12299 = vmatprep.mubr.msk.f32.mxu0 %vm14784_vm4, %v14785_v44 }
 0x3cf   :  { %14268 = vmatprep.subr.bf16.mxu0 %v14783_v43 }
 0x3d1   :  { %12300 = vmatmul.mubr.msk.f32.gmra.mrb[146].mxu0 %vm779_vm6, %v10080_v51  ;;  %v10137_v51 = vld [vmem:[%s18713_s4 + $0x260] sm:$0xff] }
 0x3d2   :  { %14270 = vmatpush3.bf16.msra.mxu0 %v15224_v5  ;;  %12302 = vmatprep.mubr.msk.f32.mxu0 %vm14784_vm4, %v14785_v44 }
 0x3d3   :  { %12362 = vmatprep.subr.mxu0 %v14785_v44 }
 0x3d5   :  { %12303 = vmatmul.mubr.msk.f32.gmra.mrb[148].mxu0 %vm779_vm6, %v10081_v41 }
 0x3d6   :  { %12363 = vmatpush3.msra.mxu0 %v15226_v56  ;;  %12305 = vmatprep.mubr.msk.f32.mxu0 %vm14784_vm4, %v14785_v44 }
 0x3d7   :  { %14271 = vmatprep.subr.bf16.mxu0 %v14783_v43 }
 0x3d9   :  { %12306 = vmatmul.mubr.msk.f32.gmra.mrb[150].mxu0 %vm779_vm6, %v10082_v52 }
 0x3da   :  { %12308 = vmatprep.mubr.msk.f32.mxu0 %vm14784_vm4, %v14785_v44 }
 0x3dd   :  { %12309 = vmatmul.mubr.msk.f32.gmra.mrb[152].mxu0 %vm779_vm6, %v10083_v53 }
 0x3de   :  { %12311 = vmatprep.mubr.msk.f32.mxu0 %vm14784_vm4, %v14785_v44 }
 0x3e1   :  { %12312 = vmatmul.mubr.msk.f32.gmra.mrb[154].mxu0 %vm779_vm6, %v10084_v54 }
 0x3e2   :  { %12314 = vmatprep.mubr.msk.f32.mxu0 %vm14784_vm4, %v14785_v44 }
 0x3e5   :  { %12315 = vmatmul.mubr.msk.f32.gmra.mrb[156].mxu0 %vm779_vm6, %v10085_v55 }
 0x3e6   :  { %12364 = vmatprep.mubr.msk.f32.mxu0 %vm14784_vm4, %v14785_v44 }
 0x3e9   :  { %12365 = vmatmul.mubr.msk.f32.vlgmr.msra.gmra.mrb[158].mxu0 %vm779_vm6, %v10105_v57  ;;  %v10138_v57 = vld [vmem:[%s18713_s4 + $0x268] sm:$0xff] }
 0x3ea   :  { %14273 = vmatpush3.bf16.msra.mxu0 %v15206_v48  ;;  %12367 = vmatprep.mubr.msk.f32.mxu0 %vm14784_vm4, %v14785_v44 }
 0x3eb   :  { %14274 = vmatprep.subr.bf16.mxu0 %v14783_v43 }
 0x3ec   :  { %v15773_v59 = vpop.f32.mrb[54].mxu0 }
 0x3ed   :  { %v11922_v60 = vpop.f32.mrb[55].mxu0  ;;  %12368 = vmatmul.mubr.msk.f32.gmra.mrb[160].mxu0 %vm779_vm6, %v10106_v58 }
 0x3ee   :  { %14276 = vmatpush3.bf16.msra.mxu0 %v15212_v45  ;;  %12370 = vmatprep.mubr.msk.f32.mxu0 %vm14784_vm4, %v14785_v44 }
 0x3ef   :  { %14277 = vmatprep.subr.bf16.mxu0 %v14783_v43 }
 0x3f0   :  { %v15783_v0 = vpop.f32.mrb[56].mxu0 }
 0x3f1   :  { %v11925_v1 = vpop.f32.mrb[57].mxu0  ;;  %12371 = vmatmul.mubr.msk.f32.gmra.mrb[162].mxu0 %vm779_vm6, %v10107_v62 }
 0x3f2   :  { %14279 = vmatpush3.bf16.msra.mxu0 %v15218_v61  ;;  %12373 = vmatprep.mubr.msk.f32.mxu0 %vm14784_vm4, %v14785_v44  ;;  %v10139_v1 = vld [vmem:[%s18713_s4 + $0x270] sm:$0xff] }
 0x3f3   :  { %14280 = vmatprep.subr.bf16.mxu0 %v14783_v43 }
 0x3f4   :  { %v15793_v3 = vpop.f32.mrb[58].mxu0 }
 0x3f5   :  { %v11928_v4 = vpop.f32.mrb[59].mxu0  ;;  %12374 = vmatmul.mubr.msk.f32.gmra.mrb[164].mxu0 %vm779_vm6, %v10108_v2 }
 0x3f6   :  { %14282 = vmatpush3.bf16.msra.mxu0 %v15224_v5  ;;  %12376 = vmatprep.mubr.msk.f32.mxu0 %vm14784_vm4, %v14785_v44 }
 0x3f7   :  { %12436 = vmatprep.subr.mxu0 %v14785_v44 }
 0x3f8   :  { %v15803_v8 = vpop.f32.mrb[60].mxu0 }
 0x3f9   :  { %v11931_v9 = vpop.f32.mrb[61].mxu0  ;;  %12377 = vmatmul.mubr.msk.f32.gmra.mrb[166].mxu0 %vm779_vm6, %v10109_v7 }
 0x3fa   :  { %12437 = vmatpush3.msra.mxu0 %v15226_v56  ;;  %12379 = vmatprep.mubr.msk.f32.mxu0 %vm14784_vm4, %v14785_v44  ;;  %v10140_v9 = vld [vmem:[%s18713_s4 + $0x278] sm:$0xff] }
 0x3fb   :  { %14283 = vmatprep.subr.bf16.mxu0 %v14783_v43 }
 0x3fc   :  { %v15813_v11 = vpop.f32.mrb[62].mxu0 }
 0x3fd   :  { %v11934_v12 = vpop.f32.mrb[63].mxu0  ;;  %12380 = vmatmul.mubr.msk.f32.gmra.mrb[168].mxu0 %vm779_vm6, %v10110_v10 }
 0x3fe   :  { %12382 = vmatprep.mubr.msk.f32.mxu0 %vm14784_vm4, %v14785_v44 }
 0x400   :  { %v15821_v63 = vpop.f32.mrb[64].mxu0 }
 0x401   :  { %v11937_v15 = vpop.f32.mrb[65].mxu0  ;;  %12383 = vmatmul.mubr.msk.f32.gmra.mrb[170].mxu0 %vm779_vm6, %v10111_v14 }
 0x402   :  { %12385 = vmatprep.mubr.msk.f32.mxu0 %vm14784_vm4, %v14785_v44  ;;  %v10141_v15 = vld [vmem:[%s18713_s4 + $0x280] sm:$0xff] }
 0x404   :  { %v15829_v17 = vpop.f32.mrb[66].mxu0 }
 0x405   :  { %v11940_v18 = vpop.f32.mrb[67].mxu0  ;;  %12386 = vmatmul.mubr.msk.f32.gmra.mrb[172].mxu0 %vm779_vm6, %v10112_v16 }
 0x406   :  { %12388 = vmatprep.mubr.msk.f32.mxu0 %vm14784_vm4, %v14785_v44 }
 0x408   :  { %v1445_v21 = vpop.f32.mrb[68].mxu0  ;;  %v15837_v6 = vpop.f32.mrb[54].mxu1 }
 0x409   :  { %v11996_v23 = vpop.f32.mrb[69].mxu0  ;;  %12024 = vmatmul.mubr.msk.f32.vlgmr.msra.gmra.mrb[76].mxu1 %vm1067_vm7, %v1445_v21  ;;  %12389 = vmatmul.mubr.msk.f32.gmra.mrb[174].mxu0 %vm779_vm6, %v10113_v19  ;;  %v11943_v24 = vpop.f32.mrb[55].mxu1  ;;  %v10161_v19 = vld [vmem:[%s18713_s4 + $0x288] sm:$0xff] }
 0x40a   :  { %12026 = vmatprep.mubr.msk.f32.mxu1 %vm14784_vm4, %v14785_v44  ;;  %12438 = vmatprep.mubr.msk.f32.mxu0 %vm14784_vm4, %v14785_v44 }
 0x40b   :  { %12096 = vmatpush3.msra.mxu1 %v10011_v22 }
 0x40c   :  { %v1450_v26 = vpop.f32.mrb[70].mxu0  ;;  %v15851_v28 = vpop.f32.mrb[56].mxu1  ;;  %12169 = vmatprep.subr.mxu1 %v14785_v44 }
 0x40d   :  { %v11999_v13 = vpop.f32.mrb[71].mxu0  ;;  %12027 = vmatmul.mubr.msk.f32.gmra.mrb[78].mxu1 %vm1067_vm7, %v1450_v26  ;;  %12439 = vmatmul.mubr.msk.f32.vlgmr.msra.gmra.mrb[176].mxu0 %vm779_vm6, %v10133_v25  ;;  %v11946_v29 = vpop.f32.mrb[57].mxu1  ;;  %v10162_v26 = vld [vmem:[%s18713_s4 + $0x290] sm:$0xff] }
 0x40e   :  { %14285 = vmatpush3.bf16.msra.mxu0 %v15206_v48  ;;  %12029 = vmatprep.mubr.msk.f32.mxu1 %vm14784_vm4, %v14785_v44 }
 0x40f   :  { %12441 = vmatprep.mubr.msk.f32.mxu0 %vm14784_vm4, %v14785_v44  ;;  %14286 = vmatprep.subr.bf16.mxu0 %v14783_v43 }
 0x410   :  { %v1298_v31 = vpop.f32.mrb[58].mxu1  ;;  %v1455_v32 = vpop.f32.mrb[72].mxu0 }
 0x411   :  { %v15866_v33 = vadd.f32 %v1298_v31, %v15773_v59  ;;  %v12002_v35 = vpop.f32.mrb[73].mxu0  ;;  %12030 = vmatmul.mubr.msk.f32.gmra.mrb[80].mxu1 %vm1067_vm7, %v1455_v32  ;;  %12442 = vmatmul.mubr.msk.f32.gmra.mrb[178].mxu0 %vm779_vm6, %v10134_v30  ;;  %v11951_v20 = vpop.f32.mrb[59].mxu1  ;;  %v10163_v32 = vld [vmem:[%s18713_s4 + $0x298] sm:$0xff] }
 0x412   :  { %14288 = vmatpush3.bf16.msra.mxu0 %v15212_v45  ;;  %12032 = vmatprep.mubr.msk.f32.mxu1 %vm14784_vm4, %v14785_v44 }
 0x413   :  { %12444 = vmatprep.mubr.msk.f32.mxu0 %vm14784_vm4, %v14785_v44  ;;  %14289 = vmatprep.subr.bf16.mxu0 %v14783_v43 }
 0x414   :  { %v1303_v37 = vpop.f32.mrb[60].mxu1  ;;  %v1460_v38 = vpop.f32.mrb[74].mxu0 }
 0x415   :  { %v15880_v39 = vadd.f32 %v1303_v37, %v15783_v0  ;;  %v12005_v40 = vpop.f32.mrb[75].mxu0  ;;  %12033 = vmatmul.mubr.msk.f32.gmra.mrb[82].mxu1 %vm1067_vm7, %v1460_v38  ;;  %12445 = vmatmul.mubr.msk.f32.gmra.mrb[180].mxu0 %vm779_vm6, %v10135_v36  ;;  %v11954_v42 = vpop.f32.mrb[61].mxu1  ;;  %v10165_v38 = vld [vmem:[%s18713_s4 + $0x2a8] sm:$0xff] }
 0x416   :  { %14291 = vmatpush3.bf16.msra.mxu0 %v15218_v61  ;;  %12035 = vmatprep.mubr.msk.f32.mxu1 %vm14784_vm4, %v14785_v44 }
 0x417   :  { %12447 = vmatprep.mubr.msk.f32.mxu0 %vm14784_vm4, %v14785_v44  ;;  %14292 = vmatprep.subr.bf16.mxu0 %v14783_v43 }
 0x418   :  { %v1308_v46 = vpop.f32.mrb[62].mxu1  ;;  %v1465_v47 = vpop.f32.mrb[76].mxu0 }
 0x419   :  { %v15894_v34 = vadd.f32 %v1308_v46, %v15793_v3  ;;  %v12008_v49 = vpop.f32.mrb[77].mxu0  ;;  %12036 = vmatmul.mubr.msk.f32.gmra.mrb[84].mxu1 %vm1067_vm7, %v1465_v47  ;;  %12448 = vmatmul.mubr.msk.f32.gmra.mrb[182].mxu0 %vm779_vm6, %v10136_v27  ;;  %v11957_v50 = vpop.f32.mrb[63].mxu1  ;;  %v10166_v27 = vld [vmem:[%s18713_s4 + $0x2b0] sm:$0xff] }
 0x41a   :  { %14294 = vmatpush3.bf16.msra.mxu0 %v15224_v5  ;;  %12038 = vmatprep.mubr.msk.f32.mxu1 %vm14784_vm4, %v14785_v44  ;;  %v10167_v49 = vld [vmem:[%s18713_s4 + $0x2b8] sm:$0xff] }
 0x41b   :  { %12450 = vmatprep.mubr.msk.f32.mxu0 %vm14784_vm4, %v14785_v44  ;;  %12510 = vmatprep.subr.mxu0 %v14785_v44 }
 0x41c   :  { %v1313_v41 = vpop.f32.mrb[64].mxu1  ;;  %v1470_v52 = vpop.f32.mrb[78].mxu0 }
 0x41d   :  { %v15908_v53 = vadd.f32 %v1313_v41, %v15803_v8  ;;  %v12011_v54 = vpop.f32.mrb[79].mxu0  ;;  %12039 = vmatmul.mubr.msk.f32.gmra.mrb[86].mxu1 %vm1067_vm7, %v1470_v52  ;;  %12451 = vmatmul.mubr.msk.f32.gmra.mrb[184].mxu0 %vm779_vm6, %v10137_v51  ;;  %v11960_v55 = vpop.f32.mrb[65].mxu1  ;;  %v10168_v41 = vld [vmem:[%s18713_s4 + $0x2c0] sm:$0xff] }
 0x41e   :  { %12511 = vmatpush3.msra.mxu0 %v15226_v56  ;;  %12041 = vmatprep.mubr.msk.f32.mxu1 %vm14784_vm4, %v14785_v44  ;;  %v10169_v55 = vld [vmem:[%s18713_s4 + $0x2c8] sm:$0xff] }
 0x41f   :  { %12453 = vmatprep.mubr.msk.f32.mxu0 %vm14784_vm4, %v14785_v44  ;;  %14295 = vmatprep.subr.bf16.mxu0 %v14783_v43 }
 0x420   :  { %v1318_v58 = vpop.f32.mrb[66].mxu1  ;;  %v1475_v59 = vpop.f32.mrb[80].mxu0 }
 0x421   :  { %v15922_v60 = vadd.f32 %v1318_v58, %v15813_v11  ;;  %v12014_v62 = vpop.f32.mrb[81].mxu0  ;;  %12042 = vmatmul.mubr.msk.f32.gmra.mrb[88].mxu1 %vm1067_vm7, %v1475_v59  ;;  %12454 = vmatmul.mubr.msk.f32.gmra.mrb[186].mxu0 %vm779_vm6, %v10138_v57  ;;  %v11963_v0 = vpop.f32.mrb[67].mxu1  ;;  %v10067_v58 = vld [vmem:[%s18714_s5 + $0x28] sm:$0xff] }
 0x422   :  { %12044 = vmatprep.mubr.msk.f32.mxu1 %vm14784_vm4, %v14785_v44  ;;  %12456 = vmatprep.mubr.msk.f32.mxu0 %vm14784_vm4, %v14785_v44  ;;  %v10189_v62 = vld [vmem:[%s18713_s4 + $0x2d0] sm:$0xff] }
 0x424   :  { %v1323_v2 = vpop.f32.mrb[68].mxu1  ;;  %v1480_v3 = vpop.f32.mrb[82].mxu0 }
 0x425   :  { %v15934_v4 = vadd.f32 %v1323_v2, %v15821_v63  ;;  %v12017_v7 = vpop.f32.mrb[83].mxu0  ;;  %12045 = vmatmul.mubr.msk.f32.gmra.mrb[90].mxu1 %vm1067_vm7, %v1480_v3  ;;  %12457 = vmatmul.mubr.msk.f32.gmra.mrb[188].mxu0 %vm779_vm6, %v10139_v1  ;;  %v11966_v8 = vpop.f32.mrb[69].mxu1  ;;  %v10190_v2 = vld [vmem:[%s18713_s4 + $0x2d8] sm:$0xff] }
 0x426   :  { %12047 = vmatprep.mubr.msk.f32.mxu1 %vm14784_vm4, %v14785_v44  ;;  %12459 = vmatprep.mubr.msk.f32.mxu0 %vm14784_vm4, %v14785_v44  ;;  %v10191_v8 = vld [vmem:[%s18713_s4 + $0x2e0] sm:$0xff] }
 0x428   :  { %v1328_v10 = vpop.f32.mrb[70].mxu1  ;;  %v1485_v11 = vpop.f32.mrb[84].mxu0 }
 0x429   :  { %v15946_v12 = vadd.f32 %v1328_v10, %v15829_v17  ;;  %v12020_v14 = vpop.f32.mrb[85].mxu0  ;;  %12048 = vmatmul.mubr.msk.f32.gmra.mrb[92].mxu1 %vm1067_vm7, %v1485_v11  ;;  %12460 = vmatmul.mubr.msk.f32.gmra.mrb[190].mxu0 %vm779_vm6, %v10140_v9  ;;  %v11969_v63 = vpop.f32.mrb[71].mxu1  ;;  %v10039_v17 = vld [vmem:[%s18714_s5 + $0x20] sm:$0xff]  ;;  %v10192_v11 = vld [vmem:[%s18713_s4 + $0x2e8] sm:$0xff] }
 0x42a   :  { %12097 = vmatprep.mubr.msk.f32.mxu1 %vm14784_vm4, %v14785_v44  ;;  %12462 = vmatprep.mubr.msk.f32.mxu0 %vm14784_vm4, %v14785_v44 }
 0x42c   :  { %v1740_v16 = vpop.f32.mrb[86].mxu0  ;;  %v1333_v22 = vpop.f32.mrb[72].mxu1 }
 0x42d   :  { %v12070_v18 = vpop.f32.mrb[87].mxu0  ;;  %12098 = vmatmul.mubr.msk.f32.vlgmr.msra.gmra.mrb[94].mxu1 %vm1067_vm7, %v1740_v16  ;;  %12463 = vmatmul.mubr.msk.f32.gmra.mrb[192].mxu0 %vm779_vm6, %v10141_v15  ;;  %v15973_v24 = vadd.f32 %v1333_v22, %v15837_v6  ;;  %v11972_v25 = vpop.f32.mrb[73].mxu1  ;;  %v10193_v15 = vld [vmem:[%s18713_s4 + $0x2f0] sm:$0xff]  ;;  %v10195_v22 = vld [vmem:[%s18713_s4 + $0x300] sm:$0xff] }
 0x42e   :  { %12100 = vmatprep.mubr.msk.f32.mxu1 %vm14784_vm4, %v14785_v44  ;;  %12512 = vmatprep.mubr.msk.f32.mxu0 %vm14784_vm4, %v14785_v44  ;;  %v10194_v18 = vld [vmem:[%s18713_s4 + $0x2f8] sm:$0xff] }
 0x42f   :  { %12170 = vmatpush3.msra.mxu1 %v10039_v17 }
 0x430   :  { %v1745_v21 = vpop.f32.mrb[88].mxu0  ;;  %12243 = vmatprep.subr.mxu1 %v14785_v44  ;;  %v1338_v29 = vpop.f32.mrb[74].mxu1 }
 0x431   :  { %v12073_v23 = vpop.f32.mrb[89].mxu0  ;;  %12101 = vmatmul.mubr.msk.f32.gmra.mrb[96].mxu1 %vm1067_vm7, %v1745_v21  ;;  %12513 = vmatmul.mubr.msk.f32.vlgmr.msra.gmra.mrb[194].mxu0 %vm779_vm6, %v10161_v19  ;;  %v15987_v6 = vadd.f32 %v1338_v29, %v15851_v28  ;;  %v11975_v31 = vpop.f32.mrb[75].mxu1  ;;  %v10164_v28 = vld [vmem:[%s18713_s4 + $0x2a0] sm:$0xff] }
 0x432   :  { %14297 = vmatpush3.bf16.msra.mxu0 %v15206_v48  ;;  %12103 = vmatprep.mubr.msk.f32.mxu1 %vm14784_vm4, %v14785_v44 }
 0x433   :  { %12515 = vmatprep.mubr.msk.f32.mxu0 %vm14784_vm4, %v14785_v44  ;;  %14298 = vmatprep.subr.bf16.mxu0 %v14783_v43 }
 0x434   :  { %v1750_v13 = vpop.f32.mrb[90].mxu0 }
 0x435   :  { %v12076_v30 = vpop.f32.mrb[91].mxu0  ;;  %12104 = vmatmul.mubr.msk.f32.gmra.mrb[98].mxu1 %vm1067_vm7, %v1750_v13  ;;  %12516 = vmatmul.mubr.msk.f32.gmra.mrb[196].mxu0 %vm779_vm6, %v10162_v26  ;;  %v10196_v26 = vld [vmem:[%s18713_s4 + $0x308] sm:$0xff] }
 0x436   :  { %14300 = vmatpush3.bf16.msra.mxu0 %v15212_v45  ;;  %12106 = vmatprep.mubr.msk.f32.mxu1 %vm14784_vm4, %v14785_v44  ;;  %v10197_v30 = vld [vmem:[%s18713_s4 + $0x310] sm:$0xff] }
 0x437   :  { %12518 = vmatprep.mubr.msk.f32.mxu0 %vm14784_vm4, %v14785_v44  ;;  %14301 = vmatprep.subr.bf16.mxu0 %v14783_v43 }
 0x438   :  { %v1755_v35 = vpop.f32.mrb[92].mxu0 }
 0x439   :  { %v12079_v20 = vpop.f32.mrb[93].mxu0  ;;  %12107 = vmatmul.mubr.msk.f32.gmra.mrb[100].mxu1 %vm1067_vm7, %v1755_v35  ;;  %12519 = vmatmul.mubr.msk.f32.gmra.mrb[198].mxu0 %vm779_vm6, %v10163_v32  ;;  %v10095_v32 = vld [vmem:[%s18714_s5 + $0x30] sm:$0xff] }
 0x43a   :  { %14303 = vmatpush3.bf16.msra.mxu0 %v15218_v61  ;;  %12109 = vmatprep.mubr.msk.f32.mxu1 %vm14784_vm4, %v14785_v44  ;;  %v10217_v20 = vld [vmem:[%s18713_s4 + $0x318] sm:$0xff] }
 0x43b   :  { %12521 = vmatprep.mubr.msk.f32.mxu0 %vm14784_vm4, %v14785_v44  ;;  %14304 = vmatprep.subr.bf16.mxu0 %v14783_v43 }
 0x43c   :  { %v1760_v36 = vpop.f32.mrb[94].mxu0 }
 0x43d   :  { %v12082_v37 = vpop.f32.mrb[95].mxu0  ;;  %12110 = vmatmul.mubr.msk.f32.gmra.mrb[102].mxu1 %vm1067_vm7, %v1760_v36  ;;  %12522 = vmatmul.mubr.msk.f32.gmra.mrb[200].mxu0 %vm779_vm6, %v10164_v28 }
 0x43e   :  { %14306 = vmatpush3.bf16.msra.mxu0 %v15224_v5  ;;  %12112 = vmatprep.mubr.msk.f32.mxu1 %vm14784_vm4, %v14785_v44  ;;  %v10218_v37 = vld [vmem:[%s18713_s4 + $0x320] sm:$0xff] }
 0x43f   :  { %12524 = vmatprep.mubr.msk.f32.mxu0 %vm14784_vm4, %v14785_v44  ;;  %12584 = vmatprep.subr.mxu0 %v14785_v44 }
 0x440   :  { %v1765_v40 = vpop.f32.mrb[96].mxu0 }
 0x441   :  { %v12085_v42 = vpop.f32.mrb[97].mxu0  ;;  %12113 = vmatmul.mubr.msk.f32.gmra.mrb[104].mxu1 %vm1067_vm7, %v1765_v40  ;;  %12525 = vmatmul.mubr.msk.f32.gmra.mrb[202].mxu0 %vm779_vm6, %v10165_v38 }
 0x442   :  { %12585 = vmatpush3.msra.mxu0 %v15226_v56  ;;  %12115 = vmatprep.mubr.msk.f32.mxu1 %vm14784_vm4, %v14785_v44  ;;  %v10219_v42 = vld [vmem:[%s18713_s4 + $0x328] sm:$0xff] }
 0x443   :  { %12527 = vmatprep.mubr.msk.f32.mxu0 %vm14784_vm4, %v14785_v44  ;;  %14307 = vmatprep.subr.bf16.mxu0 %v14783_v43 }
 0x444   :  { %v1770_v46 = vpop.f32.mrb[98].mxu0 }
 0x445   :  { %v12088_v47 = vpop.f32.mrb[99].mxu0  ;;  %12116 = vmatmul.mubr.msk.f32.gmra.mrb[106].mxu1 %vm1067_vm7, %v1770_v46  ;;  %12528 = vmatmul.mubr.msk.f32.gmra.mrb[204].mxu0 %vm779_vm6, %v10166_v27 }
 0x446   :  { %12118 = vmatprep.mubr.msk.f32.mxu1 %vm14784_vm4, %v14785_v44  ;;  %12530 = vmatprep.mubr.msk.f32.mxu0 %vm14784_vm4, %v14785_v44  ;;  %v10220_v47 = vld [vmem:[%s18713_s4 + $0x330] sm:$0xff] }
 0x448   :  { %v1775_v50 = vpop.f32.mrb[100].mxu0 }
 0x449   :  { %v12091_v51 = vpop.f32.mrb[101].mxu0  ;;  %12119 = vmatmul.mubr.msk.f32.gmra.mrb[108].mxu1 %vm1067_vm7, %v1775_v50  ;;  %12531 = vmatmul.mubr.msk.f32.gmra.mrb[206].mxu0 %vm779_vm6, %v10167_v49 }
 0x44a   :  { %12121 = vmatprep.mubr.msk.f32.mxu1 %vm14784_vm4, %v14785_v44  ;;  %12533 = vmatprep.mubr.msk.f32.mxu0 %vm14784_vm4, %v14785_v44  ;;  %v10221_v51 = vld [vmem:[%s18713_s4 + $0x338] sm:$0xff] }
 0x44c   :  { %v1780_v52 = vpop.f32.mrb[102].mxu0 }
 0x44d   :  { %v12094_v54 = vpop.f32.mrb[103].mxu0  ;;  %12122 = vmatmul.mubr.msk.f32.gmra.mrb[110].mxu1 %vm1067_vm7, %v1780_v52  ;;  %12534 = vmatmul.mubr.msk.f32.gmra.mrb[208].mxu0 %vm779_vm6, %v10168_v41 }
 0x44e   :  { %12171 = vmatprep.mubr.msk.f32.mxu1 %vm14784_vm4, %v14785_v44  ;;  %12536 = vmatprep.mubr.msk.f32.mxu0 %vm14784_vm4, %v14785_v44  ;;  %v10222_v54 = vld [vmem:[%s18713_s4 + $0x340] sm:$0xff] }
 0x450   :  { %v2035_v57 = vpop.f32.mrb[104].mxu0 }
 0x451   :  { %v12144_v59 = vpop.f32.mrb[105].mxu0  ;;  %12172 = vmatmul.mubr.msk.f32.vlgmr.msra.gmra.mrb[112].mxu1 %vm1067_vm7, %v2035_v57  ;;  %12537 = vmatmul.mubr.msk.f32.gmra.mrb[210].mxu0 %vm779_vm6, %v10169_v55 }
 0x452   :  { %12174 = vmatprep.mubr.msk.f32.mxu1 %vm14784_vm4, %v14785_v44  ;;  %12586 = vmatprep.mubr.msk.f32.mxu0 %vm14784_vm4, %v14785_v44 }
 0x453   :  { %12244 = vmatpush3.msra.mxu1 %v10067_v58  ;;  %v10223_v58 = vld [vmem:[%s18713_s4 + $0x348] sm:$0xff] }
 0x454   :  { %v2040_v0 = vpop.f32.mrb[106].mxu0  ;;  %12317 = vmatprep.subr.mxu1 %v14785_v44 }
 0x455   :  { %v12147_v1 = vpop.f32.mrb[107].mxu0  ;;  %12175 = vmatmul.mubr.msk.f32.gmra.mrb[114].mxu1 %vm1067_vm7, %v2040_v0  ;;  %12587 = vmatmul.mubr.msk.f32.vlgmr.msra.gmra.mrb[212].mxu0 %vm779_vm6, %v10189_v62  ;;  %v10224_v0 = vld [vmem:[%s18713_s4 + $0x350] sm:$0xff] }
 0x456   :  { %14309 = vmatpush3.bf16.msra.mxu0 %v15206_v48  ;;  %12177 = vmatprep.mubr.msk.f32.mxu1 %vm14784_vm4, %v14785_v44 }
 0x457   :  { %12589 = vmatprep.mubr.msk.f32.mxu0 %vm14784_vm4, %v14785_v44  ;;  %14310 = vmatprep.subr.bf16.mxu0 %v14783_v43 }
 0x458   :  { %v2045_v3 = vpop.f32.mrb[108].mxu0 }
 0x459   :  { %v12150_v7 = vpop.f32.mrb[109].mxu0  ;;  %12178 = vmatmul.mubr.msk.f32.gmra.mrb[116].mxu1 %vm1067_vm7, %v2045_v3  ;;  %12590 = vmatmul.mubr.msk.f32.gmra.mrb[214].mxu0 %vm779_vm6, %v10190_v2  ;;  %v10225_v3 = vld [vmem:[%s18713_s4 + $0x358] sm:$0xff] }
 0x45a   :  { %14312 = vmatpush3.bf16.msra.mxu0 %v15212_v45  ;;  %12180 = vmatprep.mubr.msk.f32.mxu1 %vm14784_vm4, %v14785_v44 }
 0x45b   :  { %12592 = vmatprep.mubr.msk.f32.mxu0 %vm14784_vm4, %v14785_v44  ;;  %14313 = vmatprep.subr.bf16.mxu0 %v14783_v43 }
 0x45c   :  { %v2050_v9 = vpop.f32.mrb[110].mxu0 }
 0x45d   :  { %v12153_v10 = vpop.f32.mrb[111].mxu0  ;;  %12181 = vmatmul.mubr.msk.f32.gmra.mrb[118].mxu1 %vm1067_vm7, %v2050_v9  ;;  %12593 = vmatmul.mubr.msk.f32.gmra.mrb[216].mxu0 %vm779_vm6, %v10191_v8  ;;  %v10123_v8 = vld [vmem:[%s18714_s5 + $0x38] sm:$0xff] }
 0x45e   :  { %14315 = vmatpush3.bf16.msra.mxu0 %v15218_v61  ;;  %12183 = vmatprep.mubr.msk.f32.mxu1 %vm14784_vm4, %v14785_v44  ;;  %v10245_v10 = vld [vmem:[%s18713_s4 + $0x360] sm:$0xff] }
 0x45f   :  { %12595 = vmatprep.mubr.msk.f32.mxu0 %vm14784_vm4, %v14785_v44  ;;  %14316 = vmatprep.subr.bf16.mxu0 %v14783_v43 }
 0x460   :  { %v2055_v14 = vpop.f32.mrb[112].mxu0 }
 0x461   :  { %v12156_v63 = vpop.f32.mrb[113].mxu0  ;;  %12184 = vmatmul.mubr.msk.f32.gmra.mrb[120].mxu1 %vm1067_vm7, %v2055_v14  ;;  %12596 = vmatmul.mubr.msk.f32.gmra.mrb[218].mxu0 %vm779_vm6, %v10192_v11 }
 0x462   :  { %14318 = vmatpush3.bf16.msra.mxu0 %v15224_v5  ;;  %12186 = vmatprep.mubr.msk.f32.mxu1 %vm14784_vm4, %v14785_v44  ;;  %v10246_v63 = vld [vmem:[%s18713_s4 + $0x368] sm:$0xff] }
 0x463   :  { %12598 = vmatprep.mubr.msk.f32.mxu0 %vm14784_vm4, %v14785_v44  ;;  %12658 = vmatprep.subr.mxu0 %v14785_v44 }
 0x464   :  { %v2060_v16 = vpop.f32.mrb[114].mxu0 }
 0x465   :  { %v12159_v17 = vpop.f32.mrb[115].mxu0  ;;  %12187 = vmatmul.mubr.msk.f32.gmra.mrb[122].mxu1 %vm1067_vm7, %v2060_v16  ;;  %12599 = vmatmul.mubr.msk.f32.gmra.mrb[220].mxu0 %vm779_vm6, %v10193_v15 }
 0x466   :  { %12659 = vmatpush3.msra.mxu0 %v15226_v56  ;;  %12189 = vmatprep.mubr.msk.f32.mxu1 %vm14784_vm4, %v14785_v44  ;;  %v10247_v17 = vld [vmem:[%s18713_s4 + $0x370] sm:$0xff] }
 0x467   :  { %12601 = vmatprep.mubr.msk.f32.mxu0 %vm14784_vm4, %v14785_v44  ;;  %14319 = vmatprep.subr.bf16.mxu0 %v14783_v43 }
 0x468   :  { %v2065_v19 = vpop.f32.mrb[116].mxu0 }
 0x469   :  { %v12162_v21 = vpop.f32.mrb[117].mxu0  ;;  %12190 = vmatmul.mubr.msk.f32.gmra.mrb[124].mxu1 %vm1067_vm7, %v2065_v19  ;;  %12602 = vmatmul.mubr.msk.f32.gmra.mrb[222].mxu0 %vm779_vm6, %v10194_v18 }
 0x46a   :  { %12192 = vmatprep.mubr.msk.f32.mxu1 %vm14784_vm4, %v14785_v44  ;;  %12604 = vmatprep.mubr.msk.f32.mxu0 %vm14784_vm4, %v14785_v44  ;;  %v10248_v21 = vld [vmem:[%s18713_s4 + $0x378] sm:$0xff] }
 0x46c   :  { %v2070_v23 = vpop.f32.mrb[118].mxu0 }
 0x46d   :  { %v12165_v25 = vpop.f32.mrb[119].mxu0  ;;  %12193 = vmatmul.mubr.msk.f32.gmra.mrb[126].mxu1 %vm1067_vm7, %v2070_v23  ;;  %12605 = vmatmul.mubr.msk.f32.gmra.mrb[224].mxu0 %vm779_vm6, %v10195_v22 }
 0x46e   :  { %12195 = vmatprep.mubr.msk.f32.mxu1 %vm14784_vm4, %v14785_v44  ;;  %12607 = vmatprep.mubr.msk.f32.mxu0 %vm14784_vm4, %v14785_v44  ;;  %v10249_v25 = vld [vmem:[%s18713_s4 + $0x380] sm:$0xff] }
 0x470   :  { %v2075_v13 = vpop.f32.mrb[120].mxu0 }
 0x471   :  { %v12168_v29 = vpop.f32.mrb[121].mxu0  ;;  %12196 = vmatmul.mubr.msk.f32.gmra.mrb[128].mxu1 %vm1067_vm7, %v2075_v13  ;;  %12608 = vmatmul.mubr.msk.f32.gmra.mrb[226].mxu0 %vm779_vm6, %v10196_v26 }
 0x472   :  { %12245 = vmatprep.mubr.msk.f32.mxu1 %vm14784_vm4, %v14785_v44  ;;  %12610 = vmatprep.mubr.msk.f32.mxu0 %vm14784_vm4, %v14785_v44  ;;  %v10250_v29 = vld [vmem:[%s18713_s4 + $0x388] sm:$0xff] }
 0x474   :  { %v2330_v31 = vpop.f32.mrb[122].mxu0 }
 0x475   :  { %v12218_v35 = vpop.f32.mrb[123].mxu0  ;;  %12246 = vmatmul.mubr.msk.f32.vlgmr.msra.gmra.mrb[130].mxu1 %vm1067_vm7, %v2330_v31  ;;  %12611 = vmatmul.mubr.msk.f32.gmra.mrb[228].mxu0 %vm779_vm6, %v10197_v30 }
 0x476   :  { %12248 = vmatprep.mubr.msk.f32.mxu1 %vm14784_vm4, %v14785_v44  ;;  %12660 = vmatprep.mubr.msk.f32.mxu0 %vm14784_vm4, %v14785_v44 }
 0x477   :  { %12318 = vmatpush3.msra.mxu1 %v10095_v32  ;;  %v10251_v32 = vld [vmem:[%s18713_s4 + $0x390] sm:$0xff] }
 0x478   :  { %v2335_v28 = vpop.f32.mrb[124].mxu0  ;;  %12391 = vmatprep.subr.mxu1 %v14785_v44 }
 0x479   :  { %v12221_v36 = vpop.f32.mrb[125].mxu0  ;;  %12249 = vmatmul.mubr.msk.f32.gmra.mrb[132].mxu1 %vm1067_vm7, %v2335_v28  ;;  %12661 = vmatmul.mubr.msk.f32.vlgmr.msra.gmra.mrb[230].mxu0 %vm779_vm6, %v10217_v20  ;;  %v10252_v28 = vld [vmem:[%s18713_s4 + $0x398] sm:$0xff] }
 0x47a   :  { %14321 = vmatpush3.bf16.msra.mxu0 %v15206_v48  ;;  %12251 = vmatprep.mubr.msk.f32.mxu1 %vm14784_vm4, %v14785_v44 }
 0x47b   :  { %12663 = vmatprep.mubr.msk.f32.mxu0 %vm14784_vm4, %v14785_v44  ;;  %14322 = vmatprep.subr.bf16.mxu0 %v14783_v43 }
 0x47c   :  { %v2340_v38 = vpop.f32.mrb[126].mxu0 }
 0x47d   :  { %v12224_v40 = vpop.f32.mrb[127].mxu0  ;;  %12252 = vmatmul.mubr.msk.f32.gmra.mrb[134].mxu1 %vm1067_vm7, %v2340_v38  ;;  %12664 = vmatmul.mubr.msk.f32.gmra.mrb[232].mxu0 %vm779_vm6, %v10218_v37  ;;  %v10253_v38 = vld [vmem:[%s18713_s4 + $0x3a0] sm:$0xff] }
 0x47e   :  { %14324 = vmatpush3.bf16.msra.mxu0 %v15212_v45  ;;  %12254 = vmatprep.mubr.msk.f32.mxu1 %vm14784_vm4, %v14785_v44 }
 0x47f   :  { %12666 = vmatprep.mubr.msk.f32.mxu0 %vm14784_vm4, %v14785_v44  ;;  %14325 = vmatprep.subr.bf16.mxu0 %v14783_v43 }
 0x480   :  { %v2345_v27 = vpop.f32.mrb[128].mxu0 }
 0x481   :  { %v12227_v46 = vpop.f32.mrb[129].mxu0  ;;  %12255 = vmatmul.mubr.msk.f32.gmra.mrb[136].mxu1 %vm1067_vm7, %v2345_v27  ;;  %12667 = vmatmul.mubr.msk.f32.gmra.mrb[234].mxu0 %vm779_vm6, %v10219_v42  ;;  %v10151_v42 = vld [vmem:[%s18714_s5 + $0x40] sm:$0xff] }
 0x482   :  { %14327 = vmatpush3.bf16.msra.mxu0 %v15218_v61  ;;  %12257 = vmatprep.mubr.msk.f32.mxu1 %vm14784_vm4, %v14785_v44  ;;  %v10273_v46 = vld [vmem:[%s18713_s4 + $0x3a8] sm:$0xff] }
 0x483   :  { %12669 = vmatprep.mubr.msk.f32.mxu0 %vm14784_vm4, %v14785_v44  ;;  %14328 = vmatprep.subr.bf16.mxu0 %v14783_v43 }
 0x484   :  { %v2350_v49 = vpop.f32.mrb[130].mxu0 }
 0x485   :  { %v12230_v50 = vpop.f32.mrb[131].mxu0  ;;  %12258 = vmatmul.mubr.msk.f32.gmra.mrb[138].mxu1 %vm1067_vm7, %v2350_v49  ;;  %12670 = vmatmul.mubr.msk.f32.gmra.mrb[236].mxu0 %vm779_vm6, %v10220_v47 }
 0x486   :  { %14330 = vmatpush3.bf16.msra.mxu0 %v15224_v5  ;;  %12260 = vmatprep.mubr.msk.f32.mxu1 %vm14784_vm4, %v14785_v44  ;;  %v10274_v50 = vld [vmem:[%s18713_s4 + $0x3b0] sm:$0xff] }
 0x487   :  { %12672 = vmatprep.mubr.msk.f32.mxu0 %vm14784_vm4, %v14785_v44  ;;  %12732 = vmatprep.subr.mxu0 %v14785_v44 }
 0x488   :  { %v2355_v41 = vpop.f32.mrb[132].mxu0 }
 0x489   :  { %v12233_v52 = vpop.f32.mrb[133].mxu0  ;;  %12261 = vmatmul.mubr.msk.f32.gmra.mrb[140].mxu1 %vm1067_vm7, %v2355_v41  ;;  %12673 = vmatmul.mubr.msk.f32.gmra.mrb[238].mxu0 %vm779_vm6, %v10221_v51 }
 0x48a   :  { %12733 = vmatpush3.msra.mxu0 %v15226_v56  ;;  %12263 = vmatprep.mubr.msk.f32.mxu1 %vm14784_vm4, %v14785_v44  ;;  %v10275_v52 = vld [vmem:[%s18713_s4 + $0x3b8] sm:$0xff] }
 0x48b   :  { %12675 = vmatprep.mubr.msk.f32.mxu0 %vm14784_vm4, %v14785_v44  ;;  %14331 = vmatprep.subr.bf16.mxu0 %v14783_v43 }
 0x48c   :  { %v2360_v55 = vpop.f32.mrb[134].mxu0 }
 0x48d   :  { %v12236_v57 = vpop.f32.mrb[135].mxu0  ;;  %12264 = vmatmul.mubr.msk.f32.gmra.mrb[142].mxu1 %vm1067_vm7, %v2360_v55  ;;  %12676 = vmatmul.mubr.msk.f32.gmra.mrb[240].mxu0 %vm779_vm6, %v10222_v54 }
 0x48e   :  { %12266 = vmatprep.mubr.msk.f32.mxu1 %vm14784_vm4, %v14785_v44  ;;  %12678 = vmatprep.mubr.msk.f32.mxu0 %vm14784_vm4, %v14785_v44  ;;  %v10276_v57 = vld [vmem:[%s18713_s4 + $0x3c0] sm:$0xff] }
 0x490   :  { %v2365_v59 = vpop.f32.mrb[136].mxu0 }
 0x491   :  { %v12239_v62 = vpop.f32.mrb[137].mxu0  ;;  %12267 = vmatmul.mubr.msk.f32.gmra.mrb[144].mxu1 %vm1067_vm7, %v2365_v59  ;;  %12679 = vmatmul.mubr.msk.f32.gmra.mrb[242].mxu0 %vm779_vm6, %v10223_v58 }
 0x492   :  { %12269 = vmatprep.mubr.msk.f32.mxu1 %vm14784_vm4, %v14785_v44  ;;  %12681 = vmatprep.mubr.msk.f32.mxu0 %vm14784_vm4, %v14785_v44  ;;  %v10277_v62 = vld [vmem:[%s18713_s4 + $0x3c8] sm:$0xff] }
 0x494   :  { %v2370_v1 = vpop.f32.mrb[138].mxu0 }
 0x495   :  { %v12242_v2 = vpop.f32.mrb[139].mxu0  ;;  %12270 = vmatmul.mubr.msk.f32.gmra.mrb[146].mxu1 %vm1067_vm7, %v2370_v1  ;;  %12682 = vmatmul.mubr.msk.f32.gmra.mrb[244].mxu0 %vm779_vm6, %v10224_v0 }
 0x496   :  { %12319 = vmatprep.mubr.msk.f32.mxu1 %vm14784_vm4, %v14785_v44  ;;  %12684 = vmatprep.mubr.msk.f32.mxu0 %vm14784_vm4, %v14785_v44  ;;  %v10278_v2 = vld [vmem:[%s18713_s4 + $0x3d0] sm:$0xff] }
 0x498   :  { %v2625_v7 = vpop.f32.mrb[140].mxu0 }
 0x499   :  { %v12292_v9 = vpop.f32.mrb[141].mxu0  ;;  %12320 = vmatmul.mubr.msk.f32.vlgmr.msra.gmra.mrb[148].mxu1 %vm1067_vm7, %v2625_v7  ;;  %12685 = vmatmul.mubr.msk.f32.gmra.mrb[246].mxu0 %vm779_vm6, %v10225_v3 }
 0x49a   :  { %12322 = vmatprep.mubr.msk.f32.mxu1 %vm14784_vm4, %v14785_v44  ;;  %12734 = vmatprep.mubr.msk.f32.mxu0 %vm14784_vm4, %v14785_v44 }
 0x49b   :  { %12392 = vmatpush3.msra.mxu1 %v10123_v8  ;;  %v10279_v8 = vld [vmem:[%s18713_s4 + $0x3d8] sm:$0xff] }
 0x49c   :  { %v2630_v11 = vpop.f32.mrb[142].mxu0  ;;  %12465 = vmatprep.subr.mxu1 %v14785_v44 }
 0x49d   :  { %v12295_v14 = vpop.f32.mrb[143].mxu0  ;;  %12323 = vmatmul.mubr.msk.f32.gmra.mrb[150].mxu1 %vm1067_vm7, %v2630_v11  ;;  %12735 = vmatmul.mubr.msk.f32.vlgmr.msra.gmra.mrb[248].mxu0 %vm779_vm6, %v10245_v10  ;;  %v10280_v11 = vld [vmem:[%s18713_s4 + $0x3e0] sm:$0xff] }
 0x49e   :  { %14333 = vmatpush3.bf16.msra.mxu0 %v15206_v48  ;;  %12325 = vmatprep.mubr.msk.f32.mxu1 %vm14784_vm4, %v14785_v44 }
 0x49f   :  { %12737 = vmatprep.mubr.msk.f32.mxu0 %vm14784_vm4, %v14785_v44  ;;  %14334 = vmatprep.subr.bf16.mxu0 %v14783_v43 }
 0x4a0   :  { %v2635_v15 = vpop.f32.mrb[144].mxu0 }
 0x4a1   :  { %v12298_v16 = vpop.f32.mrb[145].mxu0  ;;  %12326 = vmatmul.mubr.msk.f32.gmra.mrb[152].mxu1 %vm1067_vm7, %v2635_v15  ;;  %12738 = vmatmul.mubr.msk.f32.gmra.mrb[250].mxu0 %vm779_vm6, %v10246_v63 }
 0x4a2   :  { %14336 = vmatpush3.bf16.msra.mxu0 %v15212_v45  ;;  %12328 = vmatprep.mubr.msk.f32.mxu1 %vm14784_vm4, %v14785_v44 }
 0x4a3   :  { %12740 = vmatprep.mubr.msk.f32.mxu0 %vm14784_vm4, %v14785_v44  ;;  %14337 = vmatprep.subr.bf16.mxu0 %v14783_v43 }
 0x4a4   :  { %v2640_v18 = vpop.f32.mrb[146].mxu0 }
 0x4a5   :  { %v12301_v19 = vpop.f32.mrb[147].mxu0  ;;  %12329 = vmatmul.mubr.msk.f32.gmra.mrb[154].mxu1 %vm1067_vm7, %v2640_v18  ;;  %12741 = vmatmul.mubr.msk.f32.gmra.mrb[252].mxu0 %vm779_vm6, %v10247_v17  ;;  %v10281_v18 = vld [vmem:[%s18713_s4 + $0x3e8] sm:$0xff] }
 0x4a6   :  { %14339 = vmatpush3.bf16.msra.mxu0 %v15218_v61  ;;  %12331 = vmatprep.mubr.msk.f32.mxu1 %vm14784_vm4, %v14785_v44 }
 0x4a7   :  { %12743 = vmatprep.mubr.msk.f32.mxu0 %vm14784_vm4, %v14785_v44  ;;  %14340 = vmatprep.subr.bf16.mxu0 %v14783_v43 }
 0x4a8   :  { %v2645_v22 = vpop.f32.mrb[148].mxu0 }
 0x4a9   :  { %v12304_v23 = vpop.f32.mrb[149].mxu0  ;;  %12332 = vmatmul.mubr.msk.f32.gmra.mrb[156].mxu1 %vm1067_vm7, %v2645_v22  ;;  %12744 = vmatmul.mubr.msk.f32.gmra.mrb[254].mxu0 %vm779_vm6, %v10248_v21 }
 0x4aa   :  { %14342 = vmatpush3.bf16.msra.mxu0 %v15224_v5  ;;  %12334 = vmatprep.mubr.msk.f32.mxu1 %vm14784_vm4, %v14785_v44 }
 0x4ab   :  { %12746 = vmatprep.mubr.msk.f32.mxu0 %vm14784_vm4, %v14785_v44  ;;  %12806 = vmatprep.subr.mxu0 %v14785_v44 }
 0x4ac   :  { %v2650_v26 = vpop.f32.mrb[150].mxu0 }
 0x4ad   :  { %v12307_v13 = vpop.f32.mrb[151].mxu0  ;;  %12335 = vmatmul.mubr.msk.f32.gmra.mrb[158].mxu1 %vm1067_vm7, %v2650_v26  ;;  %12747 = vmatmul.mubr.msk.f32.gmra.mrb[0].mxu0 %vm779_vm6, %v10249_v25  ;;  %v10301_v26 = vld [vmem:[%s18713_s4 + $0x3f0] sm:$0xff] }
 0x4ae   :  { %12807 = vmatpush3.msra.mxu0 %v15226_v56  ;;  %12337 = vmatprep.mubr.msk.f32.mxu1 %vm14784_vm4, %v14785_v44 }
 0x4af   :  { %12749 = vmatprep.mubr.msk.f32.mxu0 %vm14784_vm4, %v14785_v44  ;;  %14343 = vmatprep.subr.bf16.mxu0 %v14783_v43 }
 0x4b0   :  { %v2655_v30 = vpop.f32.mrb[152].mxu0 }
 0x4b1   :  { %v12310_v31 = vpop.f32.mrb[153].mxu0  ;;  %12338 = vmatmul.mubr.msk.f32.gmra.mrb[160].mxu1 %vm1067_vm7, %v2655_v30  ;;  %12750 = vmatmul.mubr.msk.f32.gmra.mrb[2].mxu0 %vm779_vm6, %v10250_v29 }
 0x4b2   :  { %12340 = vmatprep.mubr.msk.f32.mxu1 %vm14784_vm4, %v14785_v44  ;;  %12752 = vmatprep.mubr.msk.f32.mxu0 %vm14784_vm4, %v14785_v44 }
 0x4b4   :  { %v2660_v35 = vpop.f32.mrb[154].mxu0 }
 0x4b5   :  { %v12313_v20 = vpop.f32.mrb[155].mxu0  ;;  %12341 = vmatmul.mubr.msk.f32.gmra.mrb[162].mxu1 %vm1067_vm7, %v2660_v35  ;;  %12753 = vmatmul.mubr.msk.f32.gmra.mrb[4].mxu0 %vm779_vm6, %v10251_v32  ;;  %v10302_v32 = vld [vmem:[%s18713_s4 + $0x3f8] sm:$0xff] }
 0x4b6   :  { %12343 = vmatprep.mubr.msk.f32.mxu1 %vm14784_vm4, %v14785_v44  ;;  %12755 = vmatprep.mubr.msk.f32.mxu0 %vm14784_vm4, %v14785_v44 }
 0x4b8   :  { %v2665_v36 = vpop.f32.mrb[156].mxu0 }
 0x4b9   :  { %v12316_v37 = vpop.f32.mrb[157].mxu0  ;;  %12344 = vmatmul.mubr.msk.f32.gmra.mrb[164].mxu1 %vm1067_vm7, %v2665_v36  ;;  %12756 = vmatmul.mubr.msk.f32.gmra.mrb[6].mxu0 %vm779_vm6, %v10252_v28 }
 0x4ba   :  { %12393 = vmatprep.mubr.msk.f32.mxu1 %vm14784_vm4, %v14785_v44  ;;  %12758 = vmatprep.mubr.msk.f32.mxu0 %vm14784_vm4, %v14785_v44  ;;  %v10303_v37 = vld [vmem:[%s18713_s4 + $0x400] sm:$0xff] }
 0x4bc   :  { %v2920_v40 = vpop.f32.mrb[158].mxu0 }
 0x4bd   :  { %v12366_v27 = vpop.f32.mrb[159].mxu0  ;;  %12394 = vmatmul.mubr.msk.f32.vlgmr.msra.gmra.mrb[166].mxu1 %vm1067_vm7, %v2920_v40  ;;  %12759 = vmatmul.mubr.msk.f32.gmra.mrb[8].mxu0 %vm779_vm6, %v10253_v38 }
 0x4be   :  { %12396 = vmatprep.mubr.msk.f32.mxu1 %vm14784_vm4, %v14785_v44  ;;  %12808 = vmatprep.mubr.msk.f32.mxu0 %vm14784_vm4, %v14785_v44 }
 0x4bf   :  { %12466 = vmatpush3.msra.mxu1 %v10151_v42 }
 0x4c0   :  { %v2925_v47 = vpop.f32.mrb[160].mxu0  ;;  %12539 = vmatprep.subr.mxu1 %v14785_v44 }
 0x4c1   :  { %v12369_v49 = vpop.f32.mrb[161].mxu0  ;;  %12397 = vmatmul.mubr.msk.f32.gmra.mrb[168].mxu1 %vm1067_vm7, %v2925_v47  ;;  %12809 = vmatmul.mubr.msk.f32.vlgmr.msra.gmra.mrb[10].mxu0 %vm779_vm6, %v10273_v46  ;;  %v10304_v46 = vld [vmem:[%s18713_s4 + $0x408] sm:$0xff] }
 0x4c2   :  { %14345 = vmatpush3.bf16.msra.mxu0 %v15206_v48  ;;  %12399 = vmatprep.mubr.msk.f32.mxu1 %vm14784_vm4, %v14785_v44 }
 0x4c3   :  { %12811 = vmatprep.mubr.msk.f32.mxu0 %vm14784_vm4, %v14785_v44  ;;  %14346 = vmatprep.subr.bf16.mxu0 %v14783_v43 }
 0x4c4   :  { %v2930_v51 = vpop.f32.mrb[162].mxu0 }
 0x4c5   :  { %v12372_v41 = vpop.f32.mrb[163].mxu0  ;;  %12400 = vmatmul.mubr.msk.f32.gmra.mrb[170].mxu1 %vm1067_vm7, %v2930_v51  ;;  %12812 = vmatmul.mubr.msk.f32.gmra.mrb[12].mxu0 %vm779_vm6, %v10274_v50 }
 0x4c6   :  { %14348 = vmatpush3.bf16.msra.mxu0 %v15212_v45  ;;  %12402 = vmatprep.mubr.msk.f32.mxu1 %vm14784_vm4, %v14785_v44  ;;  %v10305_v41 = vld [vmem:[%s18713_s4 + $0x410] sm:$0xff] }
 0x4c7   :  { %12814 = vmatprep.mubr.msk.f32.mxu0 %vm14784_vm4, %v14785_v44  ;;  %14349 = vmatprep.subr.bf16.mxu0 %v14783_v43 }
 0x4c8   :  { %v2935_v54 = vpop.f32.mrb[164].mxu0 }
 0x4c9   :  { %v12375_v55 = vpop.f32.mrb[165].mxu0  ;;  %12403 = vmatmul.mubr.msk.f32.gmra.mrb[172].mxu1 %vm1067_vm7, %v2935_v54  ;;  %12815 = vmatmul.mubr.msk.f32.gmra.mrb[14].mxu0 %vm779_vm6, %v10275_v52 }
 0x4ca   :  { %14351 = vmatpush3.bf16.msra.mxu0 %v15218_v61  ;;  %12405 = vmatprep.mubr.msk.f32.mxu1 %vm14784_vm4, %v14785_v44 }
 0x4cb   :  { %12817 = vmatprep.mubr.msk.f32.mxu0 %vm14784_vm4, %v14785_v44  ;;  %14352 = vmatprep.subr.bf16.mxu0 %v14783_v43 }
 0x4cc   :  { %v2940_v58 = vpop.f32.mrb[166].mxu0 }
 0x4cd   :  { %v12378_v59 = vpop.f32.mrb[167].mxu0  ;;  %12406 = vmatmul.mubr.msk.f32.gmra.mrb[174].mxu1 %vm1067_vm7, %v2940_v58  ;;  %12818 = vmatmul.mubr.msk.f32.gmra.mrb[16].mxu0 %vm779_vm6, %v10276_v57  ;;  %v10306_v58 = vld [vmem:[%s18713_s4 + $0x418] sm:$0xff] }
 0x4ce   :  { %14354 = vmatpush3.bf16.msra.mxu0 %v15224_v5  ;;  %12408 = vmatprep.mubr.msk.f32.mxu1 %vm14784_vm4, %v14785_v44 }
 0x4cf   :  { %12820 = vmatprep.mubr.msk.f32.mxu0 %vm14784_vm4, %v14785_v44  ;;  %12880 = vmatprep.subr.mxu0 %v14785_v44 }
 0x4d0   :  { %v2945_v0 = vpop.f32.mrb[168].mxu0 }
 0x4d1   :  { %v12381_v1 = vpop.f32.mrb[169].mxu0  ;;  %12409 = vmatmul.mubr.msk.f32.gmra.mrb[176].mxu1 %vm1067_vm7, %v2945_v0  ;;  %12821 = vmatmul.mubr.msk.f32.gmra.mrb[18].mxu0 %vm779_vm6, %v10277_v62 }
 0x4d2   :  { %12881 = vmatpush3.msra.mxu0 %v15226_v56  ;;  %12411 = vmatprep.mubr.msk.f32.mxu1 %vm14784_vm4, %v14785_v44 }
 0x4d3   :  { %12823 = vmatprep.mubr.msk.f32.mxu0 %vm14784_vm4, %v14785_v44  ;;  %14355 = vmatprep.subr.bf16.mxu0 %v14783_v43 }
 0x4d4   :  { %v2950_v3 = vpop.f32.mrb[170].mxu0 }
 0x4d5   :  { %v12384_v7 = vpop.f32.mrb[171].mxu0  ;;  %12412 = vmatmul.mubr.msk.f32.gmra.mrb[178].mxu1 %vm1067_vm7, %v2950_v3  ;;  %12824 = vmatmul.mubr.msk.f32.gmra.mrb[20].mxu0 %vm779_vm6, %v10278_v2  ;;  %v10307_v2 = vld [vmem:[%s18713_s4 + $0x420] sm:$0xff] }
 0x4d6   :  { %12414 = vmatprep.mubr.msk.f32.mxu1 %vm14784_vm4, %v14785_v44  ;;  %12826 = vmatprep.mubr.msk.f32.mxu0 %vm14784_vm4, %v14785_v44 }
 0x4d8   :  { %v2955_v9 = vpop.f32.mrb[172].mxu0 }
 0x4d9   :  { %v12387_v10 = vpop.f32.mrb[173].mxu0  ;;  %12415 = vmatmul.mubr.msk.f32.gmra.mrb[180].mxu1 %vm1067_vm7, %v2955_v9  ;;  %12827 = vmatmul.mubr.msk.f32.gmra.mrb[22].mxu0 %vm779_vm6, %v10279_v8 }
 0x4da   :  { %12417 = vmatprep.mubr.msk.f32.mxu1 %vm14784_vm4, %v14785_v44  ;;  %12829 = vmatprep.mubr.msk.f32.mxu0 %vm14784_vm4, %v14785_v44  ;;  %v10308_v10 = vld [vmem:[%s18713_s4 + $0x428] sm:$0xff] }
 0x4dc   :  { %v1584_v14 = vpop.f32.mrb[76].mxu1  ;;  %v2960_v63 = vpop.f32.mrb[174].mxu0 }
 0x4dd   :  { %v16430_v15 = vadd.f32 %v1584_v14, %v15866_v33  ;;  %v12025_v16 = vpop.f32.mrb[77].mxu1  ;;  %v12390_v17 = vpop.f32.mrb[175].mxu0  ;;  %12418 = vmatmul.mubr.msk.f32.gmra.mrb[182].mxu1 %vm1067_vm7, %v2960_v63  ;;  %12830 = vmatmul.mubr.msk.f32.gmra.mrb[24].mxu0 %vm779_vm6, %v10280_v11  ;;  %v10179_v33 = vld [vmem:[%s18714_s5 + $0x48] sm:$0xff] }
 0x4de   :  { %12467 = vmatprep.mubr.msk.f32.mxu1 %vm14784_vm4, %v14785_v44  ;;  %12832 = vmatprep.mubr.msk.f32.mxu0 %vm14784_vm4, %v14785_v44  ;;  %v10309_v17 = vld [vmem:[%s18713_s4 + $0x430] sm:$0xff] }
 0x4e0   :  { %v1589_v19 = vpop.f32.mrb[78].mxu1  ;;  %v3215_v21 = vpop.f32.mrb[176].mxu0 }
 0x4e1   :  { %v16445_v22 = vadd.f32 %v1589_v19, %v15880_v39  ;;  %v12028_v23 = vpop.f32.mrb[79].mxu1  ;;  %v12440_v25 = vpop.f32.mrb[177].mxu0  ;;  %12468 = vmatmul.mubr.msk.f32.vlgmr.msra.gmra.mrb[184].mxu1 %vm1067_vm7, %v3215_v21  ;;  %12833 = vmatmul.mubr.msk.f32.gmra.mrb[26].mxu0 %vm779_vm6, %v10281_v18 }
 0x4e2   :  { %12470 = vmatprep.mubr.msk.f32.mxu1 %vm14784_vm4, %v14785_v44  ;;  %12882 = vmatprep.mubr.msk.f32.mxu0 %vm14784_vm4, %v14785_v44  ;;  %v10329_v25 = vld [vmem:[%s18713_s4 + $0x438] sm:$0xff] }
 0x4e3   :  { %12540 = vmatpush3.msra.mxu1 %v10179_v33 }
 0x4e4   :  { %v1594_v13 = vpop.f32.mrb[80].mxu1  ;;  %v3220_v39 = vpop.f32.mrb[178].mxu0  ;;  %12613 = vmatprep.subr.mxu1 %v14785_v44 }
 0x4e5   :  { %v16458_v29 = vadd.f32 %v1594_v13, %v15894_v34  ;;  %v12031_v30 = vpop.f32.mrb[81].mxu1  ;;  %v12443_v31 = vpop.f32.mrb[179].mxu0  ;;  %12471 = vmatmul.mubr.msk.f32.gmra.mrb[186].mxu1 %vm1067_vm7, %v3220_v39  ;;  %12883 = vmatmul.mubr.msk.f32.vlgmr.msra.gmra.mrb[28].mxu0 %vm779_vm6, %v10301_v26 }
 0x4e6   :  { %14357 = vmatpush3.bf16.msra.mxu0 %v15206_v48  ;;  %12473 = vmatprep.mubr.msk.f32.mxu1 %vm14784_vm4, %v14785_v44  ;;  %v10330_v31 = vld [vmem:[%s18713_s4 + $0x440] sm:$0xff] }
 0x4e7   :  { %12885 = vmatprep.mubr.msk.f32.mxu0 %vm14784_vm4, %v14785_v44  ;;  %14358 = vmatprep.subr.bf16.mxu0 %v14783_v43 }
 0x4e8   :  { %v1599_v34 = vpop.f32.mrb[82].mxu1  ;;  %v3225_v35 = vpop.f32.mrb[180].mxu0 }
 0x4e9   :  { %v16472_v20 = vadd.f32 %v1599_v34, %v15908_v53  ;;  %v12034_v28 = vpop.f32.mrb[83].mxu1  ;;  %v12446_v36 = vpop.f32.mrb[181].mxu0  ;;  %12474 = vmatmul.mubr.msk.f32.gmra.mrb[188].mxu1 %vm1067_vm7, %v3225_v35  ;;  %12886 = vmatmul.mubr.msk.f32.gmra.mrb[30].mxu0 %vm779_vm6, %v10302_v32 }
 0x4ea   :  { %14360 = vmatpush3.bf16.msra.mxu0 %v15212_v45  ;;  %12476 = vmatprep.mubr.msk.f32.mxu1 %vm14784_vm4, %v14785_v44  ;;  %v10331_v36 = vld [vmem:[%s18713_s4 + $0x448] sm:$0xff] }
 0x4eb   :  { %12888 = vmatprep.mubr.msk.f32.mxu0 %vm14784_vm4, %v14785_v44  ;;  %14361 = vmatprep.subr.bf16.mxu0 %v14783_v43 }
 0x4ec   :  { %v1604_v53 = vpop.f32.mrb[84].mxu1  ;;  %v3230_v38 = vpop.f32.mrb[182].mxu0 }
 0x4ed   :  { %v16486_v40 = vadd.f32 %v1604_v53, %v15922_v60  ;;  %v12037_v42 = vpop.f32.mrb[85].mxu1  ;;  %v12449_v27 = vpop.f32.mrb[183].mxu0  ;;  %12477 = vmatmul.mubr.msk.f32.gmra.mrb[190].mxu1 %vm1067_vm7, %v3230_v38  ;;  %12889 = vmatmul.mubr.msk.f32.gmra.mrb[32].mxu0 %vm779_vm6, %v10303_v37 }
 0x4ee   :  { %14363 = vmatpush3.bf16.msra.mxu0 %v15218_v61  ;;  %12479 = vmatprep.mubr.msk.f32.mxu1 %vm14784_vm4, %v14785_v44  ;;  %v10332_v27 = vld [vmem:[%s18713_s4 + $0x450] sm:$0xff] }
 0x4ef   :  { %12891 = vmatprep.mubr.msk.f32.mxu0 %vm14784_vm4, %v14785_v44  ;;  %14364 = vmatprep.subr.bf16.mxu0 %v14783_v43 }
 0x4f0   :  { %v1609_v60 = vpop.f32.mrb[86].mxu1  ;;  %v3235_v47 = vpop.f32.mrb[184].mxu0 }
 0x4f1   :  { %v16500_v49 = vadd.f32 %v1609_v60, %v15934_v4  ;;  %v12040_v50 = vpop.f32.mrb[87].mxu1  ;;  %v12452_v51 = vpop.f32.mrb[185].mxu0  ;;  %12480 = vmatmul.mubr.msk.f32.gmra.mrb[192].mxu1 %vm1067_vm7, %v3235_v47  ;;  %12892 = vmatmul.mubr.msk.f32.gmra.mrb[34].mxu0 %vm779_vm6, %v10304_v46 }
 0x4f2   :  { %14366 = vmatpush3.bf16.msra.mxu0 %v15224_v5  ;;  %12482 = vmatprep.mubr.msk.f32.mxu1 %vm14784_vm4, %v14785_v44  ;;  %v10333_v51 = vld [vmem:[%s18713_s4 + $0x458] sm:$0xff] }
 0x4f3   :  { %12894 = vmatprep.mubr.msk.f32.mxu0 %vm14784_vm4, %v14785_v44  ;;  %12954 = vmatprep.subr.mxu0 %v14785_v44 }
 0x4f4   :  { %v1614_v4 = vpop.f32.mrb[88].mxu1  ;;  %v3240_v52 = vpop.f32.mrb[186].mxu0 }
 0x4f5   :  { %v16514_v54 = vadd.f32 %v1614_v4, %v15946_v12  ;;  %v12043_v55 = vpop.f32.mrb[89].mxu1  ;;  %v12455_v57 = vpop.f32.mrb[187].mxu0  ;;  %12483 = vmatmul.mubr.msk.f32.gmra.mrb[194].mxu1 %vm1067_vm7, %v3240_v52  ;;  %12895 = vmatmul.mubr.msk.f32.gmra.mrb[36].mxu0 %vm779_vm6, %v10305_v41 }
 0x4f6   :  { %12955 = vmatpush3.msra.mxu0 %v15226_v56  ;;  %12485 = vmatprep.mubr.msk.f32.mxu1 %vm14784_vm4, %v14785_v44  ;;  %v10334_v57 = vld [vmem:[%s18713_s4 + $0x460] sm:$0xff] }
 0x4f7   :  { %12897 = vmatprep.mubr.msk.f32.mxu0 %vm14784_vm4, %v14785_v44  ;;  %14367 = vmatprep.subr.bf16.mxu0 %v14783_v43 }
 0x4f8   :  { %v1619_v12 = vpop.f32.mrb[90].mxu1  ;;  %v3245_v59 = vpop.f32.mrb[188].mxu0 }
 0x4f9   :  { %v16528_v62 = vadd.f32 %v1619_v12, %v15973_v24  ;;  %v12046_v0 = vpop.f32.mrb[91].mxu1  ;;  %v12458_v1 = vpop.f32.mrb[189].mxu0  ;;  %12486 = vmatmul.mubr.msk.f32.gmra.mrb[196].mxu1 %vm1067_vm7, %v3245_v59  ;;  %12898 = vmatmul.mubr.msk.f32.gmra.mrb[38].mxu0 %vm779_vm6, %v10306_v58 }
 0x4fa   :  { %12488 = vmatprep.mubr.msk.f32.mxu1 %vm14784_vm4, %v14785_v44  ;;  %12900 = vmatprep.mubr.msk.f32.mxu0 %vm14784_vm4, %v14785_v44  ;;  %v10335_v1 = vld [vmem:[%s18713_s4 + $0x468] sm:$0xff] }
 0x4fc   :  { %v1624_v3 = vpop.f32.mrb[92].mxu1  ;;  %v3250_v7 = vpop.f32.mrb[190].mxu0 }
 0x4fd   :  { %v16540_v24 = vadd.f32 %v1624_v3, %v15987_v6  ;;  %v12049_v8 = vpop.f32.mrb[93].mxu1  ;;  %v12461_v9 = vpop.f32.mrb[191].mxu0  ;;  %12489 = vmatmul.mubr.msk.f32.gmra.mrb[198].mxu1 %vm1067_vm7, %v3250_v7  ;;  %12901 = vmatmul.mubr.msk.f32.gmra.mrb[40].mxu0 %vm779_vm6, %v10307_v2 }
 0x4fe   :  { %12491 = vmatprep.mubr.msk.f32.mxu1 %vm14784_vm4, %v14785_v44  ;;  %12903 = vmatprep.mubr.msk.f32.mxu0 %vm14784_vm4, %v14785_v44  ;;  %v10336_v9 = vld [vmem:[%s18713_s4 + $0x470] sm:$0xff] }
 0x500   :  { %v1879_v11 = vpop.f32.mrb[94].mxu1  ;;  %v3255_v14 = vpop.f32.mrb[192].mxu0 }
 0x501   :  { %v16552_v6 = vadd.f32 %v1879_v11, %v16430_v15  ;;  %v12099_v63 = vpop.f32.mrb[95].mxu1  ;;  %v12464_v16 = vpop.f32.mrb[193].mxu0  ;;  %12492 = vmatmul.mubr.msk.f32.gmra.mrb[200].mxu1 %vm1067_vm7, %v3255_v14  ;;  %12904 = vmatmul.mubr.msk.f32.gmra.mrb[42].mxu0 %vm779_vm6, %v10308_v10  ;;  %v10207_v15 = vld [vmem:[%s18714_s5 + $0x50] sm:$0xff] }
 0x502   :  { %12541 = vmatprep.mubr.msk.f32.mxu1 %vm14784_vm4, %v14785_v44  ;;  %12906 = vmatprep.mubr.msk.f32.mxu0 %vm14784_vm4, %v14785_v44  ;;  %v10337_v16 = vld [vmem:[%s18713_s4 + $0x478] sm:$0xff] }
 0x504   :  { %v1884_v18 = vpop.f32.mrb[96].mxu1  ;;  %v3510_v19 = vpop.f32.mrb[194].mxu0 }
 0x505   :  { %v16567_v21 = vadd.f32 %v1884_v18, %v16445_v22  ;;  %v12102_v33 = vpop.f32.mrb[97].mxu1  ;;  %v12514_v23 = vpop.f32.mrb[195].mxu0  ;;  %12542 = vmatmul.mubr.msk.f32.vlgmr.msra.gmra.mrb[202].mxu1 %vm1067_vm7, %v3510_v19  ;;  %12907 = vmatmul.mubr.msk.f32.gmra.mrb[44].mxu0 %vm779_vm6, %v10309_v17 }
 0x506   :  { %12544 = vmatprep.mubr.msk.f32.mxu1 %vm14784_vm4, %v14785_v44  ;;  %12956 = vmatprep.mubr.msk.f32.mxu0 %vm14784_vm4, %v14785_v44  ;;  %v10357_v23 = vld [vmem:[%s18713_s4 + $0x480] sm:$0xff] }
 0x507   :  { %12614 = vmatpush3.msra.mxu1 %v10207_v15 }
 0x508   :  { %v1889_v26 = vpop.f32.mrb[98].mxu1  ;;  %v3515_v22 = vpop.f32.mrb[196].mxu0  ;;  %12687 = vmatprep.subr.mxu1 %v14785_v44 }
 0x509   :  { %v16580_v13 = vadd.f32 %v1889_v26, %v16458_v29  ;;  %v12105_v39 = vpop.f32.mrb[99].mxu1  ;;  %v12517_v30 = vpop.f32.mrb[197].mxu0  ;;  %12545 = vmatmul.mubr.msk.f32.gmra.mrb[204].mxu1 %vm1067_vm7, %v3515_v22  ;;  %12957 = vmatmul.mubr.msk.f32.vlgmr.msra.gmra.mrb[46].mxu0 %vm779_vm6, %v10329_v25 }
 0x50a   :  { %14369 = vmatpush3.bf16.msra.mxu0 %v15206_v48  ;;  %12547 = vmatprep.mubr.msk.f32.mxu1 %vm14784_vm4, %v14785_v44  ;;  %v10358_v30 = vld [vmem:[%s18713_s4 + $0x488] sm:$0xff] }
 0x50b   :  { %12959 = vmatprep.mubr.msk.f32.mxu0 %vm14784_vm4, %v14785_v44  ;;  %14370 = vmatprep.subr.bf16.mxu0 %v14783_v43 }
 0x50c   :  { %v1894_v29 = vpop.f32.mrb[100].mxu1  ;;  %v3520_v32 = vpop.f32.mrb[198].mxu0 }
 0x50d   :  { %v16594_v34 = vadd.f32 %v1894_v29, %v16472_v20  ;;  %v12108_v35 = vpop.f32.mrb[101].mxu1  ;;  %v12520_v28 = vpop.f32.mrb[199].mxu0  ;;  %12548 = vmatmul.mubr.msk.f32.gmra.mrb[206].mxu1 %vm1067_vm7, %v3520_v32  ;;  %12960 = vmatmul.mubr.msk.f32.gmra.mrb[48].mxu0 %vm779_vm6, %v10330_v31 }
 0x50e   :  { %14372 = vmatpush3.bf16.msra.mxu0 %v15212_v45  ;;  %12550 = vmatprep.mubr.msk.f32.mxu1 %vm14784_vm4, %v14785_v44  ;;  %v10359_v28 = vld [vmem:[%s18713_s4 + $0x490] sm:$0xff] }
 0x50f   :  { %12962 = vmatprep.mubr.msk.f32.mxu0 %vm14784_vm4, %v14785_v44  ;;  %14373 = vmatprep.subr.bf16.mxu0 %v14783_v43 }
 0x510   :  { %v1899_v20 = vpop.f32.mrb[102].mxu1  ;;  %v3525_v37 = vpop.f32.mrb[200].mxu0 }
 0x511   :  { %v16608_v53 = vadd.f32 %v1899_v20, %v16486_v40  ;;  %v12111_v38 = vpop.f32.mrb[103].mxu1  ;;  %v12523_v42 = vpop.f32.mrb[201].mxu0  ;;  %12551 = vmatmul.mubr.msk.f32.gmra.mrb[208].mxu1 %vm1067_vm7, %v3525_v37  ;;  %12963 = vmatmul.mubr.msk.f32.gmra.mrb[50].mxu0 %vm779_vm6, %v10331_v36 }
 0x512   :  { %14375 = vmatpush3.bf16.msra.mxu0 %v15218_v61  ;;  %12553 = vmatprep.mubr.msk.f32.mxu1 %vm14784_vm4, %v14785_v44  ;;  %v10360_v42 = vld [vmem:[%s18713_s4 + $0x498] sm:$0xff] }
 0x513   :  { %12965 = vmatprep.mubr.msk.f32.mxu0 %vm14784_vm4, %v14785_v44  ;;  %14376 = vmatprep.subr.bf16.mxu0 %v14783_v43 }
 0x514   :  { %v1904_v40 = vpop.f32.mrb[104].mxu1  ;;  %v3530_v46 = vpop.f32.mrb[202].mxu0 }
 0x515   :  { %v16622_v60 = vadd.f32 %v1904_v40, %v16500_v49  ;;  %v12114_v47 = vpop.f32.mrb[105].mxu1  ;;  %v12526_v50 = vpop.f32.mrb[203].mxu0  ;;  %12554 = vmatmul.mubr.msk.f32.gmra.mrb[210].mxu1 %vm1067_vm7, %v3530_v46  ;;  %12966 = vmatmul.mubr.msk.f32.gmra.mrb[52].mxu0 %vm779_vm6, %v10332_v27 }
 0x516   :  { %14378 = vmatpush3.bf16.msra.mxu0 %v15224_v5  ;;  %12556 = vmatprep.mubr.msk.f32.mxu1 %vm14784_vm4, %v14785_v44  ;;  %v10361_v50 = vld [vmem:[%s18713_s4 + $0x4a0] sm:$0xff] }
 0x517   :  { %12968 = vmatprep.mubr.msk.f32.mxu0 %vm14784_vm4, %v14785_v44  ;;  %13028 = vmatprep.subr.mxu0 %v14785_v44 }
 0x518   :  { %v1909_v49 = vpop.f32.mrb[106].mxu1  ;;  %v3535_v41 = vpop.f32.mrb[204].mxu0 }
 0x519   :  { %v16636_v4 = vadd.f32 %v1909_v49, %v16514_v54  ;;  %v12117_v52 = vpop.f32.mrb[107].mxu1  ;;  %v12529_v55 = vpop.f32.mrb[205].mxu0  ;;  %12557 = vmatmul.mubr.msk.f32.gmra.mrb[212].mxu1 %vm1067_vm7, %v3535_v41  ;;  %12969 = vmatmul.mubr.msk.f32.gmra.mrb[54].mxu0 %vm779_vm6, %v10333_v51 }
 0x51a   :  { %13029 = vmatpush3.msra.mxu0 %v15226_v56  ;;  %12559 = vmatprep.mubr.msk.f32.mxu1 %vm14784_vm4, %v14785_v44  ;;  %v10362_v55 = vld [vmem:[%s18713_s4 + $0x4a8] sm:$0xff] }
 0x51b   :  { %12971 = vmatprep.mubr.msk.f32.mxu0 %vm14784_vm4, %v14785_v44  ;;  %14379 = vmatprep.subr.bf16.mxu0 %v14783_v43 }
 0x51c   :  { %v1914_v54 = vpop.f32.mrb[108].mxu1  ;;  %v3540_v58 = vpop.f32.mrb[206].mxu0 }
 0x51d   :  { %v16650_v12 = vadd.f32 %v1914_v54, %v16528_v62  ;;  %v12120_v59 = vpop.f32.mrb[109].mxu1  ;;  %v12532_v0 = vpop.f32.mrb[207].mxu0  ;;  %12560 = vmatmul.mubr.msk.f32.gmra.mrb[214].mxu1 %vm1067_vm7, %v3540_v58  ;;  %12972 = vmatmul.mubr.msk.f32.gmra.mrb[56].mxu0 %vm779_vm6, %v10334_v57 }
 0x51e   :  { %12562 = vmatprep.mubr.msk.f32.mxu1 %vm14784_vm4, %v14785_v44  ;;  %12974 = vmatprep.mubr.msk.f32.mxu0 %vm14784_vm4, %v14785_v44  ;;  %v10363_v0 = vld [vmem:[%s18713_s4 + $0x4b0] sm:$0xff] }
 0x520   :  { %v1919_v2 = vpop.f32.mrb[110].mxu1  ;;  %v3545_v3 = vpop.f32.mrb[208].mxu0 }
 0x521   :  { %v16662_v62 = vadd.f32 %v1919_v2, %v16540_v24  ;;  %v12123_v7 = vpop.f32.mrb[111].mxu1  ;;  %v12535_v8 = vpop.f32.mrb[209].mxu0  ;;  %12563 = vmatmul.mubr.msk.f32.gmra.mrb[216].mxu1 %vm1067_vm7, %v3545_v3  ;;  %12975 = vmatmul.mubr.msk.f32.gmra.mrb[58].mxu0 %vm779_vm6, %v10335_v1 }
 0x522   :  { %12565 = vmatprep.mubr.msk.f32.mxu1 %vm14784_vm4, %v14785_v44  ;;  %12977 = vmatprep.mubr.msk.f32.mxu0 %vm14784_vm4, %v14785_v44  ;;  %v10364_v8 = vld [vmem:[%s18713_s4 + $0x4b8] sm:$0xff] }
 0x524   :  { %v2174_v10 = vpop.f32.mrb[112].mxu1  ;;  %v3550_v11 = vpop.f32.mrb[210].mxu0 }
 0x525   :  { %v16674_v24 = vadd.f32 %v2174_v10, %v16552_v6  ;;  %v12173_v14 = vpop.f32.mrb[113].mxu1  ;;  %v12538_v63 = vpop.f32.mrb[211].mxu0  ;;  %12566 = vmatmul.mubr.msk.f32.gmra.mrb[218].mxu1 %vm1067_vm7, %v3550_v11  ;;  %12978 = vmatmul.mubr.msk.f32.gmra.mrb[60].mxu0 %vm779_vm6, %v10336_v9  ;;  %v10235_v6 = vld [vmem:[%s18714_s5 + $0x58] sm:$0xff] }
 0x526   :  { %12615 = vmatprep.mubr.msk.f32.mxu1 %vm14784_vm4, %v14785_v44  ;;  %12980 = vmatprep.mubr.msk.f32.mxu0 %vm14784_vm4, %v14785_v44  ;;  %v10365_v63 = vld [vmem:[%s18713_s4 + $0x4c0] sm:$0xff] }
 0x528   :  { %v2179_v17 = vpop.f32.mrb[114].mxu1  ;;  %v3805_v18 = vpop.f32.mrb[212].mxu0 }
 0x529   :  { %v16689_v19 = vadd.f32 %v2179_v17, %v16567_v21  ;;  %v12176_v15 = vpop.f32.mrb[115].mxu1  ;;  %v12588_v33 = vpop.f32.mrb[213].mxu0  ;;  %12616 = vmatmul.mubr.msk.f32.vlgmr.msra.gmra.mrb[220].mxu1 %vm1067_vm7, %v3805_v18  ;;  %12981 = vmatmul.mubr.msk.f32.gmra.mrb[62].mxu0 %vm779_vm6, %v10337_v16 }
 0x52a   :  { %12618 = vmatprep.mubr.msk.f32.mxu1 %vm14784_vm4, %v14785_v44  ;;  %13030 = vmatprep.mubr.msk.f32.mxu0 %vm14784_vm4, %v14785_v44  ;;  %v10385_v33 = vld [vmem:[%s18713_s4 + $0x4c8] sm:$0xff] }
 0x52b   :  { %12688 = vmatpush3.msra.mxu1 %v10235_v6 }
 0x52c   :  { %v2184_v25 = vpop.f32.mrb[116].mxu1  ;;  %v3810_v21 = vpop.f32.mrb[214].mxu0  ;;  %12761 = vmatprep.subr.mxu1 %v14785_v44 }
 0x52d   :  { %v16702_v26 = vadd.f32 %v2184_v25, %v16580_v13  ;;  %v12179_v22 = vpop.f32.mrb[117].mxu1  ;;  %v12591_v39 = vpop.f32.mrb[215].mxu0  ;;  %12619 = vmatmul.mubr.msk.f32.gmra.mrb[222].mxu1 %vm1067_vm7, %v3810_v21  ;;  %13031 = vmatmul.mubr.msk.f32.vlgmr.msra.gmra.mrb[64].mxu0 %vm779_vm6, %v10357_v23 }
 0x52e   :  { %14381 = vmatpush3.bf16.msra.mxu0 %v15206_v48  ;;  %12621 = vmatprep.mubr.msk.f32.mxu1 %vm14784_vm4, %v14785_v44  ;;  %v10386_v39 = vld [vmem:[%s18713_s4 + $0x4d0] sm:$0xff] }
 0x52f   :  { %13033 = vmatprep.mubr.msk.f32.mxu0 %vm14784_vm4, %v14785_v44  ;;  %14382 = vmatprep.subr.bf16.mxu0 %v14783_v43 }
 0x530   :  { %v2189_v13 = vpop.f32.mrb[118].mxu1  ;;  %v3815_v31 = vpop.f32.mrb[216].mxu0 }
 0x531   :  { %v16716_v29 = vadd.f32 %v2189_v13, %v16594_v34  ;;  %v12182_v32 = vpop.f32.mrb[119].mxu1  ;;  %v12594_v35 = vpop.f32.mrb[217].mxu0  ;;  %12622 = vmatmul.mubr.msk.f32.gmra.mrb[224].mxu1 %vm1067_vm7, %v3815_v31  ;;  %13034 = vmatmul.mubr.msk.f32.gmra.mrb[66].mxu0 %vm779_vm6, %v10358_v30 }
 0x532   :  { %14384 = vmatpush3.bf16.msra.mxu0 %v15212_v45  ;;  %12624 = vmatprep.mubr.msk.f32.mxu1 %vm14784_vm4, %v14785_v44  ;;  %v10387_v35 = vld [vmem:[%s18713_s4 + $0x4d8] sm:$0xff] }
 0x533   :  { %13036 = vmatprep.mubr.msk.f32.mxu0 %vm14784_vm4, %v14785_v44  ;;  %14385 = vmatprep.subr.bf16.mxu0 %v14783_v43 }
 0x534   :  { %v2194_v34 = vpop.f32.mrb[120].mxu1  ;;  %v3820_v36 = vpop.f32.mrb[218].mxu0 }
 0x535   :  { %v16730_v20 = vadd.f32 %v2194_v34, %v16608_v53  ;;  %v12185_v37 = vpop.f32.mrb[121].mxu1  ;;  %v12597_v38 = vpop.f32.mrb[219].mxu0  ;;  %12625 = vmatmul.mubr.msk.f32.gmra.mrb[226].mxu1 %vm1067_vm7, %v3820_v36  ;;  %13037 = vmatmul.mubr.msk.f32.gmra.mrb[68].mxu0 %vm779_vm6, %v10359_v28 }
 0x536   :  { %14387 = vmatpush3.bf16.msra.mxu0 %v15218_v61  ;;  %12627 = vmatprep.mubr.msk.f32.mxu1 %vm14784_vm4, %v14785_v44  ;;  %v10388_v38 = vld [vmem:[%s18713_s4 + $0x4e0] sm:$0xff] }
 0x537   :  { %13039 = vmatprep.mubr.msk.f32.mxu0 %vm14784_vm4, %v14785_v44  ;;  %14388 = vmatprep.subr.bf16.mxu0 %v14783_v43 }
 0x538   :  { %v2199_v53 = vpop.f32.mrb[122].mxu1  ;;  %v3825_v27 = vpop.f32.mrb[220].mxu0 }
 0x539   :  { %v16744_v40 = vadd.f32 %v2199_v53, %v16622_v60  ;;  %v12188_v46 = vpop.f32.mrb[123].mxu1  ;;  %v12600_v47 = vpop.f32.mrb[221].mxu0  ;;  %12628 = vmatmul.mubr.msk.f32.gmra.mrb[228].mxu1 %vm1067_vm7, %v3825_v27  ;;  %13040 = vmatmul.mubr.msk.f32.gmra.mrb[70].mxu0 %vm779_vm6, %v10360_v42 }
 0x53a   :  { %14390 = vmatpush3.bf16.msra.mxu0 %v15224_v5  ;;  %12630 = vmatprep.mubr.msk.f32.mxu1 %vm14784_vm4, %v14785_v44  ;;  %v10389_v47 = vld [vmem:[%s18713_s4 + $0x4e8] sm:$0xff] }
 0x53b   :  { %13042 = vmatprep.mubr.msk.f32.mxu0 %vm14784_vm4, %v14785_v44  ;;  %13102 = vmatprep.subr.mxu0 %v14785_v44 }
 0x53c   :  { %v2204_v60 = vpop.f32.mrb[124].mxu1  ;;  %v3830_v51 = vpop.f32.mrb[222].mxu0 }
 0x53d   :  { %v16758_v49 = vadd.f32 %v2204_v60, %v16636_v4  ;;  %v12191_v41 = vpop.f32.mrb[125].mxu1  ;;  %v12603_v52 = vpop.f32.mrb[223].mxu0  ;;  %12631 = vmatmul.mubr.msk.f32.gmra.mrb[230].mxu1 %vm1067_vm7, %v3830_v51  ;;  %13043 = vmatmul.mubr.msk.f32.gmra.mrb[72].mxu0 %vm779_vm6, %v10361_v50 }
 0x53e   :  { %13103 = vmatpush3.msra.mxu0 %v15226_v56  ;;  %12633 = vmatprep.mubr.msk.f32.mxu1 %vm14784_vm4, %v14785_v44  ;;  %v10390_v52 = vld [vmem:[%s18713_s4 + $0x4f0] sm:$0xff] }
 0x53f   :  { %13045 = vmatprep.mubr.msk.f32.mxu0 %vm14784_vm4, %v14785_v44  ;;  %14391 = vmatprep.subr.bf16.mxu0 %v14783_v43 }
 0x540   :  { %v2209_v4 = vpop.f32.mrb[126].mxu1  ;;  %v3835_v57 = vpop.f32.mrb[224].mxu0 }
 0x541   :  { %v16772_v54 = vadd.f32 %v2209_v4, %v16650_v12  ;;  %v12194_v58 = vpop.f32.mrb[127].mxu1  ;;  %v12606_v59 = vpop.f32.mrb[225].mxu0  ;;  %12634 = vmatmul.mubr.msk.f32.gmra.mrb[232].mxu1 %vm1067_vm7, %v3835_v57  ;;  %13046 = vmatmul.mubr.msk.f32.gmra.mrb[74].mxu0 %vm779_vm6, %v10362_v55 }
 0x542   :  { %12636 = vmatprep.mubr.msk.f32.mxu1 %vm14784_vm4, %v14785_v44  ;;  %13048 = vmatprep.mubr.msk.f32.mxu0 %vm14784_vm4, %v14785_v44  ;;  %v10391_v59 = vld [vmem:[%s18713_s4 + $0x4f8] sm:$0xff] }
 0x544   :  { %v2214_v1 = vpop.f32.mrb[128].mxu1  ;;  %v3840_v2 = vpop.f32.mrb[226].mxu0 }
 0x545   :  { %v16784_v12 = vadd.f32 %v2214_v1, %v16662_v62  ;;  %v12197_v3 = vpop.f32.mrb[129].mxu1  ;;  %v12609_v7 = vpop.f32.mrb[227].mxu0  ;;  %12637 = vmatmul.mubr.msk.f32.gmra.mrb[234].mxu1 %vm1067_vm7, %v3840_v2  ;;  %13049 = vmatmul.mubr.msk.f32.gmra.mrb[76].mxu0 %vm779_vm6, %v10363_v0 }
 0x546   :  { %12639 = vmatprep.mubr.msk.f32.mxu1 %vm14784_vm4, %v14785_v44  ;;  %13051 = vmatprep.mubr.msk.f32.mxu0 %vm14784_vm4, %v14785_v44  ;;  %v10392_v7 = vld [vmem:[%s18713_s4 + $0x500] sm:$0xff] }
 0x548   :  { %v2469_v9 = vpop.f32.mrb[130].mxu1  ;;  %v3845_v10 = vpop.f32.mrb[228].mxu0 }
 0x549   :  { %v16796_v62 = vadd.f32 %v2469_v9, %v16674_v24  ;;  %v12247_v11 = vpop.f32.mrb[131].mxu1  ;;  %v12612_v14 = vpop.f32.mrb[229].mxu0  ;;  %12640 = vmatmul.mubr.msk.f32.gmra.mrb[236].mxu1 %vm1067_vm7, %v3845_v10  ;;  %13052 = vmatmul.mubr.msk.f32.gmra.mrb[78].mxu0 %vm779_vm6, %v10364_v8  ;;  %v10263_v24 = vld [vmem:[%s18714_s5 + $0x60] sm:$0xff] }
 0x54a   :  { %12689 = vmatprep.mubr.msk.f32.mxu1 %vm14784_vm4, %v14785_v44  ;;  %13054 = vmatprep.mubr.msk.f32.mxu0 %vm14784_vm4, %v14785_v44  ;;  %v10393_v14 = vld [vmem:[%s18713_s4 + $0x508] sm:$0xff] }
 0x54c   :  { %v2474_v16 = vpop.f32.mrb[132].mxu1  ;;  %v4100_v17 = vpop.f32.mrb[230].mxu0 }
 0x54d   :  { %v16811_v18 = vadd.f32 %v2474_v16, %v16689_v19  ;;  %v12250_v6 = vpop.f32.mrb[133].mxu1  ;;  %v12662_v15 = vpop.f32.mrb[231].mxu0  ;;  %12690 = vmatmul.mubr.msk.f32.vlgmr.msra.gmra.mrb[238].mxu1 %vm1067_vm7, %v4100_v17  ;;  %13055 = vmatmul.mubr.msk.f32.gmra.mrb[80].mxu0 %vm779_vm6, %v10365_v63 }
 0x54e   :  { %12692 = vmatprep.mubr.msk.f32.mxu1 %vm14784_vm4, %v14785_v44  ;;  %13104 = vmatprep.mubr.msk.f32.mxu0 %vm14784_vm4, %v14785_v44  ;;  %v10413_v15 = vld [vmem:[%s18713_s4 + $0x510] sm:$0xff] }
 0x54f   :  { %12762 = vmatpush3.msra.mxu1 %v10263_v24 }
 0x550   :  { %v2479_v23 = vpop.f32.mrb[134].mxu1  ;;  %v4105_v19 = vpop.f32.mrb[232].mxu0  ;;  %12835 = vmatprep.subr.mxu1 %v14785_v44 }
 0x551   :  { %v16824_v25 = vadd.f32 %v2479_v23, %v16702_v26  ;;  %v12253_v21 = vpop.f32.mrb[135].mxu1  ;;  %v12665_v22 = vpop.f32.mrb[233].mxu0  ;;  %12693 = vmatmul.mubr.msk.f32.gmra.mrb[240].mxu1 %vm1067_vm7, %v4105_v19  ;;  %13105 = vmatmul.mubr.msk.f32.vlgmr.msra.gmra.mrb[82].mxu0 %vm779_vm6, %v10385_v33 }
 0x552   :  { %14393 = vmatpush3.bf16.msra.mxu0 %v15206_v48  ;;  %12695 = vmatprep.mubr.msk.f32.mxu1 %vm14784_vm4, %v14785_v44  ;;  %v10414_v22 = vld [vmem:[%s18713_s4 + $0x518] sm:$0xff] }
 0x553   :  { %13107 = vmatprep.mubr.msk.f32.mxu0 %vm14784_vm4, %v14785_v44  ;;  %14394 = vmatprep.subr.bf16.mxu0 %v14783_v43 }
 0x554   :  { %v2484_v26 = vpop.f32.mrb[136].mxu1  ;;  %v4110_v30 = vpop.f32.mrb[234].mxu0 }
 0x555   :  { %v16838_v13 = vadd.f32 %v2484_v26, %v16716_v29  ;;  %v12256_v31 = vpop.f32.mrb[137].mxu1  ;;  %v12668_v32 = vpop.f32.mrb[235].mxu0  ;;  %12696 = vmatmul.mubr.msk.f32.gmra.mrb[242].mxu1 %vm1067_vm7, %v4110_v30  ;;  %13108 = vmatmul.mubr.msk.f32.gmra.mrb[84].mxu0 %vm779_vm6, %v10386_v39 }
 0x556   :  { %14396 = vmatpush3.bf16.msra.mxu0 %v15212_v45  ;;  %12698 = vmatprep.mubr.msk.f32.mxu1 %vm14784_vm4, %v14785_v44  ;;  %v10415_v32 = vld [vmem:[%s18713_s4 + $0x520] sm:$0xff] }
 0x557   :  { %13110 = vmatprep.mubr.msk.f32.mxu0 %vm14784_vm4, %v14785_v44  ;;  %14397 = vmatprep.subr.bf16.mxu0 %v14783_v43 }
 0x558   :  { %v2489_v29 = vpop.f32.mrb[138].mxu1  ;;  %v4115_v28 = vpop.f32.mrb[236].mxu0 }
 0x559   :  { %v16852_v34 = vadd.f32 %v2489_v29, %v16730_v20  ;;  %v12259_v36 = vpop.f32.mrb[139].mxu1  ;;  %v12671_v37 = vpop.f32.mrb[237].mxu0  ;;  %12699 = vmatmul.mubr.msk.f32.gmra.mrb[244].mxu1 %vm1067_vm7, %v4115_v28  ;;  %13111 = vmatmul.mubr.msk.f32.gmra.mrb[86].mxu0 %vm779_vm6, %v10387_v35 }
 0x55a   :  { %14399 = vmatpush3.bf16.msra.mxu0 %v15218_v61  ;;  %12701 = vmatprep.mubr.msk.f32.mxu1 %vm14784_vm4, %v14785_v44  ;;  %v10416_v37 = vld [vmem:[%s18713_s4 + $0x528] sm:$0xff] }
 0x55b   :  { %13113 = vmatprep.mubr.msk.f32.mxu0 %vm14784_vm4, %v14785_v44  ;;  %14400 = vmatprep.subr.bf16.mxu0 %v14783_v43 }
 0x55c   :  { %v2494_v20 = vpop.f32.mrb[140].mxu1  ;;  %v4120_v42 = vpop.f32.mrb[238].mxu0 }
 0x55d   :  { %v16866_v53 = vadd.f32 %v2494_v20, %v16744_v40  ;;  %v12262_v27 = vpop.f32.mrb[141].mxu1  ;;  %v12674_v46 = vpop.f32.mrb[239].mxu0  ;;  %12702 = vmatmul.mubr.msk.f32.gmra.mrb[246].mxu1 %vm1067_vm7, %v4120_v42  ;;  %13114 = vmatmul.mubr.msk.f32.gmra.mrb[88].mxu0 %vm779_vm6, %v10388_v38 }
 0x55e   :  { %14402 = vmatpush3.bf16.msra.mxu0 %v15224_v5  ;;  %12704 = vmatprep.mubr.msk.f32.mxu1 %vm14784_vm4, %v14785_v44  ;;  %v10417_v46 = vld [vmem:[%s18713_s4 + $0x530] sm:$0xff] }
 0x55f   :  { %13116 = vmatprep.mubr.msk.f32.mxu0 %vm14784_vm4, %v14785_v44  ;;  %13176 = vmatprep.subr.mxu0 %v14785_v44 }
 0x560   :  { %v2499_v40 = vpop.f32.mrb[142].mxu1  ;;  %v4125_v50 = vpop.f32.mrb[240].mxu0 }
 0x561   :  { %v16880_v60 = vadd.f32 %v2499_v40, %v16758_v49  ;;  %v12265_v51 = vpop.f32.mrb[143].mxu1  ;;  %v12677_v41 = vpop.f32.mrb[241].mxu0  ;;  %12705 = vmatmul.mubr.msk.f32.gmra.mrb[248].mxu1 %vm1067_vm7, %v4125_v50  ;;  %13117 = vmatmul.mubr.msk.f32.gmra.mrb[90].mxu0 %vm779_vm6, %v10389_v47 }
 0x562   :  { %13177 = vmatpush3.msra.mxu0 %v15226_v56  ;;  %12707 = vmatprep.mubr.msk.f32.mxu1 %vm14784_vm4, %v14785_v44  ;;  %v10418_v41 = vld [vmem:[%s18713_s4 + $0x538] sm:$0xff] }
 0x563   :  { %13119 = vmatprep.mubr.msk.f32.mxu0 %vm14784_vm4, %v14785_v44  ;;  %14403 = vmatprep.subr.bf16.mxu0 %v14783_v43 }
 0x564   :  { %v2504_v49 = vpop.f32.mrb[144].mxu1  ;;  %v4130_v55 = vpop.f32.mrb[242].mxu0 }
 0x565   :  { %v16894_v4 = vadd.f32 %v2504_v49, %v16772_v54  ;;  %v12268_v57 = vpop.f32.mrb[145].mxu1  ;;  %v12680_v58 = vpop.f32.mrb[243].mxu0  ;;  %12708 = vmatmul.mubr.msk.f32.gmra.mrb[250].mxu1 %vm1067_vm7, %v4130_v55  ;;  %13120 = vmatmul.mubr.msk.f32.gmra.mrb[92].mxu0 %vm779_vm6, %v10390_v52 }
 0x566   :  { %12710 = vmatprep.mubr.msk.f32.mxu1 %vm14784_vm4, %v14785_v44  ;;  %13122 = vmatprep.mubr.msk.f32.mxu0 %vm14784_vm4, %v14785_v44  ;;  %v10419_v58 = vld [vmem:[%s18713_s4 + $0x540] sm:$0xff] }
 0x568   :  { %v2509_v0 = vpop.f32.mrb[146].mxu1  ;;  %v4135_v1 = vpop.f32.mrb[244].mxu0 }
 0x569   :  { %v16906_v54 = vadd.f32 %v2509_v0, %v16784_v12  ;;  %v12271_v2 = vpop.f32.mrb[147].mxu1  ;;  %v12683_v3 = vpop.f32.mrb[245].mxu0  ;;  %12711 = vmatmul.mubr.msk.f32.gmra.mrb[252].mxu1 %vm1067_vm7, %v4135_v1  ;;  %13123 = vmatmul.mubr.msk.f32.gmra.mrb[94].mxu0 %vm779_vm6, %v10391_v59 }
 0x56a   :  { %12713 = vmatprep.mubr.msk.f32.mxu1 %vm14784_vm4, %v14785_v44  ;;  %13125 = vmatprep.mubr.msk.f32.mxu0 %vm14784_vm4, %v14785_v44  ;;  %v10420_v3 = vld [vmem:[%s18713_s4 + $0x548] sm:$0xff] }
 0x56c   :  { %v2764_v8 = vpop.f32.mrb[148].mxu1  ;;  %v4140_v9 = vpop.f32.mrb[246].mxu0 }
 0x56d   :  { %v16918_v12 = vadd.f32 %v2764_v8, %v16796_v62  ;;  %v12321_v10 = vpop.f32.mrb[149].mxu1  ;;  %v12686_v11 = vpop.f32.mrb[247].mxu0  ;;  %12714 = vmatmul.mubr.msk.f32.gmra.mrb[254].mxu1 %vm1067_vm7, %v4140_v9  ;;  %13126 = vmatmul.mubr.msk.f32.gmra.mrb[96].mxu0 %vm779_vm6, %v10392_v7  ;;  %v10291_v62 = vld [vmem:[%s18714_s5 + $0x68] sm:$0xff] }
 0x56e   :  { %12763 = vmatprep.mubr.msk.f32.mxu1 %vm14784_vm4, %v14785_v44  ;;  %13128 = vmatprep.mubr.msk.f32.mxu0 %vm14784_vm4, %v14785_v44  ;;  %v10421_v11 = vld [vmem:[%s18713_s4 + $0x550] sm:$0xff] }
 0x570   :  { %v2769_v63 = vpop.f32.mrb[150].mxu1  ;;  %v4395_v16 = vpop.f32.mrb[248].mxu0 }
 0x571   :  { %v16933_v17 = vadd.f32 %v2769_v63, %v16811_v18  ;;  %v12324_v24 = vpop.f32.mrb[151].mxu1  ;;  %v12736_v6 = vpop.f32.mrb[249].mxu0  ;;  %12764 = vmatmul.mubr.msk.f32.vlgmr.msra.gmra.mrb[0].mxu1 %vm1067_vm7, %v4395_v16  ;;  %13129 = vmatmul.mubr.msk.f32.gmra.mrb[98].mxu0 %vm779_vm6, %v10393_v14 }
 0x572   :  { %12766 = vmatprep.mubr.msk.f32.mxu1 %vm14784_vm4, %v14785_v44  ;;  %13178 = vmatprep.mubr.msk.f32.mxu0 %vm14784_vm4, %v14785_v44  ;;  %v10441_v6 = vld [vmem:[%s18713_s4 + $0x558] sm:$0xff] }
 0x573   :  { %12836 = vmatpush3.msra.mxu1 %v10291_v62 }
 0x574   :  { %v2774_v33 = vpop.f32.mrb[152].mxu1  ;;  %v4400_v18 = vpop.f32.mrb[250].mxu0  ;;  %12909 = vmatprep.subr.mxu1 %v14785_v44 }
 0x575   :  { %v16946_v23 = vadd.f32 %v2774_v33, %v16824_v25  ;;  %v12327_v19 = vpop.f32.mrb[153].mxu1  ;;  %v12739_v21 = vpop.f32.mrb[251].mxu0  ;;  %12767 = vmatmul.mubr.msk.f32.gmra.mrb[2].mxu1 %vm1067_vm7, %v4400_v18  ;;  %13179 = vmatmul.mubr.msk.f32.vlgmr.msra.gmra.mrb[100].mxu0 %vm779_vm6, %v10413_v15 }
 0x576   :  { %14405 = vmatpush3.bf16.msra.mxu0 %v15206_v48  ;;  %12769 = vmatprep.mubr.msk.f32.mxu1 %vm14784_vm4, %v14785_v44  ;;  %v10442_v21 = vld [vmem:[%s18713_s4 + $0x560] sm:$0xff] }
 0x577   :  { %13181 = vmatprep.mubr.msk.f32.mxu0 %vm14784_vm4, %v14785_v44  ;;  %14406 = vmatprep.subr.bf16.mxu0 %v14783_v43 }
 0x578   :  { %v2779_v25 = vpop.f32.mrb[154].mxu1  ;;  %v4405_v39 = vpop.f32.mrb[252].mxu0 }
 0x579   :  { %v16960_v26 = vadd.f32 %v2779_v25, %v16838_v13  ;;  %v12330_v30 = vpop.f32.mrb[155].mxu1  ;;  %v12742_v31 = vpop.f32.mrb[253].mxu0  ;;  %12770 = vmatmul.mubr.msk.f32.gmra.mrb[4].mxu1 %vm1067_vm7, %v4405_v39  ;;  %13182 = vmatmul.mubr.msk.f32.gmra.mrb[102].mxu0 %vm779_vm6, %v10414_v22 }
 0x57a   :  { %14408 = vmatpush3.bf16.msra.mxu0 %v15212_v45  ;;  %12772 = vmatprep.mubr.msk.f32.mxu1 %vm14784_vm4, %v14785_v44  ;;  %v10443_v31 = vld [vmem:[%s18713_s4 + $0x568] sm:$0xff] }
 0x57b   :  { %13184 = vmatprep.mubr.msk.f32.mxu0 %vm14784_vm4, %v14785_v44  ;;  %14409 = vmatprep.subr.bf16.mxu0 %v14783_v43 }
 0x57c   :  { %v2784_v13 = vpop.f32.mrb[156].mxu1  ;;  %v4410_v35 = vpop.f32.mrb[254].mxu0 }
 0x57d   :  { %v16974_v29 = vadd.f32 %v2784_v13, %v16852_v34  ;;  %v12333_v28 = vpop.f32.mrb[157].mxu1  ;;  %v12745_v36 = vpop.f32.mrb[255].mxu0  ;;  %12773 = vmatmul.mubr.msk.f32.gmra.mrb[6].mxu1 %vm1067_vm7, %v4410_v35  ;;  %13185 = vmatmul.mubr.msk.f32.gmra.mrb[104].mxu0 %vm779_vm6, %v10415_v32 }
 0x57e   :  { %14411 = vmatpush3.bf16.msra.mxu0 %v15218_v61  ;;  %12775 = vmatprep.mubr.msk.f32.mxu1 %vm14784_vm4, %v14785_v44  ;;  %v10444_v36 = vld [vmem:[%s18713_s4 + $0x570] sm:$0xff] }
 0x57f   :  { %13187 = vmatprep.mubr.msk.f32.mxu0 %vm14784_vm4, %v14785_v44  ;;  %14412 = vmatprep.subr.bf16.mxu0 %v14783_v43 }
 0x580   :  { %v2789_v34 = vpop.f32.mrb[158].mxu1  ;;  %v4415_v38 = vpop.f32.mrb[0].mxu0 }
 0x581   :  { %v16988_v20 = vadd.f32 %v2789_v34, %v16866_v53  ;;  %v12336_v42 = vpop.f32.mrb[159].mxu1  ;;  %v12748_v27 = vpop.f32.mrb[1].mxu0  ;;  %12776 = vmatmul.mubr.msk.f32.gmra.mrb[8].mxu1 %vm1067_vm7, %v4415_v38  ;;  %13188 = vmatmul.mubr.msk.f32.gmra.mrb[106].mxu0 %vm779_vm6, %v10416_v37 }
 0x582   :  { %14414 = vmatpush3.bf16.msra.mxu0 %v15224_v5  ;;  %12778 = vmatprep.mubr.msk.f32.mxu1 %vm14784_vm4, %v14785_v44  ;;  %v10445_v27 = vld [vmem:[%s18713_s4 + $0x578] sm:$0xff] }
 0x583   :  { %13190 = vmatprep.mubr.msk.f32.mxu0 %vm14784_vm4, %v14785_v44  ;;  %13250 = vmatprep.subr.mxu0 %v14785_v44 }
 0x584   :  { %v2794_v53 = vpop.f32.mrb[160].mxu1  ;;  %v4420_v47 = vpop.f32.mrb[2].mxu0 }
 0x585   :  { %v17002_v40 = vadd.f32 %v2794_v53, %v16880_v60  ;;  %v12339_v50 = vpop.f32.mrb[161].mxu1  ;;  %v12751_v51 = vpop.f32.mrb[3].mxu0  ;;  %12779 = vmatmul.mubr.msk.f32.gmra.mrb[10].mxu1 %vm1067_vm7, %v4420_v47  ;;  %13191 = vmatmul.mubr.msk.f32.gmra.mrb[108].mxu0 %vm779_vm6, %v10417_v46 }
 0x586   :  { %13251 = vmatpush3.msra.mxu0 %v15226_v56  ;;  %12781 = vmatprep.mubr.msk.f32.mxu1 %vm14784_vm4, %v14785_v44  ;;  %v10446_v51 = vld [vmem:[%s18713_s4 + $0x580] sm:$0xff] }
 0x587   :  { %13193 = vmatprep.mubr.msk.f32.mxu0 %vm14784_vm4, %v14785_v44  ;;  %14415 = vmatprep.subr.bf16.mxu0 %v14783_v43 }
 0x588   :  { %v2799_v60 = vpop.f32.mrb[162].mxu1  ;;  %v4425_v52 = vpop.f32.mrb[4].mxu0 }
 0x589   :  { %v17016_v49 = vadd.f32 %v2799_v60, %v16894_v4  ;;  %v12342_v55 = vpop.f32.mrb[163].mxu1  ;;  %v12754_v57 = vpop.f32.mrb[5].mxu0  ;;  %12782 = vmatmul.mubr.msk.f32.gmra.mrb[12].mxu1 %vm1067_vm7, %v4425_v52  ;;  %13194 = vmatmul.mubr.msk.f32.gmra.mrb[110].mxu0 %vm779_vm6, %v10418_v41 }
 0x58a   :  { %12784 = vmatprep.mubr.msk.f32.mxu1 %vm14784_vm4, %v14785_v44  ;;  %13196 = vmatprep.mubr.msk.f32.mxu0 %vm14784_vm4, %v14785_v44  ;;  %v10447_v57 = vld [vmem:[%s18713_s4 + $0x588] sm:$0xff] }
 0x58c   :  { %v2804_v59 = vpop.f32.mrb[164].mxu1  ;;  %v4430_v0 = vpop.f32.mrb[6].mxu0 }
 0x58d   :  { %v17028_v4 = vadd.f32 %v2804_v59, %v16906_v54  ;;  %v12345_v1 = vpop.f32.mrb[165].mxu1  ;;  %v12757_v2 = vpop.f32.mrb[7].mxu0  ;;  %12785 = vmatmul.mubr.msk.f32.gmra.mrb[14].mxu1 %vm1067_vm7, %v4430_v0  ;;  %13197 = vmatmul.mubr.msk.f32.gmra.mrb[112].mxu0 %vm779_vm6, %v10419_v58 }
 0x58e   :  { %12787 = vmatprep.mubr.msk.f32.mxu1 %vm14784_vm4, %v14785_v44  ;;  %13199 = vmatprep.mubr.msk.f32.mxu0 %vm14784_vm4, %v14785_v44  ;;  %v10448_v2 = vld [vmem:[%s18713_s4 + $0x590] sm:$0xff] }
 0x590   :  { %v3059_v7 = vpop.f32.mrb[166].mxu1  ;;  %v4435_v8 = vpop.f32.mrb[8].mxu0 }
 0x591   :  { %v17040_v54 = vadd.f32 %v3059_v7, %v16918_v12  ;;  %v12395_v9 = vpop.f32.mrb[167].mxu1  ;;  %v12760_v10 = vpop.f32.mrb[9].mxu0  ;;  %12788 = vmatmul.mubr.msk.f32.gmra.mrb[16].mxu1 %vm1067_vm7, %v4435_v8  ;;  %13200 = vmatmul.mubr.msk.f32.gmra.mrb[114].mxu0 %vm779_vm6, %v10420_v3  ;;  %v10319_v12 = vld [vmem:[%s18714_s5 + $0x70] sm:$0xff] }
 0x592   :  { %12837 = vmatprep.mubr.msk.f32.mxu1 %vm14784_vm4, %v14785_v44  ;;  %13202 = vmatprep.mubr.msk.f32.mxu0 %vm14784_vm4, %v14785_v44  ;;  %v10449_v10 = vld [vmem:[%s18713_s4 + $0x598] sm:$0xff] }
 0x594   :  { %v3064_v14 = vpop.f32.mrb[168].mxu1  ;;  %v4690_v63 = vpop.f32.mrb[10].mxu0 }
 0x595   :  { %v17055_v16 = vadd.f32 %v3064_v14, %v16933_v17  ;;  %v12398_v62 = vpop.f32.mrb[169].mxu1  ;;  %v12810_v24 = vpop.f32.mrb[11].mxu0  ;;  %12838 = vmatmul.mubr.msk.f32.vlgmr.msra.gmra.mrb[18].mxu1 %vm1067_vm7, %v4690_v63  ;;  %13203 = vmatmul.mubr.msk.f32.gmra.mrb[116].mxu0 %vm779_vm6, %v10421_v11 }
 0x596   :  { %12840 = vmatprep.mubr.msk.f32.mxu1 %vm14784_vm4, %v14785_v44  ;;  %13252 = vmatprep.mubr.msk.f32.mxu0 %vm14784_vm4, %v14785_v44  ;;  %v10469_v24 = vld [vmem:[%s18713_s4 + $0x5a0] sm:$0xff] }
 0x597   :  { %12910 = vmatpush3.msra.mxu1 %v10319_v12 }
 0x598   :  { %v3069_v15 = vpop.f32.mrb[170].mxu1  ;;  %v4695_v17 = vpop.f32.mrb[12].mxu0  ;;  %12983 = vmatprep.subr.mxu1 %v14785_v44 }
 0x599   :  { %v17068_v33 = vadd.f32 %v3069_v15, %v16946_v23  ;;  %v12401_v18 = vpop.f32.mrb[171].mxu1  ;;  %v12813_v19 = vpop.f32.mrb[13].mxu0  ;;  %12841 = vmatmul.mubr.msk.f32.gmra.mrb[20].mxu1 %vm1067_vm7, %v4695_v17  ;;  %13253 = vmatmul.mubr.msk.f32.vlgmr.msra.gmra.mrb[118].mxu0 %vm779_vm6, %v10441_v6 }
 0x59a   :  { %14417 = vmatpush3.bf16.msra.mxu0 %v15206_v48  ;;  %12843 = vmatprep.mubr.msk.f32.mxu1 %vm14784_vm4, %v14785_v44  ;;  %v10470_v19 = vld [vmem:[%s18713_s4 + $0x5a8] sm:$0xff] }
 0x59b   :  { %13255 = vmatprep.mubr.msk.f32.mxu0 %vm14784_vm4, %v14785_v44  ;;  %14418 = vmatprep.subr.bf16.mxu0 %v14783_v43 }
 0x59c   :  { %v3074_v23 = vpop.f32.mrb[172].mxu1  ;;  %v4700_v22 = vpop.f32.mrb[14].mxu0 }
 0x59d   :  { %v17082_v25 = vadd.f32 %v3074_v23, %v16960_v26  ;;  %v12404_v39 = vpop.f32.mrb[173].mxu1  ;;  %v12816_v30 = vpop.f32.mrb[15].mxu0  ;;  %12844 = vmatmul.mubr.msk.f32.gmra.mrb[22].mxu1 %vm1067_vm7, %v4700_v22  ;;  %13256 = vmatmul.mubr.msk.f32.gmra.mrb[120].mxu0 %vm779_vm6, %v10442_v21 }
 0x59e   :  { %14420 = vmatpush3.bf16.msra.mxu0 %v15212_v45  ;;  %12846 = vmatprep.mubr.msk.f32.mxu1 %vm14784_vm4, %v14785_v44  ;;  %v10471_v30 = vld [vmem:[%s18713_s4 + $0x5b0] sm:$0xff] }
 0x59f   :  { %13258 = vmatprep.mubr.msk.f32.mxu0 %vm14784_vm4, %v14785_v44  ;;  %14421 = vmatprep.subr.bf16.mxu0 %v14783_v43 }
 0x5a0   :  { %v3079_v26 = vpop.f32.mrb[174].mxu1  ;;  %v4705_v32 = vpop.f32.mrb[16].mxu0 }
 0x5a1   :  { %v17096_v13 = vadd.f32 %v3079_v26, %v16974_v29  ;;  %v12407_v35 = vpop.f32.mrb[175].mxu1  ;;  %v12819_v28 = vpop.f32.mrb[17].mxu0  ;;  %12847 = vmatmul.mubr.msk.f32.gmra.mrb[24].mxu1 %vm1067_vm7, %v4705_v32  ;;  %13259 = vmatmul.mubr.msk.f32.gmra.mrb[122].mxu0 %vm779_vm6, %v10443_v31 }
 0x5a2   :  { %14423 = vmatpush3.bf16.msra.mxu0 %v15218_v61  ;;  %12849 = vmatprep.mubr.msk.f32.mxu1 %vm14784_vm4, %v14785_v44  ;;  %v10472_v28 = vld [vmem:[%s18713_s4 + $0x5b8] sm:$0xff] }
 0x5a3   :  { %13261 = vmatprep.mubr.msk.f32.mxu0 %vm14784_vm4, %v14785_v44  ;;  %14424 = vmatprep.subr.bf16.mxu0 %v14783_v43 }
 0x5a4   :  { %v3084_v29 = vpop.f32.mrb[176].mxu1  ;;  %v4710_v37 = vpop.f32.mrb[18].mxu0 }
 0x5a5   :  { %v17110_v34 = vadd.f32 %v3084_v29, %v16988_v20  ;;  %v12410_v38 = vpop.f32.mrb[177].mxu1  ;;  %v12822_v42 = vpop.f32.mrb[19].mxu0  ;;  %12850 = vmatmul.mubr.msk.f32.gmra.mrb[26].mxu1 %vm1067_vm7, %v4710_v37  ;;  %13262 = vmatmul.mubr.msk.f32.gmra.mrb[124].mxu0 %vm779_vm6, %v10444_v36 }
 0x5a6   :  { %14426 = vmatpush3.bf16.msra.mxu0 %v15224_v5  ;;  %12852 = vmatprep.mubr.msk.f32.mxu1 %vm14784_vm4, %v14785_v44  ;;  %v10473_v42 = vld [vmem:[%s18713_s4 + $0x5c0] sm:$0xff] }
 0x5a7   :  { %13264 = vmatprep.mubr.msk.f32.mxu0 %vm14784_vm4, %v14785_v44  ;;  %13324 = vmatprep.subr.mxu0 %v14785_v44 }
 0x5a8   :  { %v3089_v20 = vpop.f32.mrb[178].mxu1  ;;  %v4715_v46 = vpop.f32.mrb[20].mxu0 }
 0x5a9   :  { %v17124_v53 = vadd.f32 %v3089_v20, %v17002_v40  ;;  %v12413_v47 = vpop.f32.mrb[179].mxu1  ;;  %v12825_v50 = vpop.f32.mrb[21].mxu0  ;;  %12853 = vmatmul.mubr.msk.f32.gmra.mrb[28].mxu1 %vm1067_vm7, %v4715_v46  ;;  %13265 = vmatmul.mubr.msk.f32.gmra.mrb[126].mxu0 %vm779_vm6, %v10445_v27 }
 0x5aa   :  { %13325 = vmatpush3.msra.mxu0 %v15226_v56  ;;  %12855 = vmatprep.mubr.msk.f32.mxu1 %vm14784_vm4, %v14785_v44  ;;  %v10474_v50 = vld [vmem:[%s18713_s4 + $0x5c8] sm:$0xff] }
 0x5ab   :  { %13267 = vmatprep.mubr.msk.f32.mxu0 %vm14784_vm4, %v14785_v44  ;;  %14427 = vmatprep.subr.bf16.mxu0 %v14783_v43 }
 0x5ac   :  { %v3094_v40 = vpop.f32.mrb[180].mxu1  ;;  %v4720_v41 = vpop.f32.mrb[22].mxu0 }
 0x5ad   :  { %v17138_v60 = vadd.f32 %v3094_v40, %v17016_v49  ;;  %v12416_v52 = vpop.f32.mrb[181].mxu1  ;;  %v12828_v55 = vpop.f32.mrb[23].mxu0  ;;  %12856 = vmatmul.mubr.msk.f32.gmra.mrb[30].mxu1 %vm1067_vm7, %v4720_v41  ;;  %13268 = vmatmul.mubr.msk.f32.gmra.mrb[128].mxu0 %vm779_vm6, %v10446_v51 }
 0x5ae   :  { %12858 = vmatprep.mubr.msk.f32.mxu1 %vm14784_vm4, %v14785_v44  ;;  %13270 = vmatprep.mubr.msk.f32.mxu0 %vm14784_vm4, %v14785_v44  ;;  %v10475_v55 = vld [vmem:[%s18713_s4 + $0x5d0] sm:$0xff] }
 0x5b0   :  { %v3099_v58 = vpop.f32.mrb[182].mxu1  ;;  %v4725_v59 = vpop.f32.mrb[24].mxu0 }
 0x5b1   :  { %v17150_v49 = vadd.f32 %v3099_v58, %v17028_v4  ;;  %v12419_v0 = vpop.f32.mrb[183].mxu1  ;;  %v12831_v1 = vpop.f32.mrb[25].mxu0  ;;  %12859 = vmatmul.mubr.msk.f32.gmra.mrb[32].mxu1 %vm1067_vm7, %v4725_v59  ;;  %13271 = vmatmul.mubr.msk.f32.gmra.mrb[130].mxu0 %vm779_vm6, %v10447_v57 }
 0x5b2   :  { %12861 = vmatprep.mubr.msk.f32.mxu1 %vm14784_vm4, %v14785_v44  ;;  %13273 = vmatprep.mubr.msk.f32.mxu0 %vm14784_vm4, %v14785_v44  ;;  %v10476_v1 = vld [vmem:[%s18713_s4 + $0x5d8] sm:$0xff] }
 0x5b4   :  { %v3354_v3 = vpop.f32.mrb[184].mxu1  ;;  %v4730_v7 = vpop.f32.mrb[26].mxu0 }
 0x5b5   :  { %v17162_v4 = vadd.f32 %v3354_v3, %v17040_v54  ;;  %v12469_v8 = vpop.f32.mrb[185].mxu1  ;;  %v12834_v9 = vpop.f32.mrb[27].mxu0  ;;  %12862 = vmatmul.mubr.msk.f32.gmra.mrb[34].mxu1 %vm1067_vm7, %v4730_v7  ;;  %13274 = vmatmul.mubr.msk.f32.gmra.mrb[132].mxu0 %vm779_vm6, %v10448_v2  ;;  %v10347_v54 = vld [vmem:[%s18714_s5 + $0x78] sm:$0xff] }
 0x5b6   :  { %12911 = vmatprep.mubr.msk.f32.mxu1 %vm14784_vm4, %v14785_v44  ;;  %13276 = vmatprep.mubr.msk.f32.mxu0 %vm14784_vm4, %v14785_v44  ;;  %v10477_v9 = vld [vmem:[%s18713_s4 + $0x5e0] sm:$0xff] }
 0x5b8   :  { %v3359_v11 = vpop.f32.mrb[186].mxu1  ;;  %v4985_v14 = vpop.f32.mrb[28].mxu0 }
 0x5b9   :  { %v17177_v63 = vadd.f32 %v3359_v11, %v17055_v16  ;;  %v12472_v12 = vpop.f32.mrb[187].mxu1  ;;  %v12884_v62 = vpop.f32.mrb[29].mxu0  ;;  %12912 = vmatmul.mubr.msk.f32.vlgmr.msra.gmra.mrb[36].mxu1 %vm1067_vm7, %v4985_v14  ;;  %13277 = vmatmul.mubr.msk.f32.gmra.mrb[134].mxu0 %vm779_vm6, %v10449_v10 }
 0x5ba   :  { %12914 = vmatprep.mubr.msk.f32.mxu1 %vm14784_vm4, %v14785_v44  ;;  %13326 = vmatprep.mubr.msk.f32.mxu0 %vm14784_vm4, %v14785_v44  ;;  %v10497_v62 = vld [vmem:[%s18713_s4 + $0x5e8] sm:$0xff] }
 0x5bb   :  { %12984 = vmatpush3.msra.mxu1 %v10347_v54 }
 0x5bc   :  { %v3364_v6 = vpop.f32.mrb[188].mxu1  ;;  %v4990_v16 = vpop.f32.mrb[30].mxu0  ;;  %13057 = vmatprep.subr.mxu1 %v14785_v44 }
 0x5bd   :  { %v17190_v15 = vadd.f32 %v3364_v6, %v17068_v33  ;;  %v12475_v17 = vpop.f32.mrb[189].mxu1  ;;  %v12887_v18 = vpop.f32.mrb[31].mxu0  ;;  %12915 = vmatmul.mubr.msk.f32.gmra.mrb[38].mxu1 %vm1067_vm7, %v4990_v16  ;;  %13327 = vmatmul.mubr.msk.f32.vlgmr.msra.gmra.mrb[136].mxu0 %vm779_vm6, %v10469_v24 }
 0x5be   :  { %14429 = vmatpush3.bf16.msra.mxu0 %v15206_v48  ;;  %12917 = vmatprep.mubr.msk.f32.mxu1 %vm14784_vm4, %v14785_v44  ;;  %v10498_v18 = vld [vmem:[%s18713_s4 + $0x5f0] sm:$0xff] }
 0x5bf   :  { %13329 = vmatprep.mubr.msk.f32.mxu0 %vm14784_vm4, %v14785_v44  ;;  %14430 = vmatprep.subr.bf16.mxu0 %v14783_v43 }
 0x5c0   :  { %v3369_v33 = vpop.f32.mrb[190].mxu1  ;;  %v4995_v21 = vpop.f32.mrb[32].mxu0 }
 0x5c1   :  { %v17204_v23 = vadd.f32 %v3369_v33, %v17082_v25  ;;  %v12478_v22 = vpop.f32.mrb[191].mxu1  ;;  %v12890_v39 = vpop.f32.mrb[33].mxu0  ;;  %12918 = vmatmul.mubr.msk.f32.gmra.mrb[40].mxu1 %vm1067_vm7, %v4995_v21  ;;  %13330 = vmatmul.mubr.msk.f32.gmra.mrb[138].mxu0 %vm779_vm6, %v10470_v19 }
 0x5c2   :  { %14432 = vmatpush3.bf16.msra.mxu0 %v15212_v45  ;;  %12920 = vmatprep.mubr.msk.f32.mxu1 %vm14784_vm4, %v14785_v44  ;;  %v10499_v39 = vld [vmem:[%s18713_s4 + $0x5f8] sm:$0xff] }
 0x5c3   :  { %13332 = vmatprep.mubr.msk.f32.mxu0 %vm14784_vm4, %v14785_v44  ;;  %14433 = vmatprep.subr.bf16.mxu0 %v14783_v43 }
 0x5c4   :  { %v3374_v25 = vpop.f32.mrb[192].mxu1  ;;  %v5000_v31 = vpop.f32.mrb[34].mxu0 }
 0x5c5   :  { %v17218_v26 = vadd.f32 %v3374_v25, %v17096_v13  ;;  %v12481_v32 = vpop.f32.mrb[193].mxu1  ;;  %v12893_v35 = vpop.f32.mrb[35].mxu0  ;;  %12921 = vmatmul.mubr.msk.f32.gmra.mrb[42].mxu1 %vm1067_vm7, %v5000_v31  ;;  %13333 = vmatmul.mubr.msk.f32.gmra.mrb[140].mxu0 %vm779_vm6, %v10471_v30 }
 0x5c6   :  { %14435 = vmatpush3.bf16.msra.mxu0 %v15218_v61  ;;  %12923 = vmatprep.mubr.msk.f32.mxu1 %vm14784_vm4, %v14785_v44  ;;  %v10500_v35 = vld [vmem:[%s18713_s4 + $0x600] sm:$0xff] }
 0x5c7   :  { %13335 = vmatprep.mubr.msk.f32.mxu0 %vm14784_vm4, %v14785_v44  ;;  %14436 = vmatprep.subr.bf16.mxu0 %v14783_v43 }
 0x5c8   :  { %v3379_v13 = vpop.f32.mrb[194].mxu1  ;;  %v5005_v36 = vpop.f32.mrb[36].mxu0 }
 0x5c9   :  { %v17232_v29 = vadd.f32 %v3379_v13, %v17110_v34  ;;  %v12484_v37 = vpop.f32.mrb[195].mxu1  ;;  %v12896_v38 = vpop.f32.mrb[37].mxu0  ;;  %12924 = vmatmul.mubr.msk.f32.gmra.mrb[44].mxu1 %vm1067_vm7, %v5005_v36  ;;  %13336 = vmatmul.mubr.msk.f32.gmra.mrb[142].mxu0 %vm779_vm6, %v10472_v28 }
 0x5ca   :  { %14438 = vmatpush3.bf16.msra.mxu0 %v15224_v5  ;;  %12926 = vmatprep.mubr.msk.f32.mxu1 %vm14784_vm4, %v14785_v44  ;;  %v10501_v38 = vld [vmem:[%s18713_s4 + $0x608] sm:$0xff] }
 0x5cb   :  { %13338 = vmatprep.mubr.msk.f32.mxu0 %vm14784_vm4, %v14785_v44  ;;  %13398 = vmatprep.subr.mxu0 %v14785_v44 }
 0x5cc   :  { %v3384_v34 = vpop.f32.mrb[196].mxu1  ;;  %v5010_v27 = vpop.f32.mrb[38].mxu0 }
 0x5cd   :  { %v17246_v20 = vadd.f32 %v3384_v34, %v17124_v53  ;;  %v12487_v46 = vpop.f32.mrb[197].mxu1  ;;  %v12899_v47 = vpop.f32.mrb[39].mxu0  ;;  %12927 = vmatmul.mubr.msk.f32.gmra.mrb[46].mxu1 %vm1067_vm7, %v5010_v27  ;;  %13339 = vmatmul.mubr.msk.f32.gmra.mrb[144].mxu0 %vm779_vm6, %v10473_v42 }
 0x5ce   :  { %13399 = vmatpush3.msra.mxu0 %v15226_v56  ;;  %12929 = vmatprep.mubr.msk.f32.mxu1 %vm14784_vm4, %v14785_v44  ;;  %v10502_v47 = vld [vmem:[%s18713_s4 + $0x610] sm:$0xff] }
 0x5cf   :  { %13341 = vmatprep.mubr.msk.f32.mxu0 %vm14784_vm4, %v14785_v44  ;;  %14439 = vmatprep.subr.bf16.mxu0 %v14783_v43 }
 0x5d0   :  { %v3389_v53 = vpop.f32.mrb[198].mxu1  ;;  %v5015_v51 = vpop.f32.mrb[40].mxu0 }
 0x5d1   :  { %v17260_v40 = vadd.f32 %v3389_v53, %v17138_v60  ;;  %v12490_v41 = vpop.f32.mrb[199].mxu1  ;;  %v12902_v52 = vpop.f32.mrb[41].mxu0  ;;  %12930 = vmatmul.mubr.msk.f32.gmra.mrb[48].mxu1 %vm1067_vm7, %v5015_v51  ;;  %13342 = vmatmul.mubr.msk.f32.gmra.mrb[146].mxu0 %vm779_vm6, %v10474_v50 }
 0x5d2   :  { %12932 = vmatprep.mubr.msk.f32.mxu1 %vm14784_vm4, %v14785_v44  ;;  %13344 = vmatprep.mubr.msk.f32.mxu0 %vm14784_vm4, %v14785_v44  ;;  %v10503_v52 = vld [vmem:[%s18713_s4 + $0x618] sm:$0xff] }
 0x5d4   :  { %v3394_v57 = vpop.f32.mrb[200].mxu1  ;;  %v5020_v58 = vpop.f32.mrb[42].mxu0 }
 0x5d5   :  { %v17272_v60 = vadd.f32 %v3394_v57, %v17150_v49  ;;  %v12493_v59 = vpop.f32.mrb[201].mxu1  ;;  %v12905_v0 = vpop.f32.mrb[43].mxu0  ;;  %12933 = vmatmul.mubr.msk.f32.gmra.mrb[50].mxu1 %vm1067_vm7, %v5020_v58  ;;  %13345 = vmatmul.mubr.msk.f32.gmra.mrb[148].mxu0 %vm779_vm6, %v10475_v55 }
 0x5d6   :  { %12935 = vmatprep.mubr.msk.f32.mxu1 %vm14784_vm4, %v14785_v44  ;;  %13347 = vmatprep.mubr.msk.f32.mxu0 %vm14784_vm4, %v14785_v44  ;;  %v10504_v0 = vld [vmem:[%s18713_s4 + $0x620] sm:$0xff] }
 0x5d8   :  { %v3649_v2 = vpop.f32.mrb[202].mxu1  ;;  %v5025_v3 = vpop.f32.mrb[44].mxu0 }
 0x5d9   :  { %v17284_v49 = vadd.f32 %v3649_v2, %v17162_v4  ;;  %v12543_v7 = vpop.f32.mrb[203].mxu1  ;;  %v12908_v8 = vpop.f32.mrb[45].mxu0  ;;  %12936 = vmatmul.mubr.msk.f32.gmra.mrb[52].mxu1 %vm1067_vm7, %v5025_v3  ;;  %13348 = vmatmul.mubr.msk.f32.gmra.mrb[150].mxu0 %vm779_vm6, %v10476_v1  ;;  %v10375_v4 = vld [vmem:[%s18714_s5 + $0x80] sm:$0xff] }
 0x5da   :  { %12985 = vmatprep.mubr.msk.f32.mxu1 %vm14784_vm4, %v14785_v44  ;;  %13350 = vmatprep.mubr.msk.f32.mxu0 %vm14784_vm4, %v14785_v44  ;;  %v10505_v8 = vld [vmem:[%s18713_s4 + $0x628] sm:$0xff] }
 0x5dc   :  { %v3654_v10 = vpop.f32.mrb[204].mxu1  ;;  %v5280_v11 = vpop.f32.mrb[46].mxu0 }
 0x5dd   :  { %v17299_v14 = vadd.f32 %v3654_v10, %v17177_v63  ;;  %v12546_v54 = vpop.f32.mrb[205].mxu1  ;;  %v12958_v12 = vpop.f32.mrb[47].mxu0  ;;  %12986 = vmatmul.mubr.msk.f32.vlgmr.msra.gmra.mrb[54].mxu1 %vm1067_vm7, %v5280_v11  ;;  %13351 = vmatmul.mubr.msk.f32.gmra.mrb[152].mxu0 %vm779_vm6, %v10477_v9 }
 0x5de   :  { %12988 = vmatprep.mubr.msk.f32.mxu1 %vm14784_vm4, %v14785_v44  ;;  %13400 = vmatprep.mubr.msk.f32.mxu0 %vm14784_vm4, %v14785_v44  ;;  %v10525_v12 = vld [vmem:[%s18713_s4 + $0x630] sm:$0xff] }
 0x5df   :  { %13058 = vmatpush3.msra.mxu1 %v10375_v4 }
 0x5e0   :  { %v3659_v24 = vpop.f32.mrb[206].mxu1  ;;  %v5285_v63 = vpop.f32.mrb[48].mxu0  ;;  %13131 = vmatprep.subr.mxu1 %v14785_v44 }
 0x5e1   :  { %v17312_v6 = vadd.f32 %v3659_v24, %v17190_v15  ;;  %v12549_v16 = vpop.f32.mrb[207].mxu1  ;;  %v12961_v17 = vpop.f32.mrb[49].mxu0  ;;  %12989 = vmatmul.mubr.msk.f32.gmra.mrb[56].mxu1 %vm1067_vm7, %v5285_v63  ;;  %13401 = vmatmul.mubr.msk.f32.vlgmr.msra.gmra.mrb[154].mxu0 %vm779_vm6, %v10497_v62 }
 0x5e2   :  { %14441 = vmatpush3.bf16.msra.mxu0 %v15206_v48  ;;  %12991 = vmatprep.mubr.msk.f32.mxu1 %vm14784_vm4, %v14785_v44  ;;  %v10526_v17 = vld [vmem:[%s18713_s4 + $0x638] sm:$0xff] }
 0x5e3   :  { %13403 = vmatprep.mubr.msk.f32.mxu0 %vm14784_vm4, %v14785_v44  ;;  %14442 = vmatprep.subr.bf16.mxu0 %v14783_v43 }
 0x5e4   :  { %v3664_v15 = vpop.f32.mrb[208].mxu1  ;;  %v5290_v19 = vpop.f32.mrb[50].mxu0 }
 0x5e5   :  { %v17326_v33 = vadd.f32 %v3664_v15, %v17204_v23  ;;  %v12552_v21 = vpop.f32.mrb[209].mxu1  ;;  %v12964_v22 = vpop.f32.mrb[51].mxu0  ;;  %12992 = vmatmul.mubr.msk.f32.gmra.mrb[58].mxu1 %vm1067_vm7, %v5290_v19  ;;  %13404 = vmatmul.mubr.msk.f32.gmra.mrb[156].mxu0 %vm779_vm6, %v10498_v18 }
 0x5e6   :  { %14444 = vmatpush3.bf16.msra.mxu0 %v15212_v45  ;;  %12994 = vmatprep.mubr.msk.f32.mxu1 %vm14784_vm4, %v14785_v44  ;;  %v10527_v22 = vld [vmem:[%s18713_s4 + $0x640] sm:$0xff] }
 0x5e7   :  { %13406 = vmatprep.mubr.msk.f32.mxu0 %vm14784_vm4, %v14785_v44  ;;  %14445 = vmatprep.subr.bf16.mxu0 %v14783_v43 }
 0x5e8   :  { %v3669_v23 = vpop.f32.mrb[210].mxu1  ;;  %v5295_v30 = vpop.f32.mrb[52].mxu0 }
 0x5e9   :  { %v17340_v25 = vadd.f32 %v3669_v23, %v17218_v26  ;;  %v12555_v31 = vpop.f32.mrb[211].mxu1  ;;  %v12967_v32 = vpop.f32.mrb[53].mxu0  ;;  %12995 = vmatmul.mubr.msk.f32.gmra.mrb[60].mxu1 %vm1067_vm7, %v5295_v30  ;;  %13407 = vmatmul.mubr.msk.f32.gmra.mrb[158].mxu0 %vm779_vm6, %v10499_v39 }
 0x5ea   :  { %14447 = vmatpush3.bf16.msra.mxu0 %v15218_v61  ;;  %12997 = vmatprep.mubr.msk.f32.mxu1 %vm14784_vm4, %v14785_v44  ;;  %v10528_v32 = vld [vmem:[%s18713_s4 + $0x648] sm:$0xff] }
 0x5eb   :  { %13409 = vmatprep.mubr.msk.f32.mxu0 %vm14784_vm4, %v14785_v44  ;;  %14448 = vmatprep.subr.bf16.mxu0 %v14783_v43 }
 0x5ec   :  { %v3674_v26 = vpop.f32.mrb[212].mxu1  ;;  %v5300_v28 = vpop.f32.mrb[54].mxu0 }
 0x5ed   :  { %v17354_v13 = vadd.f32 %v3674_v26, %v17232_v29  ;;  %v12558_v36 = vpop.f32.mrb[213].mxu1  ;;  %v12970_v37 = vpop.f32.mrb[55].mxu0  ;;  %12998 = vmatmul.mubr.msk.f32.gmra.mrb[62].mxu1 %vm1067_vm7, %v5300_v28  ;;  %13410 = vmatmul.mubr.msk.f32.gmra.mrb[160].mxu0 %vm779_vm6, %v10500_v35 }
 0x5ee   :  { %14450 = vmatpush3.bf16.msra.mxu0 %v15224_v5  ;;  %13000 = vmatprep.mubr.msk.f32.mxu1 %vm14784_vm4, %v14785_v44  ;;  %v10529_v37 = vld [vmem:[%s18713_s4 + $0x650] sm:$0xff] }
 0x5ef   :  { %13412 = vmatprep.mubr.msk.f32.mxu0 %vm14784_vm4, %v14785_v44  ;;  %13472 = vmatprep.subr.mxu0 %v14785_v44 }
 0x5f0   :  { %v3679_v29 = vpop.f32.mrb[214].mxu1  ;;  %v5305_v42 = vpop.f32.mrb[56].mxu0 }
 0x5f1   :  { %v17368_v34 = vadd.f32 %v3679_v29, %v17246_v20  ;;  %v12561_v27 = vpop.f32.mrb[215].mxu1  ;;  %v12973_v46 = vpop.f32.mrb[57].mxu0  ;;  %13001 = vmatmul.mubr.msk.f32.gmra.mrb[64].mxu1 %vm1067_vm7, %v5305_v42  ;;  %13413 = vmatmul.mubr.msk.f32.gmra.mrb[162].mxu0 %vm779_vm6, %v10501_v38 }
 0x5f2   :  { %13473 = vmatpush3.msra.mxu0 %v15226_v56  ;;  %13003 = vmatprep.mubr.msk.f32.mxu1 %vm14784_vm4, %v14785_v44  ;;  %v10530_v46 = vld [vmem:[%s18713_s4 + $0x658] sm:$0xff] }
 0x5f3   :  { %13415 = vmatprep.mubr.msk.f32.mxu0 %vm14784_vm4, %v14785_v44  ;;  %14451 = vmatprep.subr.bf16.mxu0 %v14783_v43 }
 0x5f4   :  { %v3684_v20 = vpop.f32.mrb[216].mxu1  ;;  %v5310_v50 = vpop.f32.mrb[58].mxu0 }
 0x5f5   :  { %v17382_v53 = vadd.f32 %v3684_v20, %v17260_v40  ;;  %v12564_v51 = vpop.f32.mrb[217].mxu1  ;;  %v12976_v41 = vpop.f32.mrb[59].mxu0  ;;  %13004 = vmatmul.mubr.msk.f32.gmra.mrb[66].mxu1 %vm1067_vm7, %v5310_v50  ;;  %13416 = vmatmul.mubr.msk.f32.gmra.mrb[164].mxu0 %vm779_vm6, %v10502_v47 }
 0x5f6   :  { %13006 = vmatprep.mubr.msk.f32.mxu1 %vm14784_vm4, %v14785_v44  ;;  %13418 = vmatprep.mubr.msk.f32.mxu0 %vm14784_vm4, %v14785_v44  ;;  %v10531_v41 = vld [vmem:[%s18713_s4 + $0x660] sm:$0xff] }
 0x5f8   :  { %v3689_v55 = vpop.f32.mrb[218].mxu1  ;;  %v5315_v57 = vpop.f32.mrb[60].mxu0 }
 0x5f9   :  { %v17394_v40 = vadd.f32 %v3689_v55, %v17272_v60  ;;  %v12567_v58 = vpop.f32.mrb[219].mxu1  ;;  %v12979_v59 = vpop.f32.mrb[61].mxu0  ;;  %13007 = vmatmul.mubr.msk.f32.gmra.mrb[68].mxu1 %vm1067_vm7, %v5315_v57  ;;  %13419 = vmatmul.mubr.msk.f32.gmra.mrb[166].mxu0 %vm779_vm6, %v10503_v52 }
 0x5fa   :  { %13009 = vmatprep.mubr.msk.f32.mxu1 %vm14784_vm4, %v14785_v44  ;;  %13421 = vmatprep.mubr.msk.f32.mxu0 %vm14784_vm4, %v14785_v44  ;;  %v10532_v59 = vld [vmem:[%s18713_s4 + $0x668] sm:$0xff] }
 0x5fc   :  { %v3944_v1 = vpop.f32.mrb[220].mxu1  ;;  %v5320_v2 = vpop.f32.mrb[62].mxu0 }
 0x5fd   :  { %v17406_v60 = vadd.f32 %v3944_v1, %v17284_v49  ;;  %v12617_v3 = vpop.f32.mrb[221].mxu1  ;;  %v12982_v7 = vpop.f32.mrb[63].mxu0  ;;  %13010 = vmatmul.mubr.msk.f32.gmra.mrb[70].mxu1 %vm1067_vm7, %v5320_v2  ;;  %13422 = vmatmul.mubr.msk.f32.gmra.mrb[168].mxu0 %vm779_vm6, %v10504_v0  ;;  %v10403_v49 = vld [vmem:[%s18714_s5 + $0x88] sm:$0xff] }
 0x5fe   :  { %13059 = vmatprep.mubr.msk.f32.mxu1 %vm14784_vm4, %v14785_v44  ;;  %13424 = vmatprep.mubr.msk.f32.mxu0 %vm14784_vm4, %v14785_v44  ;;  %v10533_v7 = vld [vmem:[%s18713_s4 + $0x670] sm:$0xff] }
 0x600   :  { %v3949_v9 = vpop.f32.mrb[222].mxu1  ;;  %v5575_v10 = vpop.f32.mrb[64].mxu0 }
 0x601   :  { %v17421_v11 = vadd.f32 %v3949_v9, %v17299_v14  ;;  %v12620_v4 = vpop.f32.mrb[223].mxu1  ;;  %v13032_v54 = vpop.f32.mrb[65].mxu0  ;;  %13060 = vmatmul.mubr.msk.f32.vlgmr.msra.gmra.mrb[72].mxu1 %vm1067_vm7, %v5575_v10  ;;  %13425 = vmatmul.mubr.msk.f32.gmra.mrb[170].mxu0 %vm779_vm6, %v10505_v8  ;;  %v10431_v10 = vld [vmem:[%s18714_s5 + $0x90] sm:$0xff] }
 0x602   :  { %13062 = vmatprep.mubr.msk.f32.mxu1 %vm14784_vm4, %v14785_v44  ;;  %13474 = vmatprep.mubr.msk.f32.mxu0 %vm14784_vm4, %v14785_v44  ;;  %v10553_v54 = vld [vmem:[%s18713_s4 + $0x678] sm:$0xff] }
 0x603   :  { %13132 = vmatpush3.msra.mxu1 %v10403_v49 }
 0x604   :  { %v3954_v62 = vpop.f32.mrb[224].mxu1  ;;  %v5580_v14 = vpop.f32.mrb[66].mxu0  ;;  %13205 = vmatprep.subr.mxu1 %v14785_v44 }
 0x605   :  { %v17434_v24 = vadd.f32 %v3954_v62, %v17312_v6  ;;  %v12623_v63 = vpop.f32.mrb[225].mxu1  ;;  %v13035_v16 = vpop.f32.mrb[67].mxu0  ;;  %13063 = vmatmul.mubr.msk.f32.gmra.mrb[74].mxu1 %vm1067_vm7, %v5580_v14  ;;  %13475 = vmatmul.mubr.msk.f32.vlgmr.msra.gmra.mrb[172].mxu0 %vm779_vm6, %v10525_v12 }
 0x606   :  { %14453 = vmatpush3.bf16.msra.mxu0 %v15206_v48  ;;  %13065 = vmatprep.mubr.msk.f32.mxu1 %vm14784_vm4, %v14785_v44  ;;  %v10554_v16 = vld [vmem:[%s18713_s4 + $0x680] sm:$0xff] }
 0x607   :  { %13477 = vmatprep.mubr.msk.f32.mxu0 %vm14784_vm4, %v14785_v44  ;;  %14454 = vmatprep.subr.bf16.mxu0 %v14783_v43 }
 0x608   :  { %v3959_v6 = vpop.f32.mrb[226].mxu1  ;;  %v5585_v18 = vpop.f32.mrb[68].mxu0 }
 0x609   :  { %v17448_v15 = vadd.f32 %v3959_v6, %v17326_v33  ;;  %v12626_v19 = vpop.f32.mrb[227].mxu1  ;;  %v13038_v21 = vpop.f32.mrb[69].mxu0  ;;  %13066 = vmatmul.mubr.msk.f32.gmra.mrb[76].mxu1 %vm1067_vm7, %v5585_v18  ;;  %13478 = vmatmul.mubr.msk.f32.gmra.mrb[174].mxu0 %vm779_vm6, %v10526_v17 }
 0x60a   :  { %14456 = vmatpush3.bf16.msra.mxu0 %v15212_v45  ;;  %13068 = vmatprep.mubr.msk.f32.mxu1 %vm14784_vm4, %v14785_v44 }
 0x60b   :  { %13480 = vmatprep.mubr.msk.f32.mxu0 %vm14784_vm4, %v14785_v44  ;;  %14457 = vmatprep.subr.bf16.mxu0 %v14783_v43 }
 0x60c   :  { %v3964_v33 = vpop.f32.mrb[228].mxu1  ;;  %v5590_v39 = vpop.f32.mrb[70].mxu0 }
 0x60d   :  { %v17462_v23 = vadd.f32 %v3964_v33, %v17340_v25  ;;  %v12629_v30 = vpop.f32.mrb[229].mxu1  ;;  %v13041_v31 = vpop.f32.mrb[71].mxu0  ;;  %13069 = vmatmul.mubr.msk.f32.gmra.mrb[78].mxu1 %vm1067_vm7, %v5590_v39  ;;  %13481 = vmatmul.mubr.msk.f32.gmra.mrb[176].mxu0 %vm779_vm6, %v10527_v22 }
 0x60e   :  { %14459 = vmatpush3.bf16.msra.mxu0 %v15218_v61  ;;  %13071 = vmatprep.mubr.msk.f32.mxu1 %vm14784_vm4, %v14785_v44 }
 0x60f   :  { %13483 = vmatprep.mubr.msk.f32.mxu0 %vm14784_vm4, %v14785_v44  ;;  %14460 = vmatprep.subr.bf16.mxu0 %v14783_v43 }
 0x610   :  { %v3969_v25 = vpop.f32.mrb[230].mxu1  ;;  %v5595_v35 = vpop.f32.mrb[72].mxu0 }
 0x611   :  { %v17476_v26 = vadd.f32 %v3969_v25, %v17354_v13  ;;  %v12632_v28 = vpop.f32.mrb[231].mxu1  ;;  %v13044_v36 = vpop.f32.mrb[73].mxu0  ;;  %13072 = vmatmul.mubr.msk.f32.gmra.mrb[80].mxu1 %vm1067_vm7, %v5595_v35  ;;  %13484 = vmatmul.mubr.msk.f32.gmra.mrb[178].mxu0 %vm779_vm6, %v10528_v32 }
 0x612   :  { %14462 = vmatpush3.bf16.msra.mxu0 %v15224_v5  ;;  %13074 = vmatprep.mubr.msk.f32.mxu1 %vm14784_vm4, %v14785_v44 }
 0x613   :  { %13486 = vmatprep.mubr.msk.f32.mxu0 %vm14784_vm4, %v14785_v44  ;;  %13546 = vmatprep.subr.mxu0 %v14785_v44 }
 0x614   :  { %v3974_v13 = vpop.f32.mrb[232].mxu1  ;;  %v5600_v38 = vpop.f32.mrb[74].mxu0 }
 0x615   :  { %v17490_v29 = vadd.f32 %v3974_v13, %v17368_v34  ;;  %v12635_v42 = vpop.f32.mrb[233].mxu1  ;;  %v13047_v27 = vpop.f32.mrb[75].mxu0  ;;  %13075 = vmatmul.mubr.msk.f32.gmra.mrb[82].mxu1 %vm1067_vm7, %v5600_v38  ;;  %13487 = vmatmul.mubr.msk.f32.gmra.mrb[180].mxu0 %vm779_vm6, %v10529_v37 }
 0x616   :  { %13547 = vmatpush3.msra.mxu0 %v15226_v56  ;;  %13077 = vmatprep.mubr.msk.f32.mxu1 %vm14784_vm4, %v14785_v44 }
 0x617   :  { %13489 = vmatprep.mubr.msk.f32.mxu0 %vm14784_vm4, %v14785_v44  ;;  %14463 = vmatprep.subr.bf16.mxu0 %v14783_v43 }
 0x618   :  { %v3979_v34 = vpop.f32.mrb[234].mxu1  ;;  %v5605_v47 = vpop.f32.mrb[76].mxu0 }
 0x619   :  { %v12638_v20 = vpop.f32.mrb[235].mxu1  ;;  %v13050_v50 = vpop.f32.mrb[77].mxu0  ;;  %13078 = vmatmul.mubr.msk.f32.gmra.mrb[84].mxu1 %vm1067_vm7, %v5605_v47  ;;  %13490 = vmatmul.mubr.msk.f32.gmra.mrb[182].mxu0 %vm779_vm6, %v10530_v46  ;;  %v17506_v51 = vadd.f32 %v3979_v34, %v17382_v53 }
 0x61a   :  { %13080 = vmatprep.mubr.msk.f32.mxu1 %vm14784_vm4, %v14785_v44  ;;  %13492 = vmatprep.mubr.msk.f32.mxu0 %vm14784_vm4, %v14785_v44 }
 0x61c   :  { %v3984_v52 = vpop.f32.mrb[236].mxu1  ;;  %v5610_v55 = vpop.f32.mrb[78].mxu0 }
 0x61d   :  { %v12641_v57 = vpop.f32.mrb[237].mxu1  ;;  %v13053_v58 = vpop.f32.mrb[79].mxu0  ;;  %13081 = vmatmul.mubr.msk.f32.gmra.mrb[86].mxu1 %vm1067_vm7, %v5610_v55  ;;  %13493 = vmatmul.mubr.msk.f32.gmra.mrb[184].mxu0 %vm779_vm6, %v10531_v41  ;;  %v17518_v53 = vadd.f32 %v3984_v52, %v17394_v40 }
 0x61e   :  { %13083 = vmatprep.mubr.msk.f32.mxu1 %vm14784_vm4, %v14785_v44  ;;  %13495 = vmatprep.mubr.msk.f32.mxu0 %vm14784_vm4, %v14785_v44 }
 0x620   :  { %v4239_v0 = vpop.f32.mrb[238].mxu1  ;;  %v5615_v1 = vpop.f32.mrb[80].mxu0 }
 0x621   :  { %v12691_v2 = vpop.f32.mrb[239].mxu1  ;;  %v13056_v3 = vpop.f32.mrb[81].mxu0  ;;  %13084 = vmatmul.mubr.msk.f32.gmra.mrb[88].mxu1 %vm1067_vm7, %v5615_v1  ;;  %13496 = vmatmul.mubr.msk.f32.gmra.mrb[186].mxu0 %vm779_vm6, %v10532_v59  ;;  %v17530_v40 = vadd.f32 %v4239_v0, %v17406_v60  ;;  %v10459_v1 = vld [vmem:[%s18714_s5 + $0x98] sm:$0xff] }
 0x622   :  { %13133 = vmatprep.mubr.msk.f32.mxu1 %vm14784_vm4, %v14785_v44  ;;  %13498 = vmatprep.mubr.msk.f32.mxu0 %vm14784_vm4, %v14785_v44 }
 0x624   :  { %v4244_v8 = vpop.f32.mrb[240].mxu1  ;;  %v5870_v9 = vpop.f32.mrb[82].mxu0 }
 0x625   :  { %v12694_v49 = vpop.f32.mrb[241].mxu1  ;;  %v13106_v4 = vpop.f32.mrb[83].mxu0  ;;  %13134 = vmatmul.mubr.msk.f32.vlgmr.msra.gmra.mrb[90].mxu1 %vm1067_vm7, %v5870_v9  ;;  %13499 = vmatmul.mubr.msk.f32.gmra.mrb[188].mxu0 %vm779_vm6, %v10533_v7  ;;  %v17545_v60 = vadd.f32 %v4244_v8, %v17421_v11  ;;  %v10581_v7 = vld [vmem:[%s18713_s4 + $0x6c0] sm:$0xff] }
 0x626   :  { %13136 = vmatprep.mubr.msk.f32.mxu1 %vm14784_vm4, %v14785_v44  ;;  %13548 = vmatprep.mubr.msk.f32.mxu0 %vm14784_vm4, %v14785_v44 }
 0x627   :  { %13206 = vmatpush3.msra.mxu1 %v10431_v10 }
 0x628   :  { %v4249_v12 = vpop.f32.mrb[242].mxu1  ;;  %v5875_v62 = vpop.f32.mrb[84].mxu0  ;;  %13279 = vmatprep.subr.mxu1 %v14785_v44 }
 0x629   :  { %v12697_v14 = vpop.f32.mrb[243].mxu1  ;;  %v13109_v63 = vpop.f32.mrb[85].mxu0  ;;  %13137 = vmatmul.mubr.msk.f32.gmra.mrb[92].mxu1 %vm1067_vm7, %v5875_v62  ;;  %13549 = vmatmul.mubr.msk.f32.vlgmr.msra.gmra.mrb[190].mxu0 %vm779_vm6, %v10553_v54  ;;  %v17558_v11 = vadd.f32 %v4249_v12, %v17434_v24  ;;  %v10555_v24 = vld [vmem:[%s18713_s4 + $0x688] sm:$0xff] }
 0x62a   :  { %14465 = vmatpush3.bf16.msra.mxu0 %v15206_v48  ;;  %13139 = vmatprep.mubr.msk.f32.mxu1 %vm14784_vm4, %v14785_v44 }
 0x62b   :  { %13551 = vmatprep.mubr.msk.f32.mxu0 %vm14784_vm4, %v14785_v44  ;;  %14466 = vmatprep.subr.bf16.mxu0 %v14783_v43 }
 0x62c   :  { %v4254_v17 = vpop.f32.mrb[244].mxu1  ;;  %v5880_v6 = vpop.f32.mrb[86].mxu0 }
 0x62d   :  { %v12700_v18 = vpop.f32.mrb[245].mxu1  ;;  %v13112_v19 = vpop.f32.mrb[87].mxu0  ;;  %13140 = vmatmul.mubr.msk.f32.gmra.mrb[94].mxu1 %vm1067_vm7, %v5880_v6  ;;  %13552 = vmatmul.mubr.msk.f32.gmra.mrb[192].mxu0 %vm779_vm6, %v10554_v16  ;;  %v17572_v48 = vadd.f32 %v4254_v17, %v17448_v15  ;;  %v10556_v15 = vld [vmem:[%s18713_s4 + $0x690] sm:$0xff] }
 0x62e   :  { %14468 = vmatpush3.bf16.msra.mxu0 %v15212_v45  ;;  %13142 = vmatprep.mubr.msk.f32.mxu1 %vm14784_vm4, %v14785_v44 }
 0x62f   :  { %13554 = vmatprep.mubr.msk.f32.mxu0 %vm14784_vm4, %v14785_v44  ;;  %14469 = vmatprep.subr.bf16.mxu0 %v14783_v43 }
 0x630   :  { %v4259_v21 = vpop.f32.mrb[246].mxu1  ;;  %v5885_v22 = vpop.f32.mrb[88].mxu0 }
 0x631   :  { %v12703_v33 = vpop.f32.mrb[247].mxu1  ;;  %v13115_v39 = vpop.f32.mrb[89].mxu0  ;;  %13143 = vmatmul.mubr.msk.f32.gmra.mrb[96].mxu1 %vm1067_vm7, %v5885_v22  ;;  %13555 = vmatmul.mubr.msk.f32.gmra.mrb[194].mxu0 %vm779_vm6, %v10555_v24  ;;  %v17586_v45 = vadd.f32 %v4259_v21, %v17462_v23  ;;  %v10557_v23 = vld [vmem:[%s18713_s4 + $0x698] sm:$0xff] }
 0x632   :  { %14471 = vmatpush3.bf16.msra.mxu0 %v15218_v61  ;;  %13145 = vmatprep.mubr.msk.f32.mxu1 %vm14784_vm4, %v14785_v44 }
 0x633   :  { %13557 = vmatprep.mubr.msk.f32.mxu0 %vm14784_vm4, %v14785_v44  ;;  %14472 = vmatprep.subr.bf16.mxu0 %v14783_v43 }
 0x634   :  { %v4264_v30 = vpop.f32.mrb[248].mxu1  ;;  %v5890_v31 = vpop.f32.mrb[90].mxu0 }
 0x635   :  { %v12706_v32 = vpop.f32.mrb[249].mxu1  ;;  %v13118_v25 = vpop.f32.mrb[91].mxu0  ;;  %13146 = vmatmul.mubr.msk.f32.gmra.mrb[98].mxu1 %vm1067_vm7, %v5890_v31  ;;  %13558 = vmatmul.mubr.msk.f32.gmra.mrb[196].mxu0 %vm779_vm6, %v10556_v15  ;;  %v17600_v61 = vadd.f32 %v4264_v30, %v17476_v26  ;;  %v10558_v26 = vld [vmem:[%s18713_s4 + $0x6a0] sm:$0xff] }
 0x636   :  { %14474 = vmatpush3.bf16.msra.mxu0 %v15224_v5  ;;  %13148 = vmatprep.mubr.msk.f32.mxu1 %vm14784_vm4, %v14785_v44 }
 0x637   :  { %13560 = vmatprep.mubr.msk.f32.mxu0 %vm14784_vm4, %v14785_v44  ;;  %13620 = vmatprep.subr.mxu0 %v14785_v44 }
 0x638   :  { %v4269_v35 = vpop.f32.mrb[250].mxu1  ;;  %v5895_v28 = vpop.f32.mrb[92].mxu0 }
 0x639   :  { %v12709_v36 = vpop.f32.mrb[251].mxu1  ;;  %v13121_v37 = vpop.f32.mrb[93].mxu0  ;;  %13149 = vmatmul.mubr.msk.f32.gmra.mrb[100].mxu1 %vm1067_vm7, %v5895_v28  ;;  %13561 = vmatmul.mubr.msk.f32.gmra.mrb[198].mxu0 %vm779_vm6, %v10557_v23  ;;  %v17614_v5 = vadd.f32 %v4269_v35, %v17490_v29 }
 0x63a   :  { %13621 = vmatpush3.msra.mxu0 %v15226_v56  ;;  %13151 = vmatprep.mubr.msk.f32.mxu1 %vm14784_vm4, %v14785_v44  ;;  %v10559_v56 = vld [vmem:[%s18713_s4 + $0x6a8] sm:$0xff] }
 0x63b   :  { %13563 = vmatprep.mubr.msk.f32.mxu0 %vm14784_vm4, %v14785_v44  ;;  %14475 = vmatprep.subr.bf16.mxu0 %v14783_v43 }
 0x63c   :  { %v4274_v13 = vpop.f32.mrb[252].mxu1  ;;  %v5900_v38 = vpop.f32.mrb[94].mxu0 }
 0x63d   :  { %v17626_v42 = vadd.f32 %v4274_v13, %v17506_v51  ;;  %v12712_v29 = vpop.f32.mrb[253].mxu1  ;;  %v13124_v27 = vpop.f32.mrb[95].mxu0  ;;  %13152 = vmatmul.mubr.msk.f32.gmra.mrb[102].mxu1 %vm1067_vm7, %v5900_v38  ;;  %13564 = vmatmul.mubr.msk.f32.gmra.mrb[200].mxu0 %vm779_vm6, %v10558_v26  ;;  %v10560_v51 = vld [vmem:[%s18713_s4 + $0x6b0] sm:$0xff] }
 0x63e   :  { %13154 = vmatprep.mubr.msk.f32.mxu1 %vm14784_vm4, %v14785_v44  ;;  %13566 = vmatprep.mubr.msk.f32.mxu0 %vm14784_vm4, %v14785_v44  ;;  %v10588_v27 = vld [vmem:[%s18713_s4 + $0x6f8] sm:$0xff] }
 0x640   :  { %v4279_v46 = vpop.f32.mrb[254].mxu1  ;;  %v5905_v34 = vpop.f32.mrb[96].mxu0 }
 0x641   :  { %v17638_v47 = vadd.f32 %v4279_v46, %v17518_v53  ;;  %v12715_v20 = vpop.f32.mrb[255].mxu1  ;;  %v13127_v50 = vpop.f32.mrb[97].mxu0  ;;  %13155 = vmatmul.mubr.msk.f32.gmra.mrb[104].mxu1 %vm1067_vm7, %v5905_v34  ;;  %13567 = vmatmul.mubr.msk.f32.gmra.mrb[202].mxu0 %vm779_vm6, %v10559_v56  ;;  %v10561_v53 = vld [vmem:[%s18713_s4 + $0x6b8] sm:$0xff] }
 0x642   :  { %13157 = vmatprep.mubr.msk.f32.mxu1 %vm14784_vm4, %v14785_v44  ;;  %13569 = vmatprep.mubr.msk.f32.mxu0 %vm14784_vm4, %v14785_v44  ;;  %v10589_v50 = vld [vmem:[%s18713_s4 + $0x700] sm:$0xff] }
 0x644   :  { %v4534_v41 = vpop.f32.mrb[0].mxu1  ;;  %v5910_v52 = vpop.f32.mrb[98].mxu0 }
 0x645   :  { %v17650_v55 = vadd.f32 %v4534_v41, %v17530_v40  ;;  %v12765_v57 = vpop.f32.mrb[1].mxu1  ;;  %v13130_v58 = vpop.f32.mrb[99].mxu0  ;;  %13158 = vmatmul.mubr.msk.f32.gmra.mrb[106].mxu1 %vm1067_vm7, %v5910_v52  ;;  %13570 = vmatmul.mubr.msk.f32.gmra.mrb[204].mxu0 %vm779_vm6, %v10560_v51  ;;  %v10487_v51 = vld [vmem:[%s18714_s5 + $0xa0] sm:$0xff] }
 0x646   :  { %13207 = vmatprep.mubr.msk.f32.mxu1 %vm14784_vm4, %v14785_v44  ;;  %13572 = vmatprep.mubr.msk.f32.mxu0 %vm14784_vm4, %v14785_v44 }
 0x648   :  { %v4539_v59 = vpop.f32.mrb[2].mxu1  ;;  %v6165_v0 = vpop.f32.mrb[100].mxu0 }
 0x649   :  { %v17665_v2 = vadd.f32 %v4539_v59, %v17545_v60  ;;  %v12768_v3 = vpop.f32.mrb[3].mxu1  ;;  %v13180_v40 = vpop.f32.mrb[101].mxu0  ;;  %13208 = vmatmul.mubr.msk.f32.vlgmr.msra.gmra.mrb[108].mxu1 %vm1067_vm7, %v6165_v0  ;;  %13573 = vmatmul.mubr.msk.f32.gmra.mrb[206].mxu0 %vm779_vm6, %v10561_v53  ;;  %v10582_v60 = vld [vmem:[%s18713_s4 + $0x6c8] sm:$0xff] }
 0x64a   :  { %13210 = vmatprep.mubr.msk.f32.mxu1 %vm14784_vm4, %v14785_v44  ;;  %13622 = vmatprep.mubr.msk.f32.mxu0 %vm14784_vm4, %v14785_v44 }
 0x64b   :  { %13280 = vmatpush3.msra.mxu1 %v10459_v1 }
 0x64c   :  { %v4544_v8 = vpop.f32.mrb[4].mxu1  ;;  %v6170_v9 = vpop.f32.mrb[102].mxu0  ;;  %13353 = vmatprep.subr.mxu1 %v14785_v44 }
 0x64d   :  { %v17678_v10 = vadd.f32 %v4544_v8, %v17558_v11  ;;  %v12771_v49 = vpop.f32.mrb[5].mxu1  ;;  %v13183_v4 = vpop.f32.mrb[103].mxu0  ;;  %13211 = vmatmul.mubr.msk.f32.gmra.mrb[110].mxu1 %vm1067_vm7, %v6170_v9  ;;  %13623 = vmatmul.mubr.msk.f32.vlgmr.msra.gmra.mrb[208].mxu0 %vm779_vm6, %v10581_v7  ;;  %v10583_v11 = vld [vmem:[%s18713_s4 + $0x6d0] sm:$0xff] }
 0x64e   :  { %13213 = vmatprep.mubr.msk.f32.mxu1 %vm14784_vm4, %v14785_v44  ;;  %13625 = vmatprep.mubr.msk.f32.mxu0 %vm14784_vm4, %v14785_v44 }
 0x650   :  { %v4549_v54 = vpop.f32.mrb[6].mxu1  ;;  %v6175_v12 = vpop.f32.mrb[104].mxu0 }
 0x651   :  { %v17690_v62 = vadd.f32 %v4549_v54, %v17572_v48  ;;  %v12774_v14 = vpop.f32.mrb[7].mxu1  ;;  %v13186_v63 = vpop.f32.mrb[105].mxu0  ;;  %13214 = vmatmul.mubr.msk.f32.gmra.mrb[112].mxu1 %vm1067_vm7, %v6175_v12  ;;  %13626 = vmatmul.mubr.msk.f32.gmra.mrb[210].mxu0 %vm779_vm6, %v10582_v60  ;;  %v10584_v48 = vld [vmem:[%s18713_s4 + $0x6d8] sm:$0xff] }
 0x652   :  { %13216 = vmatprep.mubr.msk.f32.mxu1 %vm14784_vm4, %v14785_v44  ;;  %13628 = vmatprep.mubr.msk.f32.mxu0 %vm14784_vm4, %v14785_v44 }
 0x654   :  { %v4554_v16 = vpop.f32.mrb[8].mxu1  ;;  %v6180_v17 = vpop.f32.mrb[106].mxu0 }
 0x655   :  { %v17702_v6 = vadd.f32 %v4554_v16, %v17586_v45  ;;  %v12777_v18 = vpop.f32.mrb[9].mxu1  ;;  %v13189_v19 = vpop.f32.mrb[107].mxu0  ;;  %13217 = vmatmul.mubr.msk.f32.gmra.mrb[114].mxu1 %vm1067_vm7, %v6180_v17  ;;  %13629 = vmatmul.mubr.msk.f32.gmra.mrb[212].mxu0 %vm779_vm6, %v10583_v11  ;;  %v10585_v45 = vld [vmem:[%s18713_s4 + $0x6e0] sm:$0xff] }
 0x656   :  { %13219 = vmatprep.mubr.msk.f32.mxu1 %vm14784_vm4, %v14785_v44  ;;  %13631 = vmatprep.mubr.msk.f32.mxu0 %vm14784_vm4, %v14785_v44 }
 0x658   :  { %v4559_v24 = vpop.f32.mrb[10].mxu1  ;;  %v6185_v21 = vpop.f32.mrb[108].mxu0 }
 0x659   :  { %v17714_v22 = vadd.f32 %v4559_v24, %v17600_v61  ;;  %v12780_v33 = vpop.f32.mrb[11].mxu1  ;;  %v13192_v39 = vpop.f32.mrb[109].mxu0  ;;  %13220 = vmatmul.mubr.msk.f32.gmra.mrb[116].mxu1 %vm1067_vm7, %v6185_v21  ;;  %13632 = vmatmul.mubr.msk.f32.gmra.mrb[214].mxu0 %vm779_vm6, %v10584_v48  ;;  %v10586_v61 = vld [vmem:[%s18713_s4 + $0x6e8] sm:$0xff] }
 0x65a   :  { %13222 = vmatprep.mubr.msk.f32.mxu1 %vm14784_vm4, %v14785_v44  ;;  %13634 = vmatprep.mubr.msk.f32.mxu0 %vm14784_vm4, %v14785_v44 }
 0x65c   :  { %v4564_v15 = vpop.f32.mrb[12].mxu1  ;;  %v6190_v30 = vpop.f32.mrb[110].mxu0 }
 0x65d   :  { %v17726_v31 = vadd.f32 %v4564_v15, %v17614_v5  ;;  %v12783_v32 = vpop.f32.mrb[13].mxu1  ;;  %v13195_v25 = vpop.f32.mrb[111].mxu0  ;;  %13223 = vmatmul.mubr.msk.f32.gmra.mrb[118].mxu1 %vm1067_vm7, %v6190_v30  ;;  %13635 = vmatmul.mubr.msk.f32.gmra.mrb[216].mxu0 %vm779_vm6, %v10585_v45  ;;  %v10587_v5 = vld [vmem:[%s18713_s4 + $0x6f0] sm:$0xff] }
 0x65e   :  { %13225 = vmatprep.mubr.msk.f32.mxu1 %vm14784_vm4, %v14785_v44  ;;  %13637 = vmatprep.mubr.msk.f32.mxu0 %vm14784_vm4, %v14785_v44 }
 0x660   :  { %v4569_v23 = vpop.f32.mrb[14].mxu1  ;;  %v6195_v35 = vpop.f32.mrb[112].mxu0 }
 0x661   :  { %v17738_v28 = vadd.f32 %v4569_v23, %v17626_v42  ;;  %v12786_v36 = vpop.f32.mrb[15].mxu1  ;;  %v13198_v37 = vpop.f32.mrb[113].mxu0  ;;  %13226 = vmatmul.mubr.msk.f32.gmra.mrb[120].mxu1 %vm1067_vm7, %v6195_v35  ;;  %13638 = vmatmul.mubr.msk.f32.gmra.mrb[218].mxu0 %vm779_vm6, %v10586_v61 }
 0x662   :  { %13228 = vmatprep.mubr.msk.f32.mxu1 %vm14784_vm4, %v14785_v44  ;;  %13640 = vmatprep.mubr.msk.f32.mxu0 %vm14784_vm4, %v14785_v44 }
 0x664   :  { %v4574_v26 = vpop.f32.mrb[16].mxu1  ;;  %v6200_v13 = vpop.f32.mrb[114].mxu0 }
 0x665   :  { %v17750_v38 = vadd.f32 %v4574_v26, %v17638_v47  ;;  %v12789_v42 = vpop.f32.mrb[17].mxu1  ;;  %v13201_v29 = vpop.f32.mrb[115].mxu0  ;;  %13229 = vmatmul.mubr.msk.f32.gmra.mrb[122].mxu1 %vm1067_vm7, %v6200_v13  ;;  %13641 = vmatmul.mubr.msk.f32.gmra.mrb[220].mxu0 %vm779_vm6, %v10587_v5 }
 0x666   :  { %13231 = vmatprep.mubr.msk.f32.mxu1 %vm14784_vm4, %v14785_v44  ;;  %13643 = vmatprep.mubr.msk.f32.mxu0 %vm14784_vm4, %v14785_v44 }
 0x668   :  { %v4829_v56 = vpop.f32.mrb[18].mxu1  ;;  %v6205_v46 = vpop.f32.mrb[116].mxu0 }
 0x669   :  { %v17762_v34 = vadd.f32 %v4829_v56, %v17650_v55  ;;  %v12839_v47 = vpop.f32.mrb[19].mxu1  ;;  %v13204_v20 = vpop.f32.mrb[117].mxu0  ;;  %13232 = vmatmul.mubr.msk.f32.gmra.mrb[124].mxu1 %vm1067_vm7, %v6205_v46  ;;  %13644 = vmatmul.mubr.msk.f32.gmra.mrb[222].mxu0 %vm779_vm6, %v10588_v27 }
 0x66a   :  { %13281 = vmatprep.mubr.msk.f32.mxu1 %vm14784_vm4, %v14785_v44  ;;  %13646 = vmatprep.mubr.msk.f32.mxu0 %vm14784_vm4, %v14785_v44 }
 0x66c   :  { %v4834_v41 = vpop.f32.mrb[20].mxu1  ;;  %v6460_v52 = vpop.f32.mrb[118].mxu0 }
 0x66d   :  { %v17777_v55 = vadd.f32 %v4834_v41, %v17665_v2  ;;  %v12842_v57 = vpop.f32.mrb[21].mxu1  ;;  %v13254_v58 = vpop.f32.mrb[119].mxu0  ;;  %13282 = vmatmul.mubr.msk.f32.vlgmr.msra.gmra.mrb[126].mxu1 %vm1067_vm7, %v6460_v52  ;;  %13647 = vmatmul.mubr.msk.f32.gmra.mrb[224].mxu0 %vm779_vm6, %v10589_v50 }
 0x66e   :  { %13284 = vmatprep.mubr.msk.f32.mxu1 %vm14784_vm4, %v14785_v44  ;;  %13354 = vmatpush3.msra.mxu1 %v10487_v51 }
 0x66f   :  { %13427 = vmatprep.subr.mxu1 %v14785_v44  ;;  %13696 = vmatprep.mubr.msk.f32.mxu0 %vm14784_vm4, %v14785_v44 }
 0x670   :  { %v4839_v53 = vpop.f32.mrb[22].mxu1  ;;  %v6465_v59 = vpop.f32.mrb[120].mxu0 }
 0x671   :  { %v17787_v0 = vadd.f32 %v4839_v53, %v17678_v10  ;;  %v12845_v1 = vpop.f32.mrb[23].mxu1  ;;  %v13257_v2 = vpop.f32.mrb[121].mxu0  ;;  %13285 = vmatmul.mubr.msk.f32.gmra.mrb[128].mxu1 %vm1067_vm7, %v6465_v59 }
 0x672   :  { %13287 = vmatprep.mubr.msk.f32.mxu1 %vm14784_vm4, %v14785_v44 }
 0x674   :  { %v4844_v3 = vpop.f32.mrb[24].mxu1  ;;  %v6470_v40 = vpop.f32.mrb[122].mxu0 }
 0x675   :  { %v17793_v7 = vadd.f32 %v4844_v3, %v17690_v62  ;;  %v12848_v8 = vpop.f32.mrb[25].mxu1  ;;  %v13260_v9 = vpop.f32.mrb[123].mxu0  ;;  %13288 = vmatmul.mubr.msk.f32.gmra.mrb[130].mxu1 %vm1067_vm7, %v6470_v40 }
 0x676   :  { %13290 = vmatprep.mubr.msk.f32.mxu1 %vm14784_vm4, %v14785_v44 }
 0x678   :  { %v4849_v10 = vpop.f32.mrb[26].mxu1  ;;  %v6475_v49 = vpop.f32.mrb[124].mxu0 }
 0x679   :  { %v17799_v4 = vadd.f32 %v4849_v10, %v17702_v6  ;;  %v12851_v60 = vpop.f32.mrb[27].mxu1  ;;  %v13263_v54 = vpop.f32.mrb[125].mxu0  ;;  %13291 = vmatmul.mubr.msk.f32.gmra.mrb[132].mxu1 %vm1067_vm7, %v6475_v49 }
 0x67a   :  { %13293 = vmatprep.mubr.msk.f32.mxu1 %vm14784_vm4, %v14785_v44 }
 0x67c   :  { %v4854_v12 = vpop.f32.mrb[28].mxu1  ;;  %v6480_v62 = vpop.f32.mrb[126].mxu0 }
 0x67d   :  { %v17805_v14 = vadd.f32 %v4854_v12, %v17714_v22  ;;  %v12854_v63 = vpop.f32.mrb[29].mxu1  ;;  %v13266_v11 = vpop.f32.mrb[127].mxu0  ;;  %13294 = vmatmul.mubr.msk.f32.gmra.mrb[134].mxu1 %vm1067_vm7, %v6480_v62 }
 0x67e   :  { %13296 = vmatprep.mubr.msk.f32.mxu1 %vm14784_vm4, %v14785_v44 }
 0x680   :  { %v4859_v16 = vpop.f32.mrb[30].mxu1  ;;  %v6485_v17 = vpop.f32.mrb[128].mxu0 }
 0x681   :  { %v17811_v6 = vadd.f32 %v4859_v16, %v17726_v31  ;;  %v12857_v18 = vpop.f32.mrb[31].mxu1  ;;  %v13269_v19 = vpop.f32.mrb[129].mxu0  ;;  %13297 = vmatmul.mubr.msk.f32.gmra.mrb[136].mxu1 %vm1067_vm7, %v6485_v17 }
 0x682   :  { %13299 = vmatprep.mubr.msk.f32.mxu1 %vm14784_vm4, %v14785_v44  ;;  %v10543_v19 = vld [vmem:[%s18714_s5 + $0xb0] sm:$0xff] }
 0x684   :  { %v4864_v48 = vpop.f32.mrb[32].mxu1  ;;  %v6490_v24 = vpop.f32.mrb[130].mxu0 }
 0x685   :  { %v17817_v21 = vadd.f32 %v4864_v48, %v17738_v28  ;;  %v12860_v22 = vpop.f32.mrb[33].mxu1  ;;  %v13272_v33 = vpop.f32.mrb[131].mxu0  ;;  %13300 = vmatmul.mubr.msk.f32.gmra.mrb[138].mxu1 %vm1067_vm7, %v6490_v24  ;;  %v10515_v28 = vld [vmem:[%s18714_s5 + $0xa8] sm:$0xff] }
 0x686   :  { %13302 = vmatprep.mubr.msk.f32.mxu1 %vm14784_vm4, %v14785_v44 }
 0x688   :  { %v4869_v39 = vpop.f32.mrb[34].mxu1  ;;  %v6495_v45 = vpop.f32.mrb[132].mxu0 }
 0x689   :  { %v17823_v15 = vadd.f32 %v4869_v39, %v17750_v38  ;;  %v12863_v30 = vpop.f32.mrb[35].mxu1  ;;  %v13275_v31 = vpop.f32.mrb[133].mxu0  ;;  %13303 = vmatmul.mubr.msk.f32.gmra.mrb[140].mxu1 %vm1067_vm7, %v6495_v45 }
 0x68a   :  { %13305 = vmatprep.mubr.msk.f32.mxu1 %vm14784_vm4, %v14785_v44 }
 0x68c   :  { %v5124_v32 = vpop.f32.mrb[36].mxu1  ;;  %v6500_v25 = vpop.f32.mrb[134].mxu0 }
 0x68d   :  { %v17829_v61 = vadd.f32 %v5124_v32, %v17762_v34  ;;  %v12913_v23 = vpop.f32.mrb[37].mxu1  ;;  %v13278_v35 = vpop.f32.mrb[135].mxu0  ;;  %13306 = vmatmul.mubr.msk.f32.gmra.mrb[142].mxu1 %vm1067_vm7, %v6500_v25 }
 0x68e   :  { %13355 = vmatprep.mubr.msk.f32.mxu1 %vm14784_vm4, %v14785_v44 }
 0x690   :  { %v5129_v36 = vpop.f32.mrb[38].mxu1  ;;  %v6755_v37 = vpop.f32.mrb[136].mxu0 }
 0x691   :  { %v17838_v5 = vadd.f32 %v5129_v36, %v17777_v55  ;;  %v12916_v26 = vpop.f32.mrb[39].mxu1  ;;  %v13328_v13 = vpop.f32.mrb[137].mxu0  ;;  %13356 = vmatmul.mubr.msk.f32.vlgmr.msra.gmra.mrb[144].mxu1 %vm1067_vm7, %v6755_v37 }
 0x692   :  { %13358 = vmatprep.mubr.msk.f32.mxu1 %vm14784_vm4, %v14785_v44  ;;  %13428 = vmatpush3.msra.mxu1 %v10515_v28 }
 0x693   :  { %13501 = vmatprep.subr.mxu1 %v14785_v44 }
 0x694   :  { %v5134_v38 = vpop.f32.mrb[40].mxu1  ;;  %v6760_v42 = vpop.f32.mrb[138].mxu0 }
 0x695   :  { %v17845_v29 = vadd.f32 %v5134_v38, %v17787_v0  ;;  %v12919_v27 = vpop.f32.mrb[41].mxu1  ;;  %v13331_v56 = vpop.f32.mrb[139].mxu0  ;;  %13359 = vmatmul.mubr.msk.f32.gmra.mrb[146].mxu1 %vm1067_vm7, %v6760_v42 }
 0x696   :  { %13361 = vmatprep.mubr.msk.f32.mxu1 %vm14784_vm4, %v14785_v44 }
 0x698   :  { %v5139_v46 = vpop.f32.mrb[42].mxu1  ;;  %v6765_v34 = vpop.f32.mrb[140].mxu0 }
 0x699   :  { %v17851_v47 = vadd.f32 %v5139_v46, %v17793_v7  ;;  %v12922_v20 = vpop.f32.mrb[43].mxu1  ;;  %v13334_v50 = vpop.f32.mrb[141].mxu0  ;;  %13362 = vmatmul.mubr.msk.f32.gmra.mrb[148].mxu1 %vm1067_vm7, %v6765_v34 }
 0x69a   :  { %13364 = vmatprep.mubr.msk.f32.mxu1 %vm14784_vm4, %v14785_v44 }
 0x69c   :  { %v5144_v51 = vpop.f32.mrb[44].mxu1  ;;  %v6770_v41 = vpop.f32.mrb[142].mxu0 }
 0x69d   :  { %v17857_v52 = vadd.f32 %v5144_v51, %v17799_v4  ;;  %v12925_v55 = vpop.f32.mrb[45].mxu1  ;;  %v13337_v57 = vpop.f32.mrb[143].mxu0  ;;  %13365 = vmatmul.mubr.msk.f32.gmra.mrb[150].mxu1 %vm1067_vm7, %v6770_v41 }
 0x69e   :  { %13367 = vmatprep.mubr.msk.f32.mxu1 %vm14784_vm4, %v14785_v44 }
 0x6a0   :  { %v5149_v58 = vpop.f32.mrb[46].mxu1  ;;  %v6775_v53 = vpop.f32.mrb[144].mxu0 }
 0x6a1   :  { %v17863_v59 = vadd.f32 %v5149_v58, %v17805_v14  ;;  %v12928_v0 = vpop.f32.mrb[47].mxu1  ;;  %v13340_v1 = vpop.f32.mrb[145].mxu0  ;;  %13368 = vmatmul.mubr.msk.f32.gmra.mrb[152].mxu1 %vm1067_vm7, %v6775_v53 }
 0x6a2   :  { %13370 = vmatprep.mubr.msk.f32.mxu1 %vm14784_vm4, %v14785_v44 }
 0x6a4   :  { %v5154_v2 = vpop.f32.mrb[48].mxu1  ;;  %v6780_v3 = vpop.f32.mrb[146].mxu0 }
 0x6a5   :  { %v17869_v40 = vadd.f32 %v5154_v2, %v17811_v6  ;;  %v12931_v7 = vpop.f32.mrb[49].mxu1  ;;  %v13343_v8 = vpop.f32.mrb[147].mxu0  ;;  %13371 = vmatmul.mubr.msk.f32.gmra.mrb[154].mxu1 %vm1067_vm7, %v6780_v3 }
 0x6a6   :  { %13373 = vmatprep.mubr.msk.f32.mxu1 %vm14784_vm4, %v14785_v44  ;;  %v10571_v8 = vld [vmem:[%s18714_s5 + $0xb8] sm:$0xff] }
 0x6a8   :  { %v5159_v9 = vpop.f32.mrb[50].mxu1  ;;  %v6785_v10 = vpop.f32.mrb[148].mxu0 }
 0x6a9   :  { %v17875_v49 = vadd.f32 %v5159_v9, %v17817_v21  ;;  %v12934_v4 = vpop.f32.mrb[51].mxu1  ;;  %v13346_v60 = vpop.f32.mrb[149].mxu0  ;;  %13374 = vmatmul.mubr.msk.f32.gmra.mrb[156].mxu1 %vm1067_vm7, %v6785_v10 }
 0x6aa   :  { %13376 = vmatprep.mubr.msk.f32.mxu1 %vm14784_vm4, %v14785_v44 }
 0x6ac   :  { %v5164_v54 = vpop.f32.mrb[52].mxu1  ;;  %v6790_v12 = vpop.f32.mrb[150].mxu0 }
 0x6ad   :  { %v17881_v62 = vadd.f32 %v5164_v54, %v17823_v15  ;;  %v12937_v14 = vpop.f32.mrb[53].mxu1  ;;  %v13349_v63 = vpop.f32.mrb[151].mxu0  ;;  %13377 = vmatmul.mubr.msk.f32.gmra.mrb[158].mxu1 %vm1067_vm7, %v6790_v12 }
 0x6ae   :  { %13379 = vmatprep.mubr.msk.f32.mxu1 %vm14784_vm4, %v14785_v44 }
 0x6b0   :  { %v5419_v11 = vpop.f32.mrb[54].mxu1  ;;  %v6795_v16 = vpop.f32.mrb[152].mxu0 }
 0x6b1   :  { %v17887_v17 = vadd.f32 %v5419_v11, %v17829_v61  ;;  %v12987_v6 = vpop.f32.mrb[55].mxu1  ;;  %v13352_v18 = vpop.f32.mrb[153].mxu0  ;;  %13380 = vmatmul.mubr.msk.f32.gmra.mrb[160].mxu1 %vm1067_vm7, %v6795_v16 }
 0x6b2   :  { %13429 = vmatprep.mubr.msk.f32.mxu1 %vm14784_vm4, %v14785_v44 }
 0x6b4   :  { %v5424_v48 = vpop.f32.mrb[56].mxu1  ;;  %v7050_v24 = vpop.f32.mrb[154].mxu0 }
 0x6b5   :  { %v17896_v21 = vadd.f32 %v5424_v48, %v17838_v5  ;;  %v12990_v22 = vpop.f32.mrb[57].mxu1  ;;  %v13402_v33 = vpop.f32.mrb[155].mxu0  ;;  %13430 = vmatmul.mubr.msk.f32.vlgmr.msra.gmra.mrb[162].mxu1 %vm1067_vm7, %v7050_v24 }
 0x6b6   :  { %13432 = vmatprep.mubr.msk.f32.mxu1 %vm14784_vm4, %v14785_v44  ;;  %13502 = vmatpush3.msra.mxu1 %v10543_v19 }
 0x6b7   :  { %13575 = vmatprep.subr.mxu1 %v14785_v44 }
 0x6b8   :  { %v5429_v39 = vpop.f32.mrb[58].mxu1  ;;  %v7055_v45 = vpop.f32.mrb[156].mxu0 }
 0x6b9   :  { %v17903_v15 = vadd.f32 %v5429_v39, %v17845_v29  ;;  %v12993_v30 = vpop.f32.mrb[59].mxu1  ;;  %v13405_v31 = vpop.f32.mrb[157].mxu0  ;;  %13433 = vmatmul.mubr.msk.f32.gmra.mrb[164].mxu1 %vm1067_vm7, %v7055_v45 }
 0x6ba   :  { %13435 = vmatprep.mubr.msk.f32.mxu1 %vm14784_vm4, %v14785_v44 }
 0x6bc   :  { %v5434_v32 = vpop.f32.mrb[60].mxu1  ;;  %v7060_v25 = vpop.f32.mrb[158].mxu0 }
 0x6bd   :  { %v17909_v61 = vadd.f32 %v5434_v32, %v17851_v47  ;;  %v12996_v23 = vpop.f32.mrb[61].mxu1  ;;  %v13408_v35 = vpop.f32.mrb[159].mxu0  ;;  %13436 = vmatmul.mubr.msk.f32.gmra.mrb[166].mxu1 %vm1067_vm7, %v7060_v25 }
 0x6be   :  { %13438 = vmatprep.mubr.msk.f32.mxu1 %vm14784_vm4, %v14785_v44 }
 0x6c0   :  { %v5439_v28 = vpop.f32.mrb[62].mxu1  ;;  %v7065_v36 = vpop.f32.mrb[160].mxu0 }
 0x6c1   :  { %v17915_v37 = vadd.f32 %v5439_v28, %v17857_v52  ;;  %v12999_v5 = vpop.f32.mrb[63].mxu1  ;;  %v13411_v26 = vpop.f32.mrb[161].mxu0  ;;  %13439 = vmatmul.mubr.msk.f32.gmra.mrb[168].mxu1 %vm1067_vm7, %v7065_v36 }
 0x6c2   :  { %13441 = vmatprep.mubr.msk.f32.mxu1 %vm14784_vm4, %v14785_v44 }
 0x6c4   :  { %v5444_v13 = vpop.f32.mrb[64].mxu1  ;;  %v7070_v38 = vpop.f32.mrb[162].mxu0 }
 0x6c5   :  { %v17921_v42 = vadd.f32 %v5444_v13, %v17863_v59  ;;  %v13002_v29 = vpop.f32.mrb[65].mxu1  ;;  %v13414_v27 = vpop.f32.mrb[163].mxu0  ;;  %13442 = vmatmul.mubr.msk.f32.gmra.mrb[170].mxu1 %vm1067_vm7, %v7070_v38 }
 0x6c6   :  { %13444 = vmatprep.mubr.msk.f32.mxu1 %vm14784_vm4, %v14785_v44 }
 0x6c8   :  { %v5449_v56 = vpop.f32.mrb[66].mxu1  ;;  %v7075_v46 = vpop.f32.mrb[164].mxu0 }
 0x6c9   :  { %v17927_v34 = vadd.f32 %v5449_v56, %v17869_v40  ;;  %v13005_v47 = vpop.f32.mrb[67].mxu1  ;;  %v13417_v20 = vpop.f32.mrb[165].mxu0  ;;  %13445 = vmatmul.mubr.msk.f32.gmra.mrb[172].mxu1 %vm1067_vm7, %v7075_v46 }
 0x6ca   :  { %13447 = vmatprep.mubr.msk.f32.mxu1 %vm14784_vm4, %v14785_v44  ;;  %v10599_v20 = vld [vmem:[%s18714_s5 + $0xc0] sm:$0xff] }
 0x6cc   :  { %v5454_v50 = vpop.f32.mrb[68].mxu1  ;;  %v7080_v51 = vpop.f32.mrb[166].mxu0 }
 0x6cd   :  { %v17933_v41 = vadd.f32 %v5454_v50, %v17875_v49  ;;  %v13008_v52 = vpop.f32.mrb[69].mxu1  ;;  %v13420_v55 = vpop.f32.mrb[167].mxu0  ;;  %13448 = vmatmul.mubr.msk.f32.gmra.mrb[174].mxu1 %vm1067_vm7, %v7080_v51 }
 0x6ce   :  { %13450 = vmatprep.mubr.msk.f32.mxu1 %vm14784_vm4, %v14785_v44 }
 0x6d0   :  { %v5459_v57 = vpop.f32.mrb[70].mxu1  ;;  %v7085_v58 = vpop.f32.mrb[168].mxu0 }
 0x6d1   :  { %v17939_v53 = vadd.f32 %v5459_v57, %v17881_v62  ;;  %v13011_v59 = vpop.f32.mrb[71].mxu1  ;;  %v13423_v0 = vpop.f32.mrb[169].mxu0  ;;  %13451 = vmatmul.mubr.msk.f32.gmra.mrb[176].mxu1 %vm1067_vm7, %v7085_v58 }
 0x6d2   :  { %13453 = vmatprep.mubr.msk.f32.mxu1 %vm14784_vm4, %v14785_v44 }
 0x6d4   :  { %v5714_v1 = vpop.f32.mrb[72].mxu1  ;;  %v7090_v2 = vpop.f32.mrb[170].mxu0 }
 0x6d5   :  { %v17945_v3 = vadd.f32 %v5714_v1, %v17887_v17  ;;  %v13061_v40 = vpop.f32.mrb[73].mxu1  ;;  %v13426_v7 = vpop.f32.mrb[171].mxu0  ;;  %13454 = vmatmul.mubr.msk.f32.gmra.mrb[178].mxu1 %vm1067_vm7, %v7090_v2 }
 0x6d6   :  { %13503 = vmatprep.mubr.msk.f32.mxu1 %vm14784_vm4, %v14785_v44 }
 0x6d8   :  { %v5719_v9 = vpop.f32.mrb[74].mxu1  ;;  %v7345_v10 = vpop.f32.mrb[172].mxu0 }
 0x6d9   :  { %v17954_v49 = vadd.f32 %v5719_v9, %v17896_v21  ;;  %v13064_v4 = vpop.f32.mrb[75].mxu1  ;;  %v13476_v60 = vpop.f32.mrb[173].mxu0  ;;  %13504 = vmatmul.mubr.msk.f32.vlgmr.msra.gmra.mrb[180].mxu1 %vm1067_vm7, %v7345_v10 }
 0x6da   :  { %13506 = vmatprep.mubr.msk.f32.mxu1 %vm14784_vm4, %v14785_v44  ;;  %13576 = vmatpush3.msra.mxu1 %v10571_v8 }
 0x6db   :  { %13649 = vmatprep.subr.mxu1 %v14785_v44 }
 0x6dc   :  { %v5724_v54 = vpop.f32.mrb[76].mxu1  ;;  %v7350_v12 = vpop.f32.mrb[174].mxu0 }
 0x6dd   :  { %v17961_v62 = vadd.f32 %v5724_v54, %v17903_v15  ;;  %v13067_v14 = vpop.f32.mrb[77].mxu1  ;;  %v13479_v63 = vpop.f32.mrb[175].mxu0  ;;  %13507 = vmatmul.mubr.msk.f32.gmra.mrb[182].mxu1 %vm1067_vm7, %v7350_v12 }
 0x6de   :  { %13509 = vmatprep.mubr.msk.f32.mxu1 %vm14784_vm4, %v14785_v44 }
 0x6e0   :  { %v5729_v11 = vpop.f32.mrb[78].mxu1  ;;  %v7355_v16 = vpop.f32.mrb[176].mxu0 }
 0x6e1   :  { %v17967_v17 = vadd.f32 %v5729_v11, %v17909_v61  ;;  %v13070_v6 = vpop.f32.mrb[79].mxu1  ;;  %v13482_v18 = vpop.f32.mrb[177].mxu0  ;;  %13510 = vmatmul.mubr.msk.f32.gmra.mrb[184].mxu1 %vm1067_vm7, %v7355_v16 }
 0x6e2   :  { %13512 = vmatprep.mubr.msk.f32.mxu1 %vm14784_vm4, %v14785_v44 }
 0x6e4   :  { %v5734_v19 = vpop.f32.mrb[80].mxu1  ;;  %v7360_v48 = vpop.f32.mrb[178].mxu0 }
 0x6e5   :  { %v17973_v24 = vadd.f32 %v5734_v19, %v17915_v37  ;;  %v13073_v21 = vpop.f32.mrb[81].mxu1  ;;  %v13485_v22 = vpop.f32.mrb[179].mxu0  ;;  %13513 = vmatmul.mubr.msk.f32.gmra.mrb[186].mxu1 %vm1067_vm7, %v7360_v48 }
 0x6e6   :  { %13515 = vmatprep.mubr.msk.f32.mxu1 %vm14784_vm4, %v14785_v44 }
 0x6e8   :  { %v5739_v33 = vpop.f32.mrb[82].mxu1  ;;  %v7365_v39 = vpop.f32.mrb[180].mxu0 }
 0x6e9   :  { %v17979_v45 = vadd.f32 %v5739_v33, %v17921_v42  ;;  %v13076_v15 = vpop.f32.mrb[83].mxu1  ;;  %v13488_v30 = vpop.f32.mrb[181].mxu0  ;;  %13516 = vmatmul.mubr.msk.f32.gmra.mrb[188].mxu1 %vm1067_vm7, %v7365_v39 }
 0x6ea   :  { %13518 = vmatprep.mubr.msk.f32.mxu1 %vm14784_vm4, %v14785_v44 }
 0x6ec   :  { %v5744_v31 = vpop.f32.mrb[84].mxu1  ;;  %v7370_v32 = vpop.f32.mrb[182].mxu0 }
 0x6ed   :  { %v17985_v25 = vadd.f32 %v5744_v31, %v17927_v34  ;;  %v13079_v61 = vpop.f32.mrb[85].mxu1  ;;  %v13491_v23 = vpop.f32.mrb[183].mxu0  ;;  %13519 = vmatmul.mubr.msk.f32.gmra.mrb[190].mxu1 %vm1067_vm7, %v7370_v32 }
 0x6ee   :  { %13521 = vmatprep.mubr.msk.f32.mxu1 %vm14784_vm4, %v14785_v44 }
 0x6f0   :  { %v5749_v35 = vpop.f32.mrb[86].mxu1  ;;  %v7375_v28 = vpop.f32.mrb[184].mxu0 }
 0x6f1   :  { %v17991_v36 = vadd.f32 %v5749_v35, %v17933_v41  ;;  %v13082_v37 = vpop.f32.mrb[87].mxu1  ;;  %v13494_v5 = vpop.f32.mrb[185].mxu0  ;;  %13522 = vmatmul.mubr.msk.f32.gmra.mrb[192].mxu1 %vm1067_vm7, %v7375_v28 }
 0x6f2   :  { %13524 = vmatprep.mubr.msk.f32.mxu1 %vm14784_vm4, %v14785_v44 }
 0x6f4   :  { %v5754_v26 = vpop.f32.mrb[88].mxu1  ;;  %v7380_v13 = vpop.f32.mrb[186].mxu0 }
 0x6f5   :  { %v17997_v38 = vadd.f32 %v5754_v26, %v17939_v53  ;;  %v13085_v42 = vpop.f32.mrb[89].mxu1  ;;  %v13497_v29 = vpop.f32.mrb[187].mxu0  ;;  %13525 = vmatmul.mubr.msk.f32.gmra.mrb[194].mxu1 %vm1067_vm7, %v7380_v13 }
 0x6f6   :  { %13527 = vmatprep.mubr.msk.f32.mxu1 %vm14784_vm4, %v14785_v44 }
 0x6f8   :  { %v6009_v27 = vpop.f32.mrb[90].mxu1  ;;  %v7385_v56 = vpop.f32.mrb[188].mxu0 }
 0x6f9   :  { %v18003_v46 = vadd.f32 %v6009_v27, %v17945_v3  ;;  %v13135_v34 = vpop.f32.mrb[91].mxu1  ;;  %v13500_v47 = vpop.f32.mrb[189].mxu0  ;;  %13528 = vmatmul.mubr.msk.f32.gmra.mrb[196].mxu1 %vm1067_vm7, %v7385_v56 }
 0x6fa   :  { %13577 = vmatprep.mubr.msk.f32.mxu1 %vm14784_vm4, %v14785_v44 }
 0x6fc   :  { %v6014_v50 = vpop.f32.mrb[92].mxu1  ;;  %v7640_v51 = vpop.f32.mrb[190].mxu0 }
 0x6fd   :  { %v18012_v41 = vadd.f32 %v6014_v50, %v17954_v49  ;;  %v13138_v52 = vpop.f32.mrb[93].mxu1  ;;  %v13550_v55 = vpop.f32.mrb[191].mxu0  ;;  %13578 = vmatmul.mubr.msk.f32.vlgmr.msra.gmra.mrb[198].mxu1 %vm1067_vm7, %v7640_v51 }
 0x6fe   :  { %13580 = vmatprep.mubr.msk.f32.mxu1 %vm14784_vm4, %v14785_v44  ;;  %13650 = vmatpush3.msra.mxu1 %v10599_v20 }
 0x6ff   :  { %14499 = vmatprep.subr.bf16.mxu1 %v14783_v43 }
 0x700   :  { %v6019_v57 = vpop.f32.mrb[94].mxu1  ;;  %v7645_v58 = vpop.f32.mrb[192].mxu0 }
 0x701   :  { %v18019_v53 = vadd.f32 %v6019_v57, %v17961_v62  ;;  %v13141_v59 = vpop.f32.mrb[95].mxu1  ;;  %v13553_v0 = vpop.f32.mrb[193].mxu0  ;;  %13581 = vmatmul.mubr.msk.f32.gmra.mrb[200].mxu1 %vm1067_vm7, %v7645_v58 }
 0x702   :  { %13583 = vmatprep.mubr.msk.f32.mxu1 %vm14784_vm4, %v14785_v44 }
 0x704   :  { %v6024_v1 = vpop.f32.mrb[96].mxu1  ;;  %v7650_v2 = vpop.f32.mrb[194].mxu0 }
 0x705   :  { %v18025_v3 = vadd.f32 %v6024_v1, %v17967_v17  ;;  %v13144_v40 = vpop.f32.mrb[97].mxu1  ;;  %v13556_v7 = vpop.f32.mrb[195].mxu0  ;;  %13584 = vmatmul.mubr.msk.f32.gmra.mrb[202].mxu1 %vm1067_vm7, %v7650_v2 }
 0x706   :  { %13586 = vmatprep.mubr.msk.f32.mxu1 %vm14784_vm4, %v14785_v44 }
 0x708   :  { %v6029_v8 = vpop.f32.mrb[98].mxu1  ;;  %v7655_v9 = vpop.f32.mrb[196].mxu0 }
 0x709   :  { %v18031_v10 = vadd.f32 %v6029_v8, %v17973_v24  ;;  %v13147_v49 = vpop.f32.mrb[99].mxu1  ;;  %v13559_v4 = vpop.f32.mrb[197].mxu0  ;;  %13587 = vmatmul.mubr.msk.f32.gmra.mrb[204].mxu1 %vm1067_vm7, %v7655_v9 }
 0x70a   :  { %13589 = vmatprep.mubr.msk.f32.mxu1 %vm14784_vm4, %v14785_v44 }
 0x70c   :  { %v6034_v60 = vpop.f32.mrb[100].mxu1  ;;  %v7660_v54 = vpop.f32.mrb[198].mxu0 }
 0x70d   :  { %v18037_v12 = vadd.f32 %v6034_v60, %v17979_v45  ;;  %v13150_v62 = vpop.f32.mrb[101].mxu1  ;;  %v13562_v14 = vpop.f32.mrb[199].mxu0  ;;  %13590 = vmatmul.mubr.msk.f32.gmra.mrb[206].mxu1 %vm1067_vm7, %v7660_v54 }
 0x70e   :  { %13592 = vmatprep.mubr.msk.f32.mxu1 %vm14784_vm4, %v14785_v44 }
 0x710   :  { %v6039_v63 = vpop.f32.mrb[102].mxu1  ;;  %v7665_v11 = vpop.f32.mrb[200].mxu0 }
 0x711   :  { %v18043_v16 = vadd.f32 %v6039_v63, %v17985_v25  ;;  %v13153_v17 = vpop.f32.mrb[103].mxu1  ;;  %v13565_v6 = vpop.f32.mrb[201].mxu0  ;;  %13593 = vmatmul.mubr.msk.f32.gmra.mrb[208].mxu1 %vm1067_vm7, %v7665_v11 }
 0x712   :  { %13595 = vmatprep.mubr.msk.f32.mxu1 %vm14784_vm4, %v14785_v44 }
 0x714   :  { %v6044_v18 = vpop.f32.mrb[104].mxu1  ;;  %v7670_v19 = vpop.f32.mrb[202].mxu0 }
 0x715   :  { %v18049_v48 = vadd.f32 %v6044_v18, %v17991_v36  ;;  %v13156_v24 = vpop.f32.mrb[105].mxu1  ;;  %v13568_v21 = vpop.f32.mrb[203].mxu0  ;;  %13596 = vmatmul.mubr.msk.f32.gmra.mrb[210].mxu1 %vm1067_vm7, %v7670_v19 }
 0x716   :  { %13598 = vmatprep.mubr.msk.f32.mxu1 %vm14784_vm4, %v14785_v44 }
 0x718   :  { %v6049_v22 = vpop.f32.mrb[106].mxu1  ;;  %v7675_v33 = vpop.f32.mrb[204].mxu0 }
 0x719   :  { %v18055_v39 = vadd.f32 %v6049_v22, %v17997_v38  ;;  %v13159_v45 = vpop.f32.mrb[107].mxu1  ;;  %v13571_v15 = vpop.f32.mrb[205].mxu0  ;;  %13599 = vmatmul.mubr.msk.f32.gmra.mrb[212].mxu1 %vm1067_vm7, %v7675_v33 }
 0x71a   :  { %13601 = vmatprep.mubr.msk.f32.mxu1 %vm14784_vm4, %v14785_v44 }
 0x71c   :  { %v6304_v30 = vpop.f32.mrb[108].mxu1  ;;  %v7680_v31 = vpop.f32.mrb[206].mxu0 }
 0x71d   :  { %v18061_v32 = vadd.f32 %v6304_v30, %v18003_v46  ;;  %v13209_v25 = vpop.f32.mrb[109].mxu1  ;;  %v13574_v61 = vpop.f32.mrb[207].mxu0  ;;  %13602 = vmatmul.mubr.msk.f32.gmra.mrb[214].mxu1 %vm1067_vm7, %v7680_v31 }
 0x71e   :  { %13651 = vmatprep.mubr.msk.f32.mxu1 %vm14784_vm4, %v14785_v44 }
 0x720   :  { %v6309_v23 = vpop.f32.mrb[110].mxu1  ;;  %v7935_v35 = vpop.f32.mrb[208].mxu0 }
 0x721   :  { %v6349_v28 = vadd.f32 %v6309_v23, %v18012_v41  ;;  %v13212_v36 = vpop.f32.mrb[111].mxu1  ;;  %v13624_v37 = vpop.f32.mrb[209].mxu0  ;;  %13652 = vmatmul.mubr.msk.f32.vlgmr.msra.gmra.mrb[216].mxu1 %vm1067_vm7, %v7935_v35 }
 0x722   :  { %13654 = vmatprep.mubr.msk.f32.mxu1 %vm14784_vm4, %v14785_v44 }
 0x724   :  { %v6314_v5 = vpop.f32.mrb[112].mxu1  ;;  %v7940_v26 = vpop.f32.mrb[210].mxu0 }
 0x725   :  { %v6350_v13 = vadd.f32 %v6314_v5, %v18019_v53  ;;  %v13215_v38 = vpop.f32.mrb[113].mxu1  ;;  %v13627_v42 = vpop.f32.mrb[211].mxu0  ;;  %13655 = vmatmul.mubr.msk.f32.gmra.mrb[218].mxu1 %vm1067_vm7, %v7940_v26 }
 0x726   :  { %13657 = vmatprep.mubr.msk.f32.mxu1 %vm14784_vm4, %v14785_v44 }
 0x728   :  { %v6319_v29 = vpop.f32.mrb[114].mxu1  ;;  %v7945_v27 = vpop.f32.mrb[212].mxu0 }
 0x729   :  { %v6351_v56 = vadd.f32 %v6319_v29, %v18025_v3  ;;  %v13218_v46 = vpop.f32.mrb[115].mxu1  ;;  %v13630_v34 = vpop.f32.mrb[213].mxu0  ;;  %13658 = vmatmul.mubr.msk.f32.gmra.mrb[220].mxu1 %vm1067_vm7, %v7945_v27 }
 0x72a   :  { %13660 = vmatprep.mubr.msk.f32.mxu1 %vm14784_vm4, %v14785_v44 }
 0x72c   :  { %v6324_v47 = vpop.f32.mrb[116].mxu1  ;;  %v7950_v20 = vpop.f32.mrb[214].mxu0 }
 0x72d   :  { %v6352_v50 = vadd.f32 %v6324_v47, %v18031_v10  ;;  %v13221_v51 = vpop.f32.mrb[117].mxu1  ;;  %v13633_v41 = vpop.f32.mrb[215].mxu0  ;;  %13661 = vmatmul.mubr.msk.f32.gmra.mrb[222].mxu1 %vm1067_vm7, %v7950_v20 }
 0x72e   :  { %13663 = vmatprep.mubr.msk.f32.mxu1 %vm14784_vm4, %v14785_v44 }
 0x730   :  { %v6329_v52 = vpop.f32.mrb[118].mxu1  ;;  %v7955_v55 = vpop.f32.mrb[216].mxu0 }
 0x731   :  { %v6353_v57 = vadd.f32 %v6329_v52, %v18037_v12  ;;  %v13224_v58 = vpop.f32.mrb[119].mxu1  ;;  %v13636_v53 = vpop.f32.mrb[217].mxu0  ;;  %13664 = vmatmul.mubr.msk.f32.gmra.mrb[224].mxu1 %vm1067_vm7, %v7955_v55 }
 0x732   :  { %13666 = vmatprep.mubr.msk.f32.mxu1 %vm14784_vm4, %v14785_v44 }
 0x734   :  { %v6334_v59 = vpop.f32.mrb[120].mxu1  ;;  %v7960_v0 = vpop.f32.mrb[218].mxu0 }
 0x735   :  { %v6354_v1 = vadd.f32 %v6334_v59, %v18043_v16  ;;  %v13227_v2 = vpop.f32.mrb[121].mxu1  ;;  %v13639_v3 = vpop.f32.mrb[219].mxu0  ;;  %13667 = vmatmul.mubr.msk.f32.gmra.mrb[226].mxu1 %vm1067_vm7, %v7960_v0 }
 0x736   :  { %13669 = vmatprep.mubr.msk.f32.mxu1 %vm14784_vm4, %v14785_v44 }
 0x738   :  { %v6339_v40 = vpop.f32.mrb[122].mxu1  ;;  %v7965_v7 = vpop.f32.mrb[220].mxu0 }
 0x739   :  { %v6355_v8 = vadd.f32 %v6339_v40, %v18049_v48  ;;  %v13230_v9 = vpop.f32.mrb[123].mxu1  ;;  %v13642_v10 = vpop.f32.mrb[221].mxu0  ;;  %13670 = vmatmul.mubr.msk.f32.gmra.mrb[228].mxu1 %vm1067_vm7, %v7965_v7 }
 0x73a   :  { %13672 = vmatprep.mubr.msk.f32.mxu1 %vm14784_vm4, %v14785_v44 }
 0x73c   :  { %v6344_v49 = vpop.f32.mrb[124].mxu1  ;;  %v7970_v4 = vpop.f32.mrb[222].mxu0 }
 0x73d   :  { %v6356_v60 = vadd.f32 %v6344_v49, %v18055_v39  ;;  %v13233_v54 = vpop.f32.mrb[125].mxu1  ;;  %v13645_v12 = vpop.f32.mrb[223].mxu0  ;;  %13673 = vmatmul.mubr.msk.f32.gmra.mrb[230].mxu1 %vm1067_vm7, %v7970_v4 }
 0x73e   :  { %13675 = vmatprep.mubr.msk.f32.mxu1 %vm14784_vm4, %v14785_v44 }
 0x740   :  { %v6599_v62 = vpop.f32.mrb[126].mxu1  ;;  %v7975_v14 = vpop.f32.mrb[224].mxu0 }
 0x741   :  { %v6643_v63 = vadd.f32 %v6599_v62, %v18061_v32  ;;  %v13283_v11 = vpop.f32.mrb[127].mxu1  ;;  %13676 = vmatmul.mubr.msk.f32.gmra.mrb[232].mxu1 %vm1067_vm7, %v7975_v14  ;;  %v13648_v16 = vpop.f32.mrb[225].mxu0 }
 0x742   :  { %13736 = vmatprep.mubr.msk.f32.mxu1 %vm14784_vm4, %v14785_v44 }
 0x744   :  { %v6604_v17 = vpop.f32.mrb[128].mxu1 }
 0x745   :  { %v6644_v6 = vadd.f32 %v6604_v17, %v6349_v28  ;;  %v13286_v18 = vpop.f32.mrb[129].mxu1 }
 0x748   :  { %v6609_v19 = vpop.f32.mrb[130].mxu1 }
 0x749   :  { %v6645_v48 = vadd.f32 %v6609_v19, %v6350_v13  ;;  %v13289_v24 = vpop.f32.mrb[131].mxu1 }
 0x74c   :  { %v6614_v21 = vpop.f32.mrb[132].mxu1 }
 0x74d   :  { %v6646_v22 = vadd.f32 %v6614_v21, %v6351_v56  ;;  %v13292_v33 = vpop.f32.mrb[133].mxu1 }
 0x750   :  { %v6619_v39 = vpop.f32.mrb[134].mxu1 }
 0x751   :  { %v6647_v45 = vadd.f32 %v6619_v39, %v6352_v50  ;;  %v13295_v15 = vpop.f32.mrb[135].mxu1 }
 0x754   :  { %v6624_v30 = vpop.f32.mrb[136].mxu1 }
 0x755   :  { %v6648_v31 = vadd.f32 %v6624_v30, %v6353_v57  ;;  %v13298_v32 = vpop.f32.mrb[137].mxu1 }
 0x758   :  { %v6629_v25 = vpop.f32.mrb[138].mxu1 }
 0x759   :  { %v6649_v61 = vadd.f32 %v6629_v25, %v6354_v1  ;;  %v13301_v23 = vpop.f32.mrb[139].mxu1 }
 0x75c   :  { %v6634_v35 = vpop.f32.mrb[140].mxu1 }
 0x75d   :  { %v6650_v36 = vadd.f32 %v6634_v35, %v6355_v8  ;;  %v13304_v37 = vpop.f32.mrb[141].mxu1 }
 0x75e   :  { %v10613_v37 = vld [vmem:[%s18717_s8 + $0x40] sm:$0xff] }
 0x760   :  { %v6639_v28 = vpop.f32.mrb[142].mxu1 }
 0x761   :  { %v6651_v5 = vadd.f32 %v6639_v28, %v6356_v60  ;;  %v13307_v26 = vpop.f32.mrb[143].mxu1  ;;  %v10614_v28 = vld [vmem:[%s18717_s8 + $0x48] sm:$0xff] }
 0x764   :  { %v6894_v13 = vpop.f32.mrb[144].mxu1 }
 0x765   :  { %v6938_v38 = vadd.f32 %v6894_v13, %v6643_v63  ;;  %v13357_v42 = vpop.f32.mrb[145].mxu1  ;;  %v14500_v13 = vpack.c.bf16 %v10614_v28, %v10613_v37 }
 0x767   :  { %14501 = vmatpush3.bf16.msra.mxu1 %v14500_v13 }
 0x768   :  { %v6899_v29 = vpop.f32.mrb[146].mxu1  ;;  %14502 = vmatprep.subr.bf16.mxu1 %v14783_v43 }
 0x769   :  { %v6939_v27 = vadd.f32 %v6899_v29, %v6644_v6  ;;  %v13360_v56 = vpop.f32.mrb[147].mxu1 }
 0x76a   :  { %v10616_v56 = vld [vmem:[%s18717_s8 + $0x58] sm:$0xff] }
 0x76c   :  { %v6904_v46 = vpop.f32.mrb[148].mxu1 }
 0x76d   :  { %v6940_v34 = vadd.f32 %v6904_v46, %v6645_v48  ;;  %v13363_v47 = vpop.f32.mrb[149].mxu1 }
 0x770   :  { %v6909_v20 = vpop.f32.mrb[150].mxu1 }
 0x771   :  { %v6941_v50 = vadd.f32 %v6909_v20, %v6646_v22  ;;  %v13366_v51 = vpop.f32.mrb[151].mxu1 }
 0x774   :  { %v6914_v41 = vpop.f32.mrb[152].mxu1 }
 0x775   :  { %v6942_v52 = vadd.f32 %v6914_v41, %v6647_v45  ;;  %v13369_v55 = vpop.f32.mrb[153].mxu1 }
 0x778   :  { %v6919_v57 = vpop.f32.mrb[154].mxu1 }
 0x779   :  { %v6943_v58 = vadd.f32 %v6919_v57, %v6648_v31  ;;  %v13372_v53 = vpop.f32.mrb[155].mxu1 }
 0x77c   :  { %v6924_v59 = vpop.f32.mrb[156].mxu1 }
 0x77d   :  { %v6944_v0 = vadd.f32 %v6924_v59, %v6649_v61  ;;  %v13375_v1 = vpop.f32.mrb[157].mxu1 }
 0x780   :  { %v6929_v2 = vpop.f32.mrb[158].mxu1 }
 0x781   :  { %v6945_v3 = vadd.f32 %v6929_v2, %v6650_v36  ;;  %v13378_v40 = vpop.f32.mrb[159].mxu1 }
 0x784   :  { %v6934_v7 = vpop.f32.mrb[160].mxu1 }
 0x785   :  { %v6946_v8 = vadd.f32 %v6934_v7, %v6651_v5  ;;  %v13381_v9 = vpop.f32.mrb[161].mxu1 }
 0x788   :  { %v7189_v10 = vpop.f32.mrb[162].mxu1 }
 0x789   :  { %v7233_v49 = vadd.f32 %v7189_v10, %v6938_v38  ;;  %v13431_v4 = vpop.f32.mrb[163].mxu1 }
 0x78c   :  { %v7194_v60 = vpop.f32.mrb[164].mxu1 }
 0x78d   :  { %v7234_v54 = vadd.f32 %v7194_v60, %v6939_v27  ;;  %v13434_v12 = vpop.f32.mrb[165].mxu1  ;;  %v10615_v27 = vld [vmem:[%s18717_s8 + $0x50] sm:$0xff] }
 0x78e   :  { %v14503_v46 = vpack.c.bf16 %v10616_v56, %v10615_v27 }
 0x790   :  { %v7199_v62 = vpop.f32.mrb[166].mxu1  ;;  %14504 = vmatpush3.bf16.msra.mxu1 %v14503_v46 }
 0x791   :  { %v7235_v14 = vadd.f32 %v7199_v62, %v6940_v34  ;;  %v13437_v63 = vpop.f32.mrb[167].mxu1  ;;  %14505 = vmatprep.subr.bf16.mxu1 %v14783_v43 }
 0x794   :  { %v7204_v11 = vpop.f32.mrb[168].mxu1 }
 0x795   :  { %v7236_v16 = vadd.f32 %v7204_v11, %v6941_v50  ;;  %v13440_v17 = vpop.f32.mrb[169].mxu1 }
 0x798   :  { %v7209_v6 = vpop.f32.mrb[170].mxu1 }
 0x799   :  { %v7237_v18 = vadd.f32 %v7209_v6, %v6942_v52  ;;  %v13443_v19 = vpop.f32.mrb[171].mxu1 }
 0x79c   :  { %v7214_v48 = vpop.f32.mrb[172].mxu1 }
 0x79d   :  { %v7238_v24 = vadd.f32 %v7214_v48, %v6943_v58  ;;  %v13446_v21 = vpop.f32.mrb[173].mxu1 }
 0x7a0   :  { %v7219_v22 = vpop.f32.mrb[174].mxu1 }
 0x7a1   :  { %v7239_v33 = vadd.f32 %v7219_v22, %v6944_v0  ;;  %v13449_v39 = vpop.f32.mrb[175].mxu1 }
 0x7a4   :  { %v7224_v45 = vpop.f32.mrb[176].mxu1 }
 0x7a5   :  { %v7240_v15 = vadd.f32 %v7224_v45, %v6945_v3  ;;  %v13452_v30 = vpop.f32.mrb[177].mxu1 }
 0x7a8   :  { %v7229_v31 = vpop.f32.mrb[178].mxu1 }
 0x7a9   :  { %v7241_v32 = vadd.f32 %v7229_v31, %v6946_v8  ;;  %v13455_v25 = vpop.f32.mrb[179].mxu1 }
 0x7ac   :  { %v7484_v61 = vpop.f32.mrb[180].mxu1 }
 0x7ad   :  { %v7528_v23 = vadd.f32 %v7484_v61, %v7233_v49  ;;  %v13505_v35 = vpop.f32.mrb[181].mxu1 }
 0x7b0   :  { %v7489_v36 = vpop.f32.mrb[182].mxu1 }
 0x7b1   :  { %v7529_v5 = vadd.f32 %v7489_v36, %v7234_v54  ;;  %v13508_v26 = vpop.f32.mrb[183].mxu1 }
 0x7b4   :  { %v7494_v38 = vpop.f32.mrb[184].mxu1 }
 0x7b5   :  { %v7530_v42 = vadd.f32 %v7494_v38, %v7235_v14  ;;  %v13511_v29 = vpop.f32.mrb[185].mxu1 }
 0x7b8   :  { %v7499_v34 = vpop.f32.mrb[186].mxu1 }
 0x7b9   :  { %v7531_v47 = vadd.f32 %v7499_v34, %v7236_v16  ;;  %v13514_v20 = vpop.f32.mrb[187].mxu1 }
 0x7bc   :  { %v7504_v50 = vpop.f32.mrb[188].mxu1 }
 0x7bd   :  { %v7532_v51 = vadd.f32 %v7504_v50, %v7237_v18  ;;  %v13517_v41 = vpop.f32.mrb[189].mxu1 }
 0x7c0   :  { %v7509_v52 = vpop.f32.mrb[190].mxu1 }
 0x7c1   :  { %v7533_v55 = vadd.f32 %v7509_v52, %v7238_v24  ;;  %v13520_v57 = vpop.f32.mrb[191].mxu1 }
 0x7c4   :  { %v7514_v58 = vpop.f32.mrb[192].mxu1 }
 0x7c5   :  { %v7534_v53 = vadd.f32 %v7514_v58, %v7239_v33  ;;  %v13523_v59 = vpop.f32.mrb[193].mxu1 }
 0x7c8   :  { %v7519_v0 = vpop.f32.mrb[194].mxu1 }
 0x7c9   :  { %v7535_v1 = vadd.f32 %v7519_v0, %v7240_v15  ;;  %v13526_v2 = vpop.f32.mrb[195].mxu1 }
 0x7cc   :  { %v7524_v3 = vpop.f32.mrb[196].mxu1 }
 0x7cd   :  { %v7536_v40 = vadd.f32 %v7524_v3, %v7241_v32  ;;  %v13529_v7 = vpop.f32.mrb[197].mxu1 }
 0x7d0   :  { %v7779_v8 = vpop.f32.mrb[198].mxu1 }
 0x7d1   :  { %v7823_v9 = vadd.f32 %v7779_v8, %v7528_v23  ;;  %v13579_v10 = vpop.f32.mrb[199].mxu1  ;;  %v10609_v23 = vld [vmem:[%s18715_s6] ss:$0 sm:$0xff] }
 0x7d4   :  { %v7784_v49 = vpop.f32.mrb[200].mxu1 }
 0x7d5   :  { %v7824_v4 = vadd.f32 %v7784_v49, %v7529_v5  ;;  %v13582_v60 = vpop.f32.mrb[201].mxu1 }
 0x7d8   :  { %v7789_v54 = vpop.f32.mrb[202].mxu1 }
 0x7d9   :  { %v7825_v12 = vadd.f32 %v7789_v54, %v7530_v42  ;;  %v13585_v62 = vpop.f32.mrb[203].mxu1 }
 0x7dc   :  { %v7794_v14 = vpop.f32.mrb[204].mxu1 }
 0x7dd   :  { %v7826_v63 = vadd.f32 %v7794_v14, %v7531_v47  ;;  %v13588_v11 = vpop.f32.mrb[205].mxu1 }
 0x7e0   :  { %v7799_v16 = vpop.f32.mrb[206].mxu1 }
 0x7e1   :  { %v7827_v17 = vadd.f32 %v7799_v16, %v7532_v51  ;;  %v13591_v6 = vpop.f32.mrb[207].mxu1 }
 0x7e4   :  { %v7804_v18 = vpop.f32.mrb[208].mxu1 }
 0x7e5   :  { %v7828_v19 = vadd.f32 %v7804_v18, %v7533_v55  ;;  %v13594_v48 = vpop.f32.mrb[209].mxu1  ;;  %v8152_v18 = vld [vmem:[%s18716_s7] sm:$0x3] }
 0x7e6   :  { %v8227_v48 = vld [vmem:[%s18717_s8 + $0x8] sm:$0xff] }
 0x7e8   :  { %v7809_v24 = vpop.f32.mrb[210].mxu1 }
 0x7e9   :  { %v7829_v21 = vadd.f32 %v7809_v24, %v7534_v53  ;;  %v13597_v22 = vpop.f32.mrb[211].mxu1  ;;  %v10611_v24 = vld [vmem:[%s18716_s7 + $0x2] sm:$0x3] }
 0x7ea   :  { %v8228_v22 = vld [vmem:[%s18717_s8 + $0x10] sm:$0xff] }
 0x7ec   :  { %v7814_v33 = vpop.f32.mrb[212].mxu1 }
 0x7ed   :  { %v7830_v39 = vadd.f32 %v7814_v33, %v7535_v1  ;;  %v13600_v45 = vpop.f32.mrb[213].mxu1  ;;  %v8229_v33 = vld [vmem:[%s18717_s8 + $0x18] sm:$0xff] }
 0x7ee   :  { %v8230_v45 = vld [vmem:[%s18717_s8 + $0x20] sm:$0xff] }
 0x7f0   :  { %v7819_v15 = vpop.f32.mrb[214].mxu1 }
 0x7f1   :  { %v7831_v30 = vadd.f32 %v7819_v15, %v7536_v40  ;;  %v13603_v31 = vpop.f32.mrb[215].mxu1  ;;  %v8231_v15 = vld [vmem:[%s18717_s8 + $0x28] sm:$0xff] }
 0x7f2   :  { %v8232_v31 = vld [vmem:[%s18717_s8 + $0x30] sm:$0xff] }
 0x7f4   :  { %v8074_v32 = vpop.f32.mrb[216].mxu1 }
 0x7f5   :  { %v8118_v25 = vadd.f32 %v8074_v32, %v7823_v9  ;;  %v13653_v61 = vpop.f32.mrb[217].mxu1  ;;  %v8233_v32 = vld [vmem:[%s18717_s8 + $0x38] sm:$0xff] }
 0x7f6   :  { %v10617_v61 = vld [vmem:[%s18717_s8 + $0x60] sm:$0xff] }
 0x7f7   :  { %v8134_v36 = vadd.f32 %v10609_v23, %v8118_v25  ;;  %v14521_v25 = vpack.c.bf16 %v8233_v32, %v8232_v31  ;;  %v10651_v31 = vld [vmem:[%s18717_s8 + $0x120] sm:$0xff]  ;;  %v10652_v32 = vld [vmem:[%s18717_s8 + $0x128] sm:$0xff] }
 0x7f8   :  { %v8079_v35 = vpop.f32.mrb[218].mxu1 }
 0x7f9   :  { %v8119_v37 = vadd.f32 %v8079_v35, %v7824_v4  ;;  %v13656_v28 = vpop.f32.mrb[219].mxu1  ;;  %v8143_v13 = vmax.f32 %v8134_v36, 0.0  ;;  %v10619_v35 = vld [vmem:[%s18717_s8 + $0x70] sm:$0xff] }
 0x7fb   :  { %v8135_v5 = vadd.f32 %v10609_v23, %v8119_v37  ;;  %v10620_v37 = vld [vmem:[%s18717_s8 + $0x78] sm:$0xff] }
 0x7fc   :  { %v8084_v26 = vpop.f32.mrb[220].mxu1  ;;  %v14509_v28 = vpack.c.bf16 %v10620_v37, %v10619_v35  ;;  %v10659_v37 = vld [vmem:[%s18717_s8 + $0x148] sm:$0xff] }
 0x7fd   :  { %v8144_v38 = vmax.f32 %v8135_v5, 0.0  ;;  %v8120_v42 = vadd.f32 %v8084_v26, %v7825_v12  ;;  %v13659_v29 = vpop.f32.mrb[221].mxu1 }
 0x7fe   :  { %v10634_v29 = vld [vmem:[%s18716_s7 + $0x6] sm:$0x3] }
 0x7ff   :  { %v18119_v27 = vpack.c.bf16 %v8144_v38, %v8143_v13  ;;  %v8136_v46 = vadd.f32 %v10609_v23, %v8120_v42  ;;  %v10623_v42 = vld [vmem:[%s18716_s7 + $0x4] sm:$0x3] }
 0x800   :  { %v8089_v56 = vpop.f32.mrb[222].mxu1 }
 0x801   :  { %v8121_v34 = vadd.f32 %v8089_v56, %v7826_v63  ;;  %v13662_v47 = vpop.f32.mrb[223].mxu1  ;;  %14477 = vmatpush3.bf16.msra.mxu0 %v18119_v27  ;;  %v8145_v51 = vmax.f32 %v8136_v46, 0.0  ;;  %v10645_v56 = vld [vmem:[%s18716_s7 + $0x8] sm:$0x3]  ;;  %v10656_v46 = vld [vmem:[%s18716_s7 + $0xa] sm:$0x3] }
 0x802   :  { %14478 = vmatprep.subr.bf16.mxu0 %v14783_v43  ;;  %v10626_v47 = vld [vmem:[%s18717_s8 + $0x88] sm:$0xff] }
 0x803   :  { %v8137_v20 = vadd.f32 %v10609_v23, %v8121_v34  ;;  %v10625_v34 = vld [vmem:[%s18717_s8 + $0x80] sm:$0xff] }
 0x804   :  { %v8094_v50 = vpop.f32.mrb[224].mxu1 }
 0x805   :  { %v8146_v41 = vmax.f32 %v8137_v20, 0.0  ;;  %v8122_v52 = vadd.f32 %v8094_v50, %v7827_v17  ;;  %v13665_v55 = vpop.f32.mrb[225].mxu1  ;;  %v10627_v20 = vld [vmem:[%s18717_s8 + $0x90] sm:$0xff]  ;;  %v14536_v50 = vpack.c.bf16 %v10626_v47, %v10625_v34  ;;  %v10665_v47 = vld [vmem:[%s18717_s8 + $0x178] sm:$0xff] }
 0x806   :  { %v10629_v55 = vld [vmem:[%s18717_s8 + $0xa0] sm:$0xff]  ;;  %v10664_v34 = vld [vmem:[%s18717_s8 + $0x170] sm:$0xff] }
 0x807   :  { %v18123_v57 = vpack.c.bf16 %v8146_v41, %v8145_v51  ;;  %v8138_v53 = vadd.f32 %v10609_v23, %v8122_v52  ;;  %v10628_v51 = vld [vmem:[%s18717_s8 + $0x98] sm:$0xff]  ;;  %v10667_v41 = vld [vmem:[%s18716_s7 + $0xc] sm:$0x3] }
 0x808   :  { %v8099_v58 = vpop.f32.mrb[226].mxu1  ;;  %v14539_v52 = vpack.c.bf16 %v10628_v51, %v10627_v20  ;;  %v14617_v20 = vpack.c.bf16 %v10665_v47, %v10664_v34  ;;  %v10670_v51 = vld [vmem:[%s18717_s8 + $0x188] sm:$0xff] }
 0x809   :  { %v8123_v59 = vadd.f32 %v8099_v58, %v7828_v19  ;;  %v13668_v0 = vpop.f32.mrb[227].mxu1  ;;  %14480 = vmatpush3.bf16.msra.mxu0 %v18123_v57  ;;  %v8147_v3 = vmax.f32 %v8138_v53, 0.0  ;;  %v8226_v19 = vld [vmem:[%s18717_s8] sm:$0xff]  ;;  %v10630_v58 = vld [vmem:[%s18717_s8 + $0xa8] sm:$0xff] }
 0x80a   :  { %14481 = vmatprep.subr.bf16.mxu0 %v14783_v43  ;;  %v14542_v53 = vpack.c.bf16 %v10630_v58, %v10629_v55  ;;  %v10632_v0 = vld [vmem:[%s18717_s8 + $0xb8] sm:$0xff] }
 0x80b   :  { %v8139_v1 = vadd.f32 %v10609_v23, %v8123_v59  ;;  %v10631_v59 = vld [vmem:[%s18717_s8 + $0xb0] sm:$0xff]  ;;  %v10672_v55 = vld [vmem:[%s18717_s8 + $0x198] sm:$0xff] }
 0x80c   :  { %v8104_v2 = vpop.f32.mrb[228].mxu1 }
 0x80d   :  { %v8148_v40 = vmax.f32 %v8139_v1, 0.0  ;;  %v8124_v7 = vadd.f32 %v8104_v2, %v7829_v21  ;;  %v13671_v8 = vpop.f32.mrb[229].mxu1  ;;  %v14512_v21 = vpack.c.bf16 %v8227_v48, %v8226_v19  ;;  %v14545_v1 = vpack.c.bf16 %v10632_v0, %v10631_v59  ;;  %v10643_v19 = vld [vmem:[%s18717_s8 + $0xf8] sm:$0xff]  ;;  %v10673_v0 = vld [vmem:[%s18717_s8 + $0x1a0] sm:$0xff] }
 0x80f   :  { %v18127_v9 = vpack.c.bf16 %v8148_v40, %v8147_v3  ;;  %v8140_v49 = vadd.f32 %v10609_v23, %v8124_v7 }
 0x810   :  { %v8109_v10 = vpop.f32.mrb[230].mxu1 }
 0x811   :  { %v8125_v4 = vadd.f32 %v8109_v10, %v7830_v39  ;;  %v13674_v60 = vpop.f32.mrb[231].mxu1  ;;  %14483 = vmatpush3.bf16.msra.mxu0 %v18127_v9  ;;  %v8149_v62 = vmax.f32 %v8140_v49, 0.0  ;;  %v14515_v39 = vpack.c.bf16 %v8229_v33, %v8228_v22  ;;  %v10636_v10 = vld [vmem:[%s18717_s8 + $0xc0] sm:$0xff]  ;;  %v10637_v49 = vld [vmem:[%s18717_s8 + $0xc8] sm:$0xff]  ;;  %v10649_v33 = vld [vmem:[%s18717_s8 + $0x110] sm:$0xff] }
 0x812   :  { %14484 = vmatprep.subr.bf16.mxu0 %v14783_v43  ;;  %v10638_v60 = vld [vmem:[%s18717_s8 + $0xd0] sm:$0xff] }
 0x813   :  { %v8141_v54 = vadd.f32 %v10609_v23, %v8125_v4  ;;  %v14560_v4 = vpack.c.bf16 %v10637_v49, %v10636_v10 }
 0x814   :  { %v8114_v12 = vpop.f32.mrb[232].mxu1 }
 0x815   :  { %v8150_v14 = vmax.f32 %v8141_v54, 0.0  ;;  %v8126_v63 = vadd.f32 %v8114_v12, %v7831_v30  ;;  %v13677_v11 = vpop.f32.mrb[233].mxu1  ;;  %v14518_v30 = vpack.c.bf16 %v8231_v15, %v8230_v45  ;;  %v10639_v54 = vld [vmem:[%s18717_s8 + $0xd8] sm:$0xff] }
 0x816   :  { %v10641_v11 = vld [vmem:[%s18717_s8 + $0xe8] sm:$0xff] }
 0x817   :  { %v18131_v16 = vpack.c.bf16 %v8150_v14, %v8149_v62  ;;  %v8142_v17 = vadd.f32 %v10609_v23, %v8126_v63  ;;  %v10618_v23 = vld [vmem:[%s18717_s8 + $0x68] sm:$0xff]  ;;  %v14563_v14 = vpack.c.bf16 %v10639_v54, %v10638_v60  ;;  %v10640_v63 = vld [vmem:[%s18717_s8 + $0xe0] sm:$0xff] }
 0x818   :  { %v14506_v36 = vpack.c.bf16 %v10618_v23, %v10617_v61  ;;  %v10653_v61 = vld [vmem:[%s18717_s8 + $0x130] sm:$0xff]  ;;  %v10654_v23 = vld [vmem:[%s18717_s8 + $0x138] sm:$0xff]  ;;  %v10680_v60 = vld [vmem:[%s18717_s8 + $0x1c0] sm:$0xff] }
 0x819   :  { %14486 = vmatpush3.bf16.msra.mxu0 %v18131_v16  ;;  %v18135_v6 = vmax.f32 %v8142_v17, 0.0  ;;  %v14566_v17 = vpack.c.bf16 %v10641_v11, %v10640_v63  ;;  %v14593_v35 = vpack.c.bf16 %v10654_v23, %v10653_v61  ;;  %v10681_v54 = vld [vmem:[%s18717_s8 + $0x1c8] sm:$0xff]  ;;  %v10684_v11 = vld [vmem:[%s18717_s8 + $0x1e0] sm:$0xff] }
 0x81a   :  { %13694 = vmatprep.subr.mxu0 %v14785_v44  ;;  %14507 = vmatpush3.bf16.msra.mxu1 %v14506_v36  ;;  %v10658_v36 = vld [vmem:[%s18717_s8 + $0x140] sm:$0xff] }
 0x81b   :  { %14508 = vmatprep.subr.bf16.mxu1 %v14783_v43 }
 0x81d   :  { %13695 = vmatpush3.msra.mxu0 %v18135_v6 }
 0x81e   :  { %14487 = vmatprep.subr.bf16.mxu0 %v14783_v43  ;;  %13697 = vmatmul.mubr.msk.f32.vlgmr.msra.gmra.mrb[226].mxu0 %vm779_vm6, %v8152_v18  ;;  %v10642_v18 = vld [vmem:[%s18717_s8 + $0xf0] sm:$0xff] }
 0x81f   :  { %14489 = vmatpush3.bf16.msra.mxu0 %v18119_v27  ;;  %13717 = vmatprep.mubr.msk.f32.mxu0 %vm14784_vm4, %v14785_v44  ;;  %v14569_v48 = vpack.c.bf16 %v10643_v19, %v10642_v18  ;;  %v10686_v19 = vld [vmem:[%s18717_s8 + $0x1f0] sm:$0xff] }
 0x820   :  { %14490 = vmatprep.subr.bf16.mxu0 %v14783_v43  ;;  %14510 = vmatpush3.bf16.msra.mxu1 %v14509_v28  ;;  %v14608_v28 = vpack.c.bf16 %v10659_v37, %v10658_v36 }
 0x821   :  { %14523 = vmatprep.subr.bf16.mxu1 %v14783_v43 }
 0x823   :  { %14492 = vmatpush3.bf16.msra.mxu0 %v18123_v57 }
 0x824   :  { %14493 = vmatprep.subr.bf16.mxu0 %v14783_v43 }
 0x827   :  { %14495 = vmatpush3.bf16.msra.mxu0 %v18127_v9 }
 0x828   :  { %14496 = vmatprep.subr.bf16.mxu0 %v14783_v43 }
 0x82b   :  { %14498 = vmatpush3.bf16.msra.mxu0 %v18131_v16 }
 0x82c   :  { %13715 = vmatprep.subr.mxu0 %v14785_v44 }
 0x82f   :  { %13716 = vmatpush3.msra.mxu0 %v18135_v6 }
 0x830   :  { %13718 = vmatmul.mubr.msk.f32.vlgmr.msra.gmra.mrb[228].mxu0 %vm779_vm6, %v10611_v24  ;;  %14511 = vmatprep.subr.bf16.mxu0 %v14783_v43  ;;  %v10647_v24 = vld [vmem:[%s18717_s8 + $0x100] sm:$0xff] }
 0x831   :  { %14513 = vmatpush3.bf16.msra.mxu0 %v14512_v21  ;;  %13755 = vmatprep.mubr.msk.f32.mxu0 %vm14784_vm4, %v14785_v44  ;;  %v10648_v21 = vld [vmem:[%s18717_s8 + $0x108] sm:$0xff] }
 0x832   :  { %14514 = vmatprep.subr.bf16.mxu0 %v14783_v43  ;;  %v14584_v22 = vpack.c.bf16 %v10648_v21, %v10647_v24 }
 0x835   :  { %14516 = vmatpush3.bf16.msra.mxu0 %v14515_v39  ;;  %v10650_v39 = vld [vmem:[%s18717_s8 + $0x118] sm:$0xff] }
 0x836   :  { %14517 = vmatprep.subr.bf16.mxu0 %v14783_v43 }
 0x839   :  { %14519 = vmatpush3.bf16.msra.mxu0 %v14518_v30  ;;  %v14587_v30 = vpack.c.bf16 %v10650_v39, %v10649_v33 }
 0x83a   :  { %14520 = vmatprep.subr.bf16.mxu0 %v14783_v43 }
 0x83d   :  { %14522 = vmatpush3.bf16.msra.mxu0 %v14521_v25  ;;  %v14590_v25 = vpack.c.bf16 %v10652_v32, %v10651_v31 }
 0x83e   :  { %14535 = vmatprep.subr.bf16.mxu0 %v14783_v43 }
 0x8f1   :  { %v8222_v5 = vpop.f32.mrb[226].mxu0 }
 0x8f2   :  { %v13698_v26 = vpop.f32.mrb[227].mxu0  ;;  %13756 = vmatmul.mubr.msk.f32.vlgmr.msra.gmra.mrb[230].mxu0 %vm8318_vm8, %v8222_v5  ;;  %v10660_v5 = vld [vmem:[%s18717_s8 + $0x150] sm:$0xff] }
 0x8f3   :  { %13795 = vmatprep.mubr.msk.f32.mxu0 %vm14784_vm4, %v14785_v44  ;;  %14537 = vmatpush3.bf16.msra.mxu0 %v14536_v50  ;;  %v10661_v26 = vld [vmem:[%s18717_s8 + $0x158] sm:$0xff]  ;;  %v10669_v50 = vld [vmem:[%s18717_s8 + $0x180] sm:$0xff] }
 0x8f4   :  { %14538 = vmatprep.subr.bf16.mxu0 %v14783_v43 }
 0x8f7   :  { %14540 = vmatpush3.bf16.msra.mxu0 %v14539_v52  ;;  %v10671_v52 = vld [vmem:[%s18717_s8 + $0x190] sm:$0xff] }
 0x8f8   :  { %14541 = vmatprep.subr.bf16.mxu0 %v14783_v43  ;;  %v14635_v59 = vpack.c.bf16 %v10672_v55, %v10671_v52  ;;  %v9582_v52 = vld [vmem:[%s18719_s10 + $0x10] sm:$0xff]  ;;  %v9583_v55 = vld [vmem:[%s18719_s10 + $0x18] sm:$0xff] }
 0x8fb   :  { %14543 = vmatpush3.bf16.msra.mxu0 %v14542_v53 }
 0x8fc   :  { %14544 = vmatprep.subr.bf16.mxu0 %v14783_v43 }
 0x8ff   :  { %14546 = vmatpush3.bf16.msra.mxu0 %v14545_v1  ;;  %v10674_v1 = vld [vmem:[%s18717_s8 + $0x1a8] sm:$0xff] }
 0x900   :  { %14559 = vmatprep.subr.bf16.mxu0 %v14783_v43 }
 0x903   :  { %v8305_v13 = vpop.f32.mrb[228].mxu0 }
 0x904   :  { %13737 = vmatmul.mubr.msk.f32.vlgmr.msra.gmra.mrb[234].mxu1 %vm8318_vm8, %v8305_v13  ;;  %v13719_v38 = vpop.f32.mrb[229].mxu0 }
 0x905   :  { %14525 = vmatpush3.bf16.msra.mxu1 %v18119_v27  ;;  %13776 = vmatprep.mubr.msk.f32.mxu1 %vm14784_vm4, %v14785_v44 }
 0x906   :  { %14526 = vmatprep.subr.bf16.mxu1 %v14783_v43 }
 0x909   :  { %14528 = vmatpush3.bf16.msra.mxu1 %v18123_v57 }
 0x90a   :  { %14529 = vmatprep.subr.bf16.mxu1 %v14783_v43 }
 0x90d   :  { %14531 = vmatpush3.bf16.msra.mxu1 %v18127_v9 }
 0x90e   :  { %14532 = vmatprep.subr.bf16.mxu1 %v14783_v43 }
 0x911   :  { %14534 = vmatpush3.bf16.msra.mxu1 %v18131_v16 }
 0x912   :  { %13774 = vmatprep.subr.mxu1 %v14785_v44 }
 0x915   :  { %13775 = vmatpush3.msra.mxu1 %v18135_v6 }
 0x916   :  { %13777 = vmatmul.mubr.msk.f32.vlgmr.msra.gmra.mrb[236].mxu1 %vm779_vm6, %v10623_v42  ;;  %14547 = vmatprep.subr.bf16.mxu1 %v14783_v43  ;;  %v14611_v42 = vpack.c.bf16 %v10661_v26, %v10660_v5 }
 0x917   :  { %14549 = vmatpush3.bf16.msra.mxu1 %v18119_v27  ;;  %13816 = vmatprep.mubr.msk.f32.mxu1 %vm14784_vm4, %v14785_v44 }
 0x918   :  { %14550 = vmatprep.subr.bf16.mxu1 %v14783_v43 }
 0x91b   :  { %14552 = vmatpush3.bf16.msra.mxu1 %v18123_v57 }
 0x91c   :  { %14553 = vmatprep.subr.bf16.mxu1 %v14783_v43 }
 0x91f   :  { %14555 = vmatpush3.bf16.msra.mxu1 %v18127_v9 }
 0x920   :  { %14556 = vmatprep.subr.bf16.mxu1 %v14783_v43 }
 0x923   :  { %14558 = vmatpush3.bf16.msra.mxu1 %v18131_v16 }
 0x924   :  { %13814 = vmatprep.subr.mxu1 %v14785_v44 }
 0x927   :  { %13815 = vmatpush3.msra.mxu1 %v18135_v6 }
 0x928   :  { %13817 = vmatmul.mubr.msk.f32.vlgmr.msra.gmra.mrb[238].mxu1 %vm779_vm6, %v10634_v29  ;;  %14571 = vmatprep.subr.bf16.mxu1 %v14783_v43  ;;  %v10662_v29 = vld [vmem:[%s18717_s8 + $0x160] sm:$0xff] }
 0x929   :  { %14573 = vmatpush3.bf16.msra.mxu1 %v18119_v27  ;;  %13856 = vmatprep.mubr.msk.f32.mxu1 %vm14784_vm4, %v14785_v44 }
 0x92a   :  { %14574 = vmatprep.subr.bf16.mxu1 %v14783_v43 }
 0x92d   :  { %14576 = vmatpush3.bf16.msra.mxu1 %v18123_v57 }
 0x92e   :  { %14577 = vmatprep.subr.bf16.mxu1 %v14783_v43 }
 0x931   :  { %14579 = vmatpush3.bf16.msra.mxu1 %v18127_v9 }
 0x932   :  { %14580 = vmatprep.subr.bf16.mxu1 %v14783_v43 }
 0x935   :  { %14582 = vmatpush3.bf16.msra.mxu1 %v18131_v16 }
 0x936   :  { %13854 = vmatprep.subr.mxu1 %v14785_v44 }
 0x939   :  { %13855 = vmatpush3.msra.mxu1 %v18135_v6 }
 0x93a   :  { %13857 = vmatmul.mubr.msk.f32.vlgmr.msra.gmra.mrb[240].mxu1 %vm779_vm6, %v10645_v56  ;;  %14595 = vmatprep.subr.bf16.mxu1 %v14783_v43  ;;  %v10663_v56 = vld [vmem:[%s18717_s8 + $0x168] sm:$0xff] }
 0x93b   :  { %14597 = vmatpush3.bf16.msra.mxu1 %v18119_v27  ;;  %13896 = vmatprep.mubr.msk.f32.mxu1 %vm14784_vm4, %v14785_v44 }
 0x93c   :  { %14598 = vmatprep.subr.bf16.mxu1 %v14783_v43 }
 0x93f   :  { %14600 = vmatpush3.bf16.msra.mxu1 %v18123_v57 }
 0x940   :  { %14601 = vmatprep.subr.bf16.mxu1 %v14783_v43 }
 0x943   :  { %14603 = vmatpush3.bf16.msra.mxu1 %v18127_v9 }
 0x944   :  { %14604 = vmatprep.subr.bf16.mxu1 %v14783_v43 }
 0x947   :  { %14606 = vmatpush3.bf16.msra.mxu1 %v18131_v16 }
 0x948   :  { %13894 = vmatprep.subr.mxu1 %v14785_v44 }
 0x94b   :  { %13895 = vmatpush3.msra.mxu1 %v18135_v6 }
 0x94c   :  { %13897 = vmatmul.mubr.msk.f32.vlgmr.msra.gmra.mrb[242].mxu1 %vm779_vm6, %v10656_v46  ;;  %14619 = vmatprep.subr.bf16.mxu1 %v14783_v43  ;;  %v14614_v46 = vpack.c.bf16 %v10663_v56, %v10662_v29  ;;  %v10697_v29 = vld [vmem:[%s18717_s8 + $0x230] sm:$0xff]  ;;  %v10698_v56 = vld [vmem:[%s18717_s8 + $0x238] sm:$0xff] }
 0x94d   :  { %14621 = vmatpush3.bf16.msra.mxu1 %v18119_v27  ;;  %13936 = vmatprep.mubr.msk.f32.mxu1 %vm14784_vm4, %v14785_v44 }
 0x94e   :  { %14622 = vmatprep.subr.bf16.mxu1 %v14783_v43 }
 0x951   :  { %14624 = vmatpush3.bf16.msra.mxu1 %v18123_v57 }
 0x952   :  { %14625 = vmatprep.subr.bf16.mxu1 %v14783_v43 }
 0x955   :  { %14627 = vmatpush3.bf16.msra.mxu1 %v18127_v9 }
 0x956   :  { %14628 = vmatprep.subr.bf16.mxu1 %v14783_v43 }
 0x959   :  { %14630 = vmatpush3.bf16.msra.mxu1 %v18131_v16 }
 0x95a   :  { %13934 = vmatprep.subr.mxu1 %v14785_v44 }
 0x95d   :  { %13935 = vmatpush3.msra.mxu1 %v18135_v6 }
 0x95e   :  { %13937 = vmatmul.mubr.msk.f32.vlgmr.msra.gmra.mrb[244].mxu1 %vm779_vm6, %v10667_v41  ;;  %14655 = vmatprep.subr.bf16.mxu1 %v14783_v43  ;;  %v14632_v41 = vpack.c.bf16 %v10670_v51, %v10669_v50  ;;  %v9580_v50 = vld [vmem:[%s18719_s10] sm:$0xff]  ;;  %v9581_v51 = vld [vmem:[%s18719_s10 + $0x8] sm:$0xff] }
 0x95f   :  { %13995 = vmatprep.mubr.msk.f32.mxu1 %vm14784_vm4, %v14785_v44 }
 0x9c5   :  { %v8461_v2 = vpop.f32.mrb[230].mxu0 }
 0x9c6   :  { %v13757_v3 = vpop.f32.mrb[231].mxu0 }
 0x9c7   :  { %v10675_v3 = vld [vmem:[%s18717_s8 + $0x1b0] sm:$0xff] }
 0x9d7   :  { %v8388_v40 = vpop.f32.mrb[234].mxu1 }
 0x9d8   :  { %v18317_v7 = vadd.f32 %v8461_v2, %v8388_v40  ;;  %v13738_v8 = vpop.f32.mrb[235].mxu1  ;;  %v14638_v2 = vpack.c.bf16 %v10674_v1, %v10673_v0  ;;  %v10676_v40 = vld [vmem:[%s18717_s8 + $0x1b8] sm:$0xff]  ;;  %v9584_v0 = vld [vmem:[%s18719_s10 + $0x20] sm:$0xff]  ;;  %v9585_v1 = vld [vmem:[%s18719_s10 + $0x28] sm:$0xff] }
 0x9d9   :  { %v14641_v8 = vpack.c.bf16 %v10676_v40, %v10675_v3  ;;  %v9586_v3 = vld [vmem:[%s18719_s10 + $0x30] sm:$0xff]  ;;  %v9587_v40 = vld [vmem:[%s18719_s10 + $0x38] sm:$0xff] }
 0x9e9   :  { %v8536_v12 = vpop.f32.mrb[236].mxu1 }
 0x9ea   :  { %13796 = vmatmul.mubr.msk.f32.vlgmr.msra.gmra.mrb[232].mxu0 %vm8318_vm8, %v8536_v12  ;;  %v13778_v62 = vpop.f32.mrb[237].mxu1  ;;  %v14656_v12 = vpack.c.bf16 %v10681_v54, %v10680_v60  ;;  %v9590_v60 = vld [vmem:[%s18719_s10 + $0x50] sm:$0xff]  ;;  %v9591_v54 = vld [vmem:[%s18719_s10 + $0x58] sm:$0xff] }
 0x9eb   :  { %14561 = vmatpush3.bf16.msra.mxu0 %v14560_v4  ;;  %13835 = vmatprep.mubr.msk.f32.mxu0 %vm14784_vm4, %v14785_v44  ;;  %v10678_v4 = vld [vmem:[%s18716_s7 + $0xe] sm:$0x3]  ;;  %v10682_v62 = vld [vmem:[%s18717_s8 + $0x1d0] sm:$0xff] }
 0x9ec   :  { %14562 = vmatprep.subr.bf16.mxu0 %v14783_v43  ;;  %14657 = vmatpush3.bf16.msra.mxu1 %v14656_v12  ;;  %v14707_v12 = vpack.c.bf16 %v9591_v54, %v9590_v60 }
 0x9ed   :  { %14658 = vmatprep.subr.bf16.mxu1 %v14783_v43 }
 0x9ef   :  { %14564 = vmatpush3.bf16.msra.mxu0 %v14563_v14  ;;  %v10683_v14 = vld [vmem:[%s18717_s8 + $0x1d8] sm:$0xff] }
 0x9f0   :  { %14565 = vmatprep.subr.bf16.mxu0 %v14783_v43  ;;  %v14659_v63 = vpack.c.bf16 %v10683_v14, %v10682_v62  ;;  %v9592_v62 = vld [vmem:[%s18719_s10 + $0x60] sm:$0xff]  ;;  %v9593_v14 = vld [vmem:[%s18719_s10 + $0x68] sm:$0xff] }
 0x9f2   :  { %14660 = vmatpush3.bf16.msra.mxu1 %v14659_v63  ;;  %v14710_v63 = vpack.c.bf16 %v9593_v14, %v9592_v62 }
 0x9f3   :  { %14567 = vmatpush3.bf16.msra.mxu0 %v14566_v17  ;;  %v10685_v17 = vld [vmem:[%s18717_s8 + $0x1e8] sm:$0xff]  ;;  %14661 = vmatprep.subr.bf16.mxu1 %v14783_v43 }
 0x9f4   :  { %14568 = vmatprep.subr.bf16.mxu0 %v14783_v43  ;;  %v14662_v18 = vpack.c.bf16 %v10685_v17, %v10684_v11  ;;  %v9594_v11 = vld [vmem:[%s18719_s10 + $0x70] sm:$0xff]  ;;  %v9595_v17 = vld [vmem:[%s18719_s10 + $0x78] sm:$0xff] }
 0x9f6   :  { %14663 = vmatpush3.bf16.msra.mxu1 %v14662_v18  ;;  %v14713_v18 = vpack.c.bf16 %v9595_v17, %v9594_v11 }
 0x9f7   :  { %14570 = vmatpush3.bf16.msra.mxu0 %v14569_v48  ;;  %v10687_v48 = vld [vmem:[%s18717_s8 + $0x1f8] sm:$0xff]  ;;  %14664 = vmatprep.subr.bf16.mxu1 %v14783_v43 }
 0x9f8   :  { %14583 = vmatprep.subr.bf16.mxu0 %v14783_v43  ;;  %v14665_v24 = vpack.c.bf16 %v10687_v48, %v10686_v19  ;;  %v9674_v19 = vld [vmem:[%s18721_s12] sm:$0xff]  ;;  %v9675_v48 = vld [vmem:[%s18721_s12 + $0x8] sm:$0xff] }
 0x9fa   :  { %14666 = vmatpush3.bf16.msra.mxu1 %v14665_v24  ;;  %v9676_v24 = vld [vmem:[%s18721_s12 + $0x10] sm:$0xff] }
 0x9fb   :  { %v8694_v45 = vpop.f32.mrb[238].mxu1  ;;  %14667 = vmatprep.subr.bf16.mxu1 %v14783_v43 }
 0x9fc   :  { %13836 = vmatmul.mubr.msk.f32.vlgmr.msra.gmra.mrb[234].mxu0 %vm8318_vm8, %v8694_v45  ;;  %v13818_v15 = vpop.f32.mrb[239].mxu1 }
 0x9fd   :  { %14585 = vmatpush3.bf16.msra.mxu0 %v14584_v22  ;;  %13875 = vmatprep.mubr.msk.f32.mxu0 %vm14784_vm4, %v14785_v44 }
 0x9fe   :  { %14586 = vmatprep.subr.bf16.mxu0 %v14783_v43 }
 0xa01   :  { %14588 = vmatpush3.bf16.msra.mxu0 %v14587_v30 }
 0xa02   :  { %14589 = vmatprep.subr.bf16.mxu0 %v14783_v43 }
 0xa05   :  { %14591 = vmatpush3.bf16.msra.mxu0 %v14590_v25 }
 0xa06   :  { %14592 = vmatprep.subr.bf16.mxu0 %v14783_v43 }
 0xa09   :  { %14594 = vmatpush3.bf16.msra.mxu0 %v14593_v35 }
 0xa0a   :  { %14607 = vmatprep.subr.bf16.mxu0 %v14783_v43 }
 0xa0d   :  { %v8852_v13 = vpop.f32.mrb[240].mxu1 }
 0xa0e   :  { %13876 = vmatmul.mubr.msk.f32.vlgmr.msra.gmra.mrb[236].mxu0 %vm8318_vm8, %v8852_v13  ;;  %v13858_v38 = vpop.f32.mrb[241].mxu1  ;;  %v10695_v13 = vld [vmem:[%s18717_s8 + $0x220] sm:$0xff] }
 0xa0f   :  { %14609 = vmatpush3.bf16.msra.mxu0 %v14608_v28  ;;  %13915 = vmatprep.mubr.msk.f32.mxu0 %vm14784_vm4, %v14785_v44  ;;  %v10696_v38 = vld [vmem:[%s18717_s8 + $0x228] sm:$0xff] }
 0xa10   :  { %14610 = vmatprep.subr.bf16.mxu0 %v14783_v43 }
 0xa13   :  { %14612 = vmatpush3.bf16.msra.mxu0 %v14611_v42  ;;  %v14686_v42 = vpack.c.bf16 %v10696_v38, %v10695_v13  ;;  %v9688_v13 = vld [vmem:[%s18721_s12 + $0x70] sm:$0xff]  ;;  %v9689_v38 = vld [vmem:[%s18721_s12 + $0x78] sm:$0xff] }
 0xa14   :  { %14613 = vmatprep.subr.bf16.mxu0 %v14783_v43 }
 0xa17   :  { %14615 = vmatpush3.bf16.msra.mxu0 %v14614_v46  ;;  %v14689_v46 = vpack.c.bf16 %v10698_v56, %v10697_v29  ;;  %v9768_v29 = vld [vmem:[%s18723_s14] sm:$0xff]  ;;  %v9769_v56 = vld [vmem:[%s18723_s14 + $0x8] sm:$0xff] }
 0xa18   :  { %14616 = vmatprep.subr.bf16.mxu0 %v14783_v43 }
 0xa1b   :  { %14618 = vmatpush3.bf16.msra.mxu0 %v14617_v20 }
 0xa1c   :  { %14631 = vmatprep.subr.bf16.mxu0 %v14783_v43 }
 0xa1f   :  { %v9010_v58 = vpop.f32.mrb[242].mxu1 }
 0xa20   :  { %13916 = vmatmul.mubr.msk.f32.vlgmr.msra.gmra.mrb[238].mxu0 %vm8318_vm8, %v9010_v58  ;;  %v13898_v53 = vpop.f32.mrb[243].mxu1 }
 0xa21   :  { %14633 = vmatpush3.bf16.msra.mxu0 %v14632_v41  ;;  %13955 = vmatprep.mubr.msk.f32.mxu0 %vm14784_vm4, %v14785_v44  ;;  %v14692_v41 = vpack.c.bf16 %v9581_v51, %v9580_v50  ;;  %v9773_v50 = vld [vmem:[%s18723_s14 + $0x28] sm:$0xff] }
 0xa22   :  { %14634 = vmatprep.subr.bf16.mxu0 %v14783_v43 }
 0xa25   :  { %14636 = vmatpush3.bf16.msra.mxu0 %v14635_v59  ;;  %v14695_v59 = vpack.c.bf16 %v9583_v55, %v9582_v52 }
 0xa26   :  { %14637 = vmatprep.subr.bf16.mxu0 %v14783_v43 }
 0xa29   :  { %14639 = vmatpush3.bf16.msra.mxu0 %v14638_v2  ;;  %v14698_v2 = vpack.c.bf16 %v9585_v1, %v9584_v0  ;;  %v9775_v0 = vld [vmem:[%s18723_s14 + $0x38] sm:$0xff] }
 0xa2a   :  { %14640 = vmatprep.subr.bf16.mxu0 %v14783_v43 }
 0xa2d   :  { %14642 = vmatpush3.bf16.msra.mxu0 %v14641_v8  ;;  %v14701_v8 = vpack.c.bf16 %v9587_v40, %v9586_v3 }
 0xa2e   :  { %14643 = vmatprep.subr.bf16.mxu0 %v14783_v43 }
 0xa31   :  { %v9168_v10 = vpop.f32.mrb[244].mxu1 }
 0xa32   :  { %13956 = vmatmul.mubr.msk.f32.vlgmr.msra.gmra.mrb[240].mxu0 %vm8318_vm8, %v9168_v10  ;;  %v13938_v49 = vpop.f32.mrb[245].mxu1  ;;  %v9588_v10 = vld [vmem:[%s18719_s10 + $0x40] sm:$0xff] }
 0xa33   :  { %14645 = vmatpush3.bf16.msra.mxu0 %v18119_v27  ;;  %13976 = vmatprep.mubr.msk.f32.mxu0 %vm14784_vm4, %v14785_v44  ;;  %v9589_v49 = vld [vmem:[%s18719_s10 + $0x48] sm:$0xff] }
 0xa34   :  { %14646 = vmatprep.subr.bf16.mxu0 %v14783_v43 }
 0xa37   :  { %14648 = vmatpush3.bf16.msra.mxu0 %v18123_v57 }
 0xa38   :  { %14649 = vmatprep.subr.bf16.mxu0 %v14783_v43 }
 0xa3b   :  { %14651 = vmatpush3.bf16.msra.mxu0 %v18127_v9 }
 0xa3c   :  { %14652 = vmatprep.subr.bf16.mxu0 %v14783_v43 }
 0xa3f   :  { %14654 = vmatpush3.bf16.msra.mxu0 %v18131_v16 }
 0xa40   :  { %13974 = vmatprep.subr.mxu0 %v14785_v44 }
 0xa43   :  { %13975 = vmatpush3.msra.mxu0 %v18135_v6 }
 0xa44   :  { %13977 = vmatmul.mubr.msk.f32.vlgmr.msra.gmra.mrb[242].mxu0 %vm779_vm6, %v10678_v4  ;;  %14679 = vmatprep.subr.bf16.mxu0 %v14783_v43  ;;  %v14704_v4 = vpack.c.bf16 %v9589_v49, %v9588_v10  ;;  %v10703_v10 = vld [vmem:[%s18724_s15] ss:$0 sm:$0xff] }
 0xa45   :  { %14035 = vmatprep.mubr.msk.f32.mxu0 %vm14784_vm4, %v14785_v44 }
 0xabd   :  { %v8618_v21 = vpop.f32.mrb[232].mxu0 }
 0xabe   :  { %v8622_v22 = vadd.f32 %v8618_v21, %v18317_v7  ;;  %v13797_v33 = vpop.f32.mrb[233].mxu0  ;;  %v10694_v7 = vld [vmem:[%s18717_s8 + $0x218] sm:$0xff]  ;;  %v14716_v21 = vpack.c.bf16 %v9675_v48, %v9674_v19 }
 0xacf   :  { %v8776_v39 = vpop.f32.mrb[234].mxu0 }
 0xad0   :  { %v8780_v45 = vadd.f32 %v8776_v39, %v8622_v22  ;;  %v13837_v15 = vpop.f32.mrb[235].mxu0  ;;  %v9677_v22 = vld [vmem:[%s18721_s12 + $0x18] sm:$0xff]  ;;  %v9678_v39 = vld [vmem:[%s18721_s12 + $0x20] sm:$0xff] }
 0xad1   :  { %v14719_v33 = vpack.c.bf16 %v9677_v22, %v9676_v24 }
 0xae1   :  { %v8934_v30 = vpop.f32.mrb[236].mxu0 }
 0xae2   :  { %v8938_v31 = vadd.f32 %v8934_v30, %v8780_v45  ;;  %v13877_v32 = vpop.f32.mrb[237].mxu0  ;;  %v9679_v45 = vld [vmem:[%s18721_s12 + $0x28] sm:$0xff]  ;;  %v9680_v30 = vld [vmem:[%s18721_s12 + $0x30] sm:$0xff] }
 0xae3   :  { %v14722_v15 = vpack.c.bf16 %v9679_v45, %v9678_v39 }
 0xaf3   :  { %v9092_v25 = vpop.f32.mrb[238].mxu0 }
 0xaf4   :  { %v9096_v61 = vadd.f32 %v9092_v25, %v8938_v31  ;;  %v13917_v23 = vpop.f32.mrb[239].mxu0  ;;  %v9681_v31 = vld [vmem:[%s18721_s12 + $0x38] sm:$0xff]  ;;  %v9682_v25 = vld [vmem:[%s18721_s12 + $0x40] sm:$0xff] }
 0xaf5   :  { %v14725_v32 = vpack.c.bf16 %v9681_v31, %v9680_v30 }
 0xb05   :  { %v9250_v35 = vpop.f32.mrb[240].mxu0 }
 0xb06   :  { %v9254_v36 = vadd.f32 %v9250_v35, %v9096_v61  ;;  %v13957_v37 = vpop.f32.mrb[241].mxu0  ;;  %v9683_v61 = vld [vmem:[%s18721_s12 + $0x48] sm:$0xff]  ;;  %v9684_v35 = vld [vmem:[%s18721_s12 + $0x50] sm:$0xff] }
 0xb07   :  { %v14728_v23 = vpack.c.bf16 %v9683_v61, %v9682_v25 }
 0xb17   :  { %v9326_v28 = vpop.f32.mrb[242].mxu0 }
 0xb18   :  { %13996 = vmatmul.mubr.msk.f32.vlgmr.msra.gmra.mrb[246].mxu1 %vm8318_vm8, %v9326_v28  ;;  %v13978_v5 = vpop.f32.mrb[243].mxu0  ;;  %v9686_v28 = vld [vmem:[%s18721_s12 + $0x60] sm:$0xff] }
 0xb19   :  { %14669 = vmatpush3.bf16.msra.mxu1 %v18119_v27  ;;  %14016 = vmatprep.mubr.msk.f32.mxu1 %vm14784_vm4, %v14785_v44  ;;  %v10689_v27 = vld [vmem:[%s18716_s7 + $0x10] sm:$0x3]  ;;  %v9687_v5 = vld [vmem:[%s18721_s12 + $0x68] sm:$0xff] }
 0xb1a   :  { %14670 = vmatprep.subr.bf16.mxu1 %v14783_v43 }
 0xb1d   :  { %14672 = vmatpush3.bf16.msra.mxu1 %v18123_v57  ;;  %v10691_v57 = vld [vmem:[%s18717_s8 + $0x200] sm:$0xff] }
 0xb1e   :  { %14673 = vmatprep.subr.bf16.mxu1 %v14783_v43 }
 0xb21   :  { %14675 = vmatpush3.bf16.msra.mxu1 %v18127_v9  ;;  %v10692_v9 = vld [vmem:[%s18717_s8 + $0x208] sm:$0xff] }
 0xb22   :  { %14676 = vmatprep.subr.bf16.mxu1 %v14783_v43 }
 0xb25   :  { %14678 = vmatpush3.bf16.msra.mxu1 %v18131_v16  ;;  %v10693_v16 = vld [vmem:[%s18717_s8 + $0x210] sm:$0xff] }
 0xb26   :  { %14014 = vmatprep.subr.mxu1 %v14785_v44  ;;  %v14683_v26 = vpack.c.bf16 %v10694_v7, %v10693_v16 }
 0xb29   :  { %14015 = vmatpush3.msra.mxu1 %v18135_v6  ;;  %v14680_v6 = vpack.c.bf16 %v10692_v9, %v10691_v57  ;;  %v10700_v9 = vld [vmem:[%s18718_s9] ss:$0 sm:$0xff] }
 0xb2a   :  { %14017 = vmatmul.mubr.msk.f32.vlgmr.msra.gmra.mrb[248].mxu1 %vm779_vm6, %v10689_v27  ;;  %14715 = vmatprep.subr.bf16.mxu1 %v14783_v43  ;;  %v14734_v27 = vpack.c.bf16 %v9687_v5, %v9686_v28 }
 0xb2b   :  { %14105 = vmatprep.mubr.msk.f32.mxu1 %vm14784_vm4, %v14785_v44  ;;  %14681 = vmatpush3.bf16.msra.mxu0 %v14680_v6 }
 0xb2c   :  { %14682 = vmatprep.subr.bf16.mxu0 %v14783_v43  ;;  %14717 = vmatpush3.bf16.msra.mxu1 %v14716_v21 }
 0xb2d   :  { %14718 = vmatprep.subr.bf16.mxu1 %v14783_v43 }
 0xb2f   :  { %14684 = vmatpush3.bf16.msra.mxu0 %v14683_v26 }
 0xb30   :  { %14685 = vmatprep.subr.bf16.mxu0 %v14783_v43  ;;  %14720 = vmatpush3.bf16.msra.mxu1 %v14719_v33 }
 0xb31   :  { %14721 = vmatprep.subr.bf16.mxu1 %v14783_v43 }
 0xb33   :  { %14687 = vmatpush3.bf16.msra.mxu0 %v14686_v42  ;;  %v14737_v42 = vpack.c.bf16 %v9689_v38, %v9688_v13 }
 0xb34   :  { %14688 = vmatprep.subr.bf16.mxu0 %v14783_v43  ;;  %14723 = vmatpush3.bf16.msra.mxu1 %v14722_v15 }
 0xb35   :  { %14724 = vmatprep.subr.bf16.mxu1 %v14783_v43 }
 0xb37   :  { %14690 = vmatpush3.bf16.msra.mxu0 %v14689_v46  ;;  %v14740_v46 = vpack.c.bf16 %v9769_v56, %v9768_v29 }
 0xb38   :  { %14691 = vmatprep.subr.bf16.mxu0 %v14783_v43  ;;  %14726 = vmatpush3.bf16.msra.mxu1 %v14725_v32 }
 0xb39   :  { %14727 = vmatprep.subr.bf16.mxu1 %v14783_v43 }
 0xb3c   :  { %14729 = vmatpush3.bf16.msra.mxu1 %v14728_v23 }
 0xb3d   :  { %14730 = vmatprep.subr.bf16.mxu1 %v14783_v43 }
 0xbeb   :  { %v9408_v34 = vpop.f32.mrb[246].mxu1 }
 0xbec   :  { %v18538_v47 = vadd.f32 %v9408_v34, %v9254_v36  ;;  %v13997_v20 = vpop.f32.mrb[247].mxu1  ;;  %v9685_v36 = vld [vmem:[%s18721_s12 + $0x58] sm:$0xff] }
 0xbed   :  { %v14731_v37 = vpack.c.bf16 %v9685_v36, %v9684_v35  ;;  %v9771_v34 = vld [vmem:[%s18723_s14 + $0x18] sm:$0xff]  ;;  %v9772_v20 = vld [vmem:[%s18723_s14 + $0x20] sm:$0xff] }
 0xbee   :  { %v14746_v51 = vpack.c.bf16 %v9773_v50, %v9772_v20 }
 0xbef   :  { %14732 = vmatpush3.bf16.msra.mxu1 %v14731_v37 }
 0xbf0   :  { %14733 = vmatprep.subr.bf16.mxu1 %v14783_v43 }
 0xbf3   :  { %14735 = vmatpush3.bf16.msra.mxu1 %v14734_v27 }
 0xbf4   :  { %14736 = vmatprep.subr.bf16.mxu1 %v14783_v43 }
 0xbf7   :  { %14738 = vmatpush3.bf16.msra.mxu1 %v14737_v42 }
 0xbfd   :  { %v9484_v58 = vpop.f32.mrb[248].mxu1 }
 0xbfe   :  { %14036 = vmatmul.mubr.msk.f32.vlgmr.msra.gmra.mrb[244].mxu0 %vm8318_vm8, %v9484_v58  ;;  %v14018_v53 = vpop.f32.mrb[249].mxu1 }
 0xbff   :  { %14693 = vmatpush3.bf16.msra.mxu0 %v14692_v41  ;;  %14070 = vmatprep.mubr.msk.f32.mxu0 %vm14784_vm4, %v14785_v44  ;;  %v10701_v41 = vld [vmem:[%s18720_s11] ss:$0 sm:$0xff] }
 0xc00   :  { %14694 = vmatprep.subr.bf16.mxu0 %v14783_v43 }
 0xc03   :  { %14696 = vmatpush3.bf16.msra.mxu0 %v14695_v59  ;;  %v9774_v59 = vld [vmem:[%s18723_s14 + $0x30] sm:$0xff] }
 0xc04   :  { %14697 = vmatprep.subr.bf16.mxu0 %v14783_v43  ;;  %v14749_v1 = vpack.c.bf16 %v9775_v0, %v9774_v59 }
 0xc07   :  { %14699 = vmatpush3.bf16.msra.mxu0 %v14698_v2 }
 0xc08   :  { %14700 = vmatprep.subr.bf16.mxu0 %v14783_v43 }
 0xc0b   :  { %14702 = vmatpush3.bf16.msra.mxu0 %v14701_v8 }
 0xc0c   :  { %14703 = vmatprep.subr.bf16.mxu0 %v14783_v43 }
 0xc0f   :  { %14705 = vmatpush3.bf16.msra.mxu0 %v14704_v4 }
 0xc10   :  { %14706 = vmatprep.subr.bf16.mxu0 %v14783_v43 }
 0xc13   :  { %14708 = vmatpush3.bf16.msra.mxu0 %v14707_v12 }
 0xc14   :  { %14709 = vmatprep.subr.bf16.mxu0 %v14783_v43 }
 0xc17   :  { %14711 = vmatpush3.bf16.msra.mxu0 %v14710_v63 }
 0xc18   :  { %14712 = vmatprep.subr.bf16.mxu0 %v14783_v43 }
 0xc1b   :  { %14714 = vmatpush3.bf16.msra.mxu0 %v14713_v18 }
 0xc1c   :  { %14739 = vmatprep.subr.bf16.mxu0 %v14783_v43 }
 0xcd1   :  { %v9566_v57 = vpop.f32.mrb[244].mxu0 }
 0xcd2   :  { %v9570_v16 = vadd.f32 %v9566_v57, %v18538_v47  ;;  %v14037_v6 = vpop.f32.mrb[245].mxu0 }
 0xcd4   :  { %v9578_v7 = vadd.f32 %v10700_v9, %v9570_v16 }
 0xcd6   :  { %v9579_v26 = vmax.f32 %v9578_v7, 0.0 }
 0xcd8   :  { %14071 = vmatmul.mubr.f32.vlgmr.msra.gmra.mrb[246].mxu0 %v9579_v26 }
 0xcd9   :  { %14124 = vmatprep.mubr.msk.f32.mxu0 %vm14784_vm4, %v14785_v44  ;;  %v9770_v44 = vld [vmem:[%s18723_s14 + $0x10] sm:$0xff]  ;;  %14741 = vmatpush3.bf16.msra.mxu0 %v14740_v46  ;;  %s14758_s14 = scalar_lea.vmem %s9865_s30, 32 }
 0xcda   :  { %v14743_v47 = vpack.c.bf16 %v9771_v34, %v9770_v44  ;;  %14742 = vmatprep.subr.bf16.mxu0 %v14783_v43  ;;  %p14759_p0 = scmp.ne.s32.totalorder %s9865_s30, %s14758_s14  ;;  %p14764_p2 = scmp.lt.s32.totalorder %s14758_s14, %s14758_s14 }
 0xcdc   :  { %p14765_p3 = por %p14764_p2, %p14763_p1 }
 0xcdd   :  { %14744 = vmatpush3.bf16.msra.mxu0 %v14743_v47 }
 0xcde   :  { %14745 = vmatprep.subr.bf16.mxu0 %v14783_v43  ;;  %p14766_p4 = pnand %p14765_p3, %p14759_p0 }
 0xce1   :  { %14747 = vmatpush3.bf16.msra.mxu0 %v14746_v51 }
 0xce2   :  { %14748 = vmatprep.subr.bf16.mxu0 %v14783_v43  ;;  %v10702_v43 = vld [vmem:[%s18722_s13] ss:$0 sm:$0xff] }
 0xce5   :  { %14750 = vmatpush3.bf16.msra.mxu0 %v14749_v1 }
 0xdab   :  { %v9669_v52 = vpop.f32.mrb[246].mxu0 }
 0xdac   :  { %v9670_v55 = vadd.f32 %v10701_v41, %v9669_v52  ;;  %v14072_v58 = vpop.f32.mrb[247].mxu0 }
 0xdae   :  { %v9673_v53 = vmax.f32 %v9670_v55, 0.0 }
 0xdb0   :  { %14106 = vmatmul.mubr.f32.vlgmr.msra.gmra.mrb[250].mxu1 %v9673_v53 }
 0xe83   :  { %v9763_v2 = vpop.f32.mrb[250].mxu1 }
 0xe84   :  { %v9764_v3 = vadd.f32 %v10702_v43, %v9763_v2  ;;  %v14107_v40 = vpop.f32.mrb[251].mxu1 }
 0xe86   :  { %v9767_v8 = vmax.f32 %v9764_v3, 0.0 }
 0xe88   :  { %14125 = vmatmul.mubr.msk.f32.vlgmr.msra.gmra.mrb[248].mxu0 %vm8318_vm8, %v9767_v8 }
 0xf5b   :  { %v9852_v49 = vpop.f32.mrb[248].mxu0 }
 0xf5c   :  { %v9853_v4 = vadd.f32 %v10703_v10, %v9852_v49  ;;  %v14126_v60 = vpop.f32.mrb[249].mxu0 }
 0xf5e   :  { %9857 = vst.msk [vmem:[#allocation2] sm:$0x3] %vm9856_vm9, %v9853_v4 }
 0xf5f   :  { %14769 = shalt.err (!%p14766_p4)
}
 0xf60   :  { %s14770_s10 = scalar_lea.hbm %s18725_s16, 32 }
 0xf61   :  { %p14771_p5 = scmp.ne.s32.totalorder %s18725_s16, %s14770_s10  ;;  %p14774_p6 = scmp.lt.u32.totalorder %s14770_s10, %s18725_s16 }
 0xf63   :  { %p14776_p7 = pnand %p14774_p6, %p14771_p5 }
 0xf65   :  { %14779 = shalt.err (!%p14776_p7)
}
 0xf66   :  { %9867 = dma.vmem_to_hbm [thread:$0]  %s9865_s30, 32, %s18725_s16, [#allocation3]  }
 0xf67   :  { %14780 = dma.done.wait [#allocation3], 32  }
 0xf68   :  { %14781 = vsyncadd [#allocation3], 4294967264 }
 0xf69   :  { %9871 = vsyncpa [#allocation3], 1 }

</bundles_post_ra>
